<compile_context>
chip_gen: v5e
topology: v5e:2x2
jax: 0.10.0
libtpu: 0.0.40
codegen_flags: <defaults>
</compile_context>

<pallas_src>
import jax
import jax.numpy as jnp
from jax import lax
from jax.experimental import pallas as pl
from jax.experimental.pallas import tpu as pltpu


def _round_up(x, m):
    return (x + m - 1) // m * m


def bilstm_kernel(x_ref, wih_f_ref, whh_f_ref, b_f_ref,
                  wih_b_ref, whh_b_ref, b_b_ref,
                  wfc_f_ref, wfc_b_ref, bfc_ref, out_ref,
                  xp_f, xp_b, seq_f, seq_b):
    T, Bp, D = x_ref.shape
    Hp = seq_f.shape[-1]

    # ---- hoisted input projection: one big matmul per direction ----
    x2 = x_ref[...].reshape(T * Bp, D)                               # bf16
    xp_f[...] = (jnp.dot(x2, wih_f_ref[...],
                         preferred_element_type=jnp.float32)
                 + b_f_ref[...]).reshape(T, Bp, 4 * Hp)
    xp_b[...] = (jnp.dot(x2, wih_b_ref[...],
                         preferred_element_type=jnp.float32)
                 + b_b_ref[...]).reshape(T, Bp, 4 * Hp)

    def gates_to_hc(g, c):
        # PyTorch gate order: i, f, g, o (Hp multiple of 128 -> lane-aligned)
        i = jax.nn.sigmoid(g[:, 0:Hp])
        f = jax.nn.sigmoid(g[:, Hp:2 * Hp])
        gg = jnp.tanh(g[:, 2 * Hp:3 * Hp])
        o = jax.nn.sigmoid(g[:, 3 * Hp:4 * Hp])
        c_new = f * c + i * gg
        h_new = o * jnp.tanh(c_new)
        return h_new, c_new

    # ---- fused forward + backward recurrence (independent chains -> ILP) ----
    def body(s, carry):
        h_f, c_f, h_b, c_b = carry
        tb = T - 1 - s
        g_f = (jnp.dot(h_f.astype(jnp.bfloat16), whh_f_ref[...],
                       preferred_element_type=jnp.float32) + xp_f[s])
        g_b = (jnp.dot(h_b.astype(jnp.bfloat16), whh_b_ref[...],
                       preferred_element_type=jnp.float32) + xp_b[tb])
        h_f, c_f = gates_to_hc(g_f, c_f)
        h_b, c_b = gates_to_hc(g_b, c_b)
        seq_f[s] = h_f.astype(jnp.bfloat16)
        seq_b[tb] = h_b.astype(jnp.bfloat16)
        return (h_f, c_f, h_b, c_b)

    z = jnp.zeros((Bp, Hp), jnp.float32)        # PyTorch default h0 = c0 = 0
    lax.fori_loop(0, T, body, (z, z, z, z), unroll=True)

    # ---- split FC (no concat) + log_softmax, lane-dense (T*Bp, Cp) output ----
    hf2 = seq_f[...].reshape(T * Bp, Hp)
    hb2 = seq_b[...].reshape(T * Bp, Hp)
    logits = (jnp.dot(hf2, wfc_f_ref[...], preferred_element_type=jnp.float32)
              + jnp.dot(hb2, wfc_b_ref[...], preferred_element_type=jnp.float32)
              + bfc_ref[...])
    m = jnp.max(logits, axis=-1, keepdims=True)
    lse = m + jnp.log(jnp.sum(jnp.exp(logits - m), axis=-1, keepdims=True))
    out_ref[...] = logits - lse


@jax.jit
def lstm_forward(ids, emb, wih_f, whh_f, b_f, wih_b, whh_b, b_b, wfc, bfc):
    B, T = ids.shape
    D = emb.shape[1]
    H = whh_f.shape[0]
    C = wfc.shape[1]
    Bp = _round_up(B, 8)       # sublane multiple
    Hp = _round_up(H, 128)     # lane multiple -> aligned gate slices
    Cp = _round_up(C, 128)     # lane-dense FC / output store

    # ---- pad params (zero-padded hidden lanes stay exactly 0 through time) ----
    def pad_gate_cols(w):      # (..., 4H) -> (..., 4Hp), per-gate blocks
        w4 = w.reshape(w.shape[:-1] + (4, H))
        w4 = jnp.pad(w4, [(0, 0)] * (w4.ndim - 1) + [(0, Hp - H)])
        return w4.reshape(w.shape[:-1] + (4 * Hp,))

    def pad_lstm(wih, whh, b):
        wih_p = pad_gate_cols(wih).astype(jnp.bfloat16)                  # (D, 4Hp)
        whh_p = pad_gate_cols(
            jnp.pad(whh, ((0, Hp - H), (0, 0)))).astype(jnp.bfloat16)    # (Hp, 4Hp)
        b_p = pad_gate_cols(b)                                           # (1, 4Hp) f32
        return wih_p, whh_p, b_p

    wih_f_p, whh_f_p, b_f_p = pad_lstm(wih_f, whh_f, b_f)
    wih_b_p, whh_b_p, b_b_p = pad_lstm(wih_b, whh_b, b_b)

    # split FC (removes in-kernel lane-dim concat); padded classes get a
    # -1e30 bias so they vanish under log_softmax
    wfc_f_p = jnp.pad(wfc[:H], ((0, Hp - H), (0, Cp - C))).astype(jnp.bfloat16)
    wfc_b_p = jnp.pad(wfc[H:], ((0, Hp - H), (0, Cp - C))).astype(jnp.bfloat16)
    bfc_p = jnp.pad(bfc, ((0, 0), (0, Cp - C)), constant_values=-1e30)

    # ---- embedding lookup (glue), time-major, batch-padded, bf16 ----
    x = jnp.take(emb, ids, axis=0)                        # (B, T, D)
    x = jnp.transpose(x, (1, 0, 2))                       # (T, B, D)
    x = jnp.pad(x, ((0, 0), (0, Bp - B), (0, 0))).astype(jnp.bfloat16)

    vmem = lambda: pl.BlockSpec(memory_space=pltpu.MemorySpace.VMEM)
    # TODO(synk): for production shapes add a batch-tiling grid ("parallel" B
    # blocks) and pltpu.CompilerParams(vmem_limit_bytes=...) so the working
    # set fits v7x's 64 MiB VMEM; unnecessary at these toy sizes.
    out_flat = pl.pallas_call(
        bilstm_kernel,
        out_shape=jax.ShapeDtypeStruct((T * Bp, Cp), jnp.float32),
        in_specs=[vmem() for _ in range(10)],
        out_specs=vmem(),
        scratch_shapes=[
            pltpu.VMEM((T, Bp, 4 * Hp), jnp.float32),     # xproj fwd
            pltpu.VMEM((T, Bp, 4 * Hp), jnp.float32),     # xproj bwd
            pltpu.VMEM((T, Bp, Hp), jnp.bfloat16),        # fwd hidden sequence
            pltpu.VMEM((T, Bp, Hp), jnp.bfloat16),        # bwd hidden sequence
        ],
    )(x, wih_f_p, whh_f_p, b_f_p, wih_b_p, whh_b_p, b_b_p,
      wfc_f_p, wfc_b_p, bfc_p)

    out = out_flat.reshape(T, Bp, Cp)[:, :B, :C]          # drop padding
    return jnp.transpose(out, (1, 0, 2))                  # (B, T, C)


def init_params(key, vocab, input_dim, hidden_dim, num_classes):
    ks = jax.random.split(key, 10)
    H, D, C = hidden_dim, input_dim, num_classes
    s_lstm = 1.0 / jnp.sqrt(H)
    s_fc = 1.0 / jnp.sqrt(2 * H)
    u = lambda k, shape, s: jax.random.uniform(k, shape, jnp.float32, -s, s)

    emb = jax.random.normal(ks[0], (vocab, D), jnp.float32)
    # weights stored pre-transposed: (in, 4H) so kernel does x @ W
    # (note: a real nn.LSTM stores (4H, in); transpose when importing)
    wih_f = u(ks[1], (D, 4 * H), s_lstm)
    whh_f = u(ks[2], (H, 4 * H), s_lstm)
    b_f = (u(ks[3], (1, 4 * H), s_lstm) + u(ks[4], (1, 4 * H), s_lstm))  # b_ih + b_hh
    wih_b = u(ks[5], (D, 4 * H), s_lstm)
    whh_b = u(ks[6], (H, 4 * H), s_lstm)
    b_b = (u(ks[7], (1, 4 * H), s_lstm) + u(ks[8], (1, 4 * H), s_lstm))
    wfc = u(ks[9], (2 * H, C), s_fc)
    bfc = jnp.zeros((1, C), jnp.float32)
    return emb, wih_f, whh_f, b_f, wih_b, whh_b, b_b, wfc, bfc


if __name__ == "__main__":
    # TODO(synk): nn.LSTM dropout is a no-op for num_layers=1 (and off in eval); not modeled.
    VOCAB, INPUT_DIM, HIDDEN_DIM, NUM_CLASSES = 20, 16, 32, 5
    B, T = 2, 8

    key = jax.random.PRNGKey(0)
    k_ids, k_params = jax.random.split(key)
    ids = jax.random.randint(k_ids, (B, T), 0, VOCAB, dtype=jnp.int32)
    params = init_params(k_params, VOCAB, INPUT_DIM, HIDDEN_DIM, NUM_CLASSES)

    out = lstm_forward(ids, *params)
    jax.block_until_ready(out)
    assert out.shape == (B, T, NUM_CLASSES)
    assert bool(jnp.all(jnp.isfinite(out)))
    print("KERNEL_OK")
</pallas_src>

<mosaic_0001>
module attributes {stable_mosaic.version = 11 : i64} {
  func.func @bilstm_kernel(%arg0: memref<8x8x16xbf16, #tpu.memory_space<vmem>>, %arg1: memref<16x512xbf16, #tpu.memory_space<vmem>>, %arg2: memref<128x512xbf16, #tpu.memory_space<vmem>>, %arg3: memref<1x512xf32, #tpu.memory_space<vmem>>, %arg4: memref<16x512xbf16, #tpu.memory_space<vmem>>, %arg5: memref<128x512xbf16, #tpu.memory_space<vmem>>, %arg6: memref<1x512xf32, #tpu.memory_space<vmem>>, %arg7: memref<128x128xbf16, #tpu.memory_space<vmem>>, %arg8: memref<128x128xbf16, #tpu.memory_space<vmem>>, %arg9: memref<1x128xf32, #tpu.memory_space<vmem>>, %arg10: memref<64x128xf32, #tpu.memory_space<vmem>>, %arg11: memref<8x8x512xf32, #tpu.memory_space<vmem>>, %arg12: memref<8x8x512xf32, #tpu.memory_space<vmem>>, %arg13: memref<8x8x128xbf16, #tpu.memory_space<vmem>>, %arg14: memref<8x8x128xbf16, #tpu.memory_space<vmem>>) attributes {dimension_semantics = [], scalar_prefetch = 0 : i64, scratch_operands = 4 : i64, tpu.core_type = #tpu.core_type<tc>} {
    %c0 = arith.constant 0 : index
    %c0_0 = arith.constant 0 : index
    %c0_1 = arith.constant 0 : index
    %0 = vector.load %arg0[%c0, %c0_0, %c0_1] : memref<8x8x16xbf16, #tpu.memory_space<vmem>>, vector<8x8x16xbf16>
    %1 = vector.shape_cast %0 : vector<8x8x16xbf16> to vector<64x16xbf16>
    %c0_2 = arith.constant 0 : index
    %c0_3 = arith.constant 0 : index
    %2 = vector.load %arg1[%c0_2, %c0_3] : memref<16x512xbf16, #tpu.memory_space<vmem>>, vector<16x512xbf16>
    %cst = arith.constant dense<0.000000e+00> : vector<64x512xf32>
    %3 = tpu.matmul %1, %2, %cst {dimension_numbers = #tpu.dot_dimension_numbers<[1], [0], [0], [1], [0, 0, 1, 1], [], []>} : vector<64x16xbf16>, vector<16x512xbf16>, vector<64x512xf32> -> vector<64x512xf32>
    %c0_4 = arith.constant 0 : index
    %c0_5 = arith.constant 0 : index
    %4 = vector.load %arg3[%c0_4, %c0_5] : memref<1x512xf32, #tpu.memory_space<vmem>>, vector<1x512xf32>
    %5 = vector.broadcast %4 : vector<1x512xf32> to vector<64x512xf32>
    %6 = arith.addf %3, %5 : vector<64x512xf32>
    %7 = vector.shape_cast %6 : vector<64x512xf32> to vector<8x8x512xf32>
    %c0_6 = arith.constant 0 : index
    %c0_7 = arith.constant 0 : index
    %c0_8 = arith.constant 0 : index
    %8 = vector.load %arg11[%c0_6, %c0_7, %c0_8] : memref<8x8x512xf32, #tpu.memory_space<vmem>>, vector<8x8x512xf32>
    tpu.vector_store %arg11[%c0_6, %c0_7, %c0_8], %7 {strides = array<i32>} : memref<8x8x512xf32, #tpu.memory_space<vmem>>, vector<8x8x512xf32>,
    %c0_9 = arith.constant 0 : index
    %c0_10 = arith.constant 0 : index
    %9 = vector.load %arg4[%c0_9, %c0_10] : memref<16x512xbf16, #tpu.memory_space<vmem>>, vector<16x512xbf16>
    %cst_11 = arith.constant dense<0.000000e+00> : vector<64x512xf32>
    %10 = tpu.matmul %1, %9, %cst_11 {dimension_numbers = #tpu.dot_dimension_numbers<[1], [0], [0], [1], [0, 0, 1, 1], [], []>} : vector<64x16xbf16>, vector<16x512xbf16>, vector<64x512xf32> -> vector<64x512xf32>
    %c0_12 = arith.constant 0 : index
    %c0_13 = arith.constant 0 : index
    %11 = vector.load %arg6[%c0_12, %c0_13] : memref<1x512xf32, #tpu.memory_space<vmem>>, vector<1x512xf32>
    %12 = vector.broadcast %11 : vector<1x512xf32> to vector<64x512xf32>
    %13 = arith.addf %10, %12 : vector<64x512xf32>
    %14 = vector.shape_cast %13 : vector<64x512xf32> to vector<8x8x512xf32>
    %c0_14 = arith.constant 0 : index
    %c0_15 = arith.constant 0 : index
    %c0_16 = arith.constant 0 : index
    %15 = vector.load %arg12[%c0_14, %c0_15, %c0_16] : memref<8x8x512xf32, #tpu.memory_space<vmem>>, vector<8x8x512xf32>
    tpu.vector_store %arg12[%c0_14, %c0_15, %c0_16], %14 {strides = array<i32>} : memref<8x8x512xf32, #tpu.memory_space<vmem>>, vector<8x8x512xf32>,
    %cst_17 = arith.constant 0.000000e+00 : f32
    %16 = vector.broadcast %cst_17 : f32 to vector<8x128xf32>
    %c0_i32 = arith.constant 0 : i32
    %c7_i32 = arith.constant 7 : i32
    %17 = arith.subi %c7_i32, %c0_i32 : i32
    %18 = arith.truncf %16 : vector<8x128xf32> to vector<8x128xbf16>
    %c0_18 = arith.constant 0 : index
    %c0_19 = arith.constant 0 : index
    %19 = vector.load %arg2[%c0_18, %c0_19] : memref<128x512xbf16, #tpu.memory_space<vmem>>, vector<128x512xbf16>
    %cst_20 = arith.constant dense<0.000000e+00> : vector<8x512xf32>
    %20 = tpu.matmul %18, %19, %cst_20 {dimension_numbers = #tpu.dot_dimension_numbers<[1], [0], [0], [1], [0, 0, 1, 1], [], []>} : vector<8x128xbf16>, vector<128x512xbf16>, vector<8x512xf32> -> vector<8x512xf32>
    %21 = arith.index_cast %c0_i32 : i32 to index
    %c0_21 = arith.constant 0 : index
    %c0_22 = arith.constant 0 : index
    %22 = vector.load %arg11[%21, %c0_21, %c0_22] : memref<8x8x512xf32, #tpu.memory_space<vmem>>, vector<1x8x512xf32>
    %23 = vector.shape_cast %22 : vector<1x8x512xf32> to vector<8x512xf32>
    %24 = arith.addf %20, %23 : vector<8x512xf32>
    %25 = arith.truncf %16 : vector<8x128xf32> to vector<8x128xbf16>
    %c0_23 = arith.constant 0 : index
    %c0_24 = arith.constant 0 : index
    %26 = vector.load %arg5[%c0_23, %c0_24] : memref<128x512xbf16, #tpu.memory_space<vmem>>, vector<128x512xbf16>
    %cst_25 = arith.constant dense<0.000000e+00> : vector<8x512xf32>
    %27 = tpu.matmul %25, %26, %cst_25 {dimension_numbers = #tpu.dot_dimension_numbers<[1], [0], [0], [1], [0, 0, 1, 1], [], []>} : vector<8x128xbf16>, vector<128x512xbf16>, vector<8x512xf32> -> vector<8x512xf32>
    %28 = arith.index_cast %17 : i32 to index
    %c0_26 = arith.constant 0 : index
    %c0_27 = arith.constant 0 : index
    %29 = vector.load %arg12[%28, %c0_26, %c0_27] : memref<8x8x512xf32, #tpu.memory_space<vmem>>, vector<1x8x512xf32>
    %30 = vector.shape_cast %29 : vector<1x8x512xf32> to vector<8x512xf32>
    %31 = arith.addf %27, %30 : vector<8x512xf32>
    %32 = vector.extract_strided_slice %24 {offsets = [0, 0], sizes = [8, 128], strides = [1, 1]} : vector<8x512xf32> to vector<8x128xf32>
    %33 = arith.negf %32 : vector<8x128xf32>
    %34 = math.exp %33 : vector<8x128xf32>
    %cst_28 = arith.constant 1.000000e+00 : f32
    %35 = vector.broadcast %cst_28 : f32 to vector<8x128xf32>
    %36 = arith.addf %35, %34 : vector<8x128xf32>
    %37 = arith.divf %35, %36 : vector<8x128xf32>
    %38 = vector.extract_strided_slice %24 {offsets = [0, 128], sizes = [8, 128], strides = [1, 1]} : vector<8x512xf32> to vector<8x128xf32>
    %39 = arith.negf %38 : vector<8x128xf32>
    %40 = math.exp %39 : vector<8x128xf32>
    %cst_29 = arith.constant 1.000000e+00 : f32
    %41 = vector.broadcast %cst_29 : f32 to vector<8x128xf32>
    %42 = arith.addf %41, %40 : vector<8x128xf32>
    %43 = arith.divf %41, %42 : vector<8x128xf32>
    %44 = vector.extract_strided_slice %24 {offsets = [0, 256], sizes = [8, 128], strides = [1, 1]} : vector<8x512xf32> to vector<8x128xf32>
    %45 = math.tanh %44 : vector<8x128xf32>
    %46 = vector.extract_strided_slice %24 {offsets = [0, 384], sizes = [8, 128], strides = [1, 1]} : vector<8x512xf32> to vector<8x128xf32>
    %47 = arith.negf %46 : vector<8x128xf32>
    %48 = math.exp %47 : vector<8x128xf32>
    %cst_30 = arith.constant 1.000000e+00 : f32
    %49 = vector.broadcast %cst_30 : f32 to vector<8x128xf32>
    %50 = arith.addf %49, %48 : vector<8x128xf32>
    %51 = arith.divf %49, %50 : vector<8x128xf32>
    %52 = arith.mulf %43, %16 : vector<8x128xf32>
    %53 = arith.mulf %37, %45 : vector<8x128xf32>
    %54 = arith.addf %52, %53 : vector<8x128xf32>
    %55 = math.tanh %54 : vector<8x128xf32>
    %56 = arith.mulf %51, %55 : vector<8x128xf32>
    %57 = vector.extract_strided_slice %31 {offsets = [0, 0], sizes = [8, 128], strides = [1, 1]} : vector<8x512xf32> to vector<8x128xf32>
    %58 = arith.negf %57 : vector<8x128xf32>
    %59 = math.exp %58 : vector<8x128xf32>
    %cst_31 = arith.constant 1.000000e+00 : f32
    %60 = vector.broadcast %cst_31 : f32 to vector<8x128xf32>
    %61 = arith.addf %60, %59 : vector<8x128xf32>
    %62 = arith.divf %60, %61 : vector<8x128xf32>
    %63 = vector.extract_strided_slice %31 {offsets = [0, 128], sizes = [8, 128], strides = [1, 1]} : vector<8x512xf32> to vector<8x128xf32>
    %64 = arith.negf %63 : vector<8x128xf32>
    %65 = math.exp %64 : vector<8x128xf32>
    %cst_32 = arith.constant 1.000000e+00 : f32
    %66 = vector.broadcast %cst_32 : f32 to vector<8x128xf32>
    %67 = arith.addf %66, %65 : vector<8x128xf32>
    %68 = arith.divf %66, %67 : vector<8x128xf32>
    %69 = vector.extract_strided_slice %31 {offsets = [0, 256], sizes = [8, 128], strides = [1, 1]} : vector<8x512xf32> to vector<8x128xf32>
    %70 = math.tanh %69 : vector<8x128xf32>
    %71 = vector.extract_strided_slice %31 {offsets = [0, 384], sizes = [8, 128], strides = [1, 1]} : vector<8x512xf32> to vector<8x128xf32>
    %72 = arith.negf %71 : vector<8x128xf32>
    %73 = math.exp %72 : vector<8x128xf32>
    %cst_33 = arith.constant 1.000000e+00 : f32
    %74 = vector.broadcast %cst_33 : f32 to vector<8x128xf32>
    %75 = arith.addf %74, %73 : vector<8x128xf32>
    %76 = arith.divf %74, %75 : vector<8x128xf32>
    %77 = arith.mulf %68, %16 : vector<8x128xf32>
    %78 = arith.mulf %62, %70 : vector<8x128xf32>
    %79 = arith.addf %77, %78 : vector<8x128xf32>
    %80 = math.tanh %79 : vector<8x128xf32>
    %81 = arith.mulf %76, %80 : vector<8x128xf32>
    %82 = arith.truncf %56 : vector<8x128xf32> to vector<8x128xbf16>
    %83 = arith.index_cast %c0_i32 : i32 to index
    %c0_34 = arith.constant 0 : index
    %c0_35 = arith.constant 0 : index
    %84 = vector.load %arg13[%83, %c0_34, %c0_35] : memref<8x8x128xbf16, #tpu.memory_space<vmem>>, vector<1x8x128xbf16>
    %85 = vector.shape_cast %84 : vector<1x8x128xbf16> to vector<8x128xbf16>
    %86 = vector.shape_cast %82 : vector<8x128xbf16> to vector<1x8x128xbf16>
    tpu.vector_store %arg13[%83, %c0_34, %c0_35], %86 {strides = array<i32>} : memref<8x8x128xbf16, #tpu.memory_space<vmem>>, vector<1x8x128xbf16>,
    %87 = arith.truncf %81 : vector<8x128xf32> to vector<8x128xbf16>
    %88 = arith.index_cast %17 : i32 to index
    %c0_36 = arith.constant 0 : index
    %c0_37 = arith.constant 0 : index
    %89 = vector.load %arg14[%88, %c0_36, %c0_37] : memref<8x8x128xbf16, #tpu.memory_space<vmem>>, vector<1x8x128xbf16>
    %90 = vector.shape_cast %89 : vector<1x8x128xbf16> to vector<8x128xbf16>
    %91 = vector.shape_cast %87 : vector<8x128xbf16> to vector<1x8x128xbf16>
    tpu.vector_store %arg14[%88, %c0_36, %c0_37], %91 {strides = array<i32>} : memref<8x8x128xbf16, #tpu.memory_space<vmem>>, vector<1x8x128xbf16>,
    %c1_i32 = arith.constant 1 : i32
    %c7_i32_38 = arith.constant 7 : i32
    %92 = arith.subi %c7_i32_38, %c1_i32 : i32
    %93 = arith.truncf %56 : vector<8x128xf32> to vector<8x128xbf16>
    %c0_39 = arith.constant 0 : index
    %c0_40 = arith.constant 0 : index
    %94 = vector.load %arg2[%c0_39, %c0_40] : memref<128x512xbf16, #tpu.memory_space<vmem>>, vector<128x512xbf16>
    %cst_41 = arith.constant dense<0.000000e+00> : vector<8x512xf32>
    %95 = tpu.matmul %93, %94, %cst_41 {dimension_numbers = #tpu.dot_dimension_numbers<[1], [0], [0], [1], [0, 0, 1, 1], [], []>} : vector<8x128xbf16>, vector<128x512xbf16>, vector<8x512xf32> -> vector<8x512xf32>
    %96 = arith.index_cast %c1_i32 : i32 to index
    %c0_42 = arith.constant 0 : index
    %c0_43 = arith.constant 0 : index
    %97 = vector.load %arg11[%96, %c0_42, %c0_43] : memref<8x8x512xf32, #tpu.memory_space<vmem>>, vector<1x8x512xf32>
    %98 = vector.shape_cast %97 : vector<1x8x512xf32> to vector<8x512xf32>
    %99 = arith.addf %95, %98 : vector<8x512xf32>
    %100 = arith.truncf %81 : vector<8x128xf32> to vector<8x128xbf16>
    %c0_44 = arith.constant 0 : index
    %c0_45 = arith.constant 0 : index
    %101 = vector.load %arg5[%c0_44, %c0_45] : memref<128x512xbf16, #tpu.memory_space<vmem>>, vector<128x512xbf16>
    %cst_46 = arith.constant dense<0.000000e+00> : vector<8x512xf32>
    %102 = tpu.matmul %100, %101, %cst_46 {dimension_numbers = #tpu.dot_dimension_numbers<[1], [0], [0], [1], [0, 0, 1, 1], [], []>} : vector<8x128xbf16>, vector<128x512xbf16>, vector<8x512xf32> -> vector<8x512xf32>
    %103 = arith.index_cast %92 : i32 to index
    %c0_47 = arith.constant 0 : index
    %c0_48 = arith.constant 0 : index
    %104 = vector.load %arg12[%103, %c0_47, %c0_48] : memref<8x8x512xf32, #tpu.memory_space<vmem>>, vector<1x8x512xf32>
    %105 = vector.shape_cast %104 : vector<1x8x512xf32> to vector<8x512xf32>
    %106 = arith.addf %102, %105 : vector<8x512xf32>
    %107 = vector.extract_strided_slice %99 {offsets = [0, 0], sizes = [8, 128], strides = [1, 1]} : vector<8x512xf32> to vector<8x128xf32>
    %108 = arith.negf %107 : vector<8x128xf32>
    %109 = math.exp %108 : vector<8x128xf32>
    %cst_49 = arith.constant 1.000000e+00 : f32
    %110 = vector.broadcast %cst_49 : f32 to vector<8x128xf32>
    %111 = arith.addf %110, %109 : vector<8x128xf32>
    %112 = arith.divf %110, %111 : vector<8x128xf32>
    %113 = vector.extract_strided_slice %99 {offsets = [0, 128], sizes = [8, 128], strides = [1, 1]} : vector<8x512xf32> to vector<8x128xf32>
    %114 = arith.negf %113 : vector<8x128xf32>
    %115 = math.exp %114 : vector<8x128xf32>
    %cst_50 = arith.constant 1.000000e+00 : f32
    %116 = vector.broadcast %cst_50 : f32 to vector<8x128xf32>
    %117 = arith.addf %116, %115 : vector<8x128xf32>
    %118 = arith.divf %116, %117 : vector<8x128xf32>
    %119 = vector.extract_strided_slice %99 {offsets = [0, 256], sizes = [8, 128], strides = [1, 1]} : vector<8x512xf32> to vector<8x128xf32>
    %120 = math.tanh %119 : vector<8x128xf32>
    %121 = vector.extract_strided_slice %99 {offsets = [0, 384], sizes = [8, 128], strides = [1, 1]} : vector<8x512xf32> to vector<8x128xf32>
    %122 = arith.negf %121 : vector<8x128xf32>
    %123 = math.exp %122 : vector<8x128xf32>
    %cst_51 = arith.constant 1.000000e+00 : f32
    %124 = vector.broadcast %cst_51 : f32 to vector<8x128xf32>
    %125 = arith.addf %124, %123 : vector<8x128xf32>
    %126 = arith.divf %124, %125 : vector<8x128xf32>
    %127 = arith.mulf %118, %54 : vector<8x128xf32>
    %128 = arith.mulf %112, %120 : vector<8x128xf32>
    %129 = arith.addf %127, %128 : vector<8x128xf32>
    %130 = math.tanh %129 : vector<8x128xf32>
    %131 = arith.mulf %126, %130 : vector<8x128xf32>
    %132 = vector.extract_strided_slice %106 {offsets = [0, 0], sizes = [8, 128], strides = [1, 1]} : vector<8x512xf32> to vector<8x128xf32>
    %133 = arith.negf %132 : vector<8x128xf32>
    %134 = math.exp %133 : vector<8x128xf32>
    %cst_52 = arith.constant 1.000000e+00 : f32
    %135 = vector.broadcast %cst_52 : f32 to vector<8x128xf32>
    %136 = arith.addf %135, %134 : vector<8x128xf32>
    %137 = arith.divf %135, %136 : vector<8x128xf32>
    %138 = vector.extract_strided_slice %106 {offsets = [0, 128], sizes = [8, 128], strides = [1, 1]} : vector<8x512xf32> to vector<8x128xf32>
    %139 = arith.negf %138 : vector<8x128xf32>
    %140 = math.exp %139 : vector<8x128xf32>
    %cst_53 = arith.constant 1.000000e+00 : f32
    %141 = vector.broadcast %cst_53 : f32 to vector<8x128xf32>
    %142 = arith.addf %141, %140 : vector<8x128xf32>
    %143 = arith.divf %141, %142 : vector<8x128xf32>
    %144 = vector.extract_strided_slice %106 {offsets = [0, 256], sizes = [8, 128], strides = [1, 1]} : vector<8x512xf32> to vector<8x128xf32>
    %145 = math.tanh %144 : vector<8x128xf32>
    %146 = vector.extract_strided_slice %106 {offsets = [0, 384], sizes = [8, 128], strides = [1, 1]} : vector<8x512xf32> to vector<8x128xf32>
    %147 = arith.negf %146 : vector<8x128xf32>
    %148 = math.exp %147 : vector<8x128xf32>
    %cst_54 = arith.constant 1.000000e+00 : f32
    %149 = vector.broadcast %cst_54 : f32 to vector<8x128xf32>
    %150 = arith.addf %149, %148 : vector<8x128xf32>
    %151 = arith.divf %149, %150 : vector<8x128xf32>
    %152 = arith.mulf %143, %79 : vector<8x128xf32>
    %153 = arith.mulf %137, %145 : vector<8x128xf32>
    %154 = arith.addf %152, %153 : vector<8x128xf32>
    %155 = math.tanh %154 : vector<8x128xf32>
    %156 = arith.mulf %151, %155 : vector<8x128xf32>
    %157 = arith.truncf %131 : vector<8x128xf32> to vector<8x128xbf16>
    %158 = arith.index_cast %c1_i32 : i32 to index
    %c0_55 = arith.constant 0 : index
    %c0_56 = arith.constant 0 : index
    %159 = vector.load %arg13[%158, %c0_55, %c0_56] : memref<8x8x128xbf16, #tpu.memory_space<vmem>>, vector<1x8x128xbf16>
    %160 = vector.shape_cast %159 : vector<1x8x128xbf16> to vector<8x128xbf16>
    %161 = vector.shape_cast %157 : vector<8x128xbf16> to vector<1x8x128xbf16>
    tpu.vector_store %arg13[%158, %c0_55, %c0_56], %161 {strides = array<i32>} : memref<8x8x128xbf16, #tpu.memory_space<vmem>>, vector<1x8x128xbf16>,
    %162 = arith.truncf %156 : vector<8x128xf32> to vector<8x128xbf16>
    %163 = arith.index_cast %92 : i32 to index
    %c0_57 = arith.constant 0 : index
    %c0_58 = arith.constant 0 : index
    %164 = vector.load %arg14[%163, %c0_57, %c0_58] : memref<8x8x128xbf16, #tpu.memory_space<vmem>>, vector<1x8x128xbf16>
    %165 = vector.shape_cast %164 : vector<1x8x128xbf16> to vector<8x128xbf16>
    %166 = vector.shape_cast %162 : vector<8x128xbf16> to vector<1x8x128xbf16>
    tpu.vector_store %arg14[%163, %c0_57, %c0_58], %166 {strides = array<i32>} : memref<8x8x128xbf16, #tpu.memory_space<vmem>>, vector<1x8x128xbf16>,
    %c2_i32 = arith.constant 2 : i32
    %c7_i32_59 = arith.constant 7 : i32
    %167 = arith.subi %c7_i32_59, %c2_i32 : i32
    %168 = arith.truncf %131 : vector<8x128xf32> to vector<8x128xbf16>
    %c0_60 = arith.constant 0 : index
    %c0_61 = arith.constant 0 : index
    %169 = vector.load %arg2[%c0_60, %c0_61] : memref<128x512xbf16, #tpu.memory_space<vmem>>, vector<128x512xbf16>
    %cst_62 = arith.constant dense<0.000000e+00> : vector<8x512xf32>
    %170 = tpu.matmul %168, %169, %cst_62 {dimension_numbers = #tpu.dot_dimension_numbers<[1], [0], [0], [1], [0, 0, 1, 1], [], []>} : vector<8x128xbf16>, vector<128x512xbf16>, vector<8x512xf32> -> vector<8x512xf32>
    %171 = arith.index_cast %c2_i32 : i32 to index
    %c0_63 = arith.constant 0 : index
    %c0_64 = arith.constant 0 : index
    %172 = vector.load %arg11[%171, %c0_63, %c0_64] : memref<8x8x512xf32, #tpu.memory_space<vmem>>, vector<1x8x512xf32>
    %173 = vector.shape_cast %172 : vector<1x8x512xf32> to vector<8x512xf32>
    %174 = arith.addf %170, %173 : vector<8x512xf32>
    %175 = arith.truncf %156 : vector<8x128xf32> to vector<8x128xbf16>
    %c0_65 = arith.constant 0 : index
    %c0_66 = arith.constant 0 : index
    %176 = vector.load %arg5[%c0_65, %c0_66] : memref<128x512xbf16, #tpu.memory_space<vmem>>, vector<128x512xbf16>
    %cst_67 = arith.constant dense<0.000000e+00> : vector<8x512xf32>
    %177 = tpu.matmul %175, %176, %cst_67 {dimension_numbers = #tpu.dot_dimension_numbers<[1], [0], [0], [1], [0, 0, 1, 1], [], []>} : vector<8x128xbf16>, vector<128x512xbf16>, vector<8x512xf32> -> vector<8x512xf32>
    %178 = arith.index_cast %167 : i32 to index
    %c0_68 = arith.constant 0 : index
    %c0_69 = arith.constant 0 : index
    %179 = vector.load %arg12[%178, %c0_68, %c0_69] : memref<8x8x512xf32, #tpu.memory_space<vmem>>, vector<1x8x512xf32>
    %180 = vector.shape_cast %179 : vector<1x8x512xf32> to vector<8x512xf32>
    %181 = arith.addf %177, %180 : vector<8x512xf32>
    %182 = vector.extract_strided_slice %174 {offsets = [0, 0], sizes = [8, 128], strides = [1, 1]} : vector<8x512xf32> to vector<8x128xf32>
    %183 = arith.negf %182 : vector<8x128xf32>
    %184 = math.exp %183 : vector<8x128xf32>
    %cst_70 = arith.constant 1.000000e+00 : f32
    %185 = vector.broadcast %cst_70 : f32 to vector<8x128xf32>
    %186 = arith.addf %185, %184 : vector<8x128xf32>
    %187 = arith.divf %185, %186 : vector<8x128xf32>
    %188 = vector.extract_strided_slice %174 {offsets = [0, 128], sizes = [8, 128], strides = [1, 1]} : vector<8x512xf32> to vector<8x128xf32>
    %189 = arith.negf %188 : vector<8x128xf32>
    %190 = math.exp %189 : vector<8x128xf32>
    %cst_71 = arith.constant 1.000000e+00 : f32
    %191 = vector.broadcast %cst_71 : f32 to vector<8x128xf32>
    %192 = arith.addf %191, %190 : vector<8x128xf32>
    %193 = arith.divf %191, %192 : vector<8x128xf32>
    %194 = vector.extract_strided_slice %174 {offsets = [0, 256], sizes = [8, 128], strides = [1, 1]} : vector<8x512xf32> to vector<8x128xf32>
    %195 = math.tanh %194 : vector<8x128xf32>
    %196 = vector.extract_strided_slice %174 {offsets = [0, 384], sizes = [8, 128], strides = [1, 1]} : vector<8x512xf32> to vector<8x128xf32>
    %197 = arith.negf %196 : vector<8x128xf32>
    %198 = math.exp %197 : vector<8x128xf32>
    %cst_72 = arith.constant 1.000000e+00 : f32
    %199 = vector.broadcast %cst_72 : f32 to vector<8x128xf32>
    %200 = arith.addf %199, %198 : vector<8x128xf32>
    %201 = arith.divf %199, %200 : vector<8x128xf32>
    %202 = arith.mulf %193, %129 : vector<8x128xf32>
    %203 = arith.mulf %187, %195 : vector<8x128xf32>
    %204 = arith.addf %202, %203 : vector<8x128xf32>
    %205 = math.tanh %204 : vector<8x128xf32>
    %206 = arith.mulf %201, %205 : vector<8x128xf32>
    %207 = vector.extract_strided_slice %181 {offsets = [0, 0], sizes = [8, 128], strides = [1, 1]} : vector<8x512xf32> to vector<8x128xf32>
    %208 = arith.negf %207 : vector<8x128xf32>
    %209 = math.exp %208 : vector<8x128xf32>
    %cst_73 = arith.constant 1.000000e+00 : f32
    %210 = vector.broadcast %cst_73 : f32 to vector<8x128xf32>
    %211 = arith.addf %210, %209 : vector<8x128xf32>
    %212 = arith.divf %210, %211 : vector<8x128xf32>
    %213 = vector.extract_strided_slice %181 {offsets = [0, 128], sizes = [8, 128], strides = [1, 1]} : vector<8x512xf32> to vector<8x128xf32>
    %214 = arith.negf %213 : vector<8x128xf32>
    %215 = math.exp %214 : vector<8x128xf32>
    %cst_74 = arith.constant 1.000000e+00 : f32
    %216 = vector.broadcast %cst_74 : f32 to vector<8x128xf32>
    %217 = arith.addf %216, %215 : vector<8x128xf32>
    %218 = arith.divf %216, %217 : vector<8x128xf32>
    %219 = vector.extract_strided_slice %181 {offsets = [0, 256], sizes = [8, 128], strides = [1, 1]} : vector<8x512xf32> to vector<8x128xf32>
    %220 = math.tanh %219 : vector<8x128xf32>
    %221 = vector.extract_strided_slice %181 {offsets = [0, 384], sizes = [8, 128], strides = [1, 1]} : vector<8x512xf32> to vector<8x128xf32>
    %222 = arith.negf %221 : vector<8x128xf32>
    %223 = math.exp %222 : vector<8x128xf32>
    %cst_75 = arith.constant 1.000000e+00 : f32
    %224 = vector.broadcast %cst_75 : f32 to vector<8x128xf32>
    %225 = arith.addf %224, %223 : vector<8x128xf32>
    %226 = arith.divf %224, %225 : vector<8x128xf32>
    %227 = arith.mulf %218, %154 : vector<8x128xf32>
    %228 = arith.mulf %212, %220 : vector<8x128xf32>
    %229 = arith.addf %227, %228 : vector<8x128xf32>
    %230 = math.tanh %229 : vector<8x128xf32>
    %231 = arith.mulf %226, %230 : vector<8x128xf32>
    %232 = arith.truncf %206 : vector<8x128xf32> to vector<8x128xbf16>
    %233 = arith.index_cast %c2_i32 : i32 to index
    %c0_76 = arith.constant 0 : index
    %c0_77 = arith.constant 0 : index
    %234 = vector.load %arg13[%233, %c0_76, %c0_77] : memref<8x8x128xbf16, #tpu.memory_space<vmem>>, vector<1x8x128xbf16>
    %235 = vector.shape_cast %234 : vector<1x8x128xbf16> to vector<8x128xbf16>
    %236 = vector.shape_cast %232 : vector<8x128xbf16> to vector<1x8x128xbf16>
    tpu.vector_store %arg13[%233, %c0_76, %c0_77], %236 {strides = array<i32>} : memref<8x8x128xbf16, #tpu.memory_space<vmem>>, vector<1x8x128xbf16>,
    %237 = arith.truncf %231 : vector<8x128xf32> to vector<8x128xbf16>
    %238 = arith.index_cast %167 : i32 to index
    %c0_78 = arith.constant 0 : index
    %c0_79 = arith.constant 0 : index
    %239 = vector.load %arg14[%238, %c0_78, %c0_79] : memref<8x8x128xbf16, #tpu.memory_space<vmem>>, vector<1x8x128xbf16>
    %240 = vector.shape_cast %239 : vector<1x8x128xbf16> to vector<8x128xbf16>
    %241 = vector.shape_cast %237 : vector<8x128xbf16> to vector<1x8x128xbf16>
    tpu.vector_store %arg14[%238, %c0_78, %c0_79], %241 {strides = array<i32>} : memref<8x8x128xbf16, #tpu.memory_space<vmem>>, vector<1x8x128xbf16>,
    %c3_i32 = arith.constant 3 : i32
    %c7_i32_80 = arith.constant 7 : i32
    %242 = arith.subi %c7_i32_80, %c3_i32 : i32
    %243 = arith.truncf %206 : vector<8x128xf32> to vector<8x128xbf16>
    %c0_81 = arith.constant 0 : index
    %c0_82 = arith.constant 0 : index
    %244 = vector.load %arg2[%c0_81, %c0_82] : memref<128x512xbf16, #tpu.memory_space<vmem>>, vector<128x512xbf16>
    %cst_83 = arith.constant dense<0.000000e+00> : vector<8x512xf32>
    %245 = tpu.matmul %243, %244, %cst_83 {dimension_numbers = #tpu.dot_dimension_numbers<[1], [0], [0], [1], [0, 0, 1, 1], [], []>} : vector<8x128xbf16>, vector<128x512xbf16>, vector<8x512xf32> -> vector<8x512xf32>
    %246 = arith.index_cast %c3_i32 : i32 to index
    %c0_84 = arith.constant 0 : index
    %c0_85 = arith.constant 0 : index
    %247 = vector.load %arg11[%246, %c0_84, %c0_85] : memref<8x8x512xf32, #tpu.memory_space<vmem>>, vector<1x8x512xf32>
    %248 = vector.shape_cast %247 : vector<1x8x512xf32> to vector<8x512xf32>
    %249 = arith.addf %245, %248 : vector<8x512xf32>
    %250 = arith.truncf %231 : vector<8x128xf32> to vector<8x128xbf16>
    %c0_86 = arith.constant 0 : index
    %c0_87 = arith.constant 0 : index
    %251 = vector.load %arg5[%c0_86, %c0_87] : memref<128x512xbf16, #tpu.memory_space<vmem>>, vector<128x512xbf16>
    %cst_88 = arith.constant dense<0.000000e+00> : vector<8x512xf32>
    %252 = tpu.matmul %250, %251, %cst_88 {dimension_numbers = #tpu.dot_dimension_numbers<[1], [0], [0], [1], [0, 0, 1, 1], [], []>} : vector<8x128xbf16>, vector<128x512xbf16>, vector<8x512xf32> -> vector<8x512xf32>
    %253 = arith.index_cast %242 : i32 to index
    %c0_89 = arith.constant 0 : index
    %c0_90 = arith.constant 0 : index
    %254 = vector.load %arg12[%253, %c0_89, %c0_90] : memref<8x8x512xf32, #tpu.memory_space<vmem>>, vector<1x8x512xf32>
    %255 = vector.shape_cast %254 : vector<1x8x512xf32> to vector<8x512xf32>
    %256 = arith.addf %252, %255 : vector<8x512xf32>
    %257 = vector.extract_strided_slice %249 {offsets = [0, 0], sizes = [8, 128], strides = [1, 1]} : vector<8x512xf32> to vector<8x128xf32>
    %258 = arith.negf %257 : vector<8x128xf32>
    %259 = math.exp %258 : vector<8x128xf32>
    %cst_91 = arith.constant 1.000000e+00 : f32
    %260 = vector.broadcast %cst_91 : f32 to vector<8x128xf32>
    %261 = arith.addf %260, %259 : vector<8x128xf32>
    %262 = arith.divf %260, %261 : vector<8x128xf32>
    %263 = vector.extract_strided_slice %249 {offsets = [0, 128], sizes = [8, 128], strides = [1, 1]} : vector<8x512xf32> to vector<8x128xf32>
    %264 = arith.negf %263 : vector<8x128xf32>
    %265 = math.exp %264 : vector<8x128xf32>
    %cst_92 = arith.constant 1.000000e+00 : f32
    %266 = vector.broadcast %cst_92 : f32 to vector<8x128xf32>
    %267 = arith.addf %266, %265 : vector<8x128xf32>
    %268 = arith.divf %266, %267 : vector<8x128xf32>
    %269 = vector.extract_strided_slice %249 {offsets = [0, 256], sizes = [8, 128], strides = [1, 1]} : vector<8x512xf32> to vector<8x128xf32>
    %270 = math.tanh %269 : vector<8x128xf32>
    %271 = vector.extract_strided_slice %249 {offsets = [0, 384], sizes = [8, 128], strides = [1, 1]} : vector<8x512xf32> to vector<8x128xf32>
    %272 = arith.negf %271 : vector<8x128xf32>
    %273 = math.exp %272 : vector<8x128xf32>
    %cst_93 = arith.constant 1.000000e+00 : f32
    %274 = vector.broadcast %cst_93 : f32 to vector<8x128xf32>
    %275 = arith.addf %274, %273 : vector<8x128xf32>
    %276 = arith.divf %274, %275 : vector<8x128xf32>
    %277 = arith.mulf %268, %204 : vector<8x128xf32>
    %278 = arith.mulf %262, %270 : vector<8x128xf32>
    %279 = arith.addf %277, %278 : vector<8x128xf32>
    %280 = math.tanh %279 : vector<8x128xf32>
    %281 = arith.mulf %276, %280 : vector<8x128xf32>
    %282 = vector.extract_strided_slice %256 {offsets = [0, 0], sizes = [8, 128], strides = [1, 1]} : vector<8x512xf32> to vector<8x128xf32>
    %283 = arith.negf %282 : vector<8x128xf32>
    %284 = math.exp %283 : vector<8x128xf32>
    %cst_94 = arith.constant 1.000000e+00 : f32
    %285 = vector.broadcast %cst_94 : f32 to vector<8x128xf32>
    %286 = arith.addf %285, %284 : vector<8x128xf32>
    %287 = arith.divf %285, %286 : vector<8x128xf32>
    %288 = vector.extract_strided_slice %256 {offsets = [0, 128], sizes = [8, 128], strides = [1, 1]} : vector<8x512xf32> to vector<8x128xf32>
    %289 = arith.negf %288 : vector<8x128xf32>
    %290 = math.exp %289 : vector<8x128xf32>
    %cst_95 = arith.constant 1.000000e+00 : f32
    %291 = vector.broadcast %cst_95 : f32 to vector<8x128xf32>
    %292 = arith.addf %291, %290 : vector<8x128xf32>
    %293 = arith.divf %291, %292 : vector<8x128xf32>
    %294 = vector.extract_strided_slice %256 {offsets = [0, 256], sizes = [8, 128], strides = [1, 1]} : vector<8x512xf32> to vector<8x128xf32>
    %295 = math.tanh %294 : vector<8x128xf32>
    %296 = vector.extract_strided_slice %256 {offsets = [0, 384], sizes = [8, 128], strides = [1, 1]} : vector<8x512xf32> to vector<8x128xf32>
    %297 = arith.negf %296 : vector<8x128xf32>
    %298 = math.exp %297 : vector<8x128xf32>
    %cst_96 = arith.constant 1.000000e+00 : f32
    %299 = vector.broadcast %cst_96 : f32 to vector<8x128xf32>
    %300 = arith.addf %299, %298 : vector<8x128xf32>
    %301 = arith.divf %299, %300 : vector<8x128xf32>
    %302 = arith.mulf %293, %229 : vector<8x128xf32>
    %303 = arith.mulf %287, %295 : vector<8x128xf32>
    %304 = arith.addf %302, %303 : vector<8x128xf32>
    %305 = math.tanh %304 : vector<8x128xf32>
    %306 = arith.mulf %301, %305 : vector<8x128xf32>
    %307 = arith.truncf %281 : vector<8x128xf32> to vector<8x128xbf16>
    %308 = arith.index_cast %c3_i32 : i32 to index
    %c0_97 = arith.constant 0 : index
    %c0_98 = arith.constant 0 : index
    %309 = vector.load %arg13[%308, %c0_97, %c0_98] : memref<8x8x128xbf16, #tpu.memory_space<vmem>>, vector<1x8x128xbf16>
    %310 = vector.shape_cast %309 : vector<1x8x128xbf16> to vector<8x128xbf16>
    %311 = vector.shape_cast %307 : vector<8x128xbf16> to vector<1x8x128xbf16>
    tpu.vector_store %arg13[%308, %c0_97, %c0_98], %311 {strides = array<i32>} : memref<8x8x128xbf16, #tpu.memory_space<vmem>>, vector<1x8x128xbf16>,
    %312 = arith.truncf %306 : vector<8x128xf32> to vector<8x128xbf16>
    %313 = arith.index_cast %242 : i32 to index
    %c0_99 = arith.constant 0 : index
    %c0_100 = arith.constant 0 : index
    %314 = vector.load %arg14[%313, %c0_99, %c0_100] : memref<8x8x128xbf16, #tpu.memory_space<vmem>>, vector<1x8x128xbf16>
    %315 = vector.shape_cast %314 : vector<1x8x128xbf16> to vector<8x128xbf16>
    %316 = vector.shape_cast %312 : vector<8x128xbf16> to vector<1x8x128xbf16>
    tpu.vector_store %arg14[%313, %c0_99, %c0_100], %316 {strides = array<i32>} : memref<8x8x128xbf16, #tpu.memory_space<vmem>>, vector<1x8x128xbf16>,
    %c4_i32 = arith.constant 4 : i32
    %c7_i32_101 = arith.constant 7 : i32
    %317 = arith.subi %c7_i32_101, %c4_i32 : i32
    %318 = arith.truncf %281 : vector<8x128xf32> to vector<8x128xbf16>
    %c0_102 = arith.constant 0 : index
    %c0_103 = arith.constant 0 : index
    %319 = vector.load %arg2[%c0_102, %c0_103] : memref<128x512xbf16, #tpu.memory_space<vmem>>, vector<128x512xbf16>
    %cst_104 = arith.constant dense<0.000000e+00> : vector<8x512xf32>
    %320 = tpu.matmul %318, %319, %cst_104 {dimension_numbers = #tpu.dot_dimension_numbers<[1], [0], [0], [1], [0, 0, 1, 1], [], []>} : vector<8x128xbf16>, vector<128x512xbf16>, vector<8x512xf32> -> vector<8x512xf32>
    %321 = arith.index_cast %c4_i32 : i32 to index
    %c0_105 = arith.constant 0 : index
    %c0_106 = arith.constant 0 : index
    %322 = vector.load %arg11[%321, %c0_105, %c0_106] : memref<8x8x512xf32, #tpu.memory_space<vmem>>, vector<1x8x512xf32>
    %323 = vector.shape_cast %322 : vector<1x8x512xf32> to vector<8x512xf32>
    %324 = arith.addf %320, %323 : vector<8x512xf32>
    %325 = arith.truncf %306 : vector<8x128xf32> to vector<8x128xbf16>
    %c0_107 = arith.constant 0 : index
    %c0_108 = arith.constant 0 : index
    %326 = vector.load %arg5[%c0_107, %c0_108] : memref<128x512xbf16, #tpu.memory_space<vmem>>, vector<128x512xbf16>
    %cst_109 = arith.constant dense<0.000000e+00> : vector<8x512xf32>
    %327 = tpu.matmul %325, %326, %cst_109 {dimension_numbers = #tpu.dot_dimension_numbers<[1], [0], [0], [1], [0, 0, 1, 1], [], []>} : vector<8x128xbf16>, vector<128x512xbf16>, vector<8x512xf32> -> vector<8x512xf32>
    %328 = arith.index_cast %317 : i32 to index
    %c0_110 = arith.constant 0 : index
    %c0_111 = arith.constant 0 : index
    %329 = vector.load %arg12[%328, %c0_110, %c0_111] : memref<8x8x512xf32, #tpu.memory_space<vmem>>, vector<1x8x512xf32>
    %330 = vector.shape_cast %329 : vector<1x8x512xf32> to vector<8x512xf32>
    %331 = arith.addf %327, %330 : vector<8x512xf32>
    %332 = vector.extract_strided_slice %324 {offsets = [0, 0], sizes = [8, 128], strides = [1, 1]} : vector<8x512xf32> to vector<8x128xf32>
    %333 = arith.negf %332 : vector<8x128xf32>
    %334 = math.exp %333 : vector<8x128xf32>
    %cst_112 = arith.constant 1.000000e+00 : f32
    %335 = vector.broadcast %cst_112 : f32 to vector<8x128xf32>
    %336 = arith.addf %335, %334 : vector<8x128xf32>
    %337 = arith.divf %335, %336 : vector<8x128xf32>
    %338 = vector.extract_strided_slice %324 {offsets = [0, 128], sizes = [8, 128], strides = [1, 1]} : vector<8x512xf32> to vector<8x128xf32>
    %339 = arith.negf %338 : vector<8x128xf32>
    %340 = math.exp %339 : vector<8x128xf32>
    %cst_113 = arith.constant 1.000000e+00 : f32
    %341 = vector.broadcast %cst_113 : f32 to vector<8x128xf32>
    %342 = arith.addf %341, %340 : vector<8x128xf32>
    %343 = arith.divf %341, %342 : vector<8x128xf32>
    %344 = vector.extract_strided_slice %324 {offsets = [0, 256], sizes = [8, 128], strides = [1, 1]} : vector<8x512xf32> to vector<8x128xf32>
    %345 = math.tanh %344 : vector<8x128xf32>
    %346 = vector.extract_strided_slice %324 {offsets = [0, 384], sizes = [8, 128], strides = [1, 1]} : vector<8x512xf32> to vector<8x128xf32>
    %347 = arith.negf %346 : vector<8x128xf32>
    %348 = math.exp %347 : vector<8x128xf32>
    %cst_114 = arith.constant 1.000000e+00 : f32
    %349 = vector.broadcast %cst_114 : f32 to vector<8x128xf32>
    %350 = arith.addf %349, %348 : vector<8x128xf32>
    %351 = arith.divf %349, %350 : vector<8x128xf32>
    %352 = arith.mulf %343, %279 : vector<8x128xf32>
    %353 = arith.mulf %337, %345 : vector<8x128xf32>
    %354 = arith.addf %352, %353 : vector<8x128xf32>
    %355 = math.tanh %354 : vector<8x128xf32>
    %356 = arith.mulf %351, %355 : vector<8x128xf32>
    %357 = vector.extract_strided_slice %331 {offsets = [0, 0], sizes = [8, 128], strides = [1, 1]} : vector<8x512xf32> to vector<8x128xf32>
    %358 = arith.negf %357 : vector<8x128xf32>
    %359 = math.exp %358 : vector<8x128xf32>
    %cst_115 = arith.constant 1.000000e+00 : f32
    %360 = vector.broadcast %cst_115 : f32 to vector<8x128xf32>
    %361 = arith.addf %360, %359 : vector<8x128xf32>
    %362 = arith.divf %360, %361 : vector<8x128xf32>
    %363 = vector.extract_strided_slice %331 {offsets = [0, 128], sizes = [8, 128], strides = [1, 1]} : vector<8x512xf32> to vector<8x128xf32>
    %364 = arith.negf %363 : vector<8x128xf32>
    %365 = math.exp %364 : vector<8x128xf32>
    %cst_116 = arith.constant 1.000000e+00 : f32
    %366 = vector.broadcast %cst_116 : f32 to vector<8x128xf32>
    %367 = arith.addf %366, %365 : vector<8x128xf32>
    %368 = arith.divf %366, %367 : vector<8x128xf32>
    %369 = vector.extract_strided_slice %331 {offsets = [0, 256], sizes = [8, 128], strides = [1, 1]} : vector<8x512xf32> to vector<8x128xf32>
    %370 = math.tanh %369 : vector<8x128xf32>
    %371 = vector.extract_strided_slice %331 {offsets = [0, 384], sizes = [8, 128], strides = [1, 1]} : vector<8x512xf32> to vector<8x128xf32>
    %372 = arith.negf %371 : vector<8x128xf32>
    %373 = math.exp %372 : vector<8x128xf32>
    %cst_117 = arith.constant 1.000000e+00 : f32
    %374 = vector.broadcast %cst_117 : f32 to vector<8x128xf32>
    %375 = arith.addf %374, %373 : vector<8x128xf32>
    %376 = arith.divf %374, %375 : vector<8x128xf32>
    %377 = arith.mulf %368, %304 : vector<8x128xf32>
    %378 = arith.mulf %362, %370 : vector<8x128xf32>
    %379 = arith.addf %377, %378 : vector<8x128xf32>
    %380 = math.tanh %379 : vector<8x128xf32>
    %381 = arith.mulf %376, %380 : vector<8x128xf32>
    %382 = arith.truncf %356 : vector<8x128xf32> to vector<8x128xbf16>
    %383 = arith.index_cast %c4_i32 : i32 to index
    %c0_118 = arith.constant 0 : index
    %c0_119 = arith.constant 0 : index
    %384 = vector.load %arg13[%383, %c0_118, %c0_119] : memref<8x8x128xbf16, #tpu.memory_space<vmem>>, vector<1x8x128xbf16>
    %385 = vector.shape_cast %384 : vector<1x8x128xbf16> to vector<8x128xbf16>
    %386 = vector.shape_cast %382 : vector<8x128xbf16> to vector<1x8x128xbf16>
    tpu.vector_store %arg13[%383, %c0_118, %c0_119], %386 {strides = array<i32>} : memref<8x8x128xbf16, #tpu.memory_space<vmem>>, vector<1x8x128xbf16>,
    %387 = arith.truncf %381 : vector<8x128xf32> to vector<8x128xbf16>
    %388 = arith.index_cast %317 : i32 to index
    %c0_120 = arith.constant 0 : index
    %c0_121 = arith.constant 0 : index
    %389 = vector.load %arg14[%388, %c0_120, %c0_121] : memref<8x8x128xbf16, #tpu.memory_space<vmem>>, vector<1x8x128xbf16>
    %390 = vector.shape_cast %389 : vector<1x8x128xbf16> to vector<8x128xbf16>
    %391 = vector.shape_cast %387 : vector<8x128xbf16> to vector<1x8x128xbf16>
    tpu.vector_store %arg14[%388, %c0_120, %c0_121], %391 {strides = array<i32>} : memref<8x8x128xbf16, #tpu.memory_space<vmem>>, vector<1x8x128xbf16>,
    %c5_i32 = arith.constant 5 : i32
    %c7_i32_122 = arith.constant 7 : i32
    %392 = arith.subi %c7_i32_122, %c5_i32 : i32
    %393 = arith.truncf %356 : vector<8x128xf32> to vector<8x128xbf16>
    %c0_123 = arith.constant 0 : index
    %c0_124 = arith.constant 0 : index
    %394 = vector.load %arg2[%c0_123, %c0_124] : memref<128x512xbf16, #tpu.memory_space<vmem>>, vector<128x512xbf16>
    %cst_125 = arith.constant dense<0.000000e+00> : vector<8x512xf32>
    %395 = tpu.matmul %393, %394, %cst_125 {dimension_numbers = #tpu.dot_dimension_numbers<[1], [0], [0], [1], [0, 0, 1, 1], [], []>} : vector<8x128xbf16>, vector<128x512xbf16>, vector<8x512xf32> -> vector<8x512xf32>
    %396 = arith.index_cast %c5_i32 : i32 to index
    %c0_126 = arith.constant 0 : index
    %c0_127 = arith.constant 0 : index
    %397 = vector.load %arg11[%396, %c0_126, %c0_127] : memref<8x8x512xf32, #tpu.memory_space<vmem>>, vector<1x8x512xf32>
    %398 = vector.shape_cast %397 : vector<1x8x512xf32> to vector<8x512xf32>
    %399 = arith.addf %395, %398 : vector<8x512xf32>
    %400 = arith.truncf %381 : vector<8x128xf32> to vector<8x128xbf16>
    %c0_128 = arith.constant 0 : index
    %c0_129 = arith.constant 0 : index
    %401 = vector.load %arg5[%c0_128, %c0_129] : memref<128x512xbf16, #tpu.memory_space<vmem>>, vector<128x512xbf16>
    %cst_130 = arith.constant dense<0.000000e+00> : vector<8x512xf32>
    %402 = tpu.matmul %400, %401, %cst_130 {dimension_numbers = #tpu.dot_dimension_numbers<[1], [0], [0], [1], [0, 0, 1, 1], [], []>} : vector<8x128xbf16>, vector<128x512xbf16>, vector<8x512xf32> -> vector<8x512xf32>
    %403 = arith.index_cast %392 : i32 to index
    %c0_131 = arith.constant 0 : index
    %c0_132 = arith.constant 0 : index
    %404 = vector.load %arg12[%403, %c0_131, %c0_132] : memref<8x8x512xf32, #tpu.memory_space<vmem>>, vector<1x8x512xf32>
    %405 = vector.shape_cast %404 : vector<1x8x512xf32> to vector<8x512xf32>
    %406 = arith.addf %402, %405 : vector<8x512xf32>
    %407 = vector.extract_strided_slice %399 {offsets = [0, 0], sizes = [8, 128], strides = [1, 1]} : vector<8x512xf32> to vector<8x128xf32>
    %408 = arith.negf %407 : vector<8x128xf32>
    %409 = math.exp %408 : vector<8x128xf32>
    %cst_133 = arith.constant 1.000000e+00 : f32
    %410 = vector.broadcast %cst_133 : f32 to vector<8x128xf32>
    %411 = arith.addf %410, %409 : vector<8x128xf32>
    %412 = arith.divf %410, %411 : vector<8x128xf32>
    %413 = vector.extract_strided_slice %399 {offsets = [0, 128], sizes = [8, 128], strides = [1, 1]} : vector<8x512xf32> to vector<8x128xf32>
    %414 = arith.negf %413 : vector<8x128xf32>
    %415 = math.exp %414 : vector<8x128xf32>
    %cst_134 = arith.constant 1.000000e+00 : f32
    %416 = vector.broadcast %cst_134 : f32 to vector<8x128xf32>
    %417 = arith.addf %416, %415 : vector<8x128xf32>
    %418 = arith.divf %416, %417 : vector<8x128xf32>
    %419 = vector.extract_strided_slice %399 {offsets = [0, 256], sizes = [8, 128], strides = [1, 1]} : vector<8x512xf32> to vector<8x128xf32>
    %420 = math.tanh %419 : vector<8x128xf32>
    %421 = vector.extract_strided_slice %399 {offsets = [0, 384], sizes = [8, 128], strides = [1, 1]} : vector<8x512xf32> to vector<8x128xf32>
    %422 = arith.negf %421 : vector<8x128xf32>
    %423 = math.exp %422 : vector<8x128xf32>
    %cst_135 = arith.constant 1.000000e+00 : f32
    %424 = vector.broadcast %cst_135 : f32 to vector<8x128xf32>
    %425 = arith.addf %424, %423 : vector<8x128xf32>
    %426 = arith.divf %424, %425 : vector<8x128xf32>
    %427 = arith.mulf %418, %354 : vector<8x128xf32>
    %428 = arith.mulf %412, %420 : vector<8x128xf32>
    %429 = arith.addf %427, %428 : vector<8x128xf32>
    %430 = math.tanh %429 : vector<8x128xf32>
    %431 = arith.mulf %426, %430 : vector<8x128xf32>
    %432 = vector.extract_strided_slice %406 {offsets = [0, 0], sizes = [8, 128], strides = [1, 1]} : vector<8x512xf32> to vector<8x128xf32>
    %433 = arith.negf %432 : vector<8x128xf32>
    %434 = math.exp %433 : vector<8x128xf32>
    %cst_136 = arith.constant 1.000000e+00 : f32
    %435 = vector.broadcast %cst_136 : f32 to vector<8x128xf32>
    %436 = arith.addf %435, %434 : vector<8x128xf32>
    %437 = arith.divf %435, %436 : vector<8x128xf32>
    %438 = vector.extract_strided_slice %406 {offsets = [0, 128], sizes = [8, 128], strides = [1, 1]} : vector<8x512xf32> to vector<8x128xf32>
    %439 = arith.negf %438 : vector<8x128xf32>
    %440 = math.exp %439 : vector<8x128xf32>
    %cst_137 = arith.constant 1.000000e+00 : f32
    %441 = vector.broadcast %cst_137 : f32 to vector<8x128xf32>
    %442 = arith.addf %441, %440 : vector<8x128xf32>
    %443 = arith.divf %441, %442 : vector<8x128xf32>
    %444 = vector.extract_strided_slice %406 {offsets = [0, 256], sizes = [8, 128], strides = [1, 1]} : vector<8x512xf32> to vector<8x128xf32>
    %445 = math.tanh %444 : vector<8x128xf32>
    %446 = vector.extract_strided_slice %406 {offsets = [0, 384], sizes = [8, 128], strides = [1, 1]} : vector<8x512xf32> to vector<8x128xf32>
    %447 = arith.negf %446 : vector<8x128xf32>
    %448 = math.exp %447 : vector<8x128xf32>
    %cst_138 = arith.constant 1.000000e+00 : f32
    %449 = vector.broadcast %cst_138 : f32 to vector<8x128xf32>
    %450 = arith.addf %449, %448 : vector<8x128xf32>
    %451 = arith.divf %449, %450 : vector<8x128xf32>
    %452 = arith.mulf %443, %379 : vector<8x128xf32>
    %453 = arith.mulf %437, %445 : vector<8x128xf32>
    %454 = arith.addf %452, %453 : vector<8x128xf32>
    %455 = math.tanh %454 : vector<8x128xf32>
    %456 = arith.mulf %451, %455 : vector<8x128xf32>
    %457 = arith.truncf %431 : vector<8x128xf32> to vector<8x128xbf16>
    %458 = arith.index_cast %c5_i32 : i32 to index
    %c0_139 = arith.constant 0 : index
    %c0_140 = arith.constant 0 : index
    %459 = vector.load %arg13[%458, %c0_139, %c0_140] : memref<8x8x128xbf16, #tpu.memory_space<vmem>>, vector<1x8x128xbf16>
    %460 = vector.shape_cast %459 : vector<1x8x128xbf16> to vector<8x128xbf16>
    %461 = vector.shape_cast %457 : vector<8x128xbf16> to vector<1x8x128xbf16>
    tpu.vector_store %arg13[%458, %c0_139, %c0_140], %461 {strides = array<i32>} : memref<8x8x128xbf16, #tpu.memory_space<vmem>>, vector<1x8x128xbf16>,
    %462 = arith.truncf %456 : vector<8x128xf32> to vector<8x128xbf16>
    %463 = arith.index_cast %392 : i32 to index
    %c0_141 = arith.constant 0 : index
    %c0_142 = arith.constant 0 : index
    %464 = vector.load %arg14[%463, %c0_141, %c0_142] : memref<8x8x128xbf16, #tpu.memory_space<vmem>>, vector<1x8x128xbf16>
    %465 = vector.shape_cast %464 : vector<1x8x128xbf16> to vector<8x128xbf16>
    %466 = vector.shape_cast %462 : vector<8x128xbf16> to vector<1x8x128xbf16>
    tpu.vector_store %arg14[%463, %c0_141, %c0_142], %466 {strides = array<i32>} : memref<8x8x128xbf16, #tpu.memory_space<vmem>>, vector<1x8x128xbf16>,
    %c6_i32 = arith.constant 6 : i32
    %c7_i32_143 = arith.constant 7 : i32
    %467 = arith.subi %c7_i32_143, %c6_i32 : i32
    %468 = arith.truncf %431 : vector<8x128xf32> to vector<8x128xbf16>
    %c0_144 = arith.constant 0 : index
    %c0_145 = arith.constant 0 : index
    %469 = vector.load %arg2[%c0_144, %c0_145] : memref<128x512xbf16, #tpu.memory_space<vmem>>, vector<128x512xbf16>
    %cst_146 = arith.constant dense<0.000000e+00> : vector<8x512xf32>
    %470 = tpu.matmul %468, %469, %cst_146 {dimension_numbers = #tpu.dot_dimension_numbers<[1], [0], [0], [1], [0, 0, 1, 1], [], []>} : vector<8x128xbf16>, vector<128x512xbf16>, vector<8x512xf32> -> vector<8x512xf32>
    %471 = arith.index_cast %c6_i32 : i32 to index
    %c0_147 = arith.constant 0 : index
    %c0_148 = arith.constant 0 : index
    %472 = vector.load %arg11[%471, %c0_147, %c0_148] : memref<8x8x512xf32, #tpu.memory_space<vmem>>, vector<1x8x512xf32>
    %473 = vector.shape_cast %472 : vector<1x8x512xf32> to vector<8x512xf32>
    %474 = arith.addf %470, %473 : vector<8x512xf32>
    %475 = arith.truncf %456 : vector<8x128xf32> to vector<8x128xbf16>
    %c0_149 = arith.constant 0 : index
    %c0_150 = arith.constant 0 : index
    %476 = vector.load %arg5[%c0_149, %c0_150] : memref<128x512xbf16, #tpu.memory_space<vmem>>, vector<128x512xbf16>
    %cst_151 = arith.constant dense<0.000000e+00> : vector<8x512xf32>
    %477 = tpu.matmul %475, %476, %cst_151 {dimension_numbers = #tpu.dot_dimension_numbers<[1], [0], [0], [1], [0, 0, 1, 1], [], []>} : vector<8x128xbf16>, vector<128x512xbf16>, vector<8x512xf32> -> vector<8x512xf32>
    %478 = arith.index_cast %467 : i32 to index
    %c0_152 = arith.constant 0 : index
    %c0_153 = arith.constant 0 : index
    %479 = vector.load %arg12[%478, %c0_152, %c0_153] : memref<8x8x512xf32, #tpu.memory_space<vmem>>, vector<1x8x512xf32>
    %480 = vector.shape_cast %479 : vector<1x8x512xf32> to vector<8x512xf32>
    %481 = arith.addf %477, %480 : vector<8x512xf32>
    %482 = vector.extract_strided_slice %474 {offsets = [0, 0], sizes = [8, 128], strides = [1, 1]} : vector<8x512xf32> to vector<8x128xf32>
    %483 = arith.negf %482 : vector<8x128xf32>
    %484 = math.exp %483 : vector<8x128xf32>
    %cst_154 = arith.constant 1.000000e+00 : f32
    %485 = vector.broadcast %cst_154 : f32 to vector<8x128xf32>
    %486 = arith.addf %485, %484 : vector<8x128xf32>
    %487 = arith.divf %485, %486 : vector<8x128xf32>
    %488 = vector.extract_strided_slice %474 {offsets = [0, 128], sizes = [8, 128], strides = [1, 1]} : vector<8x512xf32> to vector<8x128xf32>
    %489 = arith.negf %488 : vector<8x128xf32>
    %490 = math.exp %489 : vector<8x128xf32>
    %cst_155 = arith.constant 1.000000e+00 : f32
    %491 = vector.broadcast %cst_155 : f32 to vector<8x128xf32>
    %492 = arith.addf %491, %490 : vector<8x128xf32>
    %493 = arith.divf %491, %492 : vector<8x128xf32>
    %494 = vector.extract_strided_slice %474 {offsets = [0, 256], sizes = [8, 128], strides = [1, 1]} : vector<8x512xf32> to vector<8x128xf32>
    %495 = math.tanh %494 : vector<8x128xf32>
    %496 = vector.extract_strided_slice %474 {offsets = [0, 384], sizes = [8, 128], strides = [1, 1]} : vector<8x512xf32> to vector<8x128xf32>
    %497 = arith.negf %496 : vector<8x128xf32>
    %498 = math.exp %497 : vector<8x128xf32>
    %cst_156 = arith.constant 1.000000e+00 : f32
    %499 = vector.broadcast %cst_156 : f32 to vector<8x128xf32>
    %500 = arith.addf %499, %498 : vector<8x128xf32>
    %501 = arith.divf %499, %500 : vector<8x128xf32>
    %502 = arith.mulf %493, %429 : vector<8x128xf32>
    %503 = arith.mulf %487, %495 : vector<8x128xf32>
    %504 = arith.addf %502, %503 : vector<8x128xf32>
    %505 = math.tanh %504 : vector<8x128xf32>
    %506 = arith.mulf %501, %505 : vector<8x128xf32>
    %507 = vector.extract_strided_slice %481 {offsets = [0, 0], sizes = [8, 128], strides = [1, 1]} : vector<8x512xf32> to vector<8x128xf32>
    %508 = arith.negf %507 : vector<8x128xf32>
    %509 = math.exp %508 : vector<8x128xf32>
    %cst_157 = arith.constant 1.000000e+00 : f32
    %510 = vector.broadcast %cst_157 : f32 to vector<8x128xf32>
    %511 = arith.addf %510, %509 : vector<8x128xf32>
    %512 = arith.divf %510, %511 : vector<8x128xf32>
    %513 = vector.extract_strided_slice %481 {offsets = [0, 128], sizes = [8, 128], strides = [1, 1]} : vector<8x512xf32> to vector<8x128xf32>
    %514 = arith.negf %513 : vector<8x128xf32>
    %515 = math.exp %514 : vector<8x128xf32>
    %cst_158 = arith.constant 1.000000e+00 : f32
    %516 = vector.broadcast %cst_158 : f32 to vector<8x128xf32>
    %517 = arith.addf %516, %515 : vector<8x128xf32>
    %518 = arith.divf %516, %517 : vector<8x128xf32>
    %519 = vector.extract_strided_slice %481 {offsets = [0, 256], sizes = [8, 128], strides = [1, 1]} : vector<8x512xf32> to vector<8x128xf32>
    %520 = math.tanh %519 : vector<8x128xf32>
    %521 = vector.extract_strided_slice %481 {offsets = [0, 384], sizes = [8, 128], strides = [1, 1]} : vector<8x512xf32> to vector<8x128xf32>
    %522 = arith.negf %521 : vector<8x128xf32>
    %523 = math.exp %522 : vector<8x128xf32>
    %cst_159 = arith.constant 1.000000e+00 : f32
    %524 = vector.broadcast %cst_159 : f32 to vector<8x128xf32>
    %525 = arith.addf %524, %523 : vector<8x128xf32>
    %526 = arith.divf %524, %525 : vector<8x128xf32>
    %527 = arith.mulf %518, %454 : vector<8x128xf32>
    %528 = arith.mulf %512, %520 : vector<8x128xf32>
    %529 = arith.addf %527, %528 : vector<8x128xf32>
    %530 = math.tanh %529 : vector<8x128xf32>
    %531 = arith.mulf %526, %530 : vector<8x128xf32>
    %532 = arith.truncf %506 : vector<8x128xf32> to vector<8x128xbf16>
    %533 = arith.index_cast %c6_i32 : i32 to index
    %c0_160 = arith.constant 0 : index
    %c0_161 = arith.constant 0 : index
    %534 = vector.load %arg13[%533, %c0_160, %c0_161] : memref<8x8x128xbf16, #tpu.memory_space<vmem>>, vector<1x8x128xbf16>
    %535 = vector.shape_cast %534 : vector<1x8x128xbf16> to vector<8x128xbf16>
    %536 = vector.shape_cast %532 : vector<8x128xbf16> to vector<1x8x128xbf16>
    tpu.vector_store %arg13[%533, %c0_160, %c0_161], %536 {strides = array<i32>} : memref<8x8x128xbf16, #tpu.memory_space<vmem>>, vector<1x8x128xbf16>,
    %537 = arith.truncf %531 : vector<8x128xf32> to vector<8x128xbf16>
    %538 = arith.index_cast %467 : i32 to index
    %c0_162 = arith.constant 0 : index
    %c0_163 = arith.constant 0 : index
    %539 = vector.load %arg14[%538, %c0_162, %c0_163] : memref<8x8x128xbf16, #tpu.memory_space<vmem>>, vector<1x8x128xbf16>
    %540 = vector.shape_cast %539 : vector<1x8x128xbf16> to vector<8x128xbf16>
    %541 = vector.shape_cast %537 : vector<8x128xbf16> to vector<1x8x128xbf16>
    tpu.vector_store %arg14[%538, %c0_162, %c0_163], %541 {strides = array<i32>} : memref<8x8x128xbf16, #tpu.memory_space<vmem>>, vector<1x8x128xbf16>,
    %c7_i32_164 = arith.constant 7 : i32
    %c7_i32_165 = arith.constant 7 : i32
    %542 = arith.subi %c7_i32_165, %c7_i32_164 : i32
    %543 = arith.truncf %506 : vector<8x128xf32> to vector<8x128xbf16>
    %c0_166 = arith.constant 0 : index
    %c0_167 = arith.constant 0 : index
    %544 = vector.load %arg2[%c0_166, %c0_167] : memref<128x512xbf16, #tpu.memory_space<vmem>>, vector<128x512xbf16>
    %cst_168 = arith.constant dense<0.000000e+00> : vector<8x512xf32>
    %545 = tpu.matmul %543, %544, %cst_168 {dimension_numbers = #tpu.dot_dimension_numbers<[1], [0], [0], [1], [0, 0, 1, 1], [], []>} : vector<8x128xbf16>, vector<128x512xbf16>, vector<8x512xf32> -> vector<8x512xf32>
    %546 = arith.index_cast %c7_i32_164 : i32 to index
    %c0_169 = arith.constant 0 : index
    %c0_170 = arith.constant 0 : index
    %547 = vector.load %arg11[%546, %c0_169, %c0_170] : memref<8x8x512xf32, #tpu.memory_space<vmem>>, vector<1x8x512xf32>
    %548 = vector.shape_cast %547 : vector<1x8x512xf32> to vector<8x512xf32>
    %549 = arith.addf %545, %548 : vector<8x512xf32>
    %550 = arith.truncf %531 : vector<8x128xf32> to vector<8x128xbf16>
    %c0_171 = arith.constant 0 : index
    %c0_172 = arith.constant 0 : index
    %551 = vector.load %arg5[%c0_171, %c0_172] : memref<128x512xbf16, #tpu.memory_space<vmem>>, vector<128x512xbf16>
    %cst_173 = arith.constant dense<0.000000e+00> : vector<8x512xf32>
    %552 = tpu.matmul %550, %551, %cst_173 {dimension_numbers = #tpu.dot_dimension_numbers<[1], [0], [0], [1], [0, 0, 1, 1], [], []>} : vector<8x128xbf16>, vector<128x512xbf16>, vector<8x512xf32> -> vector<8x512xf32>
    %553 = arith.index_cast %542 : i32 to index
    %c0_174 = arith.constant 0 : index
    %c0_175 = arith.constant 0 : index
    %554 = vector.load %arg12[%553, %c0_174, %c0_175] : memref<8x8x512xf32, #tpu.memory_space<vmem>>, vector<1x8x512xf32>
    %555 = vector.shape_cast %554 : vector<1x8x512xf32> to vector<8x512xf32>
    %556 = arith.addf %552, %555 : vector<8x512xf32>
    %557 = vector.extract_strided_slice %549 {offsets = [0, 0], sizes = [8, 128], strides = [1, 1]} : vector<8x512xf32> to vector<8x128xf32>
    %558 = arith.negf %557 : vector<8x128xf32>
    %559 = math.exp %558 : vector<8x128xf32>
    %cst_176 = arith.constant 1.000000e+00 : f32
    %560 = vector.broadcast %cst_176 : f32 to vector<8x128xf32>
    %561 = arith.addf %560, %559 : vector<8x128xf32>
    %562 = arith.divf %560, %561 : vector<8x128xf32>
    %563 = vector.extract_strided_slice %549 {offsets = [0, 128], sizes = [8, 128], strides = [1, 1]} : vector<8x512xf32> to vector<8x128xf32>
    %564 = arith.negf %563 : vector<8x128xf32>
    %565 = math.exp %564 : vector<8x128xf32>
    %cst_177 = arith.constant 1.000000e+00 : f32
    %566 = vector.broadcast %cst_177 : f32 to vector<8x128xf32>
    %567 = arith.addf %566, %565 : vector<8x128xf32>
    %568 = arith.divf %566, %567 : vector<8x128xf32>
    %569 = vector.extract_strided_slice %549 {offsets = [0, 256], sizes = [8, 128], strides = [1, 1]} : vector<8x512xf32> to vector<8x128xf32>
    %570 = math.tanh %569 : vector<8x128xf32>
    %571 = vector.extract_strided_slice %549 {offsets = [0, 384], sizes = [8, 128], strides = [1, 1]} : vector<8x512xf32> to vector<8x128xf32>
    %572 = arith.negf %571 : vector<8x128xf32>
    %573 = math.exp %572 : vector<8x128xf32>
    %cst_178 = arith.constant 1.000000e+00 : f32
    %574 = vector.broadcast %cst_178 : f32 to vector<8x128xf32>
    %575 = arith.addf %574, %573 : vector<8x128xf32>
    %576 = arith.divf %574, %575 : vector<8x128xf32>
    %577 = arith.mulf %568, %504 : vector<8x128xf32>
    %578 = arith.mulf %562, %570 : vector<8x128xf32>
    %579 = arith.addf %577, %578 : vector<8x128xf32>
    %580 = math.tanh %579 : vector<8x128xf32>
    %581 = arith.mulf %576, %580 : vector<8x128xf32>
    %582 = vector.extract_strided_slice %556 {offsets = [0, 0], sizes = [8, 128], strides = [1, 1]} : vector<8x512xf32> to vector<8x128xf32>
    %583 = arith.negf %582 : vector<8x128xf32>
    %584 = math.exp %583 : vector<8x128xf32>
    %cst_179 = arith.constant 1.000000e+00 : f32
    %585 = vector.broadcast %cst_179 : f32 to vector<8x128xf32>
    %586 = arith.addf %585, %584 : vector<8x128xf32>
    %587 = arith.divf %585, %586 : vector<8x128xf32>
    %588 = vector.extract_strided_slice %556 {offsets = [0, 128], sizes = [8, 128], strides = [1, 1]} : vector<8x512xf32> to vector<8x128xf32>
    %589 = arith.negf %588 : vector<8x128xf32>
    %590 = math.exp %589 : vector<8x128xf32>
    %cst_180 = arith.constant 1.000000e+00 : f32
    %591 = vector.broadcast %cst_180 : f32 to vector<8x128xf32>
    %592 = arith.addf %591, %590 : vector<8x128xf32>
    %593 = arith.divf %591, %592 : vector<8x128xf32>
    %594 = vector.extract_strided_slice %556 {offsets = [0, 256], sizes = [8, 128], strides = [1, 1]} : vector<8x512xf32> to vector<8x128xf32>
    %595 = math.tanh %594 : vector<8x128xf32>
    %596 = vector.extract_strided_slice %556 {offsets = [0, 384], sizes = [8, 128], strides = [1, 1]} : vector<8x512xf32> to vector<8x128xf32>
    %597 = arith.negf %596 : vector<8x128xf32>
    %598 = math.exp %597 : vector<8x128xf32>
    %cst_181 = arith.constant 1.000000e+00 : f32
    %599 = vector.broadcast %cst_181 : f32 to vector<8x128xf32>
    %600 = arith.addf %599, %598 : vector<8x128xf32>
    %601 = arith.divf %599, %600 : vector<8x128xf32>
    %602 = arith.mulf %593, %529 : vector<8x128xf32>
    %603 = arith.mulf %587, %595 : vector<8x128xf32>
    %604 = arith.addf %602, %603 : vector<8x128xf32>
    %605 = math.tanh %604 : vector<8x128xf32>
    %606 = arith.mulf %601, %605 : vector<8x128xf32>
    %607 = arith.truncf %581 : vector<8x128xf32> to vector<8x128xbf16>
    %608 = arith.index_cast %c7_i32_164 : i32 to index
    %c0_182 = arith.constant 0 : index
    %c0_183 = arith.constant 0 : index
    %609 = vector.load %arg13[%608, %c0_182, %c0_183] : memref<8x8x128xbf16, #tpu.memory_space<vmem>>, vector<1x8x128xbf16>
    %610 = vector.shape_cast %609 : vector<1x8x128xbf16> to vector<8x128xbf16>
    %611 = vector.shape_cast %607 : vector<8x128xbf16> to vector<1x8x128xbf16>
    tpu.vector_store %arg13[%608, %c0_182, %c0_183], %611 {strides = array<i32>} : memref<8x8x128xbf16, #tpu.memory_space<vmem>>, vector<1x8x128xbf16>,
    %612 = arith.truncf %606 : vector<8x128xf32> to vector<8x128xbf16>
    %613 = arith.index_cast %542 : i32 to index
    %c0_184 = arith.constant 0 : index
    %c0_185 = arith.constant 0 : index
    %614 = vector.load %arg14[%613, %c0_184, %c0_185] : memref<8x8x128xbf16, #tpu.memory_space<vmem>>, vector<1x8x128xbf16>
    %615 = vector.shape_cast %614 : vector<1x8x128xbf16> to vector<8x128xbf16>
    %616 = vector.shape_cast %612 : vector<8x128xbf16> to vector<1x8x128xbf16>
    tpu.vector_store %arg14[%613, %c0_184, %c0_185], %616 {strides = array<i32>} : memref<8x8x128xbf16, #tpu.memory_space<vmem>>, vector<1x8x128xbf16>,
    %c8_i32 = arith.constant 8 : i32
    %c0_186 = arith.constant 0 : index
    %c0_187 = arith.constant 0 : index
    %c0_188 = arith.constant 0 : index
    %617 = vector.load %arg13[%c0_186, %c0_187, %c0_188] : memref<8x8x128xbf16, #tpu.memory_space<vmem>>, vector<8x8x128xbf16>
    %618 = vector.shape_cast %617 : vector<8x8x128xbf16> to vector<64x128xbf16>
    %c0_189 = arith.constant 0 : index
    %c0_190 = arith.constant 0 : index
    %c0_191 = arith.constant 0 : index
    %619 = vector.load %arg14[%c0_189, %c0_190, %c0_191] : memref<8x8x128xbf16, #tpu.memory_space<vmem>>, vector<8x8x128xbf16>
    %620 = vector.shape_cast %619 : vector<8x8x128xbf16> to vector<64x128xbf16>
    %c0_192 = arith.constant 0 : index
    %c0_193 = arith.constant 0 : index
    %621 = vector.load %arg7[%c0_192, %c0_193] : memref<128x128xbf16, #tpu.memory_space<vmem>>, vector<128x128xbf16>
    %cst_194 = arith.constant dense<0.000000e+00> : vector<64x128xf32>
    %622 = tpu.matmul %618, %621, %cst_194 {dimension_numbers = #tpu.dot_dimension_numbers<[1], [0], [0], [1], [0, 0, 1, 1], [], []>} : vector<64x128xbf16>, vector<128x128xbf16>, vector<64x128xf32> -> vector<64x128xf32>
    %c0_195 = arith.constant 0 : index
    %c0_196 = arith.constant 0 : index
    %623 = vector.load %arg8[%c0_195, %c0_196] : memref<128x128xbf16, #tpu.memory_space<vmem>>, vector<128x128xbf16>
    %cst_197 = arith.constant dense<0.000000e+00> : vector<64x128xf32>
    %624 = tpu.matmul %620, %623, %cst_197 {dimension_numbers = #tpu.dot_dimension_numbers<[1], [0], [0], [1], [0, 0, 1, 1], [], []>} : vector<64x128xbf16>, vector<128x128xbf16>, vector<64x128xf32> -> vector<64x128xf32>
    %625 = arith.addf %622, %624 : vector<64x128xf32>
    %c0_198 = arith.constant 0 : index
    %c0_199 = arith.constant 0 : index
    %626 = vector.load %arg9[%c0_198, %c0_199] : memref<1x128xf32, #tpu.memory_space<vmem>>, vector<1x128xf32>
    %627 = vector.broadcast %626 : vector<1x128xf32> to vector<64x128xf32>
    %628 = arith.addf %625, %627 : vector<64x128xf32>
    %cst_200 = arith.constant dense<0xFF800000> : vector<64xf32>
    %629 = vector.multi_reduction <maximumf>, %628, %cst_200 [1] : vector<64x128xf32> to vector<64xf32>
    %630 = vector.shape_cast %629 : vector<64xf32> to vector<64x1xf32>
    %631 = vector.broadcast %630 : vector<64x1xf32> to vector<64x128xf32>
    %632 = arith.subf %628, %631 : vector<64x128xf32>
    %633 = math.exp %632 : vector<64x128xf32>
    %cst_201 = arith.constant dense<0.000000e+00> : vector<64xf32>
    %634 = vector.multi_reduction <add>, %633, %cst_201 [1] : vector<64x128xf32> to vector<64xf32>
    %635 = vector.shape_cast %634 : vector<64xf32> to vector<64x1xf32>
    %636 = math.log %635 : vector<64x1xf32>
    %637 = arith.addf %630, %636 : vector<64x1xf32>
    %638 = vector.broadcast %637 : vector<64x1xf32> to vector<64x128xf32>
    %639 = arith.subf %628, %638 : vector<64x128xf32>
    %c0_202 = arith.constant 0 : index
    %c0_203 = arith.constant 0 : index
    %640 = vector.load %arg10[%c0_202, %c0_203] : memref<64x128xf32, #tpu.memory_space<vmem>>, vector<64x128xf32>
    tpu.vector_store %arg10[%c0_202, %c0_203], %639 {strides = array<i32>} : memref<64x128xf32, #tpu.memory_space<vmem>>, vector<64x128xf32>,
    return
  }
}

</mosaic_0001>

<bundles_post_ra>
// kernel: lstm_forward.1
= control target key start
LH: loop header
LB: loop body
LE: loop exit
PB: predicated region body
PF: predicated region fallthrough
CT: control target
= control target key end

     0   :  { %vm98_vm0 = vcmask 130048   ;;  %s13428_s1 = inlined_call_operand.vmem [shape: bf16[16,512], index: 1, kind: input, shape index: {}]   ;;  %s13429_s0 = inlined_call_operand.vmem [shape: bf16[8,8,16], index: 0, kind: input, shape index: {}]   ;;  %s13430_s4 = inlined_call_operand.vmem [shape: bf16[16,512], index: 4, kind: input, shape index: {}]   ;;  %s13431_s2 = inlined_call_operand.vmem [shape: bf16[128,512], index: 2, kind: input, shape index: {}]   ;;  %s13432_s5 = inlined_call_operand.vmem [shape: bf16[128,512], index: 5, kind: input, shape index: {}]   ;;  %s13433_s3 = inlined_call_operand.vmem [shape: f32[1,512], index: 3, kind: input, shape index: {}]   ;;  %s13434_s6 = inlined_call_operand.vmem [shape: f32[1,512], index: 6, kind: input, shape index: {}]   ;;  %s13435_s7 = inlined_call_operand.vmem [shape: bf16[128,128], index: 7, kind: input, shape index: {}]   ;;  %s13436_s8 = inlined_call_operand.vmem [shape: bf16[128,128], index: 8, kind: input, shape index: {}]   ;;  %s13437_s9 = inlined_call_operand.vmem [shape: f32[1,128], index: 9, kind: input, shape index: {}]   ;;  %s13438_s10 = inlined_call_operand.vmem [shape: f32[64,128], index: 10, kind: output, shape index: {}]  }
   0x1   :  { %v5857_v0 = vld [vmem:[%s13428_s1] sm:$0xf]  ;;  %v8117_v1 = vld [vmem:[%s13428_s1 + $0xc] sm:$0xf0]  ;;  %v8115_v2 = vld [vmem:[%s13428_s1 + $0x4] sm:$0xf] }
   0x2   :  { %v5858_v3 = vor.u32 %v8117_v1, %v5857_v0  ;;  %v5859_v4 = vld [vmem:[%s13428_s1 + $0x10] sm:$0xf0]  ;;  %v9022_v5 = vld [vmem:[%s13429_s0] sm:$0xff]  ;;  %v9027_v6 = vld [vmem:[%s13429_s0 + $0x8] sm:$0xff] }
   0x3   :  { %v5862_v7 = vor.u32 %v8115_v2, %v5859_v4  ;;  %v8116_v8 = vld [vmem:[%s13428_s1 + $0xc] sm:$0xf]  ;;  %v5867_v9 = vld [vmem:[%s13428_s1 + $0x18] sm:$0xf0]  ;;  %v5865_v10 = vld [vmem:[%s13428_s1 + $0x8] sm:$0xf] }
   0x4   :  { %118 = vmatpush.bf16.msra.mxu0 %v5858_v3  ;;  %8659 = vmatpush.bf16.msra.mxu2 %v5858_v3  ;;  %v5870_v11 = vor.u32 %v8116_v8, %v5867_v9  ;;  %v8118_v12 = vld [vmem:[%s13428_s1 + $0x14] sm:$0xf0]  ;;  %v5889_v13 = vld [vmem:[%s13430_s4] sm:$0xf]  ;;  %v8121_v14 = vld [vmem:[%s13430_s4 + $0xc] sm:$0xf0] }
   0x5   :  { %147 = vmatpush.bf16.msra.mxu1 %v5862_v7  ;;  %8660 = vmatpush.bf16.msra.mxu3 %v5862_v7  ;;  %v5866_v15 = vor.u32 %v8118_v12, %v5865_v10  ;;  %v5890_v16 = vor.u32 %v8121_v14, %v5889_v13  ;;  %v8119_v17 = vld [vmem:[%s13430_s4 + $0x4] sm:$0xf]  ;;  %v5891_v18 = vld [vmem:[%s13430_s4 + $0x10] sm:$0xf0]  ;;  %v6033_v21 = vld [vmem:[%s13431_s2 + $0xe0] sm:$0xf] }
   0x6   :  { %v5894_v19 = vor.u32 %v8119_v17, %v5891_v18  ;;  %v9064_v20 = vld [vmem:[%s13429_s0 + $0x10] sm:$0xff]  ;;  %v8151_v23 = vld [vmem:[%s13431_s2 + $0xe4] sm:$0xf]  ;;  %v8120_v26 = vld [vmem:[%s13430_s4 + $0xc] sm:$0xf]  ;;  %v8951_v17 = vmov 0  }
   0x7   :  { %5871 = vmatmul.msk.bf16.vlgmr.msra.gmra.mxu0 %vm98_vm0, %v9022_v5  ;;  %5872 = vmatmul.msk.bf16.vlgmr.msra.gmra.mxu2 %vm98_vm0, %v9027_v6  ;;  %v8153_v22 = vld [vmem:[%s13431_s2 + $0xec] sm:$0xf0]  ;;  %v6035_v25 = vld [vmem:[%s13431_s2 + $0xf0] sm:$0xf0]  ;;  %v5899_v27 = vld [vmem:[%s13430_s4 + $0x18] sm:$0xf0] }
   0x8   :  { %5875 = vmatmul.msk.bf16.vlgmr.msra.gmra.mxu1 %vm98_vm0, %v9022_v5  ;;  %5876 = vmatmul.msk.bf16.vlgmr.msra.gmra.mxu3 %vm98_vm0, %v9027_v6  ;;  %v6034_v24 = vor.u32 %v8153_v22, %v6033_v21  ;;  %v6038_v28 = vor.u32 %v8151_v23, %v6035_v25  ;;  %v6017_v29 = vld [vmem:[%s13431_s2 + $0xc0] sm:$0xf]  ;;  %v5902_v30 = vor.u32 %v8120_v26, %v5899_v27  ;;  %v8149_v31 = vld [vmem:[%s13431_s2 + $0xcc] sm:$0xf0]  ;;  %v8147_v32 = vld [vmem:[%s13431_s2 + $0xc4] sm:$0xf] }
   0x9   :  { %205 = vmatpush.bf16.msrb.mxu3 %v5870_v11  ;;  %176 = vmatpush.bf16.msrb.mxu2 %v5866_v15  ;;  %v6019_v33 = vld [vmem:[%s13431_s2 + $0xd0] sm:$0xf0]  ;;  %v6018_v34 = vor.u32 %v8149_v31, %v6017_v29  ;;  %v6001_v36 = vld [vmem:[%s13431_s2 + $0xa0] sm:$0xf]  ;;  %v8145_v37 = vld [vmem:[%s13431_s2 + $0xac] sm:$0xf0] }
   0xa   :  { %300 = vmatpush.bf16.msrb.mxu0 %v5890_v16  ;;  %329 = vmatpush.bf16.msrb.mxu1 %v5894_v19  ;;  %v6022_v35 = vor.u32 %v8147_v32, %v6019_v33  ;;  %v8143_v38 = vld [vmem:[%s13431_s2 + $0xa4] sm:$0xf]  ;;  %v6003_v39 = vld [vmem:[%s13431_s2 + $0xb0] sm:$0xf0]  ;;  %v5897_v40 = vld [vmem:[%s13430_s4 + $0x8] sm:$0xf]  ;;  %v6002_v43 = vor.u32 %v8145_v37, %v6001_v36 }
   0xb   :  { %v8122_v41 = vld [vmem:[%s13430_s4 + $0x14] sm:$0xf0]  ;;  %v6006_v44 = vor.u32 %v8143_v38, %v6003_v39  ;;  %v5985_v45 = vld [vmem:[%s13431_s2 + $0x80] sm:$0xf]  ;;  %v8141_v46 = vld [vmem:[%s13431_s2 + $0x8c] sm:$0xf0] }
   0xc   :  { %v5898_v42 = vor.u32 %v8122_v41, %v5897_v40  ;;  %v8139_v47 = vld [vmem:[%s13431_s2 + $0x84] sm:$0xf]  ;;  %v5987_v48 = vld [vmem:[%s13431_s2 + $0x90] sm:$0xf0]  ;;  %v5986_v49 = vor.u32 %v8141_v46, %v5985_v45  ;;  %v9137_v51 = vld [vmem:[%s13429_s0 + $0x18] sm:$0xff] }
   0xd   :  { %387 = vmatpush.bf16.msra.mxu3 %v5902_v30  ;;  %v5990_v50 = vor.u32 %v8139_v47, %v5987_v48  ;;  %v5969_v52 = vld [vmem:[%s13431_s2 + $0x60] sm:$0xf]  ;;  %v8137_v53 = vld [vmem:[%s13431_s2 + $0x6c] sm:$0xf0]  ;;  %v8135_v54 = vld [vmem:[%s13431_s2 + $0x64] sm:$0xf] }
   0xe   :  { %637 = vmatpush.bf16.msra.mxu0 %v6034_v24  ;;  %650 = vmatpush.bf16.msra.mxu1 %v6038_v28  ;;  %v5970_v55 = vor.u32 %v8137_v53, %v5969_v52  ;;  %v5971_v56 = vld [vmem:[%s13431_s2 + $0x70] sm:$0xf0]  ;;  %v5953_v58 = vld [vmem:[%s13431_s2 + $0x40] sm:$0xf]  ;;  %v8133_v59 = vld [vmem:[%s13431_s2 + $0x4c] sm:$0xf0] }
   0xf   :  { %358 = vmatpush.bf16.msra.mxu2 %v5898_v42  ;;  %v5974_v57 = vor.u32 %v8135_v54, %v5971_v56  ;;  %v8131_v60 = vld [vmem:[%s13431_s2 + $0x44] sm:$0xf]  ;;  %v5954_v61 = vor.u32 %v8133_v59, %v5953_v58  ;;  %v5955_v62 = vld [vmem:[%s13431_s2 + $0x50] sm:$0xf0]  ;;  %v5937_v0 = vld [vmem:[%s13431_s2 + $0x20] sm:$0xf] }
  0x10   :  { %v5958_v63 = vor.u32 %v8131_v60, %v5955_v62  ;;  %v8129_v1 = vld [vmem:[%s13431_s2 + $0x2c] sm:$0xf0]  ;;  %v8127_v2 = vld [vmem:[%s13431_s2 + $0x24] sm:$0xf]  ;;  %v5939_v3 = vld [vmem:[%s13431_s2 + $0x30] sm:$0xf0] }
  0x11   :  { %v5938_v4 = vor.u32 %v8129_v1, %v5937_v0  ;;  %v5942_v7 = vor.u32 %v8127_v2, %v5939_v3  ;;  %v5921_v8 = vld [vmem:[%s13431_s2] sm:$0xf]  ;;  %v8125_v9 = vld [vmem:[%s13431_s2 + $0xc] sm:$0xf0]  ;;  %v8123_v10 = vld [vmem:[%s13431_s2 + $0x4] sm:$0xf] }
  0x12   :  { %638 = vmatpush.bf16.msra.mxu0 %v6018_v34  ;;  %651 = vmatpush.bf16.msra.mxu1 %v6022_v35  ;;  %v5923_v11 = vld [vmem:[%s13431_s2 + $0x10] sm:$0xf0]  ;;  %v5922_v12 = vor.u32 %v8125_v9, %v5921_v8  ;;  %v6161_v14 = vld [vmem:[%s13432_s5 + $0xe0] sm:$0xf]  ;;  %v8185_v15 = vld [vmem:[%s13432_s5 + $0xec] sm:$0xf0] }
  0x13   :  { %v5926_v13 = vor.u32 %v8123_v10, %v5923_v11  ;;  %v8183_v16 = vld [vmem:[%s13432_s5 + $0xe4] sm:$0xf]  ;;  %v6162_v18 = vor.u32 %v8185_v15, %v6161_v14  ;;  %v6163_v19 = vld [vmem:[%s13432_s5 + $0xf0] sm:$0xf0]  ;;  %v8152_v21 = vld [vmem:[%s13431_s2 + $0xec] sm:$0xf] }
  0x14   :  { %v6043_v22 = vld [vmem:[%s13431_s2 + $0xf8] sm:$0xf0]  ;;  %v6166_v23 = vor.u32 %v8183_v16, %v6163_v19  ;;  %v6145_v24 = vld [vmem:[%s13432_s5 + $0xc0] sm:$0xf]  ;;  %v8181_v26 = vld [vmem:[%s13432_s5 + $0xcc] sm:$0xf0] }
  0x15   :  { %v6046_v25 = vor.u32 %v8152_v21, %v6043_v22  ;;  %v8179_v27 = vld [vmem:[%s13432_s5 + $0xc4] sm:$0xf]  ;;  %v6147_v28 = vld [vmem:[%s13432_s5 + $0xd0] sm:$0xf0]  ;;  %v6146_v29 = vor.u32 %v8181_v26, %v6145_v24  ;;  %v8148_v31 = vld [vmem:[%s13431_s2 + $0xcc] sm:$0xf] }
  0x16   :  { %639 = vmatpush.bf16.msra.mxu0 %v6002_v43  ;;  %652 = vmatpush.bf16.msra.mxu1 %v6006_v44  ;;  %v6150_v30 = vor.u32 %v8179_v27, %v6147_v28  ;;  %v6027_v32 = vld [vmem:[%s13431_s2 + $0xd8] sm:$0xf0]  ;;  %v6129_v33 = vld [vmem:[%s13432_s5 + $0xa0] sm:$0xf]  ;;  %v8177_v35 = vld [vmem:[%s13432_s5 + $0xac] sm:$0xf0] }
  0x17   :  { %5873 = vmatmul.msk.bf16.gmra.mxu2 %vm98_vm0, %v9064_v20  ;;  %5903 = vmatmul.msk.bf16.vlgmr.msrb.gmra.mxu0 %vm98_vm0, %v9022_v5  ;;  %v6030_v34 = vor.u32 %v8148_v31, %v6027_v32  ;;  %v8175_v36 = vld [vmem:[%s13432_s5 + $0xa4] sm:$0xf]  ;;  %v6131_v37 = vld [vmem:[%s13432_s5 + $0xb0] sm:$0xf0]  ;;  %v6041_v38 = vld [vmem:[%s13431_s2 + $0xe8] sm:$0xf]  ;;  %v6130_v40 = vor.u32 %v8177_v35, %v6129_v33 }
  0x18   :  { %5877 = vmatmul.msk.bf16.gmra.mxu3 %vm98_vm0, %v9064_v20  ;;  %5907 = vmatmul.msk.bf16.vlgmr.msrb.gmra.mxu1 %vm98_vm0, %v9022_v5  ;;  %v8154_v39 = vld [vmem:[%s13431_s2 + $0xf4] sm:$0xf0]  ;;  %v6134_v42 = vor.u32 %v8175_v36, %v6131_v37  ;;  %v6113_v43 = vld [vmem:[%s13432_s5 + $0x80] sm:$0xf]  ;;  %v8173_v44 = vld [vmem:[%s13432_s5 + $0x8c] sm:$0xf0] }
  0x19   :  { %v6042_v41 = vor.u32 %v8154_v39, %v6041_v38  ;;  %v8171_v45 = vld [vmem:[%s13432_s5 + $0x84] sm:$0xf]  ;;  %v6114_v46 = vor.u32 %v8173_v44, %v6113_v43  ;;  %v6115_v47 = vld [vmem:[%s13432_s5 + $0x90] sm:$0xf0]  ;;  %v6011_v56 = vld [vmem:[%s13431_s2 + $0xb8] sm:$0xf0] }
  0x1a   :  { %640 = vmatpush.bf16.msra.mxu0 %v5986_v49  ;;  %653 = vmatpush.bf16.msra.mxu1 %v5990_v50  ;;  %v6118_v48 = vor.u32 %v8171_v45, %v6115_v47  ;;  %v6097_v49 = vld [vmem:[%s13432_s5 + $0x60] sm:$0xf]  ;;  %v8169_v50 = vld [vmem:[%s13432_s5 + $0x6c] sm:$0xf0]  ;;  %v8167_v52 = vld [vmem:[%s13432_s5 + $0x64] sm:$0xf] }
  0x1b   :  { %v6098_v53 = vor.u32 %v8169_v50, %v6097_v49  ;;  %v6099_v54 = vld [vmem:[%s13432_s5 + $0x70] sm:$0xf0]  ;;  %v6025_v58 = vld [vmem:[%s13431_s2 + $0xc8] sm:$0xf]  ;;  %v8150_v60 = vld [vmem:[%s13431_s2 + $0xd4] sm:$0xf0] }
  0x1c   :  { %v6081_v62 = vld [vmem:[%s13432_s5 + $0x40] sm:$0xf]  ;;  %v8163_v0 = vld [vmem:[%s13432_s5 + $0x44] sm:$0xf]  ;;  %v6083_v2 = vld [vmem:[%s13432_s5 + $0x50] sm:$0xf0] }
  0x1d   :  { %v6086_v3 = vor.u32 %v8163_v0, %v6083_v2  ;;  %v6065_v8 = vld [vmem:[%s13432_s5 + $0x20] sm:$0xf]  ;;  %v8161_v10 = vld [vmem:[%s13432_s5 + $0x2c] sm:$0xf0]  ;;  %v8159_v11 = vld [vmem:[%s13432_s5 + $0x24] sm:$0xf] }
  0x1e   :  { %641 = vmatpush.bf16.msra.mxu0 %v5970_v55  ;;  %654 = vmatpush.bf16.msra.mxu1 %v5974_v57  ;;  %v8144_v55 = vld [vmem:[%s13431_s2 + $0xac] sm:$0xf]  ;;  %v6102_v57 = vor.u32 %v8167_v52, %v6099_v54  ;;  %v6009_v15 = vld [vmem:[%s13431_s2 + $0xa8] sm:$0xf]  ;;  %v8146_v16 = vld [vmem:[%s13431_s2 + $0xb4] sm:$0xf0] }
  0x1f   :  { %v6014_v59 = vor.u32 %v8144_v55, %v6011_v56  ;;  %v6049_v19 = vld [vmem:[%s13432_s5] sm:$0xf]  ;;  %v8157_v21 = vld [vmem:[%s13432_s5 + $0xc] sm:$0xf0]  ;;  %v8155_v22 = vld [vmem:[%s13432_s5 + $0x4] sm:$0xf] }
  0x20   :  { %v6051_v24 = vld [vmem:[%s13432_s5 + $0x10] sm:$0xf0]  ;;  %v5993_v26 = vld [vmem:[%s13431_s2 + $0x88] sm:$0xf]  ;;  %v8142_v27 = vld [vmem:[%s13431_s2 + $0x94] sm:$0xf0] }
  0x21   :  { %v5994_v28 = vor.u32 %v8142_v27, %v5993_v26  ;;  %v5977_v32 = vld [vmem:[%s13431_s2 + $0x68] sm:$0xf]  ;;  %v8134_v35 = vld [vmem:[%s13431_s2 + $0x54] sm:$0xf0]  ;;  %v8132_v36 = vld [vmem:[%s13431_s2 + $0x4c] sm:$0xf] }
  0x22   :  { %642 = vmatpush.bf16.msra.mxu0 %v5954_v61  ;;  %655 = vmatpush.bf16.msra.mxu1 %v5958_v63  ;;  %v6026_v61 = vor.u32 %v8150_v60, %v6025_v58  ;;  %v8165_v63 = vld [vmem:[%s13432_s5 + $0x4c] sm:$0xf0]  ;;  %v5963_v38 = vld [vmem:[%s13431_s2 + $0x58] sm:$0xf0]  ;;  %v5929_v49 = vld [vmem:[%s13431_s2 + $0x8] sm:$0xf] }
  0x23   :  { %v6082_v1 = vor.u32 %v8165_v63, %v6081_v62  ;;  %v5966_v39 = vor.u32 %v8132_v36, %v5963_v38  ;;  %v5947_v44 = vld [vmem:[%s13431_s2 + $0x38] sm:$0xf0]  ;;  %v8126_v50 = vld [vmem:[%s13431_s2 + $0x14] sm:$0xf0]  ;;  %v8124_v52 = vld [vmem:[%s13431_s2 + $0xc] sm:$0xf] }
  0x24   :  { %v5931_v54 = vld [vmem:[%s13431_s2 + $0x18] sm:$0xf0]  ;;  %v6169_v55 = vld [vmem:[%s13432_s5 + $0xe8] sm:$0xf]  ;;  %v8186_v56 = vld [vmem:[%s13432_s5 + $0xf4] sm:$0xf0] }
  0x25   :  { %v5934_v58 = vor.u32 %v8124_v52, %v5931_v54  ;;  %v8184_v60 = vld [vmem:[%s13432_s5 + $0xec] sm:$0xf]  ;;  %v8182_v2 = vld [vmem:[%s13432_s5 + $0xd4] sm:$0xf0] }
  0x26   :  { %643 = vmatpush.bf16.msra.mxu0 %v5938_v4  ;;  %656 = vmatpush.bf16.msra.mxu1 %v5942_v7  ;;  %v8140_v4 = vld [vmem:[%s13431_s2 + $0x8c] sm:$0xf]  ;;  %v5995_v7 = vld [vmem:[%s13431_s2 + $0x98] sm:$0xf0]  ;;  %v8174_v26 = vld [vmem:[%s13432_s5 + $0x94] sm:$0xf0] }
  0x27   :  { %5874 = vmatmul.msk.bf16.gmra.mxu2 %vm98_vm0, %v9137_v51  ;;  %5904 = vmatmul.msk.bf16.gmra.mxu0 %vm98_vm0, %v9027_v6  ;;  %v5998_v9 = vor.u32 %v8140_v4, %v5995_v7  ;;  %v8172_v27 = vld [vmem:[%s13432_s5 + $0x8c] sm:$0xf]  ;;  %v8170_v38 = vld [vmem:[%s13432_s5 + $0x74] sm:$0xf0] }
  0x28   :  { %5878 = vmatmul.msk.bf16.gmra.mxu3 %vm98_vm0, %v9137_v51  ;;  %5908 = vmatmul.msk.bf16.gmra.mxu1 %vm98_vm0, %v9027_v6 }
  0x2a   :  { %644 = vmatpush.bf16.msra.mxu0 %v5922_v12  ;;  %657 = vmatpush.bf16.msra.mxu1 %v5926_v13  ;;  %v6067_v12 = vld [vmem:[%s13432_s5 + $0x30] sm:$0xf0]  ;;  %v6066_v13 = vor.u32 %v8161_v10, %v6065_v8  ;;  %v6155_v8 = vld [vmem:[%s13432_s5 + $0xd8] sm:$0xf0] }
  0x2b   :  { %v6070_v14 = vor.u32 %v8159_v11, %v6067_v12 }
  0x2e   :  { %886 = vmatpush.bf16.msrb.mxu0 %v6162_v18  ;;  %899 = vmatpush.bf16.msrb.mxu1 %v6166_v23  ;;  %v6010_v18 = vor.u32 %v8146_v16, %v6009_v15  ;;  %v6050_v23 = vor.u32 %v8157_v21, %v6049_v19  ;;  %v8178_v15 = vld [vmem:[%s13432_s5 + $0xb4] sm:$0xf0]  ;;  %v8176_v16 = vld [vmem:[%s13432_s5 + $0xac] sm:$0xf]  ;;  %v6139_v19 = vld [vmem:[%s13432_s5 + $0xb8] sm:$0xf0] }
  0x2f   :  { %v6142_v21 = vor.u32 %v8176_v16, %v6139_v19 }
  0x32   :  { %887 = vmatpush.bf16.msrb.mxu0 %v6146_v29  ;;  %900 = vmatpush.bf16.msrb.mxu1 %v6150_v30  ;;  %v8136_v29 = vld [vmem:[%s13431_s2 + $0x6c] sm:$0xf]  ;;  %v5979_v30 = vld [vmem:[%s13431_s2 + $0x78] sm:$0xf0] }
  0x33   :  { %v5982_v31 = vor.u32 %v8136_v29, %v5979_v30 }
  0x36   :  { %888 = vmatpush.bf16.msrb.mxu0 %v6130_v40  ;;  %901 = vmatpush.bf16.msrb.mxu1 %v6134_v42  ;;  %v5945_v40 = vld [vmem:[%s13431_s2 + $0x28] sm:$0xf]  ;;  %v8128_v42 = vld [vmem:[%s13431_s2 + $0x2c] sm:$0xf] }
  0x37   :  { %5879 = vmatmul.msk.bf16.vlgmr.msrb.gmra.mxu2 %vm98_vm0, %v9022_v5  ;;  %5905 = vmatmul.msk.bf16.gmra.mxu0 %vm98_vm0, %v9064_v20  ;;  %v5950_v45 = vor.u32 %v8128_v42, %v5947_v44  ;;  %v6089_v44 = vld [vmem:[%s13432_s5 + $0x48] sm:$0xf] }
  0x38   :  { %5883 = vmatmul.msk.bf16.vlgmr.msrb.gmra.mxu3 %vm98_vm0, %v9022_v5  ;;  %5909 = vmatmul.msk.bf16.gmra.mxu1 %vm98_vm0, %v9064_v20 }
  0x39   :  { %676 = vmatpush.bf16.msrb.mxu3 %v6046_v25  ;;  %663 = vmatpush.bf16.msrb.mxu2 %v6042_v41  ;;  %v6054_v25 = vor.u32 %v8155_v22, %v6051_v24  ;;  %v8130_v41 = vld [vmem:[%s13431_s2 + $0x34] sm:$0xf0] }
  0x3a   :  { %889 = vmatpush.bf16.msrb.mxu0 %v6114_v46  ;;  %902 = vmatpush.bf16.msrb.mxu1 %v6118_v48  ;;  %v5946_v43 = vor.u32 %v8130_v41, %v5945_v40  ;;  %v9410_v46 = vld [vmem:[%s13433_s3] sm:$0xf]  ;;  %v6107_v41 = vld [vmem:[%s13432_s5 + $0x78] sm:$0xf0] }
  0x3b   :  { %v9446_v62 = vperm.slane %v9410_v46, 1 }
  0x3d   :  { %677 = vmatpush.bf16.msrb.mxu3 %v6030_v34  ;;  %664 = vmatpush.bf16.msrb.mxu2 %v6026_v61  ;;  %v5961_v34 = vld [vmem:[%s13431_s2 + $0x48] sm:$0xf]  ;;  %v6171_v61 = vld [vmem:[%s13432_s5 + $0xf8] sm:$0xf0] }
  0x3e   :  { %890 = vmatpush.bf16.msrb.mxu0 %v6098_v53  ;;  %903 = vmatpush.bf16.msrb.mxu1 %v6102_v57  ;;  %v5962_v37 = vor.u32 %v8134_v35, %v5961_v34  ;;  %v5930_v53 = vor.u32 %v8126_v50, %v5929_v49  ;;  %v9435_v57 = vperm.slane %v9410_v46, 0  ;;  %v6174_v63 = vor.u32 %v8184_v60, %v6171_v61  ;;  %v8162_v60 = vld [vmem:[%s13432_s5 + $0x34] sm:$0xf0]  ;;  %v8160_v61 = vld [vmem:[%s13432_s5 + $0x2c] sm:$0xf] }
  0x41   :  { %678 = vmatpush.bf16.msrb.mxu3 %v6014_v59  ;;  %665 = vmatpush.bf16.msrb.mxu2 %v6010_v18  ;;  %v6170_v59 = vor.u32 %v8186_v56, %v6169_v55 }
  0x42   :  { %891 = vmatpush.bf16.msrb.mxu0 %v6082_v1  ;;  %904 = vmatpush.bf16.msrb.mxu1 %v6086_v3  ;;  %v6153_v1 = vld [vmem:[%s13432_s5 + $0xc8] sm:$0xf]  ;;  %v8180_v3 = vld [vmem:[%s13432_s5 + $0xcc] sm:$0xf] }
  0x43   :  { %v6154_v7 = vor.u32 %v8182_v2, %v6153_v1  ;;  %v6158_v11 = vor.u32 %v8180_v3, %v6155_v8  ;;  %v6057_v3 = vld [vmem:[%s13432_s5 + $0x8] sm:$0xf] }
  0x45   :  { %679 = vmatpush.bf16.msrb.mxu3 %v5998_v9  ;;  %666 = vmatpush.bf16.msrb.mxu2 %v5994_v28 }
  0x46   :  { %892 = vmatpush.bf16.msrb.mxu0 %v6066_v13  ;;  %905 = vmatpush.bf16.msrb.mxu1 %v6070_v14  ;;  %v9475_v13 = vld [vmem:[%s13434_s6] sm:$0xf]  ;;  %v6137_v14 = vld [vmem:[%s13432_s5 + $0xa8] sm:$0xf] }
  0x47   :  { %5880 = vmatmul.msk.bf16.gmra.mxu2 %vm98_vm0, %v9027_v6  ;;  %5906 = vmatmul.msk.bf16.gmra.mxu0 %vm98_vm0, %v9137_v51  ;;  %v6138_v18 = vor.u32 %v8178_v15, %v6137_v14  ;;  %v9490_v22 = vperm.slane %v9475_v13, 0  ;;  %v6059_v14 = vld [vmem:[%s13432_s5 + $0x18] sm:$0xf0] }
  0x48   :  { %5884 = vmatmul.msk.bf16.gmra.mxu3 %vm98_vm0, %v9027_v6  ;;  %5910 = vmatmul.msk.bf16.gmra.mxu1 %vm98_vm0, %v9137_v51 }
  0x49   :  { %680 = vmatpush.bf16.msrb.mxu3 %v5982_v31  ;;  %v6123_v31 = vld [vmem:[%s13432_s5 + $0x98] sm:$0xf0] }
  0x4a   :  { %893 = vmatpush.bf16.msrb.mxu0 %v6050_v23  ;;  %906 = vmatpush.bf16.msrb.mxu1 %v6054_v25  ;;  %v9493_v23 = vperm.slane %v9475_v13, 1  ;;  %v6121_v25 = vld [vmem:[%s13432_s5 + $0x88] sm:$0xf] }
  0x4b   :  { %v6122_v30 = vor.u32 %v8174_v26, %v6121_v25 }
  0x4d   :  { %681 = vmatpush.bf16.msrb.mxu3 %v5966_v39  ;;  %v8168_v39 = vld [vmem:[%s13432_s5 + $0x6c] sm:$0xf] }
  0x4e   :  { %v6110_v42 = vor.u32 %v8168_v39, %v6107_v41 }
  0x51   :  { %682 = vmatpush.bf16.msrb.mxu3 %v5950_v45  ;;  %v8166_v45 = vld [vmem:[%s13432_s5 + $0x54] sm:$0xf0] }
  0x52   :  { %v6090_v52 = vor.u32 %v8166_v45, %v6089_v44 }
  0x55   :  { %683 = vmatpush.bf16.msrb.mxu3 %v5934_v58 }
  0x57   :  { %5881 = vmatmul.msk.bf16.gmra.mxu2 %vm98_vm0, %v9064_v20  ;;  %645 = vmatmul.bf16.vlgmr.msra.gmra.mxu0 %v8951_v17 }
  0x58   :  { %5885 = vmatmul.msk.bf16.gmra.mxu3 %vm98_vm0, %v9064_v20  ;;  %658 = vmatmul.bf16.vlgmr.msra.gmra.mxu1 %v8951_v17 }
  0x67   :  { %5882 = vmatmul.msk.bf16.gmra.mxu2 %vm98_vm0, %v9137_v51  ;;  %894 = vmatmul.bf16.vlgmr.msrb.gmra.mxu0 %v8951_v17 }
  0x68   :  { %5886 = vmatmul.msk.bf16.gmra.mxu3 %vm98_vm0, %v9137_v51  ;;  %907 = vmatmul.bf16.vlgmr.msrb.gmra.mxu1 %v8951_v17 }
  0x77   :  { %5911 = vmatmul.msk.bf16.vlgmr.msra.gmra.mxu2 %vm98_vm0, %v9022_v5 }
  0x78   :  { %5915 = vmatmul.msk.bf16.vlgmr.msra.gmra.mxu3 %vm98_vm0, %v9022_v5  ;;  %v8138_v5 = vld [vmem:[%s13431_s2 + $0x74] sm:$0xf0] }
  0x79   :  { %v5978_v33 = vor.u32 %v8138_v5, %v5977_v32  ;;  %925 = vmatpush.bf16.msra.mxu3 %v6174_v63 }
  0x7b   :  { %667 = vmatpush.bf16.msrb.mxu2 %v5978_v33  ;;  %v6126_v33 = vor.u32 %v8172_v27, %v6123_v31 }
  0x7d   :  { %926 = vmatpush.bf16.msra.mxu3 %v6158_v11 }
  0x7f   :  { %668 = vmatpush.bf16.msrb.mxu2 %v5962_v37  ;;  %v6105_v37 = vld [vmem:[%s13432_s5 + $0x68] sm:$0xf] }
  0x80   :  { %v6106_v40 = vor.u32 %v8170_v38, %v6105_v37 }
  0x81   :  { %927 = vmatpush.bf16.msra.mxu3 %v6142_v21 }
  0x83   :  { %669 = vmatpush.bf16.msrb.mxu2 %v5946_v43 }
  0x84   :  { %v9412_v47 = vpop.f32.mrf.mxu0 }
  0x85   :  { %v9414_v48 = vpop.f32.mrf.mxu1  ;;  %928 = vmatpush.bf16.msra.mxu3 %v6126_v33 }
  0x87   :  { %5912 = vmatmul.msk.bf16.gmra.mxu2 %vm98_vm0, %v9027_v6 }
  0x88   :  { %5916 = vmatmul.msk.bf16.gmra.mxu3 %vm98_vm0, %v9027_v6  ;;  %670 = vmatpush.bf16.msrb.mxu2 %v5930_v53  ;;  %v6091_v53 = vld [vmem:[%s13432_s5 + $0x58] sm:$0xf0] }
  0x89   :  { %929 = vmatpush.bf16.msra.mxu3 %v6110_v42 }
  0x8a   :  { %v125_v0 = vpop.f32.mrf.mxu2 }
  0x8b   :  { %v9460_v6 = vadd.f32 %v125_v0, %v9435_v57  ;;  %v154_v4 = vpop.f32.mrf.mxu3  ;;  %v6075_v0 = vld [vmem:[%s13432_s5 + $0x38] sm:$0xf0] }
  0x8c   :  { %912 = vmatpush.bf16.msra.mxu2 %v6170_v59  ;;  %v9466_v9 = vadd.f32 %v154_v4, %v9446_v62  ;;  %v9468_v10 = vpop.f32.mrf.mxu0  ;;  %v6073_v59 = vld [vmem:[%s13432_s5 + $0x28] sm:$0xf]  ;;  %v6078_v1 = vor.u32 %v8160_v61, %v6075_v0  ;;  %v8158_v4 = vld [vmem:[%s13432_s5 + $0x14] sm:$0xf0] }
  0x8d   :  { %v9470_v12 = vpop.f32.mrf.mxu1  ;;  %v6074_v63 = vor.u32 %v8162_v60, %v6073_v59  ;;  %v6058_v11 = vor.u32 %v8158_v4, %v6057_v3 }
  0x90   :  { %913 = vmatpush.bf16.msra.mxu2 %v6154_v7  ;;  %v8156_v7 = vld [vmem:[%s13432_s5 + $0xc] sm:$0xf] }
  0x91   :  { %v6062_v16 = vor.u32 %v8156_v7, %v6059_v14 }
  0x92   :  { %v127_v24 = vpop.f32.mrf.mxu2 }
  0x93   :  { %v9505_v28 = vadd.f32 %v127_v24, %v9435_v57  ;;  %v156_v29 = vpop.f32.mrf.mxu3 }
  0x94   :  { %914 = vmatpush.bf16.msra.mxu2 %v6138_v18  ;;  %v9511_v32 = vadd.f32 %v156_v29, %v9446_v62  ;;  %v302_v5 = vpop.f32.mrf.mxu0 }
  0x95   :  { %v9514_v34 = vadd.f32 %v302_v5, %v9490_v22  ;;  %v331_v35 = vpop.f32.mrf.mxu1 }
  0x96   :  { %v9517_v36 = vadd.f32 %v331_v35, %v9493_v23 }
  0x97   :  { %13439 = vst [vmem:[#allocation6_spill] sm:$0xff] %v9514_v34  ;;  %5913 = vmatmul.msk.bf16.gmra.mxu2 %vm98_vm0, %v9064_v20 }
  0x98   :  { %915 = vmatpush.bf16.msra.mxu2 %v6122_v30  ;;  %13440 = vst [vmem:[#allocation7_spill] sm:$0xff] %v9517_v36  ;;  %5917 = vmatmul.msk.bf16.gmra.mxu3 %vm98_vm0, %v9064_v20  ;;  %v8164_v20 = vld [vmem:[%s13432_s5 + $0x4c] sm:$0xf] }
  0x99   :  { %v6094_v56 = vor.u32 %v8164_v20, %v6091_v53  ;;  %v9638_v20 = vperm.slane %v9410_v46, 2  ;;  %v9641_v53 = vperm.slane %v9410_v46, 3 }
  0x9a   :  { %v130_v43 = vpop.f32.mrf.mxu2 }
  0x9b   :  { %v9542_v49 = vadd.f32 %v130_v43, %v9435_v57  ;;  %v159_v50 = vpop.f32.mrf.mxu3  ;;  %930 = vmatpush.bf16.msra.mxu3 %v6094_v56 }
  0x9c   :  { %916 = vmatpush.bf16.msra.mxu2 %v6106_v40  ;;  %v9551_v54 = vadd.f32 %v159_v50, %v9446_v62  ;;  %v9553_v55 = vpop.f32.mrf.mxu0 }
  0x9d   :  { %13441 = vst [vmem:[#allocation8_spill] sm:$0xff] %v9542_v49  ;;  %v9555_v58 = vpop.f32.mrf.mxu1 }
  0x9e   :  { %13442 = vst [vmem:[#allocation9_spill] sm:$0xff] %v9551_v54 }
  0x9f   :  { %13443 = vst [vmem:[#allocation10_spill] sm:$0xff] %v9553_v55  ;;  %931 = vmatpush.bf16.msra.mxu3 %v6078_v1  ;;  %v150_v1 = vadd.f32 %v9414_v48, %v9446_v62  ;;  %v6263_v55 = vld [vmem:[%s13431_s2 + $0xa0] sm:$0xf] }
  0xa0   :  { %13444 = vst [vmem:[#allocation11_spill] sm:$0xff] %v9555_v58  ;;  %917 = vmatpush.bf16.msra.mxu2 %v6090_v52 }
  0xa2   :  { %v9569_v2 = vpop.f32.mrf.mxu2 }
  0xa3   :  { %13445 = vst [vmem:[#allocation12_spill] sm:$0xff] %v9569_v2  ;;  %v9580_v8 = vpop.f32.mrf.mxu3  ;;  %932 = vmatpush.bf16.msra.mxu3 %v6062_v16 }
  0xa4   :  { %918 = vmatpush.bf16.msra.mxu2 %v6074_v63  ;;  %13446 = vst [vmem:[#allocation13_spill] sm:$0xff] %v9580_v8  ;;  %v307_v15 = vpop.f32.mrf.mxu0 }
  0xa5   :  { %v9586_v18 = vadd.f32 %v307_v15, %v9490_v22  ;;  %v336_v19 = vpop.f32.mrf.mxu1 }
  0xa6   :  { %v9589_v21 = vadd.f32 %v336_v19, %v9493_v23 }
  0xa7   :  { %13447 = vst [vmem:[#allocation14_spill] sm:$0xff] %v9586_v18  ;;  %5914 = vmatmul.msk.bf16.gmra.mxu2 %vm98_vm0, %v9137_v51 }
  0xa8   :  { %919 = vmatpush.bf16.msra.mxu2 %v6058_v11  ;;  %13448 = vst [vmem:[#allocation15_spill] sm:$0xff] %v9589_v21  ;;  %5918 = vmatmul.msk.bf16.gmra.mxu3 %vm98_vm0, %v9137_v51 }
  0xaa   :  { %v135_v24 = vpop.f32.mrf.mxu2 }
  0xab   :  { %v9596_v25 = vadd.f32 %v135_v24, %v9435_v57  ;;  %v164_v26 = vpop.f32.mrf.mxu3 }
  0xac   :  { %v9599_v27 = vadd.f32 %v164_v26, %v9446_v62  ;;  %v9601_v29 = vpop.f32.mrf.mxu0 }
  0xad   :  { %13449 = vst [vmem:[#allocation16_spill] sm:$0xff] %v9596_v25  ;;  %v9603_v30 = vpop.f32.mrf.mxu1 }
  0xae   :  { %13450 = vst [vmem:[#allocation17_spill] sm:$0xff] %v9599_v27 }
  0xaf   :  { %13451 = vst [vmem:[#allocation18_spill] sm:$0xff] %v9601_v29 }
  0xb0   :  { %13452 = vst [vmem:[#allocation19_spill] sm:$0xff] %v9603_v30 }
  0xb2   :  { %v9605_v31 = vpop.f32.mrf.mxu2 }
  0xb3   :  { %13453 = vst [vmem:[#allocation20_spill] sm:$0xff] %v9605_v31  ;;  %v9607_v5 = vpop.f32.mrf.mxu3 }
  0xb4   :  { %13454 = vst [vmem:[#allocation21_spill] sm:$0xff] %v9607_v5  ;;  %v312_v33 = vpop.f32.mrf.mxu0 }
  0xb5   :  { %v9610_v35 = vadd.f32 %v312_v33, %v9490_v22  ;;  %v341_v51 = vpop.f32.mrf.mxu1 }
  0xb6   :  { %v9613_v37 = vadd.f32 %v341_v51, %v9493_v23 }
  0xb7   :  { %671 = vmatmul.bf16.vlgmr.msrb.gmra.mxu2 %v8951_v17 }
  0xb8   :  { %684 = vmatmul.bf16.vlgmr.msrb.gmra.mxu3 %v8951_v17 }
  0xba   :  { %v9617_v38 = vpop.f32.mrf.mxu2 }
  0xbb   :  { %v9619_v39 = vpop.f32.mrf.mxu3 }
  0xbc   :  { %v9621_v40 = vpop.f32.mrf.mxu0 }
  0xbd   :  { %v9623_v41 = vpop.f32.mrf.mxu1 }
  0xc2   :  { %v9625_v42 = vpop.f32.mrf.mxu2 }
  0xc3   :  { %v9627_v43 = vpop.f32.mrf.mxu3 }
  0xc4   :  { %v317_v44 = vpop.f32.mrf.mxu0 }
  0xc5   :  { %v9630_v45 = vadd.f32 %v317_v44, %v9490_v22  ;;  %v346_v50 = vpop.f32.mrf.mxu1 }
  0xc6   :  { %v9633_v52 = vadd.f32 %v346_v50, %v9493_v23 }
  0xc7   :  { %920 = vmatmul.bf16.vlgmr.msra.gmra.mxu2 %v8951_v17 }
  0xc8   :  { %933 = vmatmul.bf16.vlgmr.msra.gmra.mxu3 %v8951_v17  ;;  %v121_v17 = vadd.f32 %v9412_v47, %v9435_v57 }
  0xca   :  { %v183_v56 = vpop.f32.mrf.mxu2 }
  0xcb   :  { %v9644_v59 = vadd.f32 %v183_v56, %v9638_v20  ;;  %v212_v60 = vpop.f32.mrf.mxu3 }
  0xcc   :  { %v9647_v61 = vadd.f32 %v212_v60, %v9641_v53  ;;  %v319_v63 = vpop.f32.mrf.mxu0 }
  0xcd   :  { %v9649_v0 = vpop.f32.mrf.mxu1 }
  0xd2   :  { %v9655_v3 = vpop.f32.mrf.mxu2 }
  0xd3   :  { %v9657_v46 = vpop.f32.mrf.mxu3 }
  0xd4   :  { %v646_v4 = vpop.f32.mrf.mxu0 }
  0xd5   :  { %v647_v7 = vadd.f32 %v646_v4, %v121_v17  ;;  %v659_v11 = vpop.f32.mrf.mxu1 }
  0xd6   :  { %v660_v14 = vadd.f32 %v659_v11, %v150_v1  ;;  %v9682_v11 = vperm.slane %v9475_v13, 2 }
  0xd7   :  { %v6175_v5 = vmul.f32 -1.442695, %v647_v7  ;;  %v8215_v7 = vld [vmem:[%s13431_s2 + $0xe4] sm:$0xf] }
  0xd8   :  { %v6176_v31 = vmul.f32 -1.442695, %v660_v14 }
  0xd9   :  { %8663 = vpow2.f32 %v6175_v5  ;;  %v6279_v5 = vld [vmem:[%s13431_s2 + $0xc0] sm:$0xf] }
  0xda   :  { %v188_v15 = vpop.f32.mrf.mxu2  ;;  %8665 = vpow2.f32 %v6176_v31  ;;  %v8211_v31 = vld [vmem:[%s13431_s2 + $0xc4] sm:$0xf] }
  0xdb   :  { %v9660_v16 = vadd.f32 %v188_v15, %v9638_v20  ;;  %v217_v19 = vpop.f32.mrf.mxu3  ;;  %v9685_v15 = vperm.slane %v9475_v13, 3 }
  0xdc   :  { %v9663_v24 = vadd.f32 %v217_v19, %v9641_v53  ;;  %v648_v47 = vpop.f32.mrf.mxu0 }
  0xdd   :  { %13455 = vst [vmem:[#allocation22_spill] sm:$0xff] %v9660_v16  ;;  %v661_v26 = vpop.f32.mrf.mxu1 }
  0xde   :  { %13456 = vst [vmem:[#allocation23_spill] sm:$0xff] %v9663_v24 }
  0xe2   :  { %v9665_v33 = vpop.f32.mrf.mxu2 }
  0xe3   :  { %13457 = vst [vmem:[#allocation24_spill] sm:$0xff] %v9665_v33  ;;  %v9667_v48 = vpop.f32.mrf.mxu3 }
  0xe4   :  { %13458 = vst [vmem:[#allocation25_spill] sm:$0xff] %v9667_v48  ;;  %v895_v1 = vpop.f32.mrf.mxu0 }
  0xe5   :  { %v9679_v4 = vpop.f32.mrf.mxu1 }
  0xea   :  { %v193_v51 = vpop.f32.mrf.mxu2 }
  0xeb   :  { %v9670_v44 = vadd.f32 %v193_v51, %v9638_v20  ;;  %v222_v50 = vpop.f32.mrf.mxu3 }
  0xec   :  { %v9673_v56 = vadd.f32 %v222_v50, %v9641_v53  ;;  %v897_v50 = vpop.f32.mrf.mxu0 }
  0xed   :  { %13459 = vst [vmem:[#allocation26_spill] sm:$0xff] %v9670_v44  ;;  %v910_v36 = vpop.f32.mrf.mxu1 }
  0xee   :  { %13460 = vst [vmem:[#allocation27_spill] sm:$0xff] %v9673_v56  ;;  %v8217_v36 = vld [vmem:[%s13431_s2 + $0xec] sm:$0xf0] }
  0xf2   :  { %v9675_v60 = vpop.f32.mrf.mxu2 }
  0xf3   :  { %13461 = vst [vmem:[#allocation28_spill] sm:$0xff] %v9675_v60  ;;  %v9677_v17 = vpop.f32.mrf.mxu3 }
  0xf4   :  { %13462 = vst [vmem:[#allocation29_spill] sm:$0xff] %v9677_v17 }
  0xfa   :  { %v360_v19 = vpop.f32.mrf.mxu2 }
  0xfb   :  { %v9688_v47 = vadd.f32 %v360_v19, %v9682_v11  ;;  %v389_v26 = vpop.f32.mrf.mxu3 }
  0xfc   :  { %v9691_v51 = vadd.f32 %v389_v26, %v9685_v15  ;;  %v6295_v26 = vld [vmem:[%s13431_s2 + $0xe0] sm:$0xf] }
  0xfd   :  { %13463 = vst [vmem:[#allocation30_spill] sm:$0xff] %v9688_v47  ;;  %v6296_v14 = vor.u32 %v8217_v36, %v6295_v26  ;;  %v8218_v47 = vld [vmem:[%s13431_s2 + $0xf4] sm:$0xf0]  ;;  %v6305_v36 = vld [vmem:[%s13431_s2 + $0xf8] sm:$0xf0] }
  0xfe   :  { %13464 = vst [vmem:[#allocation31_spill] sm:$0xff] %v9691_v51  ;;  %v8216_v51 = vld [vmem:[%s13431_s2 + $0xec] sm:$0xf] }
  0xff   :  { %1266 = vmatpush.bf16.msra.mxu0 %v6296_v14  ;;  %v8214_v14 = vld [vmem:[%s13431_s2 + $0xd4] sm:$0xf0] }
 0x102   :  { %v9693_v34 = vpop.f32.mrf.mxu2 }
 0x103   :  { %13465 = vst [vmem:[#allocation32_spill] sm:$0xff] %v9693_v34  ;;  %v9695_v60 = vpop.f32.mrf.mxu3  ;;  %v6308_v34 = vor.u32 %v8216_v51, %v6305_v36 }
 0x104   :  { %13466 = vst [vmem:[#allocation33_spill] sm:$0xff] %v9695_v60 }
 0x105   :  { %1305 = vmatpush.bf16.msrb.mxu3 %v6308_v34  ;;  %v6287_v34 = vld [vmem:[%s13431_s2 + $0xc8] sm:$0xf] }
 0x106   :  { %v6288_v36 = vor.u32 %v8214_v14, %v6287_v34 }
 0x10a   :  { %v365_v17 = vpop.f32.mrf.mxu2 }
 0x10b   :  { %v9698_v13 = vadd.f32 %v365_v17, %v9682_v11  ;;  %v394_v58 = vpop.f32.mrf.mxu3  ;;  %v6297_v17 = vld [vmem:[%s13431_s2 + $0xf0] sm:$0xf0] }
 0x10c   :  { %v9701_v19 = vadd.f32 %v394_v58, %v9685_v15  ;;  %v6303_v58 = vld [vmem:[%s13431_s2 + $0xe8] sm:$0xf]  ;;  %v6300_v50 = vor.u32 %v8215_v7, %v6297_v17  ;;  %v320_v7 = vadd.f32 %v319_v63, %v9490_v22  ;;  %v6281_v63 = vld [vmem:[%s13431_s2 + $0xd0] sm:$0xf0] }
 0x10d   :  { %13467 = vst [vmem:[#allocation34_spill] sm:$0xff] %v9698_v13  ;;  %v6304_v26 = vor.u32 %v8218_v47, %v6303_v58  ;;  %v8213_v47 = vld [vmem:[%s13431_s2 + $0xcc] sm:$0xf0]  ;;  %v8664_v58 = vpop.eup %8663 }
 0x10e   :  { %13468 = vst [vmem:[#allocation35_spill] sm:$0xff] %v9701_v19  ;;  %1279 = vmatpush.bf16.msra.mxu1 %v6300_v50  ;;  %v6280_v51 = vor.u32 %v8213_v47, %v6279_v5  ;;  %v349_v50 = vadd.f32 %v9649_v0, %v9493_v23  ;;  %v8212_v5 = vld [vmem:[%s13431_s2 + $0xcc] sm:$0xf]  ;;  %v6289_v47 = vld [vmem:[%s13431_s2 + $0xd8] sm:$0xf0]  ;;  %v8666_v44 = vpop.eup %8665  ;;  %v896_v56 = vadd.f32 %v895_v1, %v320_v7 }
 0x10f   :  { %1292 = vmatpush.bf16.msrb.mxu2 %v6304_v26  ;;  %v6284_v26 = vor.u32 %v8211_v31, %v6281_v63  ;;  %v6292_v27 = vor.u32 %v8212_v5, %v6289_v47  ;;  %v8209_v0 = vld [vmem:[%s13431_s2 + $0xac] sm:$0xf0]  ;;  %v8207_v31 = vld [vmem:[%s13431_s2 + $0xa4] sm:$0xf]  ;;  %v6265_v63 = vld [vmem:[%s13431_s2 + $0xb0] sm:$0xf0] }
 0x110   :  { %1267 = vmatpush.bf16.msra.mxu0 %v6280_v51  ;;  %v6264_v34 = vor.u32 %v8209_v0, %v6263_v55  ;;  %v6268_v14 = vor.u32 %v8207_v31, %v6265_v63  ;;  %v6271_v1 = vld [vmem:[%s13431_s2 + $0xa8] sm:$0xf]  ;;  %v8210_v7 = vld [vmem:[%s13431_s2 + $0xb4] sm:$0xf0]  ;;  %v8208_v51 = vld [vmem:[%s13431_s2 + $0xac] sm:$0xf] }
 0x111   :  { %v9779_v5 = vadd.f32 1.0, %v8664_v58  ;;  %1306 = vmatpush.bf16.msrb.mxu3 %v6292_v27  ;;  %v6272_v47 = vor.u32 %v8210_v7, %v6271_v1  ;;  %v6273_v55 = vld [vmem:[%s13431_s2 + $0xb8] sm:$0xf0]  ;;  %v6178_v31 = vmul.f32 -1.442695, %v896_v56 }
 0x112   :  { %v9728_v17 = vpop.f32.mrf.mxu2  ;;  %1280 = vmatpush.bf16.msra.mxu1 %v6284_v26  ;;  %v9784_v26 = vadd.f32 1.0, %v8666_v44  ;;  %v6276_v0 = vor.u32 %v8208_v51, %v6273_v55  ;;  %v6247_v27 = vld [vmem:[%s13431_s2 + $0x80] sm:$0xf]  ;;  %v8205_v44 = vld [vmem:[%s13431_s2 + $0x8c] sm:$0xf0] }
 0x113   :  { %13469 = vst [vmem:[#allocation36_spill] sm:$0xff] %v9728_v17  ;;  %v9730_v60 = vpop.f32.mrf.mxu3  ;;  %1293 = vmatpush.bf16.msrb.mxu2 %v6288_v36  ;;  %v909_v36 = vadd.f32 %v9679_v4, %v349_v50  ;;  %v8203_v56 = vld [vmem:[%s13431_s2 + $0x84] sm:$0xf]  ;;  %8667 = vrcp.f32 %v9779_v5  ;;  %v6248_v58 = vor.u32 %v8205_v44, %v6247_v27  ;;  %v6249_v50 = vld [vmem:[%s13431_s2 + $0x90] sm:$0xf0]  ;;  %vm947_vm5 = vweird.f32 %v9779_v5 }
 0x114   :  { %13470 = vst [vmem:[#allocation37_spill] sm:$0xff] %v9730_v60  ;;  %1268 = vmatpush.bf16.msra.mxu0 %v6264_v34  ;;  %v6255_v34 = vld [vmem:[%s13431_s2 + $0x88] sm:$0xf]  ;;  %8669 = vrcp.f32 %v9784_v26  ;;  %v6252_v7 = vor.u32 %v8203_v56, %v6249_v50  ;;  %v8204_v51 = vld [vmem:[%s13431_s2 + $0x8c] sm:$0xf]  ;;  %vm966_vm1 = vweird.f32 %v9784_v26 }
 0x115   :  { %1307 = vmatpush.bf16.msrb.mxu3 %v6276_v0  ;;  %v6179_v1 = vmul.f32 -1.442695, %v909_v36  ;;  %v6231_v0 = vld [vmem:[%s13431_s2 + $0x60] sm:$0xf]  ;;  %v8201_v36 = vld [vmem:[%s13431_s2 + $0x6c] sm:$0xf0]  ;;  %8671 = vpow2.f32 %v6178_v31 }
 0x116   :  { %1281 = vmatpush.bf16.msra.mxu1 %v6268_v14  ;;  %v8206_v14 = vld [vmem:[%s13431_s2 + $0x94] sm:$0xf0]  ;;  %v6232_v27 = vor.u32 %v8201_v36, %v6231_v0  ;;  %v6233_v44 = vld [vmem:[%s13431_s2 + $0x70] sm:$0xf0]  ;;  %v6239_v56 = vld [vmem:[%s13431_s2 + $0x68] sm:$0xf] }
 0x117   :  { %1294 = vmatpush.bf16.msrb.mxu2 %v6272_v47  ;;  %v6257_v47 = vld [vmem:[%s13431_s2 + $0x98] sm:$0xf0]  ;;  %8673 = vpow2.f32 %v6179_v1  ;;  %v8200_v31 = vld [vmem:[%s13431_s2 + $0x6c] sm:$0xf]  ;;  %v6215_v1 = vld [vmem:[%s13431_s2 + $0x40] sm:$0xf] }
 0x118   :  { %1269 = vmatpush.bf16.msra.mxu0 %v6248_v58  ;;  %v6260_v55 = vor.u32 %v8204_v51, %v6257_v47  ;;  %v8202_v58 = vld [vmem:[%s13431_s2 + $0x74] sm:$0xf0]  ;;  %v8197_v0 = vld [vmem:[%s13431_s2 + $0x4c] sm:$0xf0]  ;;  %v8195_v36 = vld [vmem:[%s13431_s2 + $0x44] sm:$0xf] }
 0x119   :  { %v8239_v17 = vld [vmem:[%s13432_s5 + $0xa4] sm:$0xf]  ;;  %v13474_v16 = vand.u32 2147483647, %v9784_v26 }
 0x11a   :  { %v370_v63 = vpop.f32.mrf.mxu2  ;;  %1282 = vmatpush.bf16.msra.mxu1 %v6252_v7  ;;  %1308 = vmatpush.bf16.msrb.mxu3 %v6260_v55  ;;  %v9843_v7 = vpop.eup %8667 }
 0x11b   :  { %v9788_v25 = vadd.f32 %v370_v63, %v9682_v11  ;;  %v399_v13 = vpop.f32.mrf.mxu3  ;;  %v8199_v63 = vld [vmem:[%s13431_s2 + $0x64] sm:$0xf]  ;;  %v9847_v47 = vpop.eup %8669  ;;  %vm10041_vm4 = vcmp.eq.f32.partialorder %v13474_v16, 8.507059e+37  ;;  %vm948_vm6 = vweird.f32 %v9843_v7 }
 0x11c   :  { %v9801_v4 = vadd.f32 %v399_v13, %v9685_v15  ;;  %v6256_v13 = vor.u32 %v8206_v14, %v6255_v34  ;;  %v6236_v50 = vor.u32 %v8199_v63, %v6233_v44  ;;  %v6240_v34 = vor.u32 %v8202_v58, %v6239_v56  ;;  %v6241_v14 = vld [vmem:[%s13431_s2 + $0x78] sm:$0xf0]  ;;  %1270 = vmatpush.bf16.msra.mxu0 %v6232_v27  ;;  %v6217_v27 = vld [vmem:[%s13431_s2 + $0x50] sm:$0xf0]  ;;  %v6223_v44 = vld [vmem:[%s13431_s2 + $0x48] sm:$0xf] }
 0x11d   :  { %v6244_v51 = vor.u32 %v8200_v31, %v6241_v14  ;;  %v6216_v63 = vor.u32 %v8197_v0, %v6215_v1  ;;  %v8198_v56 = vld [vmem:[%s13431_s2 + $0x54] sm:$0xf0]  ;;  %v9871_v58 = vmul.f32 %v9843_v7, %v9779_v5  ;;  %v8196_v31 = vld [vmem:[%s13431_s2 + $0x4c] sm:$0xf]  ;;  %v6225_v14 = vld [vmem:[%s13431_s2 + $0x58] sm:$0xf0]  ;;  %v962_v1 = vmul.f32 %v9847_v47, %v9784_v26 }
 0x11e   :  { %1295 = vmatpush.bf16.msrb.mxu2 %v6256_v13  ;;  %1283 = vmatpush.bf16.msra.mxu1 %v6236_v50  ;;  %v6220_v50 = vor.u32 %v8195_v36, %v6217_v27  ;;  %v6228_v21 = vor.u32 %v8196_v31, %v6225_v14  ;;  %v6199_v27 = vld [vmem:[%s13431_s2 + $0x20] sm:$0xf]  ;;  %vm967_vm2 = vweird.f32 %v9847_v47  ;;  %v8235_v16 = vld [vmem:[%s13432_s5 + $0x84] sm:$0xf]  ;;  %vm10101_vm8 = vmor %vm947_vm5, %vm948_vm6 }
 0x11f   :  { %1309 = vmatpush.bf16.msrb.mxu3 %v6244_v51  ;;  %v8672_v51 = vpop.eup %8671  ;;  %vm10004_vm3 = vmor %vm966_vm1, %vm967_vm2 }
 0x120   :  { %1271 = vmatpush.bf16.msra.mxu0 %v6216_v63  ;;  %v8674_v36 = vpop.eup %8673  ;;  %v6201_v63 = vld [vmem:[%s13431_s2 + $0x30] sm:$0xf0]  ;;  %v9909_v33 = vadd.f32 1.0, %v8672_v51  ;;  %v8189_v51 = vld [vmem:[%s13431_s2 + $0xc] sm:$0xf0] }
 0x121   :  { %v9911_v48 = vadd.f32 1.0, %v8674_v36  ;;  %v8190_v36 = vld [vmem:[%s13431_s2 + $0x14] sm:$0xf0] }
 0x122   :  { %v9845_v13 = vpop.f32.mrf.mxu2  ;;  %1296 = vmatpush.bf16.msrb.mxu2 %v6240_v34  ;;  %v6224_v34 = vor.u32 %v8198_v56, %v6223_v44  ;;  %1284 = vmatpush.bf16.msra.mxu1 %v6220_v50  ;;  %v8193_v44 = vld [vmem:[%s13431_s2 + $0x2c] sm:$0xf0]  ;;  %v8191_v56 = vld [vmem:[%s13431_s2 + $0x24] sm:$0xf]  ;;  %v6207_v50 = vld [vmem:[%s13431_s2 + $0x28] sm:$0xf]  ;;  %8675 = vrcp.f32 %v9909_v33  ;;  %vm1010_vm11 = vweird.f32 %v9909_v33 }
 0x123   :  { %v9849_v55 = vpop.f32.mrf.mxu3  ;;  %1310 = vmatpush.bf16.msrb.mxu3 %v6228_v21  ;;  %v6200_v0 = vor.u32 %v8193_v44, %v6199_v27  ;;  %v6204_v19 = vor.u32 %v8191_v56, %v6201_v63  ;;  %v8192_v21 = vld [vmem:[%s13431_s2 + $0x2c] sm:$0xf]  ;;  %v6209_v27 = vld [vmem:[%s13431_s2 + $0x38] sm:$0xf0]  ;;  %v963_v44 = vsub.f32 1.0, %v962_v1  ;;  %8677 = vrcp.f32 %v9911_v48 }
 0x124   :  { %v6212_v31 = vor.u32 %v8192_v21, %v6209_v27  ;;  %v6183_v63 = vld [vmem:[%s13431_s2] sm:$0xf]  ;;  %v8187_v1 = vld [vmem:[%s13431_s2 + $0x4] sm:$0xf]  ;;  %v8188_v21 = vld [vmem:[%s13431_s2 + $0xc] sm:$0xf]  ;;  %vm1029_vm9 = vweird.f32 %v9911_v48 }
 0x125   :  { %1272 = vmatpush.bf16.msra.mxu0 %v6200_v0  ;;  %v6423_v27 = vld [vmem:[%s13432_s5 + $0xe0] sm:$0xf] }
 0x126   :  { %1297 = vmatpush.bf16.msrb.mxu2 %v6224_v34  ;;  %v8194_v34 = vld [vmem:[%s13431_s2 + $0x34] sm:$0xf0]  ;;  %1285 = vmatpush.bf16.msra.mxu1 %v6204_v19  ;;  %v6191_v19 = vld [vmem:[%s13431_s2 + $0x8] sm:$0xf] }
 0x127   :  { %v6208_v18 = vor.u32 %v8194_v34, %v6207_v50  ;;  %1311 = vmatpush.bf16.msrb.mxu3 %v6212_v31  ;;  %v6192_v34 = vor.u32 %v8190_v36, %v6191_v19  ;;  %v6193_v31 = vld [vmem:[%s13431_s2 + $0x18] sm:$0xf0] }
 0x12a   :  { %v375_v8 = vpop.f32.mrf.mxu2  ;;  %1298 = vmatpush.bf16.msrb.mxu2 %v6208_v18  ;;  %v6185_v18 = vld [vmem:[%s13431_s2 + $0x10] sm:$0xf0] }
 0x12b   :  { %v9914_v14 = vadd.f32 %v375_v8, %v9682_v11  ;;  %v404_v56 = vpop.f32.mrf.mxu3  ;;  %v6184_v8 = vor.u32 %v8189_v51, %v6183_v63  ;;  %v6188_v50 = vor.u32 %v8187_v1, %v6185_v18  ;;  %v8249_v63 = vld [vmem:[%s13432_s5 + $0xec] sm:$0xf0]  ;;  %v8247_v51 = vld [vmem:[%s13432_s5 + $0xe4] sm:$0xf]  ;;  %v6425_v1 = vld [vmem:[%s13432_s5 + $0xf0] sm:$0xf0]  ;;  %v964_v18 = vmul.f32 %v9847_v47, %v963_v44 }
 0x12c   :  { %v9926_v0 = vadd.f32 %v404_v56, %v9685_v15  ;;  %v6196_v56 = vor.u32 %v8188_v21, %v6193_v31  ;;  %v6424_v19 = vor.u32 %v8249_v63, %v6423_v27  ;;  %v6428_v36 = vor.u32 %v8247_v51, %v6425_v1  ;;  %v8250_v21 = vld [vmem:[%s13432_s5 + $0xf4] sm:$0xf0]  ;;  %v8248_v31 = vld [vmem:[%s13432_s5 + $0xec] sm:$0xf]  ;;  %v8245_v27 = vld [vmem:[%s13432_s5 + $0xcc] sm:$0xf0] }
 0x12d   :  { %1273 = vmatpush.bf16.msra.mxu0 %v6184_v8  ;;  %1286 = vmatpush.bf16.msra.mxu1 %v6188_v50  ;;  %v6431_v8 = vld [vmem:[%s13432_s5 + $0xe8] sm:$0xf]  ;;  %v6433_v50 = vld [vmem:[%s13432_s5 + $0xf8] sm:$0xf0]  ;;  %v6409_v1 = vld [vmem:[%s13432_s5 + $0xd0] sm:$0xf0] }
 0x12e   :  { %1299 = vmatpush.bf16.msrb.mxu2 %v6192_v34  ;;  %1312 = vmatpush.bf16.msrb.mxu3 %v6196_v56  ;;  %v6432_v44 = vor.u32 %v8250_v21, %v6431_v8  ;;  %v6407_v34 = vld [vmem:[%s13432_s5 + $0xc0] sm:$0xf]  ;;  %v6436_v63 = vor.u32 %v8248_v31, %v6433_v50  ;;  %v8243_v56 = vld [vmem:[%s13432_s5 + $0xc4] sm:$0xf]  ;;  %v6415_v8 = vld [vmem:[%s13432_s5 + $0xc8] sm:$0xf] }
 0x12f   :  { %v6408_v51 = vor.u32 %v8245_v27, %v6407_v34  ;;  %v6412_v2 = vor.u32 %v8243_v56, %v6409_v1  ;;  %v6417_v31 = vld [vmem:[%s13432_s5 + $0xd8] sm:$0xf0]  ;;  %v965_v34 = vadd.f32 %v9847_v47, %v964_v18  ;;  %v6391_v1 = vld [vmem:[%s13432_s5 + $0xa0] sm:$0xf]  ;;  %v8241_v18 = vld [vmem:[%s13432_s5 + $0xac] sm:$0xf0] }
 0x130   :  { %v6392_v60 = vor.u32 %v8241_v18, %v6391_v1  ;;  %v6401_v1 = vld [vmem:[%s13432_s5 + $0xb8] sm:$0xf0]  ;;  %v953_v18 = vand.u32 2147483648, %v9779_v5 }
 0x131   :  { %1515 = vmatpush.bf16.msrb.mxu0 %v6424_v19  ;;  %1528 = vmatpush.bf16.msrb.mxu1 %v6428_v36  ;;  %v8246_v19 = vld [vmem:[%s13432_s5 + $0xd4] sm:$0xf0]  ;;  %v8244_v36 = vld [vmem:[%s13432_s5 + $0xcc] sm:$0xf]  ;;  %v969_v29 = vsel %vm10004_vm3, %v9847_v47, %v965_v34  ;;  %v8237_v47 = vld [vmem:[%s13432_s5 + $0x8c] sm:$0xf0]  ;;  %v179_v34 = vadd.f32 %v9617_v38, %v9638_v20 }
 0x132   :  { %v9985_v21 = vpop.f32.mrf.mxu2  ;;  %1541 = vmatpush.bf16.msra.mxu2 %v6432_v44  ;;  %1554 = vmatpush.bf16.msra.mxu3 %v6436_v63  ;;  %v6416_v27 = vor.u32 %v8246_v19, %v6415_v8  ;;  %v6420_v56 = vor.u32 %v8244_v36, %v6417_v31  ;;  %v6393_v63 = vld [vmem:[%s13432_s5 + $0xb0] sm:$0xf0]  ;;  %v6399_v8 = vld [vmem:[%s13432_s5 + $0xa8] sm:$0xf]  ;;  %v8242_v19 = vld [vmem:[%s13432_s5 + $0xb4] sm:$0xf0] }
 0x133   :  { %v9997_v50 = vpop.f32.mrf.mxu3  ;;  %v13473_v36 = vand.u32 2147483648, %v9784_v26  ;;  %v6396_v30 = vor.u32 %v8239_v17, %v6393_v63  ;;  %v13477_v63 = vsub.f32 1.0, %v9871_v58  ;;  %v10057_v26 = vpop.eup %8675  ;;  %v208_v58 = vadd.f32 %v9619_v39, %v9641_v53  ;;  %v8238_v38 = vld [vmem:[%s13432_s5 + $0x94] sm:$0xf0] }
 0x134   :  { %vm1011_vm12 = vweird.f32 %v10057_v26 }
 0x135   :  { %1516 = vmatpush.bf16.msrb.mxu0 %v6408_v51  ;;  %1529 = vmatpush.bf16.msrb.mxu1 %v6412_v2  ;;  %v973_v31 = vor.u32 1.1754944e-38, %v13473_v36  ;;  %v6400_v51 = vor.u32 %v8242_v19, %v6399_v8  ;;  %v8240_v2 = vld [vmem:[%s13432_s5 + $0xac] sm:$0xf]  ;;  %v945_v8 = vmul.f32 %v9843_v7, %v13477_v63  ;;  %v6375_v19 = vld [vmem:[%s13432_s5 + $0x80] sm:$0xf]  ;;  %vm10239_vm14 = vmor %vm1010_vm11, %vm1011_vm12 }
 0x136   :  { %1542 = vmatpush.bf16.msra.mxu2 %v6416_v27  ;;  %1555 = vmatpush.bf16.msra.mxu3 %v6420_v56  ;;  %v6404_v17 = vor.u32 %v8240_v2, %v6401_v1  ;;  %v6376_v44 = vor.u32 %v8237_v47, %v6375_v19  ;;  %v6377_v56 = vld [vmem:[%s13432_s5 + $0x90] sm:$0xf0]  ;;  %v6383_v36 = vld [vmem:[%s13432_s5 + $0x88] sm:$0xf]  ;;  %v10073_v2 = vpop.eup %8677  ;;  %v8236_v63 = vld [vmem:[%s13432_s5 + $0x8c] sm:$0xf] }
 0x137   :  { %v6384_v1 = vor.u32 %v8238_v38, %v6383_v36  ;;  %v6385_v19 = vld [vmem:[%s13432_s5 + $0x98] sm:$0xf0]  ;;  %v946_v49 = vadd.f32 %v9843_v7, %v945_v8  ;;  %v13478_v27 = vand.u32 2147483647, %v9779_v5  ;;  %v6367_v36 = vld [vmem:[%s13432_s5 + $0x68] sm:$0xf]  ;;  %vm1030_vm10 = vweird.f32 %v10073_v2 }
 0x138   :  { %v6388_v54 = vor.u32 %v8236_v63, %v6385_v19  ;;  %vm10214_vm13 = vmor %vm1029_vm9, %vm1030_vm10 }
 0x139   :  { %1517 = vmatpush.bf16.msrb.mxu0 %v6392_v60  ;;  %1530 = vmatpush.bf16.msrb.mxu1 %v6396_v30  ;;  %v974_v30 = vsel %vm10041_vm4, %v973_v31, %v969_v29  ;;  %v6380_v60 = vor.u32 %v8235_v16, %v6377_v56  ;;  %vm10087_vm7 = vcmp.eq.f32.partialorder %v13478_v27, 8.507059e+37  ;;  %v954_v31 = vor.u32 1.1754944e-38, %v953_v18  ;;  %v6359_v18 = vld [vmem:[%s13432_s5 + $0x60] sm:$0xf]  ;;  %v8231_v56 = vld [vmem:[%s13432_s5 + $0x64] sm:$0xf] }
 0x13a   :  { %v672_v39 = vpop.f32.mrf.mxu2  ;;  %1543 = vmatpush.bf16.msra.mxu2 %v6400_v51  ;;  %1556 = vmatpush.bf16.msra.mxu3 %v6404_v17  ;;  %v10093_v16 = vmul.f32 %v10057_v26, %v9909_v33  ;;  %v996_v8 = vmul.f32 0.0, %v974_v30  ;;  %v950_v38 = vsel %vm10101_vm8, %v9843_v7, %v946_v49  ;;  %v8232_v30 = vld [vmem:[%s13432_s5 + $0x6c] sm:$0xf]  ;;  %v8229_v27 = vld [vmem:[%s13432_s5 + $0x4c] sm:$0xf0] }
 0x13b   :  { %v673_v47 = vadd.f32 %v672_v39, %v179_v34  ;;  %v685_v24 = vpop.f32.mrf.mxu3  ;;  %v1025_v34 = vmul.f32 %v10073_v2, %v9911_v48 }
 0x13c   :  { %v686_v51 = vadd.f32 %v685_v24, %v208_v58  ;;  %v8233_v58 = vld [vmem:[%s13432_s5 + $0x6c] sm:$0xf0] }
 0x13d   :  { %8679 = vtanh.f32 %v673_v47  ;;  %1518 = vmatpush.bf16.msrb.mxu0 %v6376_v44  ;;  %1531 = vmatpush.bf16.msrb.mxu1 %v6380_v60  ;;  %v6360_v5 = vor.u32 %v8233_v58, %v6359_v18  ;;  %v6361_v44 = vld [vmem:[%s13432_s5 + $0x70] sm:$0xf0]  ;;  %v6369_v60 = vld [vmem:[%s13432_s5 + $0x78] sm:$0xf0]  ;;  %v1026_v63 = vsub.f32 1.0, %v1025_v34 }
 0x13e   :  { %v6177_v24 = vmul.f32 -1.442695, %v686_v51  ;;  %1544 = vmatpush.bf16.msra.mxu2 %v6384_v1  ;;  %1557 = vmatpush.bf16.msra.mxu3 %v6388_v54  ;;  %v6364_v39 = vor.u32 %v8231_v56, %v6361_v44  ;;  %v8234_v54 = vld [vmem:[%s13432_s5 + $0x74] sm:$0xf0]  ;;  %v1007_v1 = vsub.f32 1.0, %v10093_v16  ;;  %v6372_v49 = vor.u32 %v8232_v30, %v6369_v60 }
 0x13f   :  { %v6368_v19 = vor.u32 %v8234_v54, %v6367_v36  ;;  %v6343_v47 = vld [vmem:[%s13432_s5 + $0x40] sm:$0xf]  ;;  %v8227_v51 = vld [vmem:[%s13432_s5 + $0x44] sm:$0xf]  ;;  %v955_v16 = vsel %vm10087_vm7, %v954_v31, %v950_v38  ;;  %v6345_v18 = vld [vmem:[%s13432_s5 + $0x50] sm:$0xf0] }
 0x140   :  { %8681 = vpow2.f32 %v6177_v24  ;;  %v6344_v24 = vor.u32 %v8229_v27, %v6343_v47  ;;  %v6351_v58 = vld [vmem:[%s13432_s5 + $0x48] sm:$0xf]  ;;  %v6348_v44 = vor.u32 %v8227_v51, %v6345_v18  ;;  %v8228_v31 = vld [vmem:[%s13432_s5 + $0x4c] sm:$0xf]  ;;  %v6353_v36 = vld [vmem:[%s13432_s5 + $0x58] sm:$0xf0] }
 0x141   :  { %1519 = vmatpush.bf16.msrb.mxu0 %v6360_v5  ;;  %1532 = vmatpush.bf16.msrb.mxu1 %v6364_v39  ;;  %v8230_v5 = vld [vmem:[%s13432_s5 + $0x54] sm:$0xf0]  ;;  %v6327_v38 = vld [vmem:[%s13432_s5 + $0x20] sm:$0xf]  ;;  %v1027_v39 = vmul.f32 %v10073_v2, %v1026_v63  ;;  %v6356_v54 = vor.u32 %v8228_v31, %v6353_v36  ;;  %v8225_v30 = vld [vmem:[%s13432_s5 + $0x2c] sm:$0xf0] }
 0x142   :  { %v674_v7 = vpop.f32.mrf.mxu2  ;;  %1545 = vmatpush.bf16.msra.mxu2 %v6368_v19  ;;  %1558 = vmatpush.bf16.msra.mxu3 %v6372_v49  ;;  %v6352_v29 = vor.u32 %v8230_v5, %v6351_v58  ;;  %v8223_v60 = vld [vmem:[%s13432_s5 + $0x24] sm:$0xf]  ;;  %v6329_v19 = vld [vmem:[%s13432_s5 + $0x30] sm:$0xf0]  ;;  %v6328_v63 = vor.u32 %v8225_v30, %v6327_v38  ;;  %v6335_v27 = vld [vmem:[%s13432_s5 + $0x28] sm:$0xf] }
 0x143   :  { %v8680_v17 = vpop.eup %8679  ;;  %v687_v34 = vpop.f32.mrf.mxu3  ;;  %v6332_v47 = vor.u32 %v8223_v60, %v6329_v19  ;;  %v8226_v51 = vld [vmem:[%s13432_s5 + $0x34] sm:$0xf0]  ;;  %v6337_v18 = vld [vmem:[%s13432_s5 + $0x38] sm:$0xf0]  ;;  %v6311_v58 = vld [vmem:[%s13432_s5] sm:$0xf]  ;;  %v1028_v31 = vadd.f32 %v10073_v2, %v1027_v39 }
 0x144   :  { %v997_v56 = vmul.f32 %v8680_v17, %v955_v16  ;;  %v8224_v17 = vld [vmem:[%s13432_s5 + $0x2c] sm:$0xf]  ;;  %v1008_v34 = vmul.f32 %v10057_v26, %v1007_v1  ;;  %v8221_v1 = vld [vmem:[%s13432_s5 + $0xc] sm:$0xf0]  ;;  %v1033_v38 = vand.u32 2147483647, %v9911_v48 }
 0x145   :  { %1520 = vmatpush.bf16.msrb.mxu0 %v6344_v24  ;;  %1533 = vmatpush.bf16.msrb.mxu1 %v6348_v44  ;;  %v6336_v24 = vor.u32 %v8226_v51, %v6335_v27  ;;  %v6340_v5 = vor.u32 %v8224_v17, %v6337_v18  ;;  %v6313_v44 = vld [vmem:[%s13432_s5 + $0x10] sm:$0xf0]  ;;  %v6312_v39 = vor.u32 %v8221_v1, %v6311_v58  ;;  %v8222_v19 = vld [vmem:[%s13432_s5 + $0x14] sm:$0xf0]  ;;  %v1014_v58 = vand.u32 2147483647, %v9909_v33 }
 0x146   :  { %v8682_v49 = vpop.eup %8681  ;;  %v10173_v7 = vadd.f32 %v997_v56, %v996_v8  ;;  %v1035_v8 = vand.u32 2147483648, %v9911_v48  ;;  %1546 = vmatpush.bf16.msra.mxu2 %v6352_v29  ;;  %1559 = vmatpush.bf16.msra.mxu3 %v6356_v54  ;;  %v8219_v56 = vld [vmem:[%s13432_s5 + $0x4] sm:$0xf]  ;;  %v378_v29 = vadd.f32 %v9985_v21, %v9682_v11  ;;  %v6319_v54 = vld [vmem:[%s13432_s5 + $0x8] sm:$0xf]  ;;  %v407_v21 = vadd.f32 %v9997_v50, %v9685_v15 }
 0x147   :  { %v10186_v16 = vadd.f32 1.0, %v8682_v49  ;;  %v6316_v60 = vor.u32 %v8219_v56, %v6313_v44  ;;  %v8220_v48 = vld [vmem:[%s13432_s5 + $0xc] sm:$0xf]  ;;  %v6321_v49 = vld [vmem:[%s13432_s5 + $0x18] sm:$0xf0]  ;;  %v1009_v27 = vadd.f32 %v10057_v26, %v1008_v34  ;;  %v1016_v50 = vand.u32 2147483648, %v9909_v33 }
 0x148   :  { %v6320_v51 = vor.u32 %v8222_v19, %v6319_v54  ;;  %v1036_v17 = vor.u32 1.1754944e-38, %v1035_v8  ;;  %v6324_v56 = vor.u32 %v8220_v48, %v6321_v49  ;;  %v1032_v34 = vsel %vm10214_vm13, %v10073_v2, %v1028_v31 }
 0x149   :  { %8683 = vrcp.f32 %v10186_v16  ;;  %1521 = vmatpush.bf16.msrb.mxu0 %v6328_v63  ;;  %1534 = vmatpush.bf16.msrb.mxu1 %v6332_v47  ;;  %vm1034_vm15 = vcmp.eq.f32.partialorder %v1033_v38, 8.507059e+37  ;;  %v1017_v44 = vor.u32 1.1754944e-38, %v1016_v50  ;;  %vm1015_vm0 = vcmp.eq.f32.partialorder %v1014_v58, 8.507059e+37 }
 0x14a   :  { %v921_v30 = vpop.f32.mrf.mxu2  ;;  %1547 = vmatpush.bf16.msra.mxu2 %v6336_v24  ;;  %1560 = vmatpush.bf16.msra.mxu3 %v6340_v5  ;;  %v1013_v5 = vsel %vm10239_vm14, %v10057_v26, %v1009_v27  ;;  %v992_v26 = vand.u32 2147483648, %v10186_v16  ;;  %vm986_vm2 = vweird.f32 %v10186_v16 }
 0x14b   :  { %v922_v63 = vadd.f32 %v921_v30, %v378_v29  ;;  %v934_v47 = vpop.f32.mrf.mxu3  ;;  %v1037_v29 = vsel %vm1034_vm15, %v1036_v17, %v1032_v34  ;;  %v1018_v38 = vsel %vm1015_vm0, %v1017_v44, %v1013_v5 }
 0x14c   :  { %v935_v1 = vadd.f32 %v934_v47, %v407_v21  ;;  %v1059_v54 = vmul.f32 0.0, %v1037_v29  ;;  %v993_v27 = vor.u32 1.1754944e-38, %v992_v26  ;;  %v6565_v26 = vld [vmem:[%s13431_s2 + $0xe8] sm:$0xf] }
 0x14d   :  { %8685 = vtanh.f32 %v922_v63  ;;  %1522 = vmatpush.bf16.msrb.mxu0 %v6312_v39  ;;  %1535 = vmatpush.bf16.msrb.mxu1 %v6316_v60  ;;  %v990_v60 = vand.u32 2147483647, %v10186_v16 }
 0x14e   :  { %v6180_v8 = vmul.f32 -1.442695, %v935_v1  ;;  %1548 = vmatpush.bf16.msra.mxu2 %v6320_v51  ;;  %1561 = vmatpush.bf16.msra.mxu3 %v6324_v56 }
 0x14f   :  { %v8684_v24 = vpop.eup %8683  ;;  %vm991_vm4 = vcmp.eq.f32.partialorder %v990_v60, 8.507059e+37 }
 0x150   :  { %v982_v33 = vmul.f32 %v8684_v24, %v10186_v16  ;;  %8687 = vpow2.f32 %v6180_v8  ;;  %vm987_vm1 = vweird.f32 %v8684_v24 }
 0x151   :  { %8689 = vtanh.f32 %v10173_v7  ;;  %vm988_vm3 = vmor %vm986_vm2, %vm987_vm1 }
 0x152   :  { %v983_v36 = vsub.f32 1.0, %v982_v33  ;;  %v923_v2 = vpop.f32.mrf.mxu2 }
 0x153   :  { %v8686_v31 = vpop.eup %8685  ;;  %v936_v21 = vpop.f32.mrf.mxu3 }
 0x154   :  { %v984_v30 = vmul.f32 %v8684_v24, %v983_v36  ;;  %v1060_v39 = vmul.f32 %v8686_v31, %v1018_v38  ;;  %v6557_v31 = vld [vmem:[%s13431_s2 + $0xe0] sm:$0xf]  ;;  %v8281_v38 = vld [vmem:[%s13431_s2 + $0xec] sm:$0xf0] }
 0x155   :  { %v6558_v21 = vor.u32 %v8281_v38, %v6557_v31  ;;  %v8274_v31 = vld [vmem:[%s13431_s2 + $0xb4] sm:$0xf0] }
 0x156   :  { %v8688_v19 = vpop.eup %8687  ;;  %v10255_v48 = vadd.f32 %v1060_v39, %v1059_v54  ;;  %v985_v49 = vadd.f32 %v8684_v24, %v984_v30  ;;  %v8279_v54 = vld [vmem:[%s13431_s2 + $0xe4] sm:$0xf]  ;;  %v6559_v30 = vld [vmem:[%s13431_s2 + $0xf0] sm:$0xf0]  ;;  %v8282_v39 = vld [vmem:[%s13431_s2 + $0xf4] sm:$0xf0] }
 0x157   :  { %v1043_v63 = vadd.f32 1.0, %v8688_v19  ;;  %v8690_v47 = vpop.eup %8689  ;;  %v6562_v60 = vor.u32 %v8279_v54, %v6559_v30  ;;  %v6566_v19 = vor.u32 %v8282_v39, %v6565_v26  ;;  %v6535_v30 = vld [vmem:[%s13431_s2 + $0xb8] sm:$0xf0]  ;;  %v6509_v39 = vld [vmem:[%s13431_s2 + $0x80] sm:$0xf] }
 0x158   :  { %v989_v50 = vsel %vm988_vm3, %v8684_v24, %v985_v49  ;;  %v8280_v49 = vld [vmem:[%s13431_s2 + $0xec] sm:$0xf] }
 0x159   :  { %8691 = vrcp.f32 %v1043_v63  ;;  %v994_v51 = vsel %vm991_vm4, %v993_v27, %v989_v50  ;;  %v1055_v56 = vand.u32 2147483648, %v1043_v63  ;;  %v1053_v8 = vand.u32 2147483647, %v1043_v63  ;;  %v6541_v50 = vld [vmem:[%s13431_s2 + $0xc0] sm:$0xf] }
 0x15a   :  { %v1000_v17 = vmul.f32 %v8690_v47, %v994_v51  ;;  %8693 = vtanh.f32 %v10255_v48  ;;  %vm1049_vm6 = vweird.f32 %v1043_v63  ;;  %v8277_v47 = vld [vmem:[%s13431_s2 + $0xcc] sm:$0xf0]  ;;  %v8275_v51 = vld [vmem:[%s13431_s2 + $0xc4] sm:$0xf] }
 0x15b   :  { %v1056_v5 = vor.u32 1.1754944e-38, %v1055_v56  ;;  %vm1054_vm8 = vcmp.eq.f32.partialorder %v1053_v8, 8.507059e+37  ;;  %v6551_v8 = vld [vmem:[%s13431_s2 + $0xd8] sm:$0xf0] }
 0x15c   :  { %v1064_v18 = vpack.c.bf16 %v1000_v17, %v1000_v17  ;;  %v6542_v17 = vor.u32 %v8277_v47, %v6541_v50  ;;  %v8270_v50 = vld [vmem:[%s13431_s2 + $0x94] sm:$0xf0] }
 0x15e   :  { %1065 = vst [vmem:[#allocation4] sm:$0xf] %v1064_v18  ;;  %1274 = vmatmul.bf16.vlgmr.msra.gmra.mxu0 %v1064_v18  ;;  %1287 = vmatmul.bf16.vlgmr.msra.gmra.mxu1 %v1064_v18 }
 0x15f   :  { %v8692_v58 = vpop.eup %8691  ;;  %1300 = vmatmul.bf16.vlgmr.msrb.gmra.mxu2 %v1064_v18  ;;  %1313 = vmatmul.bf16.vlgmr.msrb.gmra.mxu3 %v1064_v18  ;;  %v6543_v18 = vld [vmem:[%s13431_s2 + $0xd0] sm:$0xf0] }
 0x160   :  { %v1045_v1 = vmul.f32 %v8692_v58, %v1043_v63  ;;  %vm1050_vm5 = vweird.f32 %v8692_v58  ;;  %v8694_v33 = vpop.eup %8693  ;;  %v6567_v63 = vld [vmem:[%s13431_s2 + $0xf8] sm:$0xf0]  ;;  %1896 = vmatpush.bf16.msra.mxu0 %v6558_v21  ;;  %1909 = vmatpush.bf16.msra.mxu1 %v6562_v60  ;;  %v8272_v21 = vld [vmem:[%s13431_s2 + $0xac] sm:$0xf]  ;;  %v8269_v60 = vld [vmem:[%s13431_s2 + $0x8c] sm:$0xf0] }
 0x161   :  { %vm1051_vm7 = vmor %vm1049_vm6, %vm1050_vm5  ;;  %v6570_v27 = vor.u32 %v8280_v49, %v6567_v63  ;;  %1922 = vmatpush.bf16.msrb.mxu2 %v6566_v19  ;;  %v6538_v26 = vor.u32 %v8272_v21, %v6535_v30  ;;  %v8267_v19 = vld [vmem:[%s13431_s2 + $0x84] sm:$0xf]  ;;  %v6510_v49 = vor.u32 %v8269_v60, %v6509_v39  ;;  %v6511_v63 = vld [vmem:[%s13431_s2 + $0x90] sm:$0xf0] }
 0x162   :  { %v1046_v16 = vsub.f32 1.0, %v1045_v1  ;;  %v8278_v1 = vld [vmem:[%s13431_s2 + $0xd4] sm:$0xf0]  ;;  %v6514_v47 = vor.u32 %v8267_v19, %v6511_v63  ;;  %v6479_v30 = vld [vmem:[%s13431_s2 + $0x50] sm:$0xf0] }
 0x163   :  { %1935 = vmatpush.bf16.msrb.mxu3 %v6570_v27  ;;  %v6517_v27 = vld [vmem:[%s13431_s2 + $0x88] sm:$0xf]  ;;  %v8262_v39 = vld [vmem:[%s13431_s2 + $0x54] sm:$0xf0]  ;;  %v6487_v63 = vld [vmem:[%s13431_s2 + $0x58] sm:$0xf0] }
 0x164   :  { %v1047_v34 = vmul.f32 %v8692_v58, %v1046_v16  ;;  %v6546_v16 = vor.u32 %v8275_v51, %v6543_v18  ;;  %1897 = vmatpush.bf16.msra.mxu0 %v6542_v17  ;;  %v6518_v51 = vor.u32 %v8270_v50, %v6517_v27  ;;  %v8268_v17 = vld [vmem:[%s13431_s2 + $0x8c] sm:$0xf]  ;;  %v6519_v18 = vld [vmem:[%s13431_s2 + $0x98] sm:$0xf0]  ;;  %v6461_v50 = vld [vmem:[%s13431_s2 + $0x20] sm:$0xf] }
 0x166   :  { %v1048_v24 = vadd.f32 %v8692_v58, %v1047_v34  ;;  %v8276_v34 = vld [vmem:[%s13431_s2 + $0xcc] sm:$0xf]  ;;  %1910 = vmatpush.bf16.msra.mxu1 %v6546_v16  ;;  %v8265_v16 = vld [vmem:[%s13431_s2 + $0x6c] sm:$0xf0] }
 0x168   :  { %v1052_v44 = vsel %vm1051_vm7, %v8692_v58, %v1048_v24  ;;  %v6549_v58 = vld [vmem:[%s13431_s2 + $0xc8] sm:$0xf]  ;;  %v6554_v24 = vor.u32 %v8276_v34, %v6551_v8  ;;  %v6495_v8 = vld [vmem:[%s13431_s2 + $0x70] sm:$0xf0] }
 0x169   :  { %v1057_v29 = vsel %vm1054_vm8, %v1056_v5, %v1052_v44  ;;  %v6550_v56 = vor.u32 %v8278_v1, %v6549_v58  ;;  %v6525_v5 = vld [vmem:[%s13431_s2 + $0xa0] sm:$0xf]  ;;  %v8273_v44 = vld [vmem:[%s13431_s2 + $0xac] sm:$0xf0]  ;;  %v6522_v58 = vor.u32 %v8268_v17, %v6519_v18  ;;  %v6463_v18 = vld [vmem:[%s13431_s2 + $0x30] sm:$0xf0] }
 0x16a   :  { %v1063_v36 = vmul.f32 %v8694_v33, %v1057_v29  ;;  %v8271_v33 = vld [vmem:[%s13431_s2 + $0xa4] sm:$0xf]  ;;  %1936 = vmatpush.bf16.msrb.mxu3 %v6554_v24  ;;  %v6526_v29 = vor.u32 %v8273_v44, %v6525_v5  ;;  %v6493_v1 = vld [vmem:[%s13431_s2 + $0x60] sm:$0xf]  ;;  %v6501_v24 = vld [vmem:[%s13431_s2 + $0x68] sm:$0xf] }
 0x16b   :  { %1923 = vmatpush.bf16.msrb.mxu2 %v6550_v56  ;;  %v8263_v56 = vld [vmem:[%s13431_s2 + $0x64] sm:$0xf]  ;;  %v6494_v34 = vor.u32 %v8265_v16, %v6493_v1  ;;  %v8266_v5 = vld [vmem:[%s13431_s2 + $0x74] sm:$0xf0] }
 0x16c   :  { %v1066_v2 = vpack.c.bf16 %v1063_v36, %v1063_v36  ;;  %v6527_v36 = vld [vmem:[%s13431_s2 + $0xb0] sm:$0xf0]  ;;  %1898 = vmatpush.bf16.msra.mxu0 %v6526_v29  ;;  %v6498_v44 = vor.u32 %v8263_v56, %v6495_v8  ;;  %v8264_v29 = vld [vmem:[%s13431_s2 + $0x6c] sm:$0xf]  ;;  %v8258_v1 = vld [vmem:[%s13431_s2 + $0x34] sm:$0xf0] }
 0x16d   :  { %v6530_v38 = vor.u32 %v8271_v33, %v6527_v36  ;;  %v6502_v33 = vor.u32 %v8266_v5, %v6501_v24  ;;  %v6503_v36 = vld [vmem:[%s13431_s2 + $0x78] sm:$0xf0]  ;;  %v123_v5 = vadd.f32 %v9468_v10, %v9435_v57 }
 0x16e   :  { %1068 = vst [vmem:[#allocation5 + $0x1c] sm:$0xf] %v1066_v2  ;;  %1523 = vmatmul.bf16.vlgmr.msrb.gmra.mxu0 %v1066_v2  ;;  %1536 = vmatmul.bf16.vlgmr.msrb.gmra.mxu1 %v1066_v2  ;;  %v6471_v8 = vld [vmem:[%s13431_s2 + $0x38] sm:$0xf0] }
 0x16f   :  { %1549 = vmatmul.bf16.vlgmr.msra.gmra.mxu2 %v1066_v2  ;;  %1562 = vmatmul.bf16.vlgmr.msra.gmra.mxu3 %v1066_v2  ;;  %v6533_v2 = vld [vmem:[%s13431_s2 + $0xa8] sm:$0xf] }
 0x170   :  { %v6534_v54 = vor.u32 %v8274_v31, %v6533_v2  ;;  %1911 = vmatpush.bf16.msra.mxu1 %v6530_v38  ;;  %1937 = vmatpush.bf16.msrb.mxu3 %v6538_v26  ;;  %v6506_v2 = vor.u32 %v8264_v29, %v6503_v36  ;;  %v6477_v31 = vld [vmem:[%s13431_s2 + $0x40] sm:$0xf]  ;;  %v8261_v38 = vld [vmem:[%s13431_s2 + $0x4c] sm:$0xf0]  ;;  %v6485_v26 = vld [vmem:[%s13431_s2 + $0x48] sm:$0xf] }
 0x171   :  { %1899 = vmatpush.bf16.msra.mxu0 %v6510_v49  ;;  %v6478_v21 = vor.u32 %v8261_v38, %v6477_v31  ;;  %v6486_v19 = vor.u32 %v8262_v39, %v6485_v26  ;;  %v8260_v49 = vld [vmem:[%s13431_s2 + $0x4c] sm:$0xf]  ;;  %v8253_v29 = vld [vmem:[%s13431_s2 + $0xc] sm:$0xf0]  ;;  %v8251_v36 = vld [vmem:[%s13431_s2 + $0x4] sm:$0xf] }
 0x172   :  { %1924 = vmatpush.bf16.msrb.mxu2 %v6534_v54  ;;  %v8259_v54 = vld [vmem:[%s13431_s2 + $0x44] sm:$0xf]  ;;  %v6490_v27 = vor.u32 %v8260_v49, %v6487_v63  ;;  %v6453_v38 = vld [vmem:[%s13431_s2 + $0x8] sm:$0xf]  ;;  %v6685_v49 = vld [vmem:[%s13432_s5 + $0xe0] sm:$0xf] }
 0x173   :  { %v6482_v60 = vor.u32 %v8259_v54, %v6479_v30  ;;  %v8254_v54 = vld [vmem:[%s13431_s2 + $0x14] sm:$0xf0] }
 0x174   :  { %1912 = vmatpush.bf16.msra.mxu1 %v6514_v47  ;;  %1938 = vmatpush.bf16.msrb.mxu3 %v6522_v58  ;;  %v8257_v47 = vld [vmem:[%s13431_s2 + $0x2c] sm:$0xf0]  ;;  %v6469_v58 = vld [vmem:[%s13431_s2 + $0x28] sm:$0xf]  ;;  %v6454_v39 = vor.u32 %v8254_v54, %v6453_v38 }
 0x175   :  { %1900 = vmatpush.bf16.msra.mxu0 %v6494_v34  ;;  %v6462_v17 = vor.u32 %v8257_v47, %v6461_v50  ;;  %v6470_v56 = vor.u32 %v8258_v1, %v6469_v58  ;;  %v8256_v34 = vld [vmem:[%s13431_s2 + $0x2c] sm:$0xf]  ;;  %v8311_v50 = vld [vmem:[%s13432_s5 + $0xe4] sm:$0xf]  ;;  %v6687_v47 = vld [vmem:[%s13432_s5 + $0xf0] sm:$0xf0] }
 0x176   :  { %1925 = vmatpush.bf16.msrb.mxu2 %v6518_v51  ;;  %v8255_v51 = vld [vmem:[%s13431_s2 + $0x24] sm:$0xf]  ;;  %v6474_v24 = vor.u32 %v8256_v34, %v6471_v8  ;;  %v6690_v58 = vor.u32 %v8311_v50, %v6687_v47  ;;  %v6693_v1 = vld [vmem:[%s13432_s5 + $0xe8] sm:$0xf]  ;;  %v6695_v34 = vld [vmem:[%s13432_s5 + $0xf8] sm:$0xf0] }
 0x177   :  { %v6466_v16 = vor.u32 %v8255_v51, %v6463_v18  ;;  %v6655_v47 = vld [vmem:[%s13432_s5 + $0xb0] sm:$0xf0] }
 0x178   :  { %1913 = vmatpush.bf16.msra.mxu1 %v6498_v44  ;;  %1939 = vmatpush.bf16.msrb.mxu3 %v6506_v2  ;;  %v152_v44 = vadd.f32 %v9470_v12, %v9446_v62  ;;  %v6447_v12 = vld [vmem:[%s13431_s2 + $0x10] sm:$0xf0] }
 0x179   :  { %1901 = vmatpush.bf16.msra.mxu0 %v6478_v21  ;;  %v6450_v26 = vor.u32 %v8251_v36, %v6447_v12 }
 0x17a   :  { %1926 = vmatpush.bf16.msrb.mxu2 %v6502_v33  ;;  %v6445_v33 = vld [vmem:[%s13431_s2] sm:$0xf] }
 0x17b   :  { %v6446_v10 = vor.u32 %v8253_v29, %v6445_v33  ;;  %v8307_v33 = vld [vmem:[%s13432_s5 + $0xc4] sm:$0xf]  ;;  %v210_v29 = vadd.f32 %v9627_v43, %v9641_v53 }
 0x17c   :  { %1914 = vmatpush.bf16.msra.mxu1 %v6482_v60  ;;  %1940 = vmatpush.bf16.msrb.mxu3 %v6490_v27  ;;  %v8252_v60 = vld [vmem:[%s13431_s2 + $0xc] sm:$0xf]  ;;  %v8313_v27 = vld [vmem:[%s13432_s5 + $0xec] sm:$0xf0] }
 0x17d   :  { %1902 = vmatpush.bf16.msra.mxu0 %v6462_v17  ;;  %v6686_v18 = vor.u32 %v8313_v27, %v6685_v49  ;;  %v6653_v49 = vld [vmem:[%s13432_s5 + $0xa0] sm:$0xf]  ;;  %v8303_v27 = vld [vmem:[%s13432_s5 + $0xa4] sm:$0xf] }
 0x17e   :  { %1927 = vmatpush.bf16.msrb.mxu2 %v6486_v19  ;;  %v6455_v19 = vld [vmem:[%s13431_s2 + $0x18] sm:$0xf0] }
 0x17f   :  { %v6458_v63 = vor.u32 %v8252_v60, %v6455_v19 }
 0x180   :  { %1915 = vmatpush.bf16.msra.mxu1 %v6466_v16  ;;  %1941 = vmatpush.bf16.msrb.mxu3 %v6474_v24  ;;  %v8314_v16 = vld [vmem:[%s13432_s5 + $0xf4] sm:$0xf0] }
 0x181   :  { %1903 = vmatpush.bf16.msra.mxu0 %v6446_v10  ;;  %v6694_v8 = vor.u32 %v8314_v16, %v6693_v1  ;;  %v8310_v10 = vld [vmem:[%s13432_s5 + $0xd4] sm:$0xf0]  ;;  %v8304_v1 = vld [vmem:[%s13432_s5 + $0xac] sm:$0xf]  ;;  %v6663_v16 = vld [vmem:[%s13432_s5 + $0xb8] sm:$0xf0] }
 0x182   :  { %1928 = vmatpush.bf16.msrb.mxu2 %v6470_v56  ;;  %v8312_v56 = vld [vmem:[%s13432_s5 + $0xec] sm:$0xf] }
 0x183   :  { %v6698_v24 = vor.u32 %v8312_v56, %v6695_v34 }
 0x184   :  { %1916 = vmatpush.bf16.msra.mxu1 %v6450_v26  ;;  %1942 = vmatpush.bf16.msrb.mxu3 %v6458_v63  ;;  %v8305_v63 = vld [vmem:[%s13432_s5 + $0xac] sm:$0xf0] }
 0x185   :  { %2145 = vmatpush.bf16.msrb.mxu0 %v6686_v18  ;;  %v6654_v50 = vor.u32 %v8305_v63, %v6653_v49  ;;  %v8300_v63 = vld [vmem:[%s13432_s5 + $0x8c] sm:$0xf] }
 0x186   :  { %1929 = vmatpush.bf16.msrb.mxu2 %v6454_v39 }
 0x188   :  { %2158 = vmatpush.bf16.msrb.mxu1 %v6690_v58  ;;  %2184 = vmatpush.bf16.msra.mxu3 %v6698_v24  ;;  %v6658_v58 = vor.u32 %v8303_v27, %v6655_v47  ;;  %v6647_v27 = vld [vmem:[%s13432_s5 + $0x98] sm:$0xf0] }
 0x18a   :  { %2171 = vmatpush.bf16.msra.mxu2 %v6694_v8  ;;  %v6666_v8 = vor.u32 %v8304_v1, %v6663_v16  ;;  %v6650_v16 = vor.u32 %v8300_v63, %v6647_v27 }
 0x1db   :  { %v1275_v2 = vpop.f32.mrf.mxu0  ;;  %v1288_v31 = vpop.f32.mrf.mxu1 }
 0x1dc   :  { %v1276_v21 = vadd.f32 %v1275_v2, %v123_v5  ;;  %v1289_v30 = vadd.f32 %v1288_v31, %v152_v44  ;;  %v6669_v5 = vld [vmem:[%s13432_s5 + $0xc0] sm:$0xf]  ;;  %v8309_v44 = vld [vmem:[%s13432_s5 + $0xcc] sm:$0xf0]  ;;  %v6671_v2 = vld [vmem:[%s13432_s5 + $0xd0] sm:$0xf0] }
 0x1dd   :  { %v6670_v36 = vor.u32 %v8309_v44, %v6669_v5  ;;  %v6677_v31 = vld [vmem:[%s13432_s5 + $0xc8] sm:$0xf]  ;;  %v6674_v43 = vor.u32 %v8307_v33, %v6671_v2  ;;  %v6637_v44 = vld [vmem:[%s13432_s5 + $0x80] sm:$0xf]  ;;  %v8301_v33 = vld [vmem:[%s13432_s5 + $0x8c] sm:$0xf0] }
 0x1de   :  { %v6437_v51 = vmul.f32 -1.442695, %v1276_v21  ;;  %v6438_v17 = vmul.f32 -1.442695, %v1289_v30  ;;  %v6678_v54 = vor.u32 %v8310_v10, %v6677_v31  ;;  %v8308_v21 = vld [vmem:[%s13432_s5 + $0xcc] sm:$0xf] }
 0x1df   :  { %v6679_v30 = vld [vmem:[%s13432_s5 + $0xd8] sm:$0xf0]  ;;  %2146 = vmatpush.bf16.msrb.mxu0 %v6670_v36  ;;  %2159 = vmatpush.bf16.msrb.mxu1 %v6674_v43  ;;  %v6638_v36 = vor.u32 %v8301_v33, %v6637_v44  ;;  %v8299_v2 = vld [vmem:[%s13432_s5 + $0x84] sm:$0xf]  ;;  %v6639_v31 = vld [vmem:[%s13432_s5 + $0x90] sm:$0xf0] }
 0x1e0   :  { %8695 = vpow2.f32 %v6437_v51  ;;  %v6682_v19 = vor.u32 %v8308_v21, %v6679_v30  ;;  %v6661_v51 = vld [vmem:[%s13432_s5 + $0xa8] sm:$0xf]  ;;  %2172 = vmatpush.bf16.msra.mxu2 %v6678_v54  ;;  %v8302_v30 = vld [vmem:[%s13432_s5 + $0x94] sm:$0xf0]  ;;  %v6642_v49 = vor.u32 %v8299_v2, %v6639_v31  ;;  %v8296_v2 = vld [vmem:[%s13432_s5 + $0x6c] sm:$0xf] }
 0x1e1   :  { %8697 = vpow2.f32 %v6438_v17  ;;  %v8306_v17 = vld [vmem:[%s13432_s5 + $0xb4] sm:$0xf0]  ;;  %v6645_v10 = vld [vmem:[%s13432_s5 + $0x88] sm:$0xf]  ;;  %v6631_v31 = vld [vmem:[%s13432_s5 + $0x78] sm:$0xf0] }
 0x1e2   :  { %v10498_v12 = vpop.f32.mrf.mxu2  ;;  %v1314_v38 = vpop.f32.mrf.mxu3  ;;  %2185 = vmatpush.bf16.msra.mxu3 %v6682_v19  ;;  %v6662_v34 = vor.u32 %v8306_v17, %v6661_v51  ;;  %v6621_v17 = vld [vmem:[%s13432_s5 + $0x60] sm:$0xf] }
 0x1e3   :  { %v1315_v26 = vadd.f32 %v1314_v38, %v210_v29  ;;  %v1277_v39 = vpop.f32.mrf.mxu0  ;;  %v1290_v60 = vpop.f32.mrf.mxu1  ;;  %2147 = vmatpush.bf16.msrb.mxu0 %v6654_v50  ;;  %2160 = vmatpush.bf16.msrb.mxu1 %v6658_v58  ;;  %v181_v38 = vadd.f32 %v9625_v42, %v9638_v20  ;;  %v6646_v42 = vor.u32 %v8302_v30, %v6645_v10  ;;  %v6605_v30 = vld [vmem:[%s13432_s5 + $0x40] sm:$0xf] }
 0x1e4   :  { %2173 = vmatpush.bf16.msra.mxu2 %v6662_v34  ;;  %v6629_v34 = vld [vmem:[%s13432_s5 + $0x68] sm:$0xf] }
 0x1e5   :  { %v6439_v18 = vmul.f32 -1.442695, %v1315_v26  ;;  %v1302_v1 = vadd.f32 %v10498_v12, %v181_v38 }
 0x1e6   :  { %v8696_v56 = vpop.eup %8695  ;;  %2186 = vmatpush.bf16.msra.mxu3 %v6666_v8 }
 0x1e7   :  { %v8698_v24 = vpop.eup %8697  ;;  %v10530_v5 = vadd.f32 1.0, %v8696_v56  ;;  %8699 = vpow2.f32 %v6439_v18  ;;  %2148 = vmatpush.bf16.msrb.mxu0 %v6638_v36  ;;  %v8297_v18 = vld [vmem:[%s13432_s5 + $0x6c] sm:$0xf0]  ;;  %2161 = vmatpush.bf16.msrb.mxu1 %v6642_v49  ;;  %v8298_v36 = vld [vmem:[%s13432_s5 + $0x74] sm:$0xf0] }
 0x1e8   :  { %v10538_v29 = vadd.f32 1.0, %v8698_v24  ;;  %v6622_v56 = vor.u32 %v8297_v18, %v6621_v17  ;;  %2174 = vmatpush.bf16.msra.mxu2 %v6646_v42  ;;  %v6630_v27 = vor.u32 %v8298_v36, %v6629_v34  ;;  %v8294_v17 = vld [vmem:[%s13432_s5 + $0x54] sm:$0xf0]  ;;  %v6581_v34 = vld [vmem:[%s13432_s5 + $0x8] sm:$0xf] }
 0x1e9   :  { %8701 = vrcp.f32 %v10530_v5  ;;  %v1580_v43 = vand.u32 2147483647, %v10530_v5  ;;  %v1582_v39 = vand.u32 2147483648, %v10530_v5  ;;  %vm1576_vm10 = vweird.f32 %v10530_v5 }
 0x1ea   :  { %8703 = vrcp.f32 %v10538_v29  ;;  %v1303_v54 = vpop.f32.mrf.mxu2  ;;  %v1316_v21 = vpop.f32.mrf.mxu3  ;;  %v1601_v26 = vand.u32 2147483648, %v10538_v29  ;;  %v1599_v50 = vand.u32 2147483647, %v10538_v29  ;;  %2187 = vmatpush.bf16.msra.mxu3 %v6650_v16  ;;  %vm1595_vm15 = vweird.f32 %v10538_v29 }
 0x1eb   :  { %v1524_v60 = vpop.f32.mrf.mxu0  ;;  %v1537_v19 = vpop.f32.mrf.mxu1  ;;  %vm10601_vm9 = vcmp.eq.f32.partialorder %v1580_v43, 8.507059e+37  ;;  %v10605_v21 = vor.u32 1.1754944e-38, %v1582_v39  ;;  %2149 = vmatpush.bf16.msrb.mxu0 %v6622_v56  ;;  %v8293_v43 = vld [vmem:[%s13432_s5 + $0x4c] sm:$0xf0]  ;;  %v8291_v39 = vld [vmem:[%s13432_s5 + $0x44] sm:$0xf] }
 0x1ec   :  { %v1525_v47 = vadd.f32 %v1524_v60, %v9630_v45  ;;  %v1538_v51 = vadd.f32 %v1537_v19, %v9633_v52  ;;  %v8295_v45 = vld [vmem:[%s13432_s5 + $0x64] sm:$0xf]  ;;  %v6623_v52 = vld [vmem:[%s13432_s5 + $0x70] sm:$0xf0]  ;;  %v8292_v56 = vld [vmem:[%s13432_s5 + $0x4c] sm:$0xf]  ;;  %2175 = vmatpush.bf16.msra.mxu2 %v6630_v27 }
 0x1ed   :  { %v8700_v58 = vpop.eup %8699  ;;  %v6626_v12 = vor.u32 %v8295_v45, %v6623_v52  ;;  %v6607_v19 = vld [vmem:[%s13432_s5 + $0x50] sm:$0xf0]  ;;  %v6615_v45 = vld [vmem:[%s13432_s5 + $0x58] sm:$0xf0]  ;;  %vm10639_vm12 = vcmp.eq.f32.partialorder %v1599_v50, 8.507059e+37 }
 0x1ee   :  { %v10584_v8 = vadd.f32 1.0, %v8700_v58  ;;  %v6440_v24 = vmul.f32 -1.442695, %v1525_v47  ;;  %v6441_v44 = vmul.f32 -1.442695, %v1538_v51  ;;  %v6634_v47 = vor.u32 %v8296_v2, %v6631_v31 }
 0x1ef   :  { %v10586_v33 = vpop.eup %8701  ;;  %2162 = vmatpush.bf16.msrb.mxu1 %v6626_v12  ;;  %v6613_v51 = vld [vmem:[%s13432_s5 + $0x48] sm:$0xf]  ;;  %v1602_v58 = vor.u32 1.1754944e-38, %v1601_v26  ;;  %v8289_v12 = vld [vmem:[%s13432_s5 + $0x2c] sm:$0xf0]  ;;  %v6610_v50 = vor.u32 %v8291_v39, %v6607_v19  ;;  %v6618_v19 = vor.u32 %v8292_v56, %v6615_v45 }
 0x1f0   :  { %v10597_v10 = vpop.eup %8703  ;;  %v1572_v38 = vmul.f32 %v10586_v33, %v10530_v5  ;;  %8705 = vrcp.f32 %v10584_v8  ;;  %vm1577_vm11 = vweird.f32 %v10586_v33  ;;  %2188 = vmatpush.bf16.msra.mxu3 %v6634_v47  ;;  %v6614_v2 = vor.u32 %v8294_v17, %v6613_v51  ;;  %v6591_v31 = vld [vmem:[%s13432_s5 + $0x30] sm:$0xf0]  ;;  %v8288_v27 = vld [vmem:[%s13432_s5 + $0x2c] sm:$0xf]  ;;  %v8283_v54 = vld [vmem:[%s13432_s5 + $0x4] sm:$0xf] }
 0x1f1   :  { %v1591_v60 = vmul.f32 %v10597_v10, %v10538_v29  ;;  %8707 = vtanh.f32 %v1302_v1  ;;  %vm1596_vm13 = vweird.f32 %v10597_v10  ;;  %vm10668_vm14 = vmor %vm1576_vm10, %vm1577_vm11  ;;  %vm1615_vm2 = vweird.f32 %v10584_v8 }
 0x1f2   :  { %v1573_v49 = vsub.f32 1.0, %v1572_v38  ;;  %8709 = vpow2.f32 %v6440_v24  ;;  %v10623_v42 = vpop.f32.mrf.mxu2  ;;  %v1563_v63 = vpop.f32.mrf.mxu3  ;;  %v6606_v24 = vor.u32 %v8293_v43, %v6605_v30  ;;  %v6597_v38 = vld [vmem:[%s13432_s5 + $0x28] sm:$0xf]  ;;  %vm1597_vm0 = vmor %vm1595_vm15, %vm1596_vm13  ;;  %2176 = vmatpush.bf16.msra.mxu2 %v6614_v2  ;;  %v8284_v43 = vld [vmem:[%s13432_s5 + $0xc] sm:$0xf] }
 0x1f3   :  { %v1592_v18 = vsub.f32 1.0, %v1591_v60  ;;  %8711 = vpow2.f32 %v6441_v44  ;;  %v1526_v1 = vpop.f32.mrf.mxu0  ;;  %v1539_v16 = vpop.f32.mrf.mxu1  ;;  %v1564_v26 = vadd.f32 %v1563_v63, %v9926_v0  ;;  %v6589_v44 = vld [vmem:[%s13432_s5 + $0x20] sm:$0xf]  ;;  %v8287_v0 = vld [vmem:[%s13432_s5 + $0x24] sm:$0xf]  ;;  %2163 = vmatpush.bf16.msrb.mxu1 %v6610_v50 }
 0x1f4   :  { %v1574_v52 = vmul.f32 %v10586_v33, %v1573_v49  ;;  %2150 = vmatpush.bf16.msrb.mxu0 %v6606_v24  ;;  %v6590_v49 = vor.u32 %v8289_v12, %v6589_v44  ;;  %v8290_v63 = vld [vmem:[%s13432_s5 + $0x34] sm:$0xf0]  ;;  %v6594_v17 = vor.u32 %v8287_v0, %v6591_v31  ;;  %v6573_v1 = vld [vmem:[%s13432_s5] sm:$0xf]  ;;  %v8285_v16 = vld [vmem:[%s13432_s5 + $0xc] sm:$0xf0]  ;;  %2189 = vmatpush.bf16.msra.mxu3 %v6618_v19 }
 0x1f5   :  { %v1593_v36 = vmul.f32 %v10597_v10, %v1592_v18  ;;  %v6442_v39 = vmul.f32 -1.442695, %v1564_v26  ;;  %v6599_v18 = vld [vmem:[%s13432_s5 + $0x38] sm:$0xf0]  ;;  %v6598_v45 = vor.u32 %v8290_v63, %v6597_v38  ;;  %v6574_v38 = vor.u32 %v8285_v16, %v6573_v1 }
 0x1f6   :  { %v10661_v30 = vpop.eup %8705  ;;  %v1575_v60 = vadd.f32 %v10586_v33, %v1574_v52  ;;  %v6602_v52 = vor.u32 %v8288_v27, %v6599_v18 }
 0x1f7   :  { %v8708_v47 = vpop.eup %8707  ;;  %v1594_v5 = vadd.f32 %v10597_v10, %v1593_v36  ;;  %v1611_v51 = vmul.f32 %v10661_v30, %v10584_v8  ;;  %8713 = vpow2.f32 %v6442_v39  ;;  %2164 = vmatpush.bf16.msrb.mxu1 %v6594_v17  ;;  %2177 = vmatpush.bf16.msra.mxu2 %v6598_v45  ;;  %v6583_v39 = vld [vmem:[%s13432_s5 + $0x18] sm:$0xf0]  ;;  %vm1616_vm1 = vweird.f32 %v10661_v30 }
 0x1f8   :  { %v8710_v29 = vpop.eup %8709  ;;  %v1579_v56 = vsel %vm10668_vm14, %v10586_v33, %v1575_v60  ;;  %2151 = vmatpush.bf16.msrb.mxu0 %v6590_v49  ;;  %v8286_v60 = vld [vmem:[%s13432_s5 + $0x14] sm:$0xf0]  ;;  %2190 = vmatpush.bf16.msra.mxu3 %v6602_v52  ;;  %v1551_v17 = vadd.f32 %v10623_v42, %v9914_v14  ;;  %v6586_v18 = vor.u32 %v8284_v43, %v6583_v39  ;;  %vm10742_vm3 = vmor %vm1615_vm2, %vm1616_vm1 }
 0x1f9   :  { %v8712_v26 = vpop.eup %8711  ;;  %v1584_v24 = vsel %vm10601_vm9, %v10605_v21, %v1579_v56  ;;  %v1598_v44 = vsel %vm1597_vm0, %v10597_v10, %v1594_v5  ;;  %v1612_v12 = vsub.f32 1.0, %v1611_v51  ;;  %v10700_v36 = vadd.f32 1.0, %v8710_v29 }
 0x1fa   :  { %v1603_v50 = vsel %vm10639_vm12, %v1602_v58, %v1598_v44  ;;  %v1626_v0 = vmul.f32 %v8708_v47, %v1584_v24  ;;  %v10704_v33 = vadd.f32 1.0, %v8712_v26  ;;  %v1552_v2 = vpop.f32.mrf.mxu2  ;;  %v1565_v31 = vpop.f32.mrf.mxu3  ;;  %v6575_v58 = vld [vmem:[%s13432_s5 + $0x10] sm:$0xf0]  ;;  %v6582_v27 = vor.u32 %v8286_v60, %v6581_v34 }
 0x1fb   :  { %v1625_v21 = vmul.f32 %v1603_v50, %v10173_v7  ;;  %v1613_v10 = vmul.f32 %v10661_v30, %v1612_v12  ;;  %8715 = vrcp.f32 %v10700_v36  ;;  %v6578_v63 = vor.u32 %v8283_v54, %v6575_v58 }
 0x1fc   :  { %8717 = vrcp.f32 %v10704_v33  ;;  %2152 = vmatpush.bf16.msrb.mxu0 %v6574_v38  ;;  %v1621_v47 = vand.u32 2147483648, %v10584_v8  ;;  %v1619_v51 = vand.u32 2147483647, %v10584_v8  ;;  %2178 = vmatpush.bf16.msra.mxu2 %v6582_v27  ;;  %v1664_v24 = vand.u32 2147483648, %v10704_v33 }
 0x1fd   :  { %v10722_v7 = vadd.f32 %v1626_v0, %v1625_v21  ;;  %v8714_v19 = vpop.eup %8713  ;;  %v1614_v49 = vadd.f32 %v10661_v30, %v1613_v10  ;;  %2165 = vmatpush.bf16.msrb.mxu1 %v6578_v63  ;;  %2191 = vmatpush.bf16.msra.mxu3 %v6586_v18  ;;  %v1645_v44 = vand.u32 2147483648, %v10700_v36  ;;  %v1643_v0 = vand.u32 2147483647, %v10700_v36 }
 0x1fe   :  { %v10734_v5 = vadd.f32 1.0, %v8714_v19  ;;  %v1622_v14 = vor.u32 1.1754944e-38, %v1621_v47  ;;  %vm1620_vm4 = vcmp.eq.f32.partialorder %v1619_v51, 8.507059e+37  ;;  %v1662_v38 = vand.u32 2147483647, %v10704_v33 }
 0x1ff   :  { %8719 = vtanh.f32 %v10722_v7  ;;  %v1618_v8 = vsel %vm10742_vm3, %v10661_v30, %v1614_v49  ;;  %vm1639_vm7 = vweird.f32 %v10700_v36  ;;  %vm1658_vm8 = vweird.f32 %v10704_v33 }
 0x200   :  { %8721 = vrcp.f32 %v10734_v5  ;;  %v1623_v12 = vsel %vm1620_vm4, %v1622_v14, %v1618_v8  ;;  %v1646_v58 = vor.u32 1.1754944e-38, %v1645_v44  ;;  %v1665_v43 = vor.u32 1.1754944e-38, %v1664_v24  ;;  %v6827_v24 = vld [vmem:[%s13431_s2 + $0xe8] sm:$0xf]  ;;  %v8346_v44 = vld [vmem:[%s13431_s2 + $0xf4] sm:$0xf0] }
 0x201   :  { %v8716_v1 = vpop.eup %8715  ;;  %8723 = vtanh.f32 %v1551_v17  ;;  %vm1644_vm11 = vcmp.eq.f32.partialorder %v1643_v0, 8.507059e+37  ;;  %vm1663_vm12 = vcmp.eq.f32.partialorder %v1662_v38, 8.507059e+37  ;;  %v1684_v18 = vand.u32 2147483648, %v10734_v5  ;;  %v8344_v0 = vld [vmem:[%s13431_s2 + $0xec] sm:$0xf] }
 0x202   :  { %v8718_v29 = vpop.eup %8717  ;;  %v1635_v56 = vmul.f32 %v8716_v1, %v10700_v36  ;;  %vm1640_vm5 = vweird.f32 %v8716_v1  ;;  %vm1678_vm14 = vweird.f32 %v10734_v5  ;;  %v8341_v38 = vld [vmem:[%s13431_s2 + $0xcc] sm:$0xf0] }
 0x203   :  { %v1654_v42 = vmul.f32 %v8718_v29, %v10704_v33  ;;  %vm1659_vm6 = vweird.f32 %v8718_v29  ;;  %vm1641_vm9 = vmor %vm1639_vm7, %vm1640_vm5 }
 0x204   :  { %v1636_v45 = vsub.f32 1.0, %v1635_v56  ;;  %vm1660_vm10 = vmor %vm1658_vm8, %vm1659_vm6 }
 0x205   :  { %v8720_v52 = vpop.eup %8719  ;;  %v1655_v26 = vsub.f32 1.0, %v1654_v42  ;;  %v6819_v42 = vld [vmem:[%s13431_s2 + $0xe0] sm:$0xf] }
 0x206   :  { %v1637_v50 = vmul.f32 %v8716_v1, %v1636_v45  ;;  %v1629_v2 = vmul.f32 %v8720_v52, %v1623_v12  ;;  %v8722_v30 = vpop.eup %8721  ;;  %v8343_v45 = vld [vmem:[%s13431_s2 + $0xe4] sm:$0xf] }
 0x207   :  { %v1656_v31 = vmul.f32 %v8718_v29, %v1655_v26  ;;  %v1674_v21 = vmul.f32 %v8722_v30, %v10734_v5  ;;  %v8724_v60 = vpop.eup %8723  ;;  %vm1679_vm13 = vweird.f32 %v8722_v30  ;;  %v6821_v26 = vld [vmem:[%s13431_s2 + $0xf0] sm:$0xf0] }
 0x208   :  { %v1638_v54 = vadd.f32 %v8716_v1, %v1637_v50  ;;  %v1693_v10 = vpack.c.bf16 %v1629_v2, %v1629_v2  ;;  %vm1680_vm15 = vmor %vm1678_vm14, %vm1679_vm13  ;;  %v6824_v12 = vor.u32 %v8343_v45, %v6821_v26  ;;  %v6828_v50 = vor.u32 %v8346_v44, %v6827_v24  ;;  %v6829_v2 = vld [vmem:[%s13431_s2 + $0xf8] sm:$0xf0]  ;;  %v6773_v45 = vld [vmem:[%s13431_s2 + $0x90] sm:$0xf0] }
 0x209   :  { %v1657_v34 = vadd.f32 %v8718_v29, %v1656_v31  ;;  %v1675_v19 = vsub.f32 1.0, %v1674_v21  ;;  %v6803_v31 = vld [vmem:[%s13431_s2 + $0xc0] sm:$0xf]  ;;  %v8334_v26 = vld [vmem:[%s13431_s2 + $0x94] sm:$0xf0] }
 0x20a   :  { %v1642_v39 = vsel %vm1641_vm9, %v8716_v1, %v1638_v54  ;;  %1695 = vst [vmem:[#allocation4 + $0x4] sm:$0xf] %v1693_v10  ;;  %1904 = vmatmul.bf16.vlgmr.msra.gmra.mxu0 %v1693_v10  ;;  %1917 = vmatmul.bf16.vlgmr.msra.gmra.mxu1 %v1693_v10  ;;  %v1682_v1 = vand.u32 2147483647, %v10734_v5  ;;  %v8345_v5 = vld [vmem:[%s13431_s2 + $0xec] sm:$0xf0]  ;;  %v6804_v21 = vor.u32 %v8341_v38, %v6803_v31 }
 0x20b   :  { %v1647_v49 = vsel %vm1644_vm11, %v1646_v58, %v1642_v39  ;;  %v1661_v63 = vsel %vm1660_vm10, %v8718_v29, %v1657_v34  ;;  %1930 = vmatmul.bf16.vlgmr.msrb.gmra.mxu2 %v1693_v10  ;;  %1943 = vmatmul.bf16.vlgmr.msrb.gmra.mxu3 %v1693_v10  ;;  %v1676_v33 = vmul.f32 %v8722_v30, %v1675_v19  ;;  %v1685_v29 = vor.u32 1.1754944e-38, %v1684_v18  ;;  %v8339_v54 = vld [vmem:[%s13431_s2 + $0xc4] sm:$0xf]  ;;  %v6805_v10 = vld [vmem:[%s13431_s2 + $0xd0] sm:$0xf0] }
 0x20c   :  { %v1666_v36 = vsel %vm1663_vm12, %v1665_v43, %v1661_v63  ;;  %v1689_v27 = vmul.f32 %v8724_v60, %v1647_v49  ;;  %vm1683_vm0 = vcmp.eq.f32.partialorder %v1682_v1, 8.507059e+37  ;;  %v6820_v52 = vor.u32 %v8345_v5, %v6819_v42  ;;  %2539 = vmatpush.bf16.msra.mxu1 %v6824_v12  ;;  %2552 = vmatpush.bf16.msrb.mxu2 %v6828_v50  ;;  %v6811_v58 = vld [vmem:[%s13431_s2 + $0xc8] sm:$0xf]  ;;  %v8342_v34 = vld [vmem:[%s13431_s2 + $0xd4] sm:$0xf0] }
 0x20d   :  { %v1688_v47 = vmul.f32 %v1666_v36, %v10255_v48  ;;  %v1677_v17 = vadd.f32 %v8722_v30, %v1676_v33  ;;  %v6808_v60 = vor.u32 %v8339_v54, %v6805_v10  ;;  %v6812_v43 = vor.u32 %v8342_v34, %v6811_v58  ;;  %v8340_v39 = vld [vmem:[%s13431_s2 + $0xcc] sm:$0xf]  ;;  %v6813_v19 = vld [vmem:[%s13431_s2 + $0xd8] sm:$0xf0]  ;;  %v6787_v63 = vld [vmem:[%s13431_s2 + $0xa0] sm:$0xf] }
 0x20e   :  { %2526 = vmatpush.bf16.msra.mxu0 %v6820_v52  ;;  %v6816_v49 = vor.u32 %v8340_v39, %v6813_v19  ;;  %v8337_v36 = vld [vmem:[%s13431_s2 + $0xac] sm:$0xf0]  ;;  %v8338_v18 = vld [vmem:[%s13431_s2 + $0xb4] sm:$0xf0]  ;;  %v8331_v42 = vld [vmem:[%s13431_s2 + $0x84] sm:$0xf] }
 0x20f   :  { %v10760_v51 = vadd.f32 %v1689_v27, %v1688_v47  ;;  %v1681_v16 = vsel %vm1680_vm15, %v8722_v30, %v1677_v17  ;;  %v6832_v30 = vor.u32 %v8344_v0, %v6829_v2  ;;  %v8335_v27 = vld [vmem:[%s13431_s2 + $0xa4] sm:$0xf]  ;;  %v6788_v33 = vor.u32 %v8337_v36, %v6787_v63  ;;  %v6789_v47 = vld [vmem:[%s13431_s2 + $0xb0] sm:$0xf0]  ;;  %v6795_v17 = vld [vmem:[%s13431_s2 + $0xa8] sm:$0xf] }
 0x210   :  { %v1686_v8 = vsel %vm1683_vm0, %v1685_v29, %v1681_v16  ;;  %2540 = vmatpush.bf16.msra.mxu1 %v6808_v60  ;;  %2553 = vmatpush.bf16.msrb.mxu2 %v6812_v43  ;;  %v6792_v1 = vor.u32 %v8335_v27, %v6789_v47  ;;  %v6796_v16 = vor.u32 %v8338_v18, %v6795_v17  ;;  %v8336_v29 = vld [vmem:[%s13431_s2 + $0xac] sm:$0xf]  ;;  %v6779_v52 = vld [vmem:[%s13431_s2 + $0x88] sm:$0xf]  ;;  %v6781_v50 = vld [vmem:[%s13431_s2 + $0x98] sm:$0xf0] }
 0x211   :  { %8725 = vtanh.f32 %v10760_v51  ;;  %2565 = vmatpush.bf16.msrb.mxu3 %v6832_v30  ;;  %v6776_v24 = vor.u32 %v8331_v42, %v6773_v45  ;;  %v6780_v44 = vor.u32 %v8334_v26, %v6779_v52  ;;  %v8332_v12 = vld [vmem:[%s13431_s2 + $0x8c] sm:$0xf]  ;;  %v6755_v2 = vld [vmem:[%s13431_s2 + $0x60] sm:$0xf]  ;;  %v8329_v30 = vld [vmem:[%s13431_s2 + $0x6c] sm:$0xf0] }
 0x212   :  { %2527 = vmatpush.bf16.msra.mxu0 %v6804_v21  ;;  %v6784_v0 = vor.u32 %v8332_v12, %v6781_v50  ;;  %v8327_v31 = vld [vmem:[%s13431_s2 + $0x64] sm:$0xf]  ;;  %v6756_v38 = vor.u32 %v8329_v30, %v6755_v2  ;;  %v6757_v54 = vld [vmem:[%s13431_s2 + $0x70] sm:$0xf0]  ;;  %v6763_v21 = vld [vmem:[%s13431_s2 + $0x68] sm:$0xf] }
 0x213   :  { %v8330_v10 = vld [vmem:[%s13431_s2 + $0x74] sm:$0xf0]  ;;  %v6760_v58 = vor.u32 %v8327_v31, %v6757_v54  ;;  %v8328_v60 = vld [vmem:[%s13431_s2 + $0x6c] sm:$0xf]  ;;  %v6765_v43 = vld [vmem:[%s13431_s2 + $0x78] sm:$0xf0] }
 0x214   :  { %2541 = vmatpush.bf16.msra.mxu1 %v6792_v1  ;;  %2554 = vmatpush.bf16.msrb.mxu2 %v6796_v16  ;;  %v6764_v34 = vor.u32 %v8330_v10, %v6763_v21  ;;  %v6768_v39 = vor.u32 %v8328_v60, %v6765_v43  ;;  %v6739_v19 = vld [vmem:[%s13431_s2 + $0x40] sm:$0xf]  ;;  %v8323_v63 = vld [vmem:[%s13431_s2 + $0x44] sm:$0xf]  ;;  %v6741_v27 = vld [vmem:[%s13431_s2 + $0x50] sm:$0xf0] }
 0x215   :  { %2566 = vmatpush.bf16.msrb.mxu3 %v6816_v49  ;;  %v8325_v49 = vld [vmem:[%s13431_s2 + $0x4c] sm:$0xf0]  ;;  %v8326_v47 = vld [vmem:[%s13431_s2 + $0x54] sm:$0xf0]  ;;  %v6744_v17 = vor.u32 %v8323_v63, %v6741_v27  ;;  %v8324_v1 = vld [vmem:[%s13431_s2 + $0x4c] sm:$0xf] }
 0x216   :  { %2528 = vmatpush.bf16.msra.mxu0 %v6788_v33  ;;  %v6740_v36 = vor.u32 %v8325_v49, %v6739_v19  ;;  %v6747_v33 = vld [vmem:[%s13431_s2 + $0x48] sm:$0xf]  ;;  %v6749_v16 = vld [vmem:[%s13431_s2 + $0x58] sm:$0xf0]  ;;  %v6725_v42 = vld [vmem:[%s13431_s2 + $0x30] sm:$0xf0] }
 0x217   :  { %v8726_v56 = vpop.eup %8725  ;;  %v6748_v18 = vor.u32 %v8326_v47, %v6747_v33  ;;  %v8322_v45 = vld [vmem:[%s13431_s2 + $0x34] sm:$0xf0]  ;;  %v6707_v31 = vld [vmem:[%s13431_s2] sm:$0xf]  ;;  %v8315_v54 = vld [vmem:[%s13431_s2 + $0x4] sm:$0xf] }
 0x218   :  { %v1692_v14 = vmul.f32 %v8726_v56, %v1686_v8  ;;  %v6797_v56 = vld [vmem:[%s13431_s2 + $0xb8] sm:$0xf0]  ;;  %2542 = vmatpush.bf16.msra.mxu1 %v6776_v24  ;;  %2555 = vmatpush.bf16.msrb.mxu2 %v6780_v44  ;;  %v8320_v24 = vld [vmem:[%s13431_s2 + $0x2c] sm:$0xf]  ;;  %v8318_v10 = vld [vmem:[%s13431_s2 + $0x14] sm:$0xf0] }
 0x219   :  { %v6800_v8 = vor.u32 %v8336_v29, %v6797_v56  ;;  %v6752_v29 = vor.u32 %v8324_v1, %v6749_v16  ;;  %v6723_v56 = vld [vmem:[%s13431_s2 + $0x20] sm:$0xf]  ;;  %v6733_v44 = vld [vmem:[%s13431_s2 + $0x38] sm:$0xf0]  ;;  %v8377_v63 = vld [vmem:[%s13432_s5 + $0xec] sm:$0xf0] }
 0x21a   :  { %v1696_v48 = vpack.c.bf16 %v1692_v14, %v1692_v14  ;;  %v6771_v14 = vld [vmem:[%s13431_s2 + $0x80] sm:$0xf]  ;;  %v6717_v19 = vld [vmem:[%s13431_s2 + $0x18] sm:$0xf0]  ;;  %v8375_v33 = vld [vmem:[%s13432_s5 + $0xe4] sm:$0xf] }
 0x21b   :  { %2567 = vmatpush.bf16.msrb.mxu3 %v6800_v8  ;;  %v8321_v8 = vld [vmem:[%s13431_s2 + $0x2c] sm:$0xf0]  ;;  %v6947_v49 = vld [vmem:[%s13432_s5 + $0xe0] sm:$0xf]  ;;  %v6949_v47 = vld [vmem:[%s13432_s5 + $0xf0] sm:$0xf0] }
 0x21c   :  { %1698 = vst [vmem:[#allocation5 + $0x18] sm:$0xf] %v1696_v48  ;;  %2153 = vmatmul.bf16.vlgmr.msrb.gmra.mxu0 %v1696_v48  ;;  %2166 = vmatmul.bf16.vlgmr.msrb.gmra.mxu1 %v1696_v48  ;;  %v6948_v27 = vor.u32 %v8377_v63, %v6947_v49  ;;  %v8378_v1 = vld [vmem:[%s13432_s5 + $0xf4] sm:$0xf0]  ;;  %v8376_v16 = vld [vmem:[%s13432_s5 + $0xec] sm:$0xf] }
 0x21d   :  { %2179 = vmatmul.bf16.vlgmr.msra.gmra.mxu2 %v1696_v48  ;;  %2192 = vmatmul.bf16.vlgmr.msra.gmra.mxu3 %v1696_v48  ;;  %v8333_v48 = vld [vmem:[%s13431_s2 + $0x8c] sm:$0xf0]  ;;  %v8370_v49 = vld [vmem:[%s13432_s5 + $0xb4] sm:$0xf0] }
 0x21e   :  { %v6772_v5 = vor.u32 %v8333_v48, %v6771_v14  ;;  %2543 = vmatpush.bf16.msra.mxu1 %v6760_v58  ;;  %2556 = vmatpush.bf16.msrb.mxu2 %v6764_v34  ;;  %v8319_v14 = vld [vmem:[%s13431_s2 + $0x24] sm:$0xf]  ;;  %v6724_v48 = vor.u32 %v8321_v8, %v6723_v56 }
 0x21f   :  { %2568 = vmatpush.bf16.msrb.mxu3 %v6784_v0  ;;  %v6728_v52 = vor.u32 %v8319_v14, %v6725_v42  ;;  %v6736_v0 = vor.u32 %v8320_v24, %v6733_v44  ;;  %v6931_v42 = vld [vmem:[%s13432_s5 + $0xc0] sm:$0xf] }
 0x220   :  { %2529 = vmatpush.bf16.msra.mxu0 %v6772_v5  ;;  %v6731_v5 = vld [vmem:[%s13431_s2 + $0x28] sm:$0xf] }
 0x221   :  { %v6732_v26 = vor.u32 %v8322_v45, %v6731_v5  ;;  %v8373_v5 = vld [vmem:[%s13432_s5 + $0xcc] sm:$0xf0]  ;;  %v8371_v45 = vld [vmem:[%s13432_s5 + $0xc4] sm:$0xf] }
 0x222   :  { %2544 = vmatpush.bf16.msra.mxu1 %v6744_v17  ;;  %2557 = vmatpush.bf16.msrb.mxu2 %v6748_v18  ;;  %v6955_v17 = vld [vmem:[%s13432_s5 + $0xe8] sm:$0xf]  ;;  %v6952_v18 = vor.u32 %v8375_v33, %v6949_v47  ;;  %v6932_v44 = vor.u32 %v8373_v5, %v6931_v42  ;;  %v6925_v33 = vld [vmem:[%s13432_s5 + $0xb8] sm:$0xf0]  ;;  %v6899_v47 = vld [vmem:[%s13432_s5 + $0x80] sm:$0xf]  ;;  %v344_v5 = vadd.f32 %v9623_v41, %v9493_v23 }
 0x223   :  { %2569 = vmatpush.bf16.msrb.mxu3 %v6768_v39  ;;  %v8316_v39 = vld [vmem:[%s13431_s2 + $0xc] sm:$0xf]  ;;  %v6956_v14 = vor.u32 %v8378_v1, %v6955_v17  ;;  %v8365_v1 = vld [vmem:[%s13432_s5 + $0x8c] sm:$0xf0]  ;;  %v6901_v42 = vld [vmem:[%s13432_s5 + $0x90] sm:$0xf0] }
 0x224   :  { %2530 = vmatpush.bf16.msra.mxu0 %v6756_v38  ;;  %v8317_v38 = vld [vmem:[%s13431_s2 + $0xc] sm:$0xf0] }
 0x225   :  { %v6708_v21 = vor.u32 %v8317_v38, %v6707_v31  ;;  %v6941_v31 = vld [vmem:[%s13432_s5 + $0xd8] sm:$0xf0] }
 0x226   :  { %2545 = vmatpush.bf16.msra.mxu1 %v6728_v52  ;;  %2558 = vmatpush.bf16.msrb.mxu2 %v6732_v26 }
 0x227   :  { %2570 = vmatpush.bf16.msrb.mxu3 %v6752_v29  ;;  %v6957_v29 = vld [vmem:[%s13432_s5 + $0xf8] sm:$0xf0] }
 0x228   :  { %2531 = vmatpush.bf16.msra.mxu0 %v6740_v36  ;;  %v6720_v36 = vor.u32 %v8316_v39, %v6717_v19 }
 0x22b   :  { %2571 = vmatpush.bf16.msrb.mxu3 %v6736_v0  ;;  %v8374_v0 = vld [vmem:[%s13432_s5 + $0xd4] sm:$0xf0] }
 0x22c   :  { %2532 = vmatpush.bf16.msra.mxu0 %v6724_v48  ;;  %v6960_v48 = vor.u32 %v8376_v16, %v6957_v29  ;;  %v315_v16 = vadd.f32 %v9621_v40, %v9490_v22 }
 0x22f   :  { %2572 = vmatpush.bf16.msrb.mxu3 %v6720_v36 }
 0x230   :  { %2533 = vmatpush.bf16.msra.mxu0 %v6708_v21  ;;  %v6915_v21 = vld [vmem:[%s13432_s5 + $0xa0] sm:$0xf] }
 0x233   :  { %2814 = vmatpush.bf16.msra.mxu3 %v6960_v48  ;;  %v8363_v48 = vld [vmem:[%s13432_s5 + $0x84] sm:$0xf] }
 0x234   :  { %2775 = vmatpush.bf16.msrb.mxu0 %v6948_v27  ;;  %v8368_v27 = vld [vmem:[%s13432_s5 + $0xac] sm:$0xf] }
 0x238   :  { %2776 = vmatpush.bf16.msrb.mxu0 %v6932_v44 }
 0x287   :  { %v1905_v12 = vpop.f32.mrf.mxu0  ;;  %v1918_v50 = vpop.f32.mrf.mxu1 }
 0x288   :  { %v1906_v2 = vadd.f32 %v1905_v12, %v9460_v6  ;;  %v1919_v30 = vadd.f32 %v1918_v50, %v9466_v9  ;;  %v6709_v6 = vld [vmem:[%s13431_s2 + $0x10] sm:$0xf0]  ;;  %v6715_v9 = vld [vmem:[%s13431_s2 + $0x8] sm:$0xf] }
 0x289   :  { %v6712_v60 = vor.u32 %v8315_v54, %v6709_v6  ;;  %v6716_v43 = vor.u32 %v8318_v10, %v6715_v9  ;;  %v6933_v12 = vld [vmem:[%s13432_s5 + $0xd0] sm:$0xf0]  ;;  %v6939_v50 = vld [vmem:[%s13432_s5 + $0xc8] sm:$0xf]  ;;  %v8369_v6 = vld [vmem:[%s13432_s5 + $0xac] sm:$0xf0] }
 0x28a   :  { %v6699_v58 = vmul.f32 -1.442695, %v1906_v2  ;;  %v6700_v34 = vmul.f32 -1.442695, %v1919_v30  ;;  %v6936_v2 = vor.u32 %v8371_v45, %v6933_v12  ;;  %v8372_v30 = vld [vmem:[%s13432_s5 + $0xcc] sm:$0xf]  ;;  %v6916_v10 = vor.u32 %v8369_v6, %v6915_v21 }
 0x28b   :  { %2546 = vmatpush.bf16.msra.mxu1 %v6712_v60  ;;  %2559 = vmatpush.bf16.msrb.mxu2 %v6716_v43  ;;  %v6944_v54 = vor.u32 %v8372_v30, %v6941_v31  ;;  %v6923_v60 = vld [vmem:[%s13432_s5 + $0xa8] sm:$0xf]  ;;  %v6883_v30 = vld [vmem:[%s13432_s5 + $0x60] sm:$0xf] }
 0x28c   :  { %8727 = vpow2.f32 %v6699_v58  ;;  %v8367_v58 = vld [vmem:[%s13432_s5 + $0xa4] sm:$0xf]  ;;  %v6924_v36 = vor.u32 %v8370_v49, %v6923_v60  ;;  %2777 = vmatpush.bf16.msrb.mxu0 %v6916_v10  ;;  %v6891_v49 = vld [vmem:[%s13432_s5 + $0x68] sm:$0xf] }
 0x28d   :  { %8729 = vpow2.f32 %v6700_v34  ;;  %v6917_v34 = vld [vmem:[%s13432_s5 + $0xb0] sm:$0xf0]  ;;  %2815 = vmatpush.bf16.msra.mxu3 %v6944_v54  ;;  %v8361_v54 = vld [vmem:[%s13432_s5 + $0x6c] sm:$0xf0]  ;;  %v8359_v10 = vld [vmem:[%s13432_s5 + $0x64] sm:$0xf] }
 0x28e   :  { %v10984_v56 = vpop.f32.mrf.mxu2  ;;  %v1944_v8 = vpop.f32.mrf.mxu3  ;;  %v6920_v19 = vor.u32 %v8367_v58, %v6917_v34  ;;  %v6885_v58 = vld [vmem:[%s13432_s5 + $0x70] sm:$0xf0] }
 0x28f   :  { %v1945_v52 = vadd.f32 %v1944_v8, %v9647_v61  ;;  %v1907_v26 = vpop.f32.mrf.mxu0  ;;  %v1920_v24 = vpop.f32.mrf.mxu1  ;;  %2788 = vmatpush.bf16.msrb.mxu1 %v6952_v18  ;;  %2801 = vmatpush.bf16.msra.mxu2 %v6956_v14  ;;  %v6940_v61 = vor.u32 %v8374_v0, %v6939_v50  ;;  %v6928_v8 = vor.u32 %v8368_v27, %v6925_v33 }
 0x290   :  { %v6900_v14 = vor.u32 %v8365_v1, %v6899_v47  ;;  %v6907_v26 = vld [vmem:[%s13432_s5 + $0x88] sm:$0xf]  ;;  %v8366_v24 = vld [vmem:[%s13432_s5 + $0x94] sm:$0xf0]  ;;  %v1932_v12 = vadd.f32 %v10984_v56, %v9644_v59  ;;  %v402_v27 = vadd.f32 %v9849_v55, %v9685_v15  ;;  %v8360_v47 = vld [vmem:[%s13432_s5 + $0x6c] sm:$0xf] }
 0x291   :  { %v6701_v38 = vmul.f32 -1.442695, %v1945_v52  ;;  %v6904_v52 = vor.u32 %v8363_v48, %v6901_v42  ;;  %2816 = vmatpush.bf16.msra.mxu3 %v6928_v8  ;;  %v6908_v0 = vor.u32 %v8366_v24, %v6907_v26 }
 0x292   :  { %v8728_v9 = vpop.eup %8727  ;;  %2778 = vmatpush.bf16.msrb.mxu0 %v6900_v14 }
 0x293   :  { %v8730_v43 = vpop.eup %8729  ;;  %v11026_v39 = vadd.f32 1.0, %v8728_v9  ;;  %8731 = vpow2.f32 %v6701_v38  ;;  %2789 = vmatpush.bf16.msrb.mxu1 %v6936_v2  ;;  %2802 = vmatpush.bf16.msra.mxu2 %v6940_v61  ;;  %v8364_v2 = vld [vmem:[%s13432_s5 + $0x8c] sm:$0xf]  ;;  %v6909_v61 = vld [vmem:[%s13432_s5 + $0x98] sm:$0xf0]  ;;  %v6884_v9 = vor.u32 %v8361_v54, %v6883_v30 }
 0x294   :  { %v11031_v63 = vadd.f32 1.0, %v8730_v43  ;;  %v6912_v56 = vor.u32 %v8364_v2, %v6909_v61  ;;  %v8358_v30 = vld [vmem:[%s13432_s5 + $0x54] sm:$0xf0] }
 0x295   :  { %8733 = vrcp.f32 %v11026_v39  ;;  %v2210_v29 = vand.u32 2147483647, %v11026_v39  ;;  %v2212_v40 = vand.u32 2147483648, %v11026_v39  ;;  %vm2206_vm3 = vweird.f32 %v11026_v39 }
 0x296   :  { %8735 = vrcp.f32 %v11031_v63  ;;  %v1933_v17 = vpop.f32.mrf.mxu2  ;;  %v1946_v18 = vpop.f32.mrf.mxu3  ;;  %v2231_v45 = vand.u32 2147483648, %v11031_v63  ;;  %v2229_v6 = vand.u32 2147483647, %v11031_v63  ;;  %2817 = vmatpush.bf16.msra.mxu3 %v6912_v56  ;;  %2779 = vmatpush.bf16.msrb.mxu0 %v6884_v9  ;;  %vm2225_vm7 = vweird.f32 %v11031_v63 }
 0x297   :  { %2790 = vmatpush.bf16.msrb.mxu1 %v6920_v19  ;;  %2803 = vmatpush.bf16.msra.mxu2 %v6924_v36  ;;  %vm11096_vm2 = vcmp.eq.f32.partialorder %v2210_v29, 8.507059e+37  ;;  %v11100_v19 = vor.u32 1.1754944e-38, %v2212_v40  ;;  %v8362_v36 = vld [vmem:[%s13432_s5 + $0x74] sm:$0xf0]  ;;  %v6893_v17 = vld [vmem:[%s13432_s5 + $0x78] sm:$0xf0]  ;;  %v6888_v29 = vor.u32 %v8359_v10, %v6885_v58 }
 0x298   :  { %v6867_v18 = vld [vmem:[%s13432_s5 + $0x40] sm:$0xf]  ;;  %v2232_v8 = vor.u32 1.1754944e-38, %v2231_v45  ;;  %vm11129_vm5 = vcmp.eq.f32.partialorder %v2229_v6, 8.507059e+37  ;;  %v6892_v42 = vor.u32 %v8362_v36, %v6891_v49  ;;  %v6896_v26 = vor.u32 %v8360_v47, %v6893_v17  ;;  %v8353_v58 = vld [vmem:[%s13432_s5 + $0x2c] sm:$0xf0] }
 0x299   :  { %v8732_v44 = vpop.eup %8731  ;;  %v2154_v50 = vpop.f32.mrf.mxu0  ;;  %v6851_v10 = vld [vmem:[%s13432_s5 + $0x20] sm:$0xf]  ;;  %v6859_v47 = vld [vmem:[%s13432_s5 + $0x28] sm:$0xf]  ;;  %v8354_v17 = vld [vmem:[%s13432_s5 + $0x34] sm:$0xf0] }
 0x29a   :  { %v2167_v41 = vpop.f32.mrf.mxu1  ;;  %v11077_v31 = vadd.f32 1.0, %v8732_v44  ;;  %v2155_v38 = vadd.f32 %v2154_v50, %v315_v16  ;;  %v8355_v44 = vld [vmem:[%s13432_s5 + $0x44] sm:$0xf]  ;;  %v6875_v50 = vld [vmem:[%s13432_s5 + $0x48] sm:$0xf]  ;;  %2818 = vmatpush.bf16.msra.mxu3 %v6896_v26 }
 0x29b   :  { %v2168_v59 = vadd.f32 %v2167_v41, %v344_v5  ;;  %v11082_v21 = vpop.eup %8733  ;;  %2791 = vmatpush.bf16.msrb.mxu1 %v6904_v52  ;;  %2804 = vmatpush.bf16.msra.mxu2 %v6908_v0  ;;  %v8357_v5 = vld [vmem:[%s13432_s5 + $0x4c] sm:$0xf0]  ;;  %v6876_v9 = vor.u32 %v8358_v30, %v6875_v50 }
 0x29c   :  { %v11091_v34 = vpop.eup %8735  ;;  %v2202_v60 = vmul.f32 %v11082_v21, %v11026_v39  ;;  %vm2207_vm1 = vweird.f32 %v11082_v21  ;;  %8737 = vrcp.f32 %v11077_v31  ;;  %v6702_v1 = vmul.f32 -1.442695, %v2155_v38  ;;  %v8356_v38 = vld [vmem:[%s13432_s5 + $0x4c] sm:$0xf] }
 0x29d   :  { %v2221_v33 = vmul.f32 %v11091_v34, %v11031_v63  ;;  %8739 = vtanh.f32 %v1932_v12  ;;  %v6703_v16 = vmul.f32 -1.442695, %v2168_v59  ;;  %vm11125_vm4 = vmor %vm2206_vm3, %vm2207_vm1  ;;  %v6868_v24 = vor.u32 %v8357_v5, %v6867_v18  ;;  %v6869_v12 = vld [vmem:[%s13432_s5 + $0x50] sm:$0xf0]  ;;  %v6877_v59 = vld [vmem:[%s13432_s5 + $0x58] sm:$0xf0] }
 0x29e   :  { %v2203_v55 = vsub.f32 1.0, %v2202_v60  ;;  %8741 = vpow2.f32 %v6702_v1  ;;  %vm2226_vm6 = vweird.f32 %v11091_v34  ;;  %v6872_v6 = vor.u32 %v8355_v44, %v6869_v12  ;;  %v8351_v60 = vld [vmem:[%s13432_s5 + $0x24] sm:$0xf]  ;;  %v6837_v44 = vld [vmem:[%s13432_s5 + $0x10] sm:$0xf0] }
 0x29f   :  { %v2222_v39 = vsub.f32 1.0, %v2221_v33  ;;  %2792 = vmatpush.bf16.msrb.mxu1 %v6888_v29  ;;  %8743 = vpow2.f32 %v6703_v16  ;;  %2805 = vmatpush.bf16.msra.mxu2 %v6892_v42  ;;  %v6853_v33 = vld [vmem:[%s13432_s5 + $0x30] sm:$0xf0]  ;;  %vm11186_vm8 = vmor %vm2225_vm7, %vm2226_vm6  ;;  %v6880_v1 = vor.u32 %v8356_v38, %v6877_v59  ;;  %v6852_v16 = vor.u32 %v8353_v58, %v6851_v10  ;;  %v8352_v29 = vld [vmem:[%s13432_s5 + $0x2c] sm:$0xf] }
 0x2a0   :  { %v2204_v40 = vmul.f32 %v11082_v21, %v2203_v55  ;;  %v11137_v52 = vpop.f32.mrf.mxu2  ;;  %v2193_v45 = vpop.f32.mrf.mxu3  ;;  %2780 = vmatpush.bf16.msrb.mxu0 %v6868_v24  ;;  %v6856_v5 = vor.u32 %v8351_v60, %v6853_v33  ;;  %v8347_v24 = vld [vmem:[%s13432_s5 + $0x4] sm:$0xf]  ;;  %v6843_v12 = vld [vmem:[%s13432_s5 + $0x8] sm:$0xf]  ;;  %v6845_v10 = vld [vmem:[%s13432_s5 + $0x18] sm:$0xf0]  ;;  %vm2245_vm10 = vweird.f32 %v11077_v31  ;;  %v373_v33 = vadd.f32 %v9845_v13, %v9682_v11 }
 0x2a1   :  { %v2223_v41 = vmul.f32 %v11091_v34, %v2222_v39  ;;  %v2194_v0 = vadd.f32 %v2193_v45, %v402_v27  ;;  %v2156_v2 = vpop.f32.mrf.mxu0  ;;  %v6861_v39 = vld [vmem:[%s13432_s5 + $0x38] sm:$0xf0]  ;;  %v8349_v45 = vld [vmem:[%s13432_s5 + $0xc] sm:$0xf0]  ;;  %2819 = vmatpush.bf16.msra.mxu3 %v6880_v1  ;;  %v2251_v58 = vand.u32 2147483648, %v11077_v31 }
 0x2a2   :  { %v2169_v61 = vpop.f32.mrf.mxu1  ;;  %v11159_v56 = vpop.eup %8737  ;;  %v2205_v54 = vadd.f32 %v11082_v21, %v2204_v40  ;;  %v6835_v40 = vld [vmem:[%s13432_s5] sm:$0xf]  ;;  %v8350_v2 = vld [vmem:[%s13432_s5 + $0x14] sm:$0xf0] }
 0x2a3   :  { %v8740_v49 = vpop.eup %8739  ;;  %v2224_v36 = vadd.f32 %v11091_v34, %v2223_v41  ;;  %v2241_v27 = vmul.f32 %v11159_v56, %v11077_v31  ;;  %v6704_v55 = vmul.f32 -1.442695, %v2194_v0  ;;  %2793 = vmatpush.bf16.msrb.mxu1 %v6872_v6  ;;  %2806 = vmatpush.bf16.msra.mxu2 %v6876_v9  ;;  %v6864_v0 = vor.u32 %v8352_v29, %v6861_v39  ;;  %v8348_v9 = vld [vmem:[%s13432_s5 + $0xc] sm:$0xf] }
 0x2a4   :  { %v2209_v18 = vsel %vm11125_vm4, %v11082_v21, %v2205_v54  ;;  %v8742_v26 = vpop.eup %8741  ;;  %2781 = vmatpush.bf16.msrb.mxu0 %v6852_v16  ;;  %v6836_v59 = vor.u32 %v8349_v45, %v6835_v40  ;;  %v6840_v54 = vor.u32 %v8347_v24, %v6837_v44  ;;  %vm2246_vm9 = vweird.f32 %v11159_v56 }
 0x2a5   :  { %v2214_v42 = vsel %vm11096_vm2, %v11100_v19, %v2209_v18  ;;  %v2228_v21 = vsel %vm11186_vm8, %v11091_v34, %v2224_v36  ;;  %v2242_v14 = vsub.f32 1.0, %v2241_v27  ;;  %8745 = vpow2.f32 %v6704_v55  ;;  %v8744_v50 = vpop.eup %8743  ;;  %2820 = vmatpush.bf16.msra.mxu3 %v6864_v0  ;;  %vm2247_vm11 = vmor %vm2245_vm10, %vm2246_vm9 }
 0x2a6   :  { %v2233_v43 = vsel %vm11129_vm5, %v2232_v8, %v2228_v21  ;;  %v2256_v19 = vmul.f32 %v8740_v49, %v2214_v42  ;;  %v6860_v34 = vor.u32 %v8354_v17, %v6859_v47  ;;  %v11224_v41 = vadd.f32 1.0, %v8742_v26 }
 0x2a7   :  { %v2255_v8 = vmul.f32 %v2233_v43, %v10722_v7  ;;  %v2243_v48 = vmul.f32 %v11159_v56, %v2242_v14  ;;  %v11229_v61 = vadd.f32 1.0, %v8744_v50  ;;  %2794 = vmatpush.bf16.msrb.mxu1 %v6856_v5  ;;  %v6844_v7 = vor.u32 %v8350_v2, %v6843_v12 }
 0x2a8   :  { %v2182_v30 = vpop.f32.mrf.mxu2  ;;  %v2195_v38 = vpop.f32.mrf.mxu3  ;;  %8747 = vrcp.f32 %v11224_v41  ;;  %2807 = vmatpush.bf16.msra.mxu2 %v6860_v34  ;;  %2782 = vmatpush.bf16.msrb.mxu0 %v6836_v59  ;;  %v2249_v36 = vand.u32 2147483647, %v11077_v31  ;;  %v6848_v27 = vor.u32 %v8348_v9, %v6845_v10  ;;  %v2252_v18 = vor.u32 1.1754944e-38, %v2251_v58 }
 0x2a9   :  { %v11231_v6 = vadd.f32 %v2256_v19, %v2255_v8  ;;  %8749 = vrcp.f32 %v11229_v61  ;;  %v2244_v60 = vadd.f32 %v11159_v56, %v2243_v48  ;;  %v2181_v55 = vadd.f32 %v11137_v52, %v373_v33  ;;  %v8409_v33 = vld [vmem:[%s13431_s2 + $0xec] sm:$0xf0] }
 0x2aa   :  { %2821 = vmatpush.bf16.msra.mxu3 %v6848_v27  ;;  %vm2250_vm12 = vcmp.eq.f32.partialorder %v2249_v36, 8.507059e+37  ;;  %v2275_v14 = vand.u32 2147483648, %v11224_v41  ;;  %v2294_v52 = vand.u32 2147483648, %v11229_v61  ;;  %v2292_v43 = vand.u32 2147483647, %v11229_v61 }
 0x2ab   :  { %8751 = vtanh.f32 %v11231_v6  ;;  %v8746_v49 = vpop.eup %8745  ;;  %2795 = vmatpush.bf16.msrb.mxu1 %v6840_v54  ;;  %v2248_v17 = vsel %vm2247_vm11, %v11159_v56, %v2244_v60  ;;  %v2273_v56 = vand.u32 2147483647, %v11224_v41  ;;  %vm2269_vm15 = vweird.f32 %v11224_v41  ;;  %v7081_v27 = vld [vmem:[%s13431_s2 + $0xe0] sm:$0xf] }
 0x2ac   :  { %v11249_v47 = vadd.f32 1.0, %v8746_v49  ;;  %2808 = vmatpush.bf16.msra.mxu2 %v6844_v7  ;;  %v2253_v29 = vsel %vm2250_vm12, %v2252_v18, %v2248_v17  ;;  %vm2288_vm0 = vweird.f32 %v11229_v61  ;;  %v2276_v24 = vor.u32 1.1754944e-38, %v2275_v14  ;;  %v7089_v18 = vld [vmem:[%s13431_s2 + $0xe8] sm:$0xf]  ;;  %v7067_v14 = vld [vmem:[%s13431_s2 + $0xd0] sm:$0xf0] }
 0x2ad   :  { %v2295_v12 = vor.u32 1.1754944e-38, %v2294_v52  ;;  %vm2274_vm3 = vcmp.eq.f32.partialorder %v2273_v56, 8.507059e+37  ;;  %vm2293_vm4 = vcmp.eq.f32.partialorder %v2292_v43, 8.507059e+37  ;;  %v7082_v17 = vor.u32 %v8409_v33, %v7081_v27  ;;  %v7073_v52 = vld [vmem:[%s13431_s2 + $0xc8] sm:$0xf] }
 0x2ae   :  { %v8748_v63 = vpop.eup %8747  ;;  %8753 = vrcp.f32 %v11249_v47  ;;  %v2314_v7 = vand.u32 2147483648, %v11249_v47  ;;  %vm2308_vm6 = vweird.f32 %v11249_v47  ;;  %v2312_v9 = vand.u32 2147483647, %v11249_v47  ;;  %v7075_v43 = vld [vmem:[%s13431_s2 + $0xd8] sm:$0xf0] }
 0x2af   :  { %v8750_v1 = vpop.eup %8749  ;;  %v2265_v31 = vmul.f32 %v8748_v63, %v11224_v41  ;;  %8755 = vtanh.f32 %v2181_v55  ;;  %vm2270_vm13 = vweird.f32 %v8748_v63  ;;  %v8410_v55 = vld [vmem:[%s13431_s2 + $0xf4] sm:$0xf0]  ;;  %v7043_v27 = vld [vmem:[%s13431_s2 + $0x98] sm:$0xf0] }
 0x2b0   :  { %v2284_v13 = vmul.f32 %v8750_v1, %v11229_v61  ;;  %vm2289_vm14 = vweird.f32 %v8750_v1  ;;  %vm2271_vm1 = vmor %vm2269_vm15, %vm2270_vm13  ;;  %v2315_v58 = vor.u32 1.1754944e-38, %v2314_v7  ;;  %vm2313_vm8 = vcmp.eq.f32.partialorder %v2312_v9, 8.507059e+37  ;;  %v8395_v7 = vld [vmem:[%s13431_s2 + $0x84] sm:$0xf] }
 0x2b1   :  { %v8752_v16 = vpop.eup %8751  ;;  %v2266_v39 = vsub.f32 1.0, %v2265_v31  ;;  %vm2290_vm2 = vmor %vm2288_vm0, %vm2289_vm14  ;;  %v7090_v31 = vor.u32 %v8410_v55, %v7089_v18  ;;  %v7019_v55 = vld [vmem:[%s13431_s2 + $0x70] sm:$0xf0] }
 0x2b2   :  { %v2259_v42 = vmul.f32 %v8752_v16, %v2253_v29  ;;  %v2285_v21 = vsub.f32 1.0, %v2284_v13  ;;  %v8408_v16 = vld [vmem:[%s13431_s2 + $0xec] sm:$0xf]  ;;  %v7091_v13 = vld [vmem:[%s13431_s2 + $0xf8] sm:$0xf0] }
 0x2b3   :  { %v2267_v5 = vmul.f32 %v8748_v63, %v2266_v39  ;;  %v7094_v29 = vor.u32 %v8408_v16, %v7091_v13  ;;  %v7065_v39 = vld [vmem:[%s13431_s2 + $0xc0] sm:$0xf] }
 0x2b4   :  { %v2323_v40 = vpack.c.bf16 %v2259_v42, %v2259_v42  ;;  %v8754_v45 = vpop.eup %8753  ;;  %v2286_v26 = vmul.f32 %v8750_v1, %v2285_v21  ;;  %v8405_v42 = vld [vmem:[%s13431_s2 + $0xcc] sm:$0xf0]  ;;  %v8403_v21 = vld [vmem:[%s13431_s2 + $0xc4] sm:$0xf] }
 0x2b5   :  { %v2268_v19 = vadd.f32 %v8748_v63, %v2267_v5  ;;  %v2304_v34 = vmul.f32 %v8754_v45, %v11249_v47  ;;  %v8756_v48 = vpop.eup %8755  ;;  %vm2309_vm5 = vweird.f32 %v8754_v45  ;;  %v8407_v47 = vld [vmem:[%s13431_s2 + $0xe4] sm:$0xf]  ;;  %v7066_v56 = vor.u32 %v8405_v42, %v7065_v39  ;;  %v8406_v5 = vld [vmem:[%s13431_s2 + $0xd4] sm:$0xf0]  ;;  %v7027_v39 = vld [vmem:[%s13431_s2 + $0x78] sm:$0xf0] }
 0x2b6   :  { %2325 = vst [vmem:[#allocation4 + $0x8] sm:$0xf] %v2323_v40  ;;  %2534 = vmatmul.bf16.vlgmr.msra.gmra.mxu0 %v2323_v40  ;;  %2547 = vmatmul.bf16.vlgmr.msra.gmra.mxu1 %v2323_v40  ;;  %v2287_v44 = vadd.f32 %v8750_v1, %v2286_v26  ;;  %vm2310_vm7 = vmor %vm2308_vm6, %vm2309_vm5  ;;  %v8404_v26 = vld [vmem:[%s13431_s2 + $0xcc] sm:$0xf] }
 0x2b7   :  { %2560 = vmatmul.bf16.vlgmr.msrb.gmra.mxu2 %v2323_v40  ;;  %2573 = vmatmul.bf16.vlgmr.msrb.gmra.mxu3 %v2323_v40  ;;  %v2272_v50 = vsel %vm2271_vm1, %v8748_v63, %v2268_v19  ;;  %v2305_v8 = vsub.f32 1.0, %v2304_v34  ;;  %v7083_v63 = vld [vmem:[%s13431_s2 + $0xf0] sm:$0xf0]  ;;  %v7070_v40 = vor.u32 %v8403_v21, %v7067_v14  ;;  %v7078_v19 = vor.u32 %v8404_v26, %v7075_v43  ;;  %v7049_v34 = vld [vmem:[%s13431_s2 + $0xa0] sm:$0xf] }
 0x2b8   :  { %v2277_v0 = vsel %vm2274_vm3, %v2276_v24, %v2272_v50  ;;  %v2291_v41 = vsel %vm2290_vm2, %v8750_v1, %v2287_v44  ;;  %v7086_v1 = vor.u32 %v8407_v47, %v7083_v63  ;;  %3156 = vmatpush.bf16.msra.mxu0 %v7082_v17  ;;  %3182 = vmatpush.bf16.msrb.mxu2 %v7090_v31  ;;  %v8401_v24 = vld [vmem:[%s13431_s2 + $0xac] sm:$0xf0]  ;;  %v8399_v44 = vld [vmem:[%s13431_s2 + $0xa4] sm:$0xf]  ;;  %v7051_v50 = vld [vmem:[%s13431_s2 + $0xb0] sm:$0xf0] }
 0x2b9   :  { %v2296_v2 = vsel %vm2293_vm4, %v2295_v12, %v2291_v41  ;;  %v2319_v30 = vmul.f32 %v8756_v48, %v2277_v0  ;;  %v2306_v38 = vmul.f32 %v8754_v45, %v2305_v8  ;;  %3195 = vmatpush.bf16.msrb.mxu3 %v7094_v29  ;;  %v7050_v12 = vor.u32 %v8401_v24, %v7049_v34  ;;  %v7057_v8 = vld [vmem:[%s13431_s2 + $0xa8] sm:$0xf]  ;;  %v8402_v48 = vld [vmem:[%s13431_s2 + $0xb4] sm:$0xf0]  ;;  %v7017_v47 = vld [vmem:[%s13431_s2 + $0x60] sm:$0xf] }
 0x2ba   :  { %v2318_v59 = vmul.f32 %v2296_v2, %v10760_v51  ;;  %3169 = vmatpush.bf16.msra.mxu1 %v7086_v1  ;;  %v7054_v0 = vor.u32 %v8399_v44, %v7051_v50  ;;  %v7058_v41 = vor.u32 %v8402_v48, %v7057_v8  ;;  %v8400_v2 = vld [vmem:[%s13431_s2 + $0xac] sm:$0xf]  ;;  %v8393_v17 = vld [vmem:[%s13431_s2 + $0x6c] sm:$0xf0]  ;;  %v8391_v63 = vld [vmem:[%s13431_s2 + $0x64] sm:$0xf] }
 0x2bb   :  { %v2307_v54 = vadd.f32 %v8754_v45, %v2306_v38  ;;  %v7018_v18 = vor.u32 %v8393_v17, %v7017_v47  ;;  %v7025_v1 = vld [vmem:[%s13431_s2 + $0x68] sm:$0xf]  ;;  %v8394_v31 = vld [vmem:[%s13431_s2 + $0x74] sm:$0xf0]  ;;  %v7022_v16 = vor.u32 %v8391_v63, %v7019_v55  ;;  %v8392_v29 = vld [vmem:[%s13431_s2 + $0x6c] sm:$0xf] }
 0x2bc   :  { %v11264_v61 = vadd.f32 %v2319_v30, %v2318_v59  ;;  %3157 = vmatpush.bf16.msra.mxu0 %v7066_v56  ;;  %v7059_v30 = vld [vmem:[%s13431_s2 + $0xb8] sm:$0xf0]  ;;  %v7033_v59 = vld [vmem:[%s13431_s2 + $0x80] sm:$0xf]  ;;  %v7026_v13 = vor.u32 %v8394_v31, %v7025_v1  ;;  %v7030_v42 = vor.u32 %v8392_v29, %v7027_v39  ;;  %v8389_v56 = vld [vmem:[%s13431_s2 + $0x4c] sm:$0xf0] }
 0x2bd   :  { %v2311_v10 = vsel %vm2310_vm7, %v8754_v45, %v2307_v54  ;;  %v7074_v45 = vor.u32 %v8406_v5, %v7073_v52  ;;  %3196 = vmatpush.bf16.msrb.mxu3 %v7078_v19  ;;  %v7062_v38 = vor.u32 %v8400_v2, %v7059_v30  ;;  %v8397_v54 = vld [vmem:[%s13431_s2 + $0x8c] sm:$0xf0]  ;;  %v7001_v21 = vld [vmem:[%s13431_s2 + $0x40] sm:$0xf]  ;;  %v8387_v14 = vld [vmem:[%s13431_s2 + $0x44] sm:$0xf] }
 0x2be   :  { %8757 = vtanh.f32 %v11264_v61  ;;  %v2316_v49 = vsel %vm2313_vm8, %v2315_v58, %v2311_v10  ;;  %3170 = vmatpush.bf16.msra.mxu1 %v7070_v40  ;;  %v7034_v9 = vor.u32 %v8397_v54, %v7033_v59  ;;  %v7035_v10 = vld [vmem:[%s13431_s2 + $0x90] sm:$0xf0]  ;;  %v7041_v58 = vld [vmem:[%s13431_s2 + $0x88] sm:$0xf]  ;;  %v7002_v52 = vor.u32 %v8389_v56, %v7001_v21  ;;  %v8388_v19 = vld [vmem:[%s13431_s2 + $0x4c] sm:$0xf] }
 0x2bf   :  { %3183 = vmatpush.bf16.msrb.mxu2 %v7074_v45  ;;  %v7003_v5 = vld [vmem:[%s13431_s2 + $0x50] sm:$0xf0]  ;;  %v7009_v40 = vld [vmem:[%s13431_s2 + $0x48] sm:$0xf]  ;;  %v8390_v45 = vld [vmem:[%s13431_s2 + $0x54] sm:$0xf0] }
 0x2c0   :  { %3158 = vmatpush.bf16.msra.mxu0 %v7050_v12  ;;  %v7006_v26 = vor.u32 %v8387_v14, %v7003_v5  ;;  %v7010_v43 = vor.u32 %v8390_v45, %v7009_v40  ;;  %v7011_v34 = vld [vmem:[%s13431_s2 + $0x58] sm:$0xf0]  ;;  %v6985_v44 = vld [vmem:[%s13431_s2 + $0x20] sm:$0xf]  ;;  %v8385_v12 = vld [vmem:[%s13431_s2 + $0x2c] sm:$0xf0] }
 0x2c1   :  { %3197 = vmatpush.bf16.msrb.mxu3 %v7062_v38  ;;  %v7014_v24 = vor.u32 %v8388_v19, %v7011_v34  ;;  %v8383_v50 = vld [vmem:[%s13431_s2 + $0x24] sm:$0xf]  ;;  %v6993_v2 = vld [vmem:[%s13431_s2 + $0x28] sm:$0xf]  ;;  %v8386_v30 = vld [vmem:[%s13431_s2 + $0x34] sm:$0xf0] }
 0x2c2   :  { %3171 = vmatpush.bf16.msra.mxu1 %v7054_v0  ;;  %v6986_v0 = vor.u32 %v8385_v12, %v6985_v44  ;;  %v6977_v47 = vld [vmem:[%s13431_s2 + $0x8] sm:$0xf]  ;;  %v8382_v17 = vld [vmem:[%s13431_s2 + $0x14] sm:$0xf0]  ;;  %v8380_v63 = vld [vmem:[%s13431_s2 + $0xc] sm:$0xf] }
 0x2c3   :  { %3184 = vmatpush.bf16.msrb.mxu2 %v7058_v41  ;;  %v6987_v41 = vld [vmem:[%s13431_s2 + $0x30] sm:$0xf0]  ;;  %v6978_v55 = vor.u32 %v8382_v17, %v6977_v47  ;;  %v6979_v1 = vld [vmem:[%s13431_s2 + $0x18] sm:$0xf0]  ;;  %v7209_v31 = vld [vmem:[%s13432_s5 + $0xe0] sm:$0xf]  ;;  %v186_v17 = vadd.f32 %v9655_v3, %v9638_v20 }
 0x2c4   :  { %v8758_v60 = vpop.eup %8757  ;;  %3159 = vmatpush.bf16.msra.mxu0 %v7034_v9  ;;  %v6990_v54 = vor.u32 %v8383_v50, %v6987_v41  ;;  %v8384_v9 = vld [vmem:[%s13431_s2 + $0x2c] sm:$0xf]  ;;  %v7211_v21 = vld [vmem:[%s13432_s5 + $0xf0] sm:$0xf0]  ;;  %v7217_v56 = vld [vmem:[%s13432_s5 + $0xe8] sm:$0xf] }
 0x2c5   :  { %v2322_v36 = vmul.f32 %v8758_v60, %v2316_v49  ;;  %v8398_v60 = vld [vmem:[%s13431_s2 + $0x94] sm:$0xf0]  ;;  %v7038_v49 = vor.u32 %v8395_v7, %v7035_v10  ;;  %v6994_v7 = vor.u32 %v8386_v30, %v6993_v2  ;;  %v6995_v10 = vld [vmem:[%s13431_s2 + $0x38] sm:$0xf0]  ;;  %v8437_v44 = vld [vmem:[%s13432_s5 + $0xcc] sm:$0xf0] }
 0x2c6   :  { %v8442_v45 = vld [vmem:[%s13432_s5 + $0xf4] sm:$0xf0]  ;;  %v8435_v12 = vld [vmem:[%s13432_s5 + $0xc4] sm:$0xf]  ;;  %v7161_v3 = vld [vmem:[%s13432_s5 + $0x80] sm:$0xf] }
 0x2c7   :  { %v2326_v51 = vpack.c.bf16 %v2322_v36, %v2322_v36  ;;  %v7042_v36 = vor.u32 %v8398_v60, %v7041_v58  ;;  %3172 = vmatpush.bf16.msra.mxu1 %v7038_v49  ;;  %v6998_v58 = vor.u32 %v8384_v9, %v6995_v10  ;;  %v7218_v19 = vor.u32 %v8442_v45, %v7217_v56  ;;  %v8438_v30 = vld [vmem:[%s13432_s5 + $0xd4] sm:$0xf0]  ;;  %v8427_v56 = vld [vmem:[%s13432_s5 + $0x84] sm:$0xf] }
 0x2c8   :  { %3160 = vmatpush.bf16.msra.mxu0 %v7018_v18  ;;  %v215_v18 = vadd.f32 %v9657_v46, %v9641_v53  ;;  %v6982_v46 = vor.u32 %v8380_v63, %v6979_v1  ;;  %v8434_v47 = vld [vmem:[%s13432_s5 + $0xb4] sm:$0xf0]  ;;  %v8432_v1 = vld [vmem:[%s13432_s5 + $0xac] sm:$0xf] }
 0x2c9   :  { %2328 = vst [vmem:[#allocation5 + $0x14] sm:$0xf] %v2326_v51  ;;  %2783 = vmatmul.bf16.vlgmr.msrb.gmra.mxu0 %v2326_v51  ;;  %2796 = vmatmul.bf16.vlgmr.msrb.gmra.mxu1 %v2326_v51  ;;  %v8430_v45 = vld [vmem:[%s13432_s5 + $0x94] sm:$0xf0] }
 0x2ca   :  { %2809 = vmatmul.bf16.vlgmr.msra.gmra.mxu2 %v2326_v51  ;;  %2822 = vmatmul.bf16.vlgmr.msra.gmra.mxu3 %v2326_v51  ;;  %v8396_v51 = vld [vmem:[%s13431_s2 + $0x8c] sm:$0xf] }
 0x2cb   :  { %v7046_v33 = vor.u32 %v8396_v51, %v7043_v27  ;;  %3185 = vmatpush.bf16.msrb.mxu2 %v7042_v36  ;;  %3173 = vmatpush.bf16.msra.mxu1 %v7022_v16  ;;  %v8379_v36 = vld [vmem:[%s13431_s2 + $0x4] sm:$0xf]  ;;  %v6971_v51 = vld [vmem:[%s13431_s2 + $0x10] sm:$0xf0]  ;;  %v8441_v16 = vld [vmem:[%s13432_s5 + $0xec] sm:$0xf0] }
 0x2cc   :  { %3161 = vmatpush.bf16.msra.mxu0 %v7002_v52  ;;  %v7210_v39 = vor.u32 %v8441_v16, %v7209_v31  ;;  %v7187_v31 = vld [vmem:[%s13432_s5 + $0xb8] sm:$0xf0] }
 0x2cd   :  { %3198 = vmatpush.bf16.msrb.mxu3 %v7046_v33  ;;  %v6974_v33 = vor.u32 %v8379_v36, %v6971_v51  ;;  %v7179_v36 = vld [vmem:[%s13432_s5 + $0xb0] sm:$0xf0]  ;;  %v7185_v51 = vld [vmem:[%s13432_s5 + $0xa8] sm:$0xf] }
 0x2cf   :  { %3186 = vmatpush.bf16.msrb.mxu2 %v7026_v13  ;;  %3174 = vmatpush.bf16.msra.mxu1 %v7006_v26  ;;  %v8440_v26 = vld [vmem:[%s13432_s5 + $0xec] sm:$0xf] }
 0x2d0   :  { %3162 = vmatpush.bf16.msra.mxu0 %v6986_v0  ;;  %v7201_v0 = vld [vmem:[%s13432_s5 + $0xc8] sm:$0xf] }
 0x2d1   :  { %3199 = vmatpush.bf16.msrb.mxu3 %v7030_v42  ;;  %v8439_v42 = vld [vmem:[%s13432_s5 + $0xe4] sm:$0xf]  ;;  %v7202_v9 = vor.u32 %v8438_v30, %v7201_v0 }
 0x2d2   :  { %v7214_v40 = vor.u32 %v8439_v42, %v7211_v21  ;;  %v8423_v30 = vld [vmem:[%s13432_s5 + $0x64] sm:$0xf] }
 0x2d3   :  { %3187 = vmatpush.bf16.msrb.mxu2 %v7010_v43  ;;  %3175 = vmatpush.bf16.msra.mxu1 %v6990_v54  ;;  %v7219_v43 = vld [vmem:[%s13432_s5 + $0xf8] sm:$0xf0] }
 0x2d4   :  { %v7222_v34 = vor.u32 %v8440_v26, %v7219_v43 }
 0x2d5   :  { %3200 = vmatpush.bf16.msrb.mxu3 %v7014_v24  ;;  %v7193_v24 = vld [vmem:[%s13432_s5 + $0xc0] sm:$0xf] }
 0x2d7   :  { %3188 = vmatpush.bf16.msrb.mxu2 %v6994_v7  ;;  %3176 = vmatpush.bf16.msra.mxu1 %v6974_v33 }
 0x2d9   :  { %3201 = vmatpush.bf16.msrb.mxu3 %v6998_v58  ;;  %v7177_v58 = vld [vmem:[%s13432_s5 + $0xa0] sm:$0xf] }
 0x2db   :  { %3189 = vmatpush.bf16.msrb.mxu2 %v6978_v55  ;;  %3418 = vmatpush.bf16.msrb.mxu1 %v7214_v40  ;;  %v7186_v55 = vor.u32 %v8434_v47, %v7185_v51  ;;  %v7099_v47 = vld [vmem:[%s13432_s5 + $0x10] sm:$0xf0] }
 0x2dd   :  { %3202 = vmatpush.bf16.msrb.mxu3 %v6982_v46  ;;  %v8429_v46 = vld [vmem:[%s13432_s5 + $0x8c] sm:$0xf0] }
 0x2de   :  { %v7162_v21 = vor.u32 %v8429_v46, %v7161_v3  ;;  %v7131_v3 = vld [vmem:[%s13432_s5 + $0x50] sm:$0xf0]  ;;  %v7137_v46 = vld [vmem:[%s13432_s5 + $0x48] sm:$0xf] }
 0x2df   :  { %3431 = vmatpush.bf16.msra.mxu2 %v7218_v19 }
 0x2e1   :  { %3444 = vmatpush.bf16.msra.mxu3 %v7222_v34 }
 0x2e3   :  { %3432 = vmatpush.bf16.msra.mxu2 %v7202_v9  ;;  %v8426_v9 = vld [vmem:[%s13432_s5 + $0x74] sm:$0xf0] }
 0x2e7   :  { %3433 = vmatpush.bf16.msra.mxu2 %v7186_v55  ;;  %v8421_v55 = vld [vmem:[%s13432_s5 + $0x4c] sm:$0xf0] }
 0x333   :  { %v2535_v8 = vpop.f32.mrf.mxu0  ;;  %v2548_v48 = vpop.f32.mrf.mxu1 }
 0x334   :  { %v2536_v38 = vadd.f32 %v2535_v8, %v9505_v28  ;;  %v2549_v59 = vadd.f32 %v2548_v48, %v9511_v32  ;;  %v6969_v28 = vld [vmem:[%s13431_s2] sm:$0xf]  ;;  %v8381_v32 = vld [vmem:[%s13431_s2 + $0xc] sm:$0xf0]  ;;  %v7194_v8 = vor.u32 %v8437_v44, %v7193_v24  ;;  %v7195_v48 = vld [vmem:[%s13432_s5 + $0xd0] sm:$0xf0] }
 0x335   :  { %v6970_v27 = vor.u32 %v8381_v32, %v6969_v28  ;;  %v7198_v2 = vor.u32 %v8435_v12, %v7195_v48  ;;  %v8431_v32 = vld [vmem:[%s13432_s5 + $0xa4] sm:$0xf]  ;;  %v8428_v12 = vld [vmem:[%s13432_s5 + $0x8c] sm:$0xf] }
 0x336   :  { %v6961_v60 = vmul.f32 -1.442695, %v2536_v38  ;;  %v6962_v49 = vmul.f32 -1.442695, %v2549_v59  ;;  %v8436_v38 = vld [vmem:[%s13432_s5 + $0xcc] sm:$0xf] }
 0x337   :  { %3163 = vmatpush.bf16.msra.mxu0 %v6970_v27  ;;  %v7203_v59 = vld [vmem:[%s13432_s5 + $0xd8] sm:$0xf0]  ;;  %3419 = vmatpush.bf16.msrb.mxu1 %v7198_v2  ;;  %v8425_v2 = vld [vmem:[%s13432_s5 + $0x6c] sm:$0xf0] }
 0x338   :  { %8759 = vpow2.f32 %v6961_v60  ;;  %v7206_v10 = vor.u32 %v8436_v38, %v7203_v59  ;;  %v8433_v60 = vld [vmem:[%s13432_s5 + $0xac] sm:$0xf0]  ;;  %v7147_v59 = vld [vmem:[%s13432_s5 + $0x70] sm:$0xf0] }
 0x339   :  { %8761 = vpow2.f32 %v6962_v49  ;;  %v7178_v28 = vor.u32 %v8433_v60, %v7177_v58 }
 0x33a   :  { %v11472_v13 = vpop.f32.mrf.mxu2  ;;  %v2574_v29 = vpop.f32.mrf.mxu3  ;;  %3445 = vmatpush.bf16.msra.mxu3 %v7206_v10 }
 0x33b   :  { %v2575_v14 = vadd.f32 %v2574_v29, %v215_v18  ;;  %v2537_v52 = vpop.f32.mrf.mxu0  ;;  %v2550_v5 = vpop.f32.mrf.mxu1  ;;  %3405 = vmatpush.bf16.msrb.mxu0 %v7210_v39  ;;  %v7182_v18 = vor.u32 %v8431_v32, %v7179_v36  ;;  %v7190_v29 = vor.u32 %v8432_v1, %v7187_v31  ;;  %v2562_v42 = vadd.f32 %v11472_v13, %v186_v17  ;;  %v8424_v32 = vld [vmem:[%s13432_s5 + $0x6c] sm:$0xf]  ;;  %v7155_v36 = vld [vmem:[%s13432_s5 + $0x78] sm:$0xf0] }
 0x33c   :  { %v7169_v52 = vld [vmem:[%s13432_s5 + $0x88] sm:$0xf] }
 0x33d   :  { %v6963_v50 = vmul.f32 -1.442695, %v2575_v14  ;;  %3420 = vmatpush.bf16.msrb.mxu1 %v7182_v18  ;;  %v7163_v14 = vld [vmem:[%s13432_s5 + $0x90] sm:$0xf0]  ;;  %v7170_v44 = vor.u32 %v8430_v45, %v7169_v52  ;;  %v7150_v18 = vor.u32 %v8423_v30, %v7147_v59  ;;  %v8422_v52 = vld [vmem:[%s13432_s5 + $0x54] sm:$0xf0] }
 0x33e   :  { %v8760_v41 = vpop.eup %8759  ;;  %3446 = vmatpush.bf16.msra.mxu3 %v7190_v29  ;;  %v7166_v13 = vor.u32 %v8427_v56, %v7163_v14  ;;  %v7139_v45 = vld [vmem:[%s13432_s5 + $0x58] sm:$0xf0]  ;;  %v7138_v30 = vor.u32 %v8422_v52, %v7137_v46  ;;  %v7115_v59 = vld [vmem:[%s13432_s5 + $0x30] sm:$0xf0] }
 0x33f   :  { %v8762_v54 = vpop.eup %8761  ;;  %v11516_v7 = vadd.f32 1.0, %v8760_v41  ;;  %8763 = vpow2.f32 %v6963_v50  ;;  %3406 = vmatpush.bf16.msrb.mxu0 %v7194_v8  ;;  %v7171_v50 = vld [vmem:[%s13432_s5 + $0x98] sm:$0xf0]  ;;  %v7145_v41 = vld [vmem:[%s13432_s5 + $0x60] sm:$0xf]  ;;  %3434 = vmatpush.bf16.msra.mxu2 %v7170_v44 }
 0x340   :  { %v11524_v49 = vadd.f32 1.0, %v8762_v54  ;;  %v7153_v54 = vld [vmem:[%s13432_s5 + $0x68] sm:$0xf] }
 0x341   :  { %8765 = vrcp.f32 %v11516_v7  ;;  %v2842_v63 = vand.u32 2147483648, %v11516_v7  ;;  %v2840_v16 = vand.u32 2147483647, %v11516_v7  ;;  %vm2836_vm10 = vweird.f32 %v11516_v7  ;;  %3421 = vmatpush.bf16.msrb.mxu1 %v7166_v13  ;;  %v8420_v13 = vld [vmem:[%s13432_s5 + $0x4c] sm:$0xf] }
 0x342   :  { %8767 = vrcp.f32 %v11524_v49  ;;  %v2563_v27 = vpop.f32.mrf.mxu2  ;;  %v2576_v33 = vpop.f32.mrf.mxu3  ;;  %v2859_v5 = vand.u32 2147483647, %v11524_v49  ;;  %v2861_v43 = vand.u32 2147483648, %v11524_v49  ;;  %v7154_v31 = vor.u32 %v8426_v9, %v7153_v54  ;;  %v7121_v54 = vld [vmem:[%s13432_s5 + $0x28] sm:$0xf] }
 0x343   :  { %3407 = vmatpush.bf16.msrb.mxu0 %v7178_v28  ;;  %v11575_v19 = vor.u32 1.1754944e-38, %v2842_v63  ;;  %vm11587_vm9 = vcmp.eq.f32.partialorder %v2840_v16, 8.507059e+37  ;;  %v7174_v28 = vor.u32 %v8428_v12, %v7171_v50  ;;  %v7146_v33 = vor.u32 %v8425_v2, %v7145_v41  ;;  %v7113_v41 = vld [vmem:[%s13432_s5 + $0x20] sm:$0xf]  ;;  %v8417_v2 = vld [vmem:[%s13432_s5 + $0x2c] sm:$0xf0] }
 0x344   :  { %v2862_v27 = vor.u32 1.1754944e-38, %v2861_v43  ;;  %v7158_v16 = vor.u32 %v8424_v32, %v7155_v36  ;;  %vm2855_vm14 = vweird.f32 %v11524_v49  ;;  %vm11672_vm0 = vcmp.eq.f32.partialorder %v2859_v5, 8.507059e+37  ;;  %3435 = vmatpush.bf16.msra.mxu2 %v7154_v31  ;;  %v7097_v32 = vld [vmem:[%s13432_s5] sm:$0xf] }
 0x345   :  { %v8764_v39 = vpop.eup %8763  ;;  %3447 = vmatpush.bf16.msra.mxu3 %v7174_v28  ;;  %3422 = vmatpush.bf16.msrb.mxu1 %v7150_v18  ;;  %v7105_v18 = vld [vmem:[%s13432_s5 + $0x8] sm:$0xf] }
 0x346   :  { %v11567_v40 = vadd.f32 1.0, %v8764_v39  ;;  %v2784_v34 = vpop.f32.mrf.mxu0  ;;  %v2797_v24 = vpop.f32.mrf.mxu1 }
 0x347   :  { %v11572_v26 = vpop.eup %8765  ;;  %3408 = vmatpush.bf16.msrb.mxu0 %v7162_v21  ;;  %v2785_v58 = vadd.f32 %v2784_v34, %v9610_v35  ;;  %v2798_v60 = vadd.f32 %v2797_v24, %v9613_v37  ;;  %v7129_v35 = vld [vmem:[%s13432_s5 + $0x40] sm:$0xf] }
 0x348   :  { %v11583_v8 = vpop.eup %8767  ;;  %v2832_v48 = vmul.f32 %v11572_v26, %v11516_v7  ;;  %8769 = vrcp.f32 %v11567_v40  ;;  %vm2837_vm11 = vweird.f32 %v11572_v26  ;;  %v7130_v29 = vor.u32 %v8421_v55, %v7129_v35  ;;  %v8419_v7 = vld [vmem:[%s13432_s5 + $0x44] sm:$0xf]  ;;  %3436 = vmatpush.bf16.msra.mxu2 %v7138_v30  ;;  %v8414_v55 = vld [vmem:[%s13432_s5 + $0x14] sm:$0xf0] }
 0x349   :  { %v2851_v38 = vmul.f32 %v11583_v8, %v11524_v49  ;;  %8771 = vtanh.f32 %v2562_v42  ;;  %vm2856_vm12 = vweird.f32 %v11583_v8  ;;  %vm11631_vm13 = vmor %vm2836_vm10, %vm2837_vm11  ;;  %v6964_v17 = vmul.f32 -1.442695, %v2785_v58  ;;  %3448 = vmatpush.bf16.msra.mxu3 %v7158_v16  ;;  %v8418_v58 = vld [vmem:[%s13432_s5 + $0x34] sm:$0xf0] }
 0x34a   :  { %v2833_v10 = vsub.f32 1.0, %v2832_v48  ;;  %v6965_v63 = vmul.f32 -1.442695, %v2798_v60  ;;  %v7134_v14 = vor.u32 %v8419_v7, %v7131_v3  ;;  %vm11665_vm15 = vmor %vm2855_vm14, %vm2856_vm12  ;;  %v8416_v60 = vld [vmem:[%s13432_s5 + $0x2c] sm:$0xf]  ;;  %vm2875_vm2 = vweird.f32 %v11567_v40 }
 0x34b   :  { %v2852_v51 = vsub.f32 1.0, %v2851_v38  ;;  %3409 = vmatpush.bf16.msrb.mxu0 %v7146_v33  ;;  %8773 = vpow2.f32 %v6964_v17  ;;  %v8415_v38 = vld [vmem:[%s13432_s5 + $0x24] sm:$0xf]  ;;  %v7114_v33 = vor.u32 %v8417_v2, %v7113_v41  ;;  %v8412_v7 = vld [vmem:[%s13432_s5 + $0xc] sm:$0xf] }
 0x34c   :  { %v2834_v37 = vmul.f32 %v11572_v26, %v2833_v10  ;;  %8775 = vpow2.f32 %v6965_v63  ;;  %v7142_v10 = vor.u32 %v8420_v13, %v7139_v45  ;;  %3423 = vmatpush.bf16.msrb.mxu1 %v7134_v14  ;;  %v7118_v35 = vor.u32 %v8415_v38, %v7115_v59  ;;  %v7107_v3 = vld [vmem:[%s13432_s5 + $0x18] sm:$0xf0] }
 0x34d   :  { %v2853_v1 = vmul.f32 %v11583_v8, %v2852_v51  ;;  %v11652_v21 = vpop.f32.mrf.mxu2  ;;  %v2823_v56 = vpop.f32.mrf.mxu3  ;;  %v2881_v13 = vand.u32 2147483648, %v11567_v40  ;;  %v7106_v45 = vor.u32 %v8414_v55, %v7105_v18  ;;  %v7110_v34 = vor.u32 %v8412_v7, %v7107_v3 }
 0x34e   :  { %v11648_v39 = vpop.eup %8769  ;;  %v2835_v42 = vadd.f32 %v11572_v26, %v2834_v37  ;;  %v2786_v50 = vpop.f32.mrf.mxu0  ;;  %v2824_v5 = vadd.f32 %v2823_v56, %v9801_v4  ;;  %v8411_v37 = vld [vmem:[%s13432_s5 + $0x4] sm:$0xf]  ;;  %3449 = vmatpush.bf16.msra.mxu3 %v7142_v10  ;;  %v2811_v2 = vadd.f32 %v11652_v21, %v9788_v25 }
 0x34f   :  { %v8772_v43 = vpop.eup %8771  ;;  %v2854_v24 = vadd.f32 %v11583_v8, %v2853_v1  ;;  %v2871_v12 = vmul.f32 %v11648_v39, %v11567_v40  ;;  %v2799_v48 = vpop.f32.mrf.mxu1  ;;  %3410 = vmatpush.bf16.msrb.mxu0 %v7130_v29  ;;  %vm2876_vm1 = vweird.f32 %v11648_v39  ;;  %v7102_v52 = vor.u32 %v8411_v37, %v7099_v47 }
 0x350   :  { %v2839_v49 = vsel %vm11631_vm13, %v11572_v26, %v2835_v42  ;;  %3424 = vmatpush.bf16.msrb.mxu1 %v7118_v35  ;;  %vm2877_vm3 = vmor %vm2875_vm2, %vm2876_vm1 }
 0x351   :  { %v2844_v26 = vsel %vm11587_vm9, %v11575_v19, %v2839_v49  ;;  %v2858_v4 = vsel %vm11665_vm15, %v11583_v8, %v2854_v24  ;;  %v2872_v9 = vsub.f32 1.0, %v2871_v12  ;;  %v6966_v19 = vmul.f32 -1.442695, %v2824_v5  ;;  %v7123_v8 = vld [vmem:[%s13432_s5 + $0x38] sm:$0xf0]  ;;  %v8774_v17 = vpop.eup %8773 }
 0x352   :  { %v2863_v28 = vsel %vm11672_vm0, %v2862_v27, %v2858_v4  ;;  %v2886_v0 = vmul.f32 %v8772_v43, %v2844_v26  ;;  %v8413_v27 = vld [vmem:[%s13432_s5 + $0xc] sm:$0xf0]  ;;  %v7126_v63 = vor.u32 %v8416_v60, %v7123_v8  ;;  %v8776_v1 = vpop.eup %8775  ;;  %v11736_v16 = vadd.f32 1.0, %v8774_v17 }
 0x353   :  { %v2885_v36 = vmul.f32 %v2863_v28, %v11231_v6  ;;  %v2873_v51 = vmul.f32 %v11648_v39, %v2872_v9  ;;  %8777 = vpow2.f32 %v6966_v19  ;;  %v7122_v6 = vor.u32 %v8418_v58, %v7121_v54  ;;  %3411 = vmatpush.bf16.msrb.mxu0 %v7114_v33 }
 0x354   :  { %v7098_v29 = vor.u32 %v8413_v27, %v7097_v32  ;;  %v11745_v46 = vadd.f32 1.0, %v8776_v1  ;;  %v2879_v43 = vand.u32 2147483647, %v11567_v40  ;;  %3450 = vmatpush.bf16.msra.mxu3 %v7126_v63  ;;  %3425 = vmatpush.bf16.msrb.mxu1 %v7102_v52  ;;  %v2882_v12 = vor.u32 1.1754944e-38, %v2881_v13  ;;  %v7345_v52 = vld [vmem:[%s13431_s2 + $0xf0] sm:$0xf0] }
 0x355   :  { %v11734_v31 = vadd.f32 %v2886_v0, %v2885_v36  ;;  %v2812_v42 = vpop.f32.mrf.mxu2  ;;  %v2825_v56 = vpop.f32.mrf.mxu3  ;;  %v2874_v14 = vadd.f32 %v11648_v39, %v2873_v51  ;;  %3437 = vmatpush.bf16.msra.mxu2 %v7122_v6  ;;  %v2905_v26 = vand.u32 2147483648, %v11736_v16  ;;  %v2903_v25 = vand.u32 2147483647, %v11736_v16  ;;  %v7351_v13 = vld [vmem:[%s13431_s2 + $0xe8] sm:$0xf] }
 0x356   :  { %vm2880_vm4 = vcmp.eq.f32.partialorder %v2879_v43, 8.507059e+37  ;;  %v2924_v9 = vand.u32 2147483648, %v11745_v46  ;;  %v2922_v58 = vand.u32 2147483647, %v11745_v46  ;;  %vm2899_vm7 = vweird.f32 %v11736_v16  ;;  %v8473_v42 = vld [vmem:[%s13431_s2 + $0xec] sm:$0xf0] }
 0x357   :  { %8779 = vtanh.f32 %v11734_v31  ;;  %3412 = vmatpush.bf16.msrb.mxu0 %v7098_v29  ;;  %v2878_v44 = vsel %vm2877_vm3, %v11648_v39, %v2874_v14  ;;  %vm2918_vm8 = vweird.f32 %v11745_v46  ;;  %v2906_v0 = vor.u32 1.1754944e-38, %v2905_v26  ;;  %v8471_v56 = vld [vmem:[%s13431_s2 + $0xe4] sm:$0xf]  ;;  %v7311_v26 = vld [vmem:[%s13431_s2 + $0xa0] sm:$0xf] }
 0x358   :  { %8781 = vrcp.f32 %v11736_v16  ;;  %3451 = vmatpush.bf16.msra.mxu3 %v7110_v34  ;;  %v2883_v48 = vsel %vm2880_vm4, %v2882_v12, %v2878_v44  ;;  %v2925_v32 = vor.u32 1.1754944e-38, %v2924_v9  ;;  %vm2904_vm11 = vcmp.eq.f32.partialorder %v2903_v25, 8.507059e+37  ;;  %v7353_v44 = vld [vmem:[%s13431_s2 + $0xf8] sm:$0xf0]  ;;  %v8463_v9 = vld [vmem:[%s13431_s2 + $0xa4] sm:$0xf] }
 0x359   :  { %8783 = vrcp.f32 %v11745_v46  ;;  %v8778_v24 = vpop.eup %8777  ;;  %3438 = vmatpush.bf16.msra.mxu2 %v7106_v45  ;;  %vm2923_vm12 = vcmp.eq.f32.partialorder %v2922_v58, 8.507059e+37  ;;  %v8474_v45 = vld [vmem:[%s13431_s2 + $0xf4] sm:$0xf0]  ;;  %v7348_v43 = vor.u32 %v8471_v56, %v7345_v52  ;;  %v7313_v25 = vld [vmem:[%s13431_s2 + $0xb0] sm:$0xf0] }
 0x35a   :  { %v2932_v50 = vadd.f32 1.0, %v8778_v24  ;;  %v7352_v34 = vor.u32 %v8474_v45, %v7351_v13  ;;  %v8472_v24 = vld [vmem:[%s13431_s2 + $0xec] sm:$0xf]  ;;  %v8466_v58 = vld [vmem:[%s13431_s2 + $0xb4] sm:$0xf0] }
 0x35b   :  { %v7356_v12 = vor.u32 %v8472_v24, %v7353_v44  ;;  %v7289_v52 = vld [vmem:[%s13431_s2 + $0x78] sm:$0xf0]  ;;  %v7263_v45 = vld [vmem:[%s13431_s2 + $0x40] sm:$0xf]  ;;  %v7265_v44 = vld [vmem:[%s13431_s2 + $0x50] sm:$0xf0] }
 0x35c   :  { %8785 = vrcp.f32 %v2932_v50  ;;  %v2944_v18 = vand.u32 2147483648, %v2932_v50  ;;  %vm2938_vm14 = vweird.f32 %v2932_v50  ;;  %v2942_v55 = vand.u32 2147483647, %v2932_v50 }
 0x35d   :  { %v8780_v40 = vpop.eup %8779  ;;  %8787 = vtanh.f32 %v2811_v2  ;;  %v7329_v2 = vld [vmem:[%s13431_s2 + $0xd0] sm:$0xf0] }
 0x35e   :  { %v8782_v41 = vpop.eup %8781  ;;  %v2889_v49 = vmul.f32 %v8780_v40, %v2883_v48  ;;  %vm2943_vm0 = vcmp.eq.f32.partialorder %v2942_v55, 8.507059e+37  ;;  %v8469_v40 = vld [vmem:[%s13431_s2 + $0xcc] sm:$0xf0]  ;;  %v8467_v48 = vld [vmem:[%s13431_s2 + $0xc4] sm:$0xf] }
 0x35f   :  { %v8784_v5 = vpop.eup %8783  ;;  %v2895_v30 = vmul.f32 %v8782_v41, %v11736_v16  ;;  %vm2900_vm5 = vweird.f32 %v8782_v41  ;;  %v2945_v16 = vor.u32 1.1754944e-38, %v2944_v18  ;;  %v7305_v18 = vld [vmem:[%s13431_s2 + $0x98] sm:$0xf0] }
 0x360   :  { %v2914_v38 = vmul.f32 %v8784_v5, %v11745_v46  ;;  %v2953_v39 = vpack.c.bf16 %v2889_v49, %v2889_v49  ;;  %vm2919_vm6 = vweird.f32 %v8784_v5  ;;  %vm2901_vm9 = vmor %vm2899_vm7, %vm2900_vm5  ;;  %v7335_v49 = vld [vmem:[%s13431_s2 + $0xc8] sm:$0xf] }
 0x361   :  { %v2896_v59 = vsub.f32 1.0, %v2895_v30  ;;  %vm2920_vm10 = vmor %vm2918_vm8, %vm2919_vm6  ;;  %v7332_v30 = vor.u32 %v8467_v48, %v7329_v2  ;;  %v7273_v2 = vld [vmem:[%s13431_s2 + $0x58] sm:$0xf0] }
 0x362   :  { %v2915_v54 = vsub.f32 1.0, %v2914_v38  ;;  %2955 = vst [vmem:[#allocation4 + $0xc] sm:$0xf] %v2953_v39  ;;  %3164 = vmatmul.bf16.vlgmr.msra.gmra.mxu0 %v2953_v39  ;;  %3177 = vmatmul.bf16.vlgmr.msra.gmra.mxu1 %v2953_v39  ;;  %v8786_v4 = vpop.eup %8785 }
 0x363   :  { %v2897_v10 = vmul.f32 %v8782_v41, %v2896_v59  ;;  %3190 = vmatmul.bf16.vlgmr.msrb.gmra.mxu2 %v2953_v39  ;;  %3203 = vmatmul.bf16.vlgmr.msrb.gmra.mxu3 %v2953_v39  ;;  %v2934_v60 = vmul.f32 %v8786_v4, %v2932_v50  ;;  %v8788_v51 = vpop.eup %8787  ;;  %vm2939_vm13 = vweird.f32 %v8786_v4  ;;  %v7327_v50 = vld [vmem:[%s13431_s2 + $0xc0] sm:$0xf]  ;;  %v8468_v39 = vld [vmem:[%s13431_s2 + $0xcc] sm:$0xf]  ;;  %v7337_v59 = vld [vmem:[%s13431_s2 + $0xd8] sm:$0xf0] }
 0x364   :  { %v2916_v21 = vmul.f32 %v8784_v5, %v2915_v54  ;;  %vm2940_vm15 = vmor %vm2938_vm14, %vm2939_vm13  ;;  %3799 = vmatpush.bf16.msra.mxu1 %v7348_v43  ;;  %3812 = vmatpush.bf16.msrb.mxu2 %v7352_v34  ;;  %v7340_v54 = vor.u32 %v8468_v39, %v7337_v59  ;;  %v8453_v43 = vld [vmem:[%s13431_s2 + $0x4c] sm:$0xf0]  ;;  %v8451_v34 = vld [vmem:[%s13431_s2 + $0x44] sm:$0xf] }
 0x365   :  { %v2898_v28 = vadd.f32 %v8782_v41, %v2897_v10  ;;  %v2935_v8 = vsub.f32 1.0, %v2934_v60  ;;  %3825 = vmatpush.bf16.msrb.mxu3 %v7356_v12  ;;  %v7316_v60 = vor.u32 %v8463_v9, %v7313_v25  ;;  %v7264_v24 = vor.u32 %v8453_v43, %v7263_v45  ;;  %v7271_v12 = vld [vmem:[%s13431_s2 + $0x48] sm:$0xf]  ;;  %v8449_v39 = vld [vmem:[%s13431_s2 + $0x2c] sm:$0xf0] }
 0x366   :  { %v2917_v19 = vadd.f32 %v8784_v5, %v2916_v21  ;;  %v7319_v21 = vld [vmem:[%s13431_s2 + $0xa8] sm:$0xf]  ;;  %v8447_v59 = vld [vmem:[%s13431_s2 + $0x24] sm:$0xf]  ;;  %v7249_v25 = vld [vmem:[%s13431_s2 + $0x30] sm:$0xf0] }
 0x367   :  { %v2902_v36 = vsel %vm2901_vm9, %v8782_v41, %v2898_v28  ;;  %v2936_v47 = vmul.f32 %v8786_v4, %v2935_v8  ;;  %v7328_v41 = vor.u32 %v8469_v40, %v7327_v50  ;;  %v7320_v28 = vor.u32 %v8466_v58, %v7319_v21  ;;  %v8454_v50 = vld [vmem:[%s13431_s2 + $0x54] sm:$0xf0]  ;;  %v7255_v21 = vld [vmem:[%s13431_s2 + $0x28] sm:$0xf] }
 0x368   :  { %v2907_v33 = vsel %vm2904_vm11, %v2906_v0, %v2902_v36  ;;  %v2921_v35 = vsel %vm2920_vm10, %v8784_v5, %v2917_v19  ;;  %v8470_v5 = vld [vmem:[%s13431_s2 + $0xd4] sm:$0xf0]  ;;  %3800 = vmatpush.bf16.msra.mxu1 %v7332_v30  ;;  %v8464_v0 = vld [vmem:[%s13431_s2 + $0xac] sm:$0xf]  ;;  %v7321_v19 = vld [vmem:[%s13431_s2 + $0xb8] sm:$0xf0]  ;;  %v7268_v40 = vor.u32 %v8451_v34, %v7265_v44  ;;  %v7272_v48 = vor.u32 %v8454_v50, %v7271_v12 }
 0x369   :  { %v2926_v27 = vsel %vm2923_vm12, %v2925_v32, %v2921_v35  ;;  %v2949_v37 = vmul.f32 %v8788_v51, %v2907_v33  ;;  %v2937_v63 = vadd.f32 %v8786_v4, %v2936_v47  ;;  %v7336_v38 = vor.u32 %v8470_v5, %v7335_v49  ;;  %3826 = vmatpush.bf16.msrb.mxu3 %v7340_v54  ;;  %v7295_v32 = vld [vmem:[%s13431_s2 + $0x80] sm:$0xf]  ;;  %v8461_v36 = vld [vmem:[%s13431_s2 + $0x8c] sm:$0xf0]  ;;  %v8459_v51 = vld [vmem:[%s13431_s2 + $0x84] sm:$0xf] }
 0x36a   :  { %v2948_v17 = vmul.f32 %v2926_v27, %v11264_v61  ;;  %v7343_v61 = vld [vmem:[%s13431_s2 + $0xe0] sm:$0xf]  ;;  %v7324_v8 = vor.u32 %v8464_v0, %v7321_v19  ;;  %v7296_v33 = vor.u32 %v8461_v36, %v7295_v32  ;;  %v7297_v35 = vld [vmem:[%s13431_s2 + $0x90] sm:$0xf0]  ;;  %v7303_v27 = vld [vmem:[%s13431_s2 + $0x88] sm:$0xf] }
 0x36b   :  { %v2941_v1 = vsel %vm2940_vm15, %v8786_v4, %v2937_v63  ;;  %v7344_v14 = vor.u32 %v8473_v42, %v7343_v61  ;;  %3813 = vmatpush.bf16.msrb.mxu2 %v7336_v38  ;;  %v8465_v4 = vld [vmem:[%s13431_s2 + $0xac] sm:$0xf0]  ;;  %v7300_v47 = vor.u32 %v8459_v51, %v7297_v35  ;;  %v8460_v63 = vld [vmem:[%s13431_s2 + $0x8c] sm:$0xf]  ;;  %v8458_v61 = vld [vmem:[%s13431_s2 + $0x74] sm:$0xf0] }
 0x36c   :  { %v11768_v6 = vadd.f32 %v2949_v37, %v2948_v17  ;;  %v2946_v7 = vsel %vm2943_vm0, %v2945_v16, %v2941_v1  ;;  %v7312_v10 = vor.u32 %v8465_v4, %v7311_v26  ;;  %3801 = vmatpush.bf16.msra.mxu1 %v7316_v60  ;;  %v8462_v37 = vld [vmem:[%s13431_s2 + $0x94] sm:$0xf0]  ;;  %v7308_v55 = vor.u32 %v8460_v63, %v7305_v18  ;;  %v7279_v1 = vld [vmem:[%s13431_s2 + $0x60] sm:$0xf]  ;;  %v8457_v16 = vld [vmem:[%s13431_s2 + $0x6c] sm:$0xf0] }
 0x36d   :  { %3786 = vmatpush.bf16.msra.mxu0 %v7344_v14  ;;  %3827 = vmatpush.bf16.msrb.mxu3 %v7324_v8  ;;  %v7304_v17 = vor.u32 %v8462_v37, %v7303_v27  ;;  %v8456_v14 = vld [vmem:[%s13431_s2 + $0x6c] sm:$0xf]  ;;  %v7247_v38 = vld [vmem:[%s13431_s2 + $0x20] sm:$0xf]  ;;  %v13511_v54 = vld [vmem:[#allocation8_spill] sm:$0xff]  ;;  %v7252_v60 = vor.u32 %v8447_v59, %v7249_v25 }
 0x36e   :  { %8789 = vtanh.f32 %v11768_v6  ;;  %v7292_v13 = vor.u32 %v8456_v14, %v7289_v52  ;;  %v13512_v4 = vld [vmem:[#allocation9_spill] sm:$0xff]  ;;  %v8448_v0 = vld [vmem:[%s13431_s2 + $0x2c] sm:$0xf]  ;;  %v7231_v51 = vld [vmem:[%s13431_s2] sm:$0xf] }
 0x36f   :  { %3814 = vmatpush.bf16.msrb.mxu2 %v7320_v28  ;;  %v8450_v58 = vld [vmem:[%s13431_s2 + $0x34] sm:$0xf0]  ;;  %v7257_v19 = vld [vmem:[%s13431_s2 + $0x38] sm:$0xf0]  ;;  %v8443_v35 = vld [vmem:[%s13431_s2 + $0x4] sm:$0xf] }
 0x370   :  { %3802 = vmatpush.bf16.msra.mxu1 %v7300_v47  ;;  %v7256_v28 = vor.u32 %v8450_v58, %v7255_v21  ;;  %v7260_v36 = vor.u32 %v8448_v0, %v7257_v19  ;;  %v7233_v37 = vld [vmem:[%s13431_s2 + $0x10] sm:$0xf0]  ;;  %v7239_v47 = vld [vmem:[%s13431_s2 + $0x8] sm:$0xf]  ;;  %v8506_v34 = vld [vmem:[%s13432_s5 + $0xf4] sm:$0xf0] }
 0x371   :  { %3787 = vmatpush.bf16.msra.mxu0 %v7328_v41  ;;  %3828 = vmatpush.bf16.msrb.mxu3 %v7308_v55  ;;  %v8452_v41 = vld [vmem:[%s13431_s2 + $0x4c] sm:$0xf]  ;;  %v7236_v63 = vor.u32 %v8443_v35, %v7233_v37  ;;  %v7479_v43 = vld [vmem:[%s13432_s5 + $0xe8] sm:$0xf]  ;;  %v7481_v50 = vld [vmem:[%s13432_s5 + $0xf8] sm:$0xf0] }
 0x372   :  { %v7276_v49 = vor.u32 %v8452_v41, %v7273_v2  ;;  %v8444_v55 = vld [vmem:[%s13431_s2 + $0xc] sm:$0xf]  ;;  %v7480_v12 = vor.u32 %v8506_v34, %v7479_v43  ;;  %v7463_v59 = vld [vmem:[%s13432_s5 + $0xc8] sm:$0xf]  ;;  %v7465_v25 = vld [vmem:[%s13432_s5 + $0xd8] sm:$0xf0] }
 0x373   :  { %3815 = vmatpush.bf16.msrb.mxu2 %v7304_v17  ;;  %v8446_v17 = vld [vmem:[%s13431_s2 + $0x14] sm:$0xf0]  ;;  %v8495_v0 = vld [vmem:[%s13432_s5 + $0xa4] sm:$0xf]  ;;  %v7447_v37 = vld [vmem:[%s13432_s5 + $0xa8] sm:$0xf] }
 0x374   :  { %v8790_v29 = vpop.eup %8789  ;;  %v7240_v18 = vor.u32 %v8446_v17, %v7239_v47  ;;  %v8498_v47 = vld [vmem:[%s13432_s5 + $0xb4] sm:$0xf0]  ;;  %v13516_v43 = vld [vmem:[#allocation19_spill] sm:$0xff] }
 0x375   :  { %v2952_v3 = vmul.f32 %v8790_v29, %v2946_v7  ;;  %3788 = vmatpush.bf16.msra.mxu0 %v7312_v10  ;;  %v8455_v29 = vld [vmem:[%s13431_s2 + $0x64] sm:$0xf]  ;;  %v7280_v7 = vor.u32 %v8457_v16, %v7279_v1  ;;  %3829 = vmatpush.bf16.msrb.mxu3 %v7292_v13  ;;  %v7248_v10 = vor.u32 %v8449_v39, %v7247_v38  ;;  %v7241_v1 = vld [vmem:[%s13431_s2 + $0x18] sm:$0xf0]  ;;  %v7471_v16 = vld [vmem:[%s13432_s5 + $0xe0] sm:$0xf] }
 0x376   :  { %v339_v34 = vadd.f32 %v13516_v43, %v9493_v23  ;;  %v7607_v43 = vld [vmem:[%s13431_s2 + $0xf0] sm:$0xf0] }
 0x377   :  { %v2956_v46 = vpack.c.bf16 %v2952_v3, %v2952_v3  ;;  %v7281_v3 = vld [vmem:[%s13431_s2 + $0x70] sm:$0xf0] }
 0x378   :  { %v7284_v42 = vor.u32 %v8455_v29, %v7281_v3  ;;  %v7244_v3 = vor.u32 %v8444_v55, %v7241_v1  ;;  %v7449_v55 = vld [vmem:[%s13432_s5 + $0xb8] sm:$0xf0] }
 0x379   :  { %2958 = vst [vmem:[#allocation5 + $0x10] sm:$0xf] %v2956_v46  ;;  %3413 = vmatmul.bf16.vlgmr.msrb.gmra.mxu0 %v2956_v46  ;;  %3426 = vmatmul.bf16.vlgmr.msrb.gmra.mxu1 %v2956_v46 }
 0x37a   :  { %3439 = vmatmul.bf16.vlgmr.msra.gmra.mxu2 %v2956_v46  ;;  %3452 = vmatmul.bf16.vlgmr.msra.gmra.mxu3 %v2956_v46  ;;  %v7287_v46 = vld [vmem:[%s13431_s2 + $0x68] sm:$0xf] }
 0x37b   :  { %3789 = vmatpush.bf16.msra.mxu0 %v7296_v33  ;;  %v7288_v56 = vor.u32 %v8458_v61, %v7287_v46  ;;  %3803 = vmatpush.bf16.msra.mxu1 %v7284_v42  ;;  %v8445_v33 = vld [vmem:[%s13431_s2 + $0xc] sm:$0xf0]  ;;  %v8503_v61 = vld [vmem:[%s13432_s5 + $0xe4] sm:$0xf]  ;;  %v7473_v42 = vld [vmem:[%s13432_s5 + $0xf0] sm:$0xf0] }
 0x37c   :  { %3830 = vmatpush.bf16.msrb.mxu3 %v7276_v49  ;;  %v7232_v27 = vor.u32 %v8445_v33, %v7231_v51  ;;  %v8505_v46 = vld [vmem:[%s13432_s5 + $0xec] sm:$0xf0]  ;;  %v7476_v44 = vor.u32 %v8503_v61, %v7473_v42 }
 0x37d   :  { %3816 = vmatpush.bf16.msrb.mxu2 %v7288_v56  ;;  %v13513_v56 = vld [vmem:[#allocation23_spill] sm:$0xff]  ;;  %v7472_v45 = vor.u32 %v8505_v46, %v7471_v16 }
 0x37f   :  { %3790 = vmatpush.bf16.msra.mxu0 %v7280_v7  ;;  %3804 = vmatpush.bf16.msra.mxu1 %v7268_v40  ;;  %v7455_v40 = vld [vmem:[%s13432_s5 + $0xc0] sm:$0xf] }
 0x380   :  { %3831 = vmatpush.bf16.msrb.mxu3 %v7260_v36  ;;  %v13514_v36 = vld [vmem:[#allocation22_spill] sm:$0xff] }
 0x381   :  { %3817 = vmatpush.bf16.msrb.mxu2 %v7272_v48  ;;  %v8501_v48 = vld [vmem:[%s13432_s5 + $0xcc] sm:$0xf0] }
 0x382   :  { %v7456_v49 = vor.u32 %v8501_v48, %v7455_v40 }
 0x383   :  { %3791 = vmatpush.bf16.msra.mxu0 %v7264_v24  ;;  %3805 = vmatpush.bf16.msra.mxu1 %v7252_v60  ;;  %v8504_v24 = vld [vmem:[%s13432_s5 + $0xec] sm:$0xf]  ;;  %v7439_v60 = vld [vmem:[%s13432_s5 + $0xa0] sm:$0xf] }
 0x384   :  { %3832 = vmatpush.bf16.msrb.mxu3 %v7244_v3  ;;  %v7484_v2 = vor.u32 %v8504_v24, %v7481_v50  ;;  %v8491_v3 = vld [vmem:[%s13432_s5 + $0x84] sm:$0xf]  ;;  %v7433_v50 = vld [vmem:[%s13432_s5 + $0x98] sm:$0xf0] }
 0x385   :  { %3818 = vmatpush.bf16.msrb.mxu2 %v7256_v28  ;;  %v8497_v28 = vld [vmem:[%s13432_s5 + $0xac] sm:$0xf0] }
 0x386   :  { %v7440_v35 = vor.u32 %v8497_v28, %v7439_v60  ;;  %v7415_v60 = vld [vmem:[%s13432_s5 + $0x68] sm:$0xf]  ;;  %v8490_v28 = vld [vmem:[%s13432_s5 + $0x74] sm:$0xf0] }
 0x387   :  { %3792 = vmatpush.bf16.msra.mxu0 %v7248_v10  ;;  %3806 = vmatpush.bf16.msra.mxu1 %v7236_v63  ;;  %v7448_v63 = vor.u32 %v8498_v47, %v7447_v37  ;;  %v7391_v37 = vld [vmem:[%s13432_s5 + $0x40] sm:$0xf]  ;;  %v8485_v47 = vld [vmem:[%s13432_s5 + $0x4c] sm:$0xf0] }
 0x388   :  { %4074 = vmatpush.bf16.msra.mxu3 %v7484_v2  ;;  %v7407_v2 = vld [vmem:[%s13432_s5 + $0x60] sm:$0xf] }
 0x389   :  { %3819 = vmatpush.bf16.msrb.mxu2 %v7240_v18  ;;  %v8496_v18 = vld [vmem:[%s13432_s5 + $0xac] sm:$0xf] }
 0x38a   :  { %v7452_v16 = vor.u32 %v8496_v18, %v7449_v55 }
 0x38b   :  { %3793 = vmatpush.bf16.msra.mxu0 %v7232_v27  ;;  %4048 = vmatpush.bf16.msrb.mxu1 %v7476_v44  ;;  %v8494_v44 = vld [vmem:[%s13432_s5 + $0x94] sm:$0xf0] }
 0x38d   :  { %4061 = vmatpush.bf16.msra.mxu2 %v7480_v12  ;;  %v8492_v12 = vld [vmem:[%s13432_s5 + $0x8c] sm:$0xf] }
 0x38f   :  { %4035 = vmatpush.bf16.msrb.mxu0 %v7472_v45 }
 0x393   :  { %4036 = vmatpush.bf16.msrb.mxu0 %v7456_v49  ;;  %v8489_v49 = vld [vmem:[%s13432_s5 + $0x6c] sm:$0xf0] }
 0x397   :  { %4037 = vmatpush.bf16.msrb.mxu0 %v7440_v35 }
 0x3df   :  { %v3165_v5 = vpop.f32.mrf.mxu0  ;;  %v3178_v30 = vpop.f32.mrf.mxu1 }
 0x3e0   :  { %v3166_v26 = vadd.f32 %v3165_v5, %v13511_v54  ;;  %v3179_v9 = vadd.f32 %v3178_v30, %v13512_v4  ;;  %v8499_v5 = vld [vmem:[%s13432_s5 + $0xc4] sm:$0xf]  ;;  %v7457_v30 = vld [vmem:[%s13432_s5 + $0xd0] sm:$0xf0]  ;;  %v8502_v54 = vld [vmem:[%s13432_s5 + $0xd4] sm:$0xf0] }
 0x3e1   :  { %v7460_v39 = vor.u32 %v8499_v5, %v7457_v30  ;;  %v7464_v10 = vor.u32 %v8502_v54, %v7463_v59  ;;  %v7409_v59 = vld [vmem:[%s13432_s5 + $0x70] sm:$0xf0] }
 0x3e2   :  { %v7223_v8 = vmul.f32 -1.442695, %v3166_v26  ;;  %v7224_v32 = vmul.f32 -1.442695, %v3179_v9  ;;  %v8500_v26 = vld [vmem:[%s13432_s5 + $0xcc] sm:$0xf] }
 0x3e3   :  { %v7468_v58 = vor.u32 %v8500_v26, %v7465_v25  ;;  %4049 = vmatpush.bf16.msrb.mxu1 %v7460_v39  ;;  %4062 = vmatpush.bf16.msra.mxu2 %v7464_v10  ;;  %v8487_v39 = vld [vmem:[%s13432_s5 + $0x64] sm:$0xf]  ;;  %v7436_v25 = vor.u32 %v8492_v12, %v7433_v50 }
 0x3e4   :  { %8791 = vpow2.f32 %v7223_v8  ;;  %v7412_v35 = vor.u32 %v8487_v39, %v7409_v59 }
 0x3e5   :  { %8793 = vpow2.f32 %v7224_v32  ;;  %v7441_v32 = vld [vmem:[%s13432_s5 + $0xb0] sm:$0xf0]  ;;  %4075 = vmatpush.bf16.msra.mxu3 %v7468_v58  ;;  %v7408_v58 = vor.u32 %v8489_v49, %v7407_v2  ;;  %v8481_v2 = vld [vmem:[%s13432_s5 + $0x2c] sm:$0xf0]  ;;  %v8479_v49 = vld [vmem:[%s13432_s5 + $0x24] sm:$0xf] }
 0x3e6   :  { %v3191_v29 = vpop.f32.mrf.mxu2  ;;  %v3204_v7 = vpop.f32.mrf.mxu3  ;;  %v7444_v27 = vor.u32 %v8495_v0, %v7441_v32 }
 0x3e7   :  { %v3205_v14 = vadd.f32 %v3204_v7, %v13513_v56  ;;  %v3167_v52 = vpop.f32.mrf.mxu0  ;;  %v3180_v13 = vpop.f32.mrf.mxu1  ;;  %v3192_v51 = vadd.f32 %v3191_v29, %v13514_v36  ;;  %v7423_v29 = vld [vmem:[%s13432_s5 + $0x80] sm:$0xf]  ;;  %v8493_v7 = vld [vmem:[%s13432_s5 + $0x8c] sm:$0xf0]  ;;  %4063 = vmatpush.bf16.msra.mxu2 %v7448_v63  ;;  %v7425_v56 = vld [vmem:[%s13432_s5 + $0x90] sm:$0xf0] }
 0x3e8   :  { %4050 = vmatpush.bf16.msrb.mxu1 %v7444_v27  ;;  %v7424_v42 = vor.u32 %v8493_v7, %v7423_v29  ;;  %v13515_v13 = vld [vmem:[#allocation18_spill] sm:$0xff]  ;;  %v7428_v24 = vor.u32 %v8491_v3, %v7425_v56  ;;  %v8488_v36 = vld [vmem:[%s13432_s5 + $0x6c] sm:$0xf]  ;;  %v7416_v27 = vor.u32 %v8490_v28, %v7415_v60  ;;  %v13521_v3 = vld [vmem:[#allocation37_spill] sm:$0xff] }
 0x3e9   :  { %v7225_v41 = vmul.f32 -1.442695, %v3205_v14  ;;  %v7431_v14 = vld [vmem:[%s13432_s5 + $0x88] sm:$0xf]  ;;  %v310_v45 = vadd.f32 %v13515_v13, %v9490_v22  ;;  %4076 = vmatpush.bf16.msra.mxu3 %v7452_v16  ;;  %v8483_v29 = vld [vmem:[%s13432_s5 + $0x44] sm:$0xf] }
 0x3ea   :  { %v8792_v38 = vpop.eup %8791  ;;  %4038 = vmatpush.bf16.msrb.mxu0 %v7424_v42  ;;  %v7432_v10 = vor.u32 %v8494_v44, %v7431_v14  ;;  %v7392_v42 = vor.u32 %v8485_v47, %v7391_v37  ;;  %v7393_v56 = vld [vmem:[%s13432_s5 + $0x50] sm:$0xf0]  ;;  %v7399_v14 = vld [vmem:[%s13432_s5 + $0x48] sm:$0xf]  ;;  %v8486_v13 = vld [vmem:[%s13432_s5 + $0x54] sm:$0xf0] }
 0x3eb   :  { %v8794_v4 = vpop.eup %8793  ;;  %v12011_v9 = vadd.f32 1.0, %v8792_v38  ;;  %8795 = vpow2.f32 %v7225_v41  ;;  %v7401_v44 = vld [vmem:[%s13432_s5 + $0x58] sm:$0xf0]  ;;  %v7396_v50 = vor.u32 %v8483_v29, %v7393_v56  ;;  %v8482_v60 = vld [vmem:[%s13432_s5 + $0x34] sm:$0xf0] }
 0x3ec   :  { %v12016_v21 = vadd.f32 1.0, %v8794_v4  ;;  %4051 = vmatpush.bf16.msrb.mxu1 %v7428_v24  ;;  %4064 = vmatpush.bf16.msra.mxu2 %v7432_v10  ;;  %v8484_v24 = vld [vmem:[%s13432_s5 + $0x4c] sm:$0xf]  ;;  %v7383_v10 = vld [vmem:[%s13432_s5 + $0x28] sm:$0xf] }
 0x3ed   :  { %8797 = vrcp.f32 %v12011_v9  ;;  %v3470_v33 = vand.u32 2147483647, %v12011_v9  ;;  %v3472_v17 = vand.u32 2147483648, %v12011_v9  ;;  %vm3466_vm1 = vweird.f32 %v12011_v9  ;;  %4077 = vmatpush.bf16.msra.mxu3 %v7436_v25  ;;  %v8480_v28 = vld [vmem:[%s13432_s5 + $0x2c] sm:$0xf] }
 0x3ee   :  { %8799 = vrcp.f32 %v12016_v21  ;;  %v3193_v19 = vpop.f32.mrf.mxu2  ;;  %v3206_v8 = vpop.f32.mrf.mxu3  ;;  %v3491_v46 = vand.u32 2147483648, %v12016_v21  ;;  %v3489_v41 = vand.u32 2147483647, %v12016_v21  ;;  %4039 = vmatpush.bf16.msrb.mxu0 %v7408_v58  ;;  %vm3485_vm6 = vweird.f32 %v12016_v21  ;;  %v7361_v47 = vld [vmem:[%s13432_s5 + $0x10] sm:$0xf0] }
 0x3ef   :  { %8801 = vtanh.f32 %v3192_v51  ;;  %vm12096_vm3 = vcmp.eq.f32.partialorder %v3470_v33, 8.507059e+37  ;;  %v3473_v38 = vor.u32 1.1754944e-38, %v3472_v17  ;;  %v7417_v51 = vld [vmem:[%s13432_s5 + $0x78] sm:$0xf0] }
 0x3f0   :  { %v3492_v19 = vor.u32 1.1754944e-38, %v3491_v46  ;;  %v7420_v16 = vor.u32 %v8488_v36, %v7417_v51  ;;  %v397_v46 = vadd.f32 %v13521_v3, %v9685_v15  ;;  %4052 = vmatpush.bf16.msrb.mxu1 %v7412_v35  ;;  %vm12160_vm8 = vcmp.eq.f32.partialorder %v3489_v41, 8.507059e+37  ;;  %4065 = vmatpush.bf16.msra.mxu2 %v7416_v27  ;;  %v7375_v41 = vld [vmem:[%s13432_s5 + $0x20] sm:$0xf]  ;;  %v8475_v35 = vld [vmem:[%s13432_s5 + $0x4] sm:$0xf] }
 0x3f1   :  { %v8796_v1 = vpop.eup %8795  ;;  %v7359_v51 = vld [vmem:[%s13432_s5] sm:$0xf]  ;;  %v7369_v29 = vld [vmem:[%s13432_s5 + $0x18] sm:$0xf0] }
 0x3f2   :  { %v12057_v61 = vadd.f32 1.0, %v8796_v1  ;;  %4078 = vmatpush.bf16.msra.mxu3 %v7420_v16  ;;  %4040 = vmatpush.bf16.msrb.mxu0 %v7392_v42  ;;  %v8476_v16 = vld [vmem:[%s13432_s5 + $0xc] sm:$0xf]  ;;  %v7364_v42 = vor.u32 %v8475_v35, %v7361_v47 }
 0x3f3   :  { %v12065_v52 = vpop.eup %8797 }
 0x3f4   :  { %v12080_v40 = vpop.eup %8799  ;;  %v3462_v48 = vmul.f32 %v12065_v52, %v12011_v9  ;;  %8803 = vrcp.f32 %v12057_v61  ;;  %vm3467_vm2 = vweird.f32 %v12065_v52  ;;  %4053 = vmatpush.bf16.msrb.mxu1 %v7396_v50  ;;  %vm3505_vm10 = vweird.f32 %v12057_v61  ;;  %v13528_v50 = vld [vmem:[#allocation36_spill] sm:$0xff] }
 0x3f5   :  { %v3481_v5 = vmul.f32 %v12080_v40, %v12016_v21  ;;  %vm3486_vm4 = vweird.f32 %v12080_v40  ;;  %v8802_v17 = vpop.eup %8801  ;;  %vm12131_vm5 = vmor %vm3466_vm1, %vm3467_vm2  ;;  %v3511_v56 = vand.u32 2147483648, %v12057_v61 }
 0x3f6   :  { %v3463_v54 = vsub.f32 1.0, %v3462_v48  ;;  %v3414_v26 = vpop.f32.mrf.mxu0  ;;  %v3427_v4 = vpop.f32.mrf.mxu1  ;;  %vm12155_vm7 = vmor %vm3485_vm6, %vm3486_vm4  ;;  %v7400_v48 = vor.u32 %v8486_v13, %v7399_v14  ;;  %v3509_v13 = vand.u32 2147483647, %v12057_v61 }
 0x3f7   :  { %v3482_v0 = vsub.f32 1.0, %v3481_v5  ;;  %v3415_v8 = vadd.f32 %v3414_v26, %v310_v45  ;;  %v3428_v32 = vadd.f32 %v3427_v4, %v339_v34  ;;  %v7404_v26 = vor.u32 %v8484_v24, %v7401_v44  ;;  %v7377_v4 = vld [vmem:[%s13432_s5 + $0x30] sm:$0xf0] }
 0x3f8   :  { %v3464_v33 = vmul.f32 %v12065_v52, %v3463_v54  ;;  %v7380_v36 = vor.u32 %v8479_v49, %v7377_v4  ;;  %4066 = vmatpush.bf16.msra.mxu2 %v7400_v48  ;;  %v3512_v44 = vor.u32 1.1754944e-38, %v3511_v56  ;;  %v368_v48 = vadd.f32 %v13528_v50, %v9682_v11  ;;  %v7615_v50 = vld [vmem:[%s13431_s2 + $0xf8] sm:$0xf0] }
 0x3f9   :  { %v3483_v63 = vmul.f32 %v12080_v40, %v3482_v0  ;;  %v7226_v55 = vmul.f32 -1.442695, %v3415_v8  ;;  %v7227_v1 = vmul.f32 -1.442695, %v3428_v32  ;;  %v7385_v0 = vld [vmem:[%s13432_s5 + $0x38] sm:$0xf0]  ;;  %v7376_v32 = vor.u32 %v8481_v2, %v7375_v41  ;;  %4079 = vmatpush.bf16.msra.mxu3 %v7404_v26 }
 0x3fa   :  { %v12138_v7 = vpop.eup %8803  ;;  %v3465_v9 = vadd.f32 %v12065_v52, %v3464_v33  ;;  %v8477_v33 = vld [vmem:[%s13432_s5 + $0xc] sm:$0xf0]  ;;  %v7388_v37 = vor.u32 %v8480_v28, %v7385_v0  ;;  %4054 = vmatpush.bf16.msrb.mxu1 %v7380_v36  ;;  %vm3510_vm12 = vcmp.eq.f32.partialorder %v3509_v13, 8.507059e+37 }
 0x3fb   :  { %v3484_v45 = vadd.f32 %v12080_v40, %v3483_v63  ;;  %v3501_v34 = vmul.f32 %v12138_v7, %v12057_v61  ;;  %8805 = vpow2.f32 %v7226_v55  ;;  %vm3506_vm9 = vweird.f32 %v12138_v7  ;;  %4041 = vmatpush.bf16.msrb.mxu0 %v7376_v32  ;;  %v8537_v13 = vld [vmem:[%s13431_s2 + $0xec] sm:$0xf0] }
 0x3fc   :  { %v3469_v12 = vsel %vm12131_vm5, %v12065_v52, %v3465_v9  ;;  %8807 = vpow2.f32 %v7227_v1  ;;  %v7360_v55 = vor.u32 %v8477_v33, %v7359_v51  ;;  %v8478_v1 = vld [vmem:[%s13432_s5 + $0x14] sm:$0xf0]  ;;  %vm12249_vm11 = vmor %vm3505_vm10, %vm3506_vm9 }
 0x3fd   :  { %v3474_v52 = vsel %vm12096_vm3, %v3473_v38, %v3469_v12  ;;  %v3488_v5 = vsel %vm12155_vm7, %v12080_v40, %v3484_v45  ;;  %v3502_v39 = vsub.f32 1.0, %v3501_v34  ;;  %v12189_v59 = vpop.f32.mrf.mxu2  ;;  %v3453_v54 = vpop.f32.mrf.mxu3  ;;  %4080 = vmatpush.bf16.msra.mxu3 %v7388_v37  ;;  %v7372_v45 = vor.u32 %v8476_v16, %v7369_v29 }
 0x3fe   :  { %v3493_v30 = vsel %vm12160_vm8, %v3492_v19, %v3488_v5  ;;  %v3516_v38 = vmul.f32 %v8802_v17, %v3474_v52  ;;  %v3454_v25 = vadd.f32 %v3453_v54, %v397_v46  ;;  %v3416_v40 = vpop.f32.mrf.mxu0  ;;  %v3429_v58 = vpop.f32.mrf.mxu1  ;;  %v7367_v17 = vld [vmem:[%s13432_s5 + $0x8] sm:$0xf]  ;;  %4055 = vmatpush.bf16.msrb.mxu1 %v7364_v42  ;;  %v3441_v5 = vadd.f32 %v12189_v59, %v368_v48 }
 0x3ff   :  { %v3515_v8 = vmul.f32 %v3493_v30, %v11734_v31  ;;  %v3503_v19 = vmul.f32 %v12138_v7, %v3502_v39  ;;  %v7384_v31 = vor.u32 %v8482_v60, %v7383_v10  ;;  %v7368_v21 = vor.u32 %v8478_v1, %v7367_v17  ;;  %4042 = vmatpush.bf16.msrb.mxu0 %v7360_v55 }
 0x400   :  { %v7228_v27 = vmul.f32 -1.442695, %v3454_v25 }
 0x401   :  { %v8806_v63 = vpop.eup %8805  ;;  %v12225_v18 = vadd.f32 %v3516_v38, %v3515_v8  ;;  %v3504_v9 = vadd.f32 %v12138_v7, %v3503_v19  ;;  %4067 = vmatpush.bf16.msra.mxu2 %v7384_v31  ;;  %4081 = vmatpush.bf16.msra.mxu3 %v7372_v45 }
 0x402   :  { %v8808_v3 = vpop.eup %8807  ;;  %v12237_v46 = vadd.f32 1.0, %v8806_v63  ;;  %8809 = vpow2.f32 %v7228_v27 }
 0x403   :  { %8811 = vtanh.f32 %v12225_v18  ;;  %v12243_v14 = vadd.f32 1.0, %v8808_v3  ;;  %v3508_v61 = vsel %vm12249_vm11, %v12138_v7, %v3504_v9 }
 0x404   :  { %8813 = vrcp.f32 %v12237_v46  ;;  %v3513_v49 = vsel %vm3510_vm12, %v3512_v44, %v3508_v61  ;;  %v3535_v38 = vand.u32 2147483648, %v12237_v46  ;;  %v3533_v58 = vand.u32 2147483647, %v12237_v46 }
 0x405   :  { %8815 = vrcp.f32 %v12243_v14  ;;  %v3442_v34 = vpop.f32.mrf.mxu2  ;;  %v3455_v24 = vpop.f32.mrf.mxu3  ;;  %4068 = vmatpush.bf16.msra.mxu2 %v7368_v21  ;;  %v3554_v25 = vand.u32 2147483648, %v12243_v14  ;;  %v3552_v60 = vand.u32 2147483647, %v12243_v14  ;;  %vm3529_vm15 = vweird.f32 %v12237_v46  ;;  %v8535_v21 = vld [vmem:[%s13431_s2 + $0xe4] sm:$0xf] }
 0x406   :  { %vm3548_vm0 = vweird.f32 %v12243_v14  ;;  %v3536_v8 = vor.u32 1.1754944e-38, %v3535_v38  ;;  %vm3534_vm3 = vcmp.eq.f32.partialorder %v3533_v58, 8.507059e+37  ;;  %v7613_v34 = vld [vmem:[%s13431_s2 + $0xe8] sm:$0xf]  ;;  %v8538_v24 = vld [vmem:[%s13431_s2 + $0xf4] sm:$0xf0]  ;;  %v7610_v61 = vor.u32 %v8535_v21, %v7607_v43 }
 0x407   :  { %v3555_v36 = vor.u32 1.1754944e-38, %v3554_v25  ;;  %vm3553_vm4 = vcmp.eq.f32.partialorder %v3552_v60, 8.507059e+37  ;;  %v7614_v44 = vor.u32 %v8538_v24, %v7613_v34  ;;  %v7573_v38 = vld [vmem:[%s13431_s2 + $0xa0] sm:$0xf]  ;;  %v8529_v25 = vld [vmem:[%s13431_s2 + $0xac] sm:$0xf0] }
 0x408   :  { %v8810_v12 = vpop.eup %8809  ;;  %v7574_v58 = vor.u32 %v8529_v25, %v7573_v38  ;;  %v7581_v60 = vld [vmem:[%s13431_s2 + $0xa8] sm:$0xf]  ;;  %v7551_v43 = vld [vmem:[%s13431_s2 + $0x78] sm:$0xf0]  ;;  %v7525_v24 = vld [vmem:[%s13431_s2 + $0x40] sm:$0xf] }
 0x409   :  { %v8812_v41 = vpop.eup %8811  ;;  %v3562_v2 = vadd.f32 1.0, %v8810_v12  ;;  %v8536_v12 = vld [vmem:[%s13431_s2 + $0xec] sm:$0xf]  ;;  %v7509_v38 = vld [vmem:[%s13431_s2 + $0x20] sm:$0xf] }
 0x40a   :  { %v8814_v52 = vpop.eup %8813  ;;  %v3519_v39 = vmul.f32 %v8812_v41, %v3513_v49  ;;  %v7618_v48 = vor.u32 %v8536_v12, %v7615_v50  ;;  %v7589_v41 = vld [vmem:[%s13431_s2 + $0xc0] sm:$0xf]  ;;  %v8531_v49 = vld [vmem:[%s13431_s2 + $0xc4] sm:$0xf]  ;;  %v7527_v50 = vld [vmem:[%s13431_s2 + $0x50] sm:$0xf0] }
 0x40b   :  { %v8816_v54 = vpop.eup %8815  ;;  %v3525_v26 = vmul.f32 %v8814_v52, %v12237_v46  ;;  %8817 = vrcp.f32 %v3562_v2  ;;  %vm3530_vm13 = vweird.f32 %v8814_v52  ;;  %v3574_v16 = vand.u32 2147483648, %v3562_v2  ;;  %v8513_v25 = vld [vmem:[%s13431_s2 + $0x2c] sm:$0xf0] }
 0x40c   :  { %v3544_v7 = vmul.f32 %v8816_v54, %v12243_v14  ;;  %v3583_v10 = vpack.c.bf16 %v3519_v39, %v3519_v39  ;;  %8819 = vtanh.f32 %v3441_v5  ;;  %vm3549_vm14 = vweird.f32 %v8816_v54  ;;  %vm3531_vm1 = vmor %vm3529_vm15, %vm3530_vm13  ;;  %v7591_v5 = vld [vmem:[%s13431_s2 + $0xd0] sm:$0xf0]  ;;  %v7597_v39 = vld [vmem:[%s13431_s2 + $0xc8] sm:$0xf] }
 0x40d   :  { %v3526_v4 = vsub.f32 1.0, %v3525_v26  ;;  %vm3550_vm2 = vmor %vm3548_vm0, %vm3549_vm14  ;;  %vm3568_vm6 = vweird.f32 %v3562_v2  ;;  %v3572_v29 = vand.u32 2147483647, %v3562_v2  ;;  %v3575_v46 = vor.u32 1.1754944e-38, %v3574_v16  ;;  %v7567_v16 = vld [vmem:[%s13431_s2 + $0x98] sm:$0xf0] }
 0x40e   :  { %v3545_v30 = vsub.f32 1.0, %v3544_v7  ;;  %3585 = vst [vmem:[#allocation4 + $0x10] sm:$0xf] %v3583_v10  ;;  %3794 = vmatmul.bf16.vlgmr.msra.gmra.mxu0 %v3583_v10  ;;  %3807 = vmatmul.bf16.vlgmr.msra.gmra.mxu1 %v3583_v10  ;;  %v7594_v26 = vor.u32 %v8531_v49, %v7591_v5  ;;  %v7535_v5 = vld [vmem:[%s13431_s2 + $0x58] sm:$0xf0] }
 0x40f   :  { %v3527_v40 = vmul.f32 %v8814_v52, %v3526_v4  ;;  %3820 = vmatmul.bf16.vlgmr.msrb.gmra.mxu2 %v3583_v10  ;;  %3833 = vmatmul.bf16.vlgmr.msrb.gmra.mxu3 %v3583_v10  ;;  %vm3573_vm8 = vcmp.eq.f32.partialorder %v3572_v29, 8.507059e+37  ;;  %v8532_v4 = vld [vmem:[%s13431_s2 + $0xcc] sm:$0xf]  ;;  %v7599_v10 = vld [vmem:[%s13431_s2 + $0xd8] sm:$0xf0] }
 0x410   :  { %v3546_v59 = vmul.f32 %v8816_v54, %v3545_v30  ;;  %4429 = vmatpush.bf16.msra.mxu1 %v7610_v61  ;;  %4442 = vmatpush.bf16.msrb.mxu2 %v7614_v44  ;;  %v7602_v30 = vor.u32 %v8532_v4, %v7599_v10  ;;  %v8517_v61 = vld [vmem:[%s13431_s2 + $0x4c] sm:$0xf0]  ;;  %v8515_v44 = vld [vmem:[%s13431_s2 + $0x44] sm:$0xf] }
 0x411   :  { %v8818_v28 = vpop.eup %8817  ;;  %v3528_v0 = vadd.f32 %v8814_v52, %v3527_v40  ;;  %4455 = vmatpush.bf16.msrb.mxu3 %v7618_v48  ;;  %v8527_v40 = vld [vmem:[%s13431_s2 + $0xa4] sm:$0xf]  ;;  %v7526_v12 = vor.u32 %v8517_v61, %v7525_v24  ;;  %v7533_v48 = vld [vmem:[%s13431_s2 + $0x48] sm:$0xf] }
 0x412   :  { %v3547_v19 = vadd.f32 %v8816_v54, %v3546_v59  ;;  %v3564_v32 = vmul.f32 %v8818_v28, %v3562_v2  ;;  %v8820_v33 = vpop.eup %8819  ;;  %vm3569_vm5 = vweird.f32 %v8818_v28  ;;  %v8533_v2 = vld [vmem:[%s13431_s2 + $0xcc] sm:$0xf0]  ;;  %v7575_v59 = vld [vmem:[%s13431_s2 + $0xb0] sm:$0xf0] }
 0x413   :  { %v3532_v51 = vsel %vm3531_vm1, %v8814_v52, %v3528_v0  ;;  %vm3570_vm7 = vmor %vm3568_vm6, %vm3569_vm5  ;;  %v7590_v52 = vor.u32 %v8533_v2, %v7589_v41  ;;  %v7578_v0 = vor.u32 %v8527_v40, %v7575_v59  ;;  %v8518_v41 = vld [vmem:[%s13431_s2 + $0x54] sm:$0xf0]  ;;  %v7530_v2 = vor.u32 %v8515_v44, %v7527_v50  ;;  %v8511_v40 = vld [vmem:[%s13431_s2 + $0x24] sm:$0xf] }
 0x414   :  { %v3537_v35 = vsel %vm3534_vm3, %v3536_v8, %v3532_v51  ;;  %v3551_v27 = vsel %vm3550_vm2, %v8816_v54, %v3547_v19  ;;  %v3565_v31 = vsub.f32 1.0, %v3564_v32  ;;  %v8534_v54 = vld [vmem:[%s13431_s2 + $0xd4] sm:$0xf0]  ;;  %4430 = vmatpush.bf16.msra.mxu1 %v7594_v26  ;;  %v8528_v19 = vld [vmem:[%s13431_s2 + $0xac] sm:$0xf]  ;;  %v7534_v49 = vor.u32 %v8518_v41, %v7533_v48 }
 0x415   :  { %v3556_v37 = vsel %vm3553_vm4, %v3555_v36, %v3551_v27  ;;  %v3579_v47 = vmul.f32 %v8820_v33, %v3537_v35  ;;  %v7598_v7 = vor.u32 %v8534_v54, %v7597_v39  ;;  %4456 = vmatpush.bf16.msrb.mxu3 %v7602_v30  ;;  %v7583_v32 = vld [vmem:[%s13431_s2 + $0xb8] sm:$0xf0]  ;;  %v7557_v51 = vld [vmem:[%s13431_s2 + $0x80] sm:$0xf]  ;;  %v8525_v33 = vld [vmem:[%s13431_s2 + $0x8c] sm:$0xf0] }
 0x416   :  { %v3578_v17 = vmul.f32 %v3556_v37, %v11768_v6  ;;  %v3566_v63 = vmul.f32 %v8818_v28, %v3565_v31  ;;  %v7605_v6 = vld [vmem:[%s13431_s2 + $0xe0] sm:$0xf]  ;;  %v7586_v36 = vor.u32 %v8528_v19, %v7583_v32  ;;  %v8523_v35 = vld [vmem:[%s13431_s2 + $0x84] sm:$0xf]  ;;  %v7558_v27 = vor.u32 %v8525_v33, %v7557_v51  ;;  %v7559_v31 = vld [vmem:[%s13431_s2 + $0x90] sm:$0xf0] }
 0x417   :  { %v7606_v45 = vor.u32 %v8537_v13, %v7605_v6  ;;  %4443 = vmatpush.bf16.msrb.mxu2 %v7598_v7  ;;  %v7565_v37 = vld [vmem:[%s13431_s2 + $0x88] sm:$0xf]  ;;  %v8522_v6 = vld [vmem:[%s13431_s2 + $0x74] sm:$0xf0]  ;;  %v13529_v39 = vld [vmem:[#allocation12_spill] sm:$0xff] }
 0x418   :  { %v12269_v55 = vadd.f32 %v3579_v47, %v3578_v17  ;;  %v3567_v1 = vadd.f32 %v8818_v28, %v3566_v63  ;;  %4431 = vmatpush.bf16.msra.mxu1 %v7578_v0  ;;  %v8526_v47 = vld [vmem:[%s13431_s2 + $0x94] sm:$0xf0]  ;;  %v7562_v17 = vor.u32 %v8523_v35, %v7559_v31  ;;  %v133_v54 = vadd.f32 %v13529_v39, %v9435_v57  ;;  %v7517_v0 = vld [vmem:[%s13431_s2 + $0x28] sm:$0xf]  ;;  %v7519_v51 = vld [vmem:[%s13431_s2 + $0x38] sm:$0xf0] }
 0x419   :  { %4416 = vmatpush.bf16.msra.mxu0 %v7606_v45  ;;  %4457 = vmatpush.bf16.msrb.mxu3 %v7586_v36  ;;  %v7566_v63 = vor.u32 %v8526_v47, %v7565_v37  ;;  %v8520_v45 = vld [vmem:[%s13431_s2 + $0x6c] sm:$0xf]  ;;  %v13530_v26 = vld [vmem:[#allocation13_spill] sm:$0xff]  ;;  %v7493_v31 = vld [vmem:[%s13431_s2] sm:$0xf] }
 0x41a   :  { %8821 = vtanh.f32 %v12269_v55  ;;  %v3571_v3 = vsel %vm3570_vm7, %v8818_v28, %v3567_v1  ;;  %v8530_v28 = vld [vmem:[%s13431_s2 + $0xb4] sm:$0xf0]  ;;  %v8524_v1 = vld [vmem:[%s13431_s2 + $0x8c] sm:$0xf]  ;;  %v7554_v34 = vor.u32 %v8520_v45, %v7551_v43  ;;  %v162_v7 = vadd.f32 %v13530_v26, %v9446_v62  ;;  %v8509_v37 = vld [vmem:[%s13431_s2 + $0xc] sm:$0xf0] }
 0x41b   :  { %v3576_v42 = vsel %vm3573_vm8, %v3575_v46, %v3571_v3  ;;  %v7582_v8 = vor.u32 %v8530_v28, %v7581_v60  ;;  %v7570_v29 = vor.u32 %v8524_v1, %v7567_v16  ;;  %v7541_v3 = vld [vmem:[%s13431_s2 + $0x60] sm:$0xf]  ;;  %v8521_v46 = vld [vmem:[%s13431_s2 + $0x6c] sm:$0xf0]  ;;  %v7510_v60 = vor.u32 %v8513_v25, %v7509_v38  ;;  %v7511_v28 = vld [vmem:[%s13431_s2 + $0x30] sm:$0xf0] }
 0x41c   :  { %4432 = vmatpush.bf16.msra.mxu1 %v7562_v17  ;;  %v7514_v19 = vor.u32 %v8511_v40, %v7511_v28  ;;  %v8512_v36 = vld [vmem:[%s13431_s2 + $0x2c] sm:$0xf]  ;;  %v8507_v47 = vld [vmem:[%s13431_s2 + $0x4] sm:$0xf]  ;;  %v7494_v17 = vor.u32 %v8509_v37, %v7493_v31  ;;  %v7501_v1 = vld [vmem:[%s13431_s2 + $0x8] sm:$0xf] }
 0x41d   :  { %4417 = vmatpush.bf16.msra.mxu0 %v7590_v52  ;;  %4444 = vmatpush.bf16.msrb.mxu2 %v7582_v8  ;;  %v8516_v52 = vld [vmem:[%s13431_s2 + $0x4c] sm:$0xf]  ;;  %v8514_v8 = vld [vmem:[%s13431_s2 + $0x34] sm:$0xf0]  ;;  %v8569_v45 = vld [vmem:[%s13432_s5 + $0xec] sm:$0xf0] }
 0x41e   :  { %4458 = vmatpush.bf16.msrb.mxu3 %v7570_v29  ;;  %v7538_v4 = vor.u32 %v8516_v52, %v7535_v5  ;;  %v7518_v32 = vor.u32 %v8514_v8, %v7517_v0  ;;  %v8510_v16 = vld [vmem:[%s13431_s2 + $0x14] sm:$0xf0]  ;;  %v8567_v43 = vld [vmem:[%s13432_s5 + $0xe4] sm:$0xf]  ;;  %v7741_v50 = vld [vmem:[%s13432_s5 + $0xe8] sm:$0xf] }
 0x41f   :  { %v13531_v29 = vld [vmem:[#allocation25_spill] sm:$0xff]  ;;  %v8568_v41 = vld [vmem:[%s13432_s5 + $0xec] sm:$0xf]  ;;  %v7717_v5 = vld [vmem:[%s13432_s5 + $0xc0] sm:$0xf] }
 0x420   :  { %v8822_v9 = vpop.eup %8821  ;;  %v8570_v48 = vld [vmem:[%s13432_s5 + $0xf4] sm:$0xf0]  ;;  %v7743_v52 = vld [vmem:[%s13432_s5 + $0xf8] sm:$0xf0]  ;;  %v8565_v39 = vld [vmem:[%s13432_s5 + $0xcc] sm:$0xf0] }
 0x421   :  { %v3582_v56 = vmul.f32 %v8822_v9, %v3576_v42  ;;  %4418 = vmatpush.bf16.msra.mxu0 %v7574_v58  ;;  %4445 = vmatpush.bf16.msrb.mxu2 %v7566_v63  ;;  %v8519_v9 = vld [vmem:[%s13431_s2 + $0x64] sm:$0xf]  ;;  %v7542_v42 = vor.u32 %v8521_v46, %v7541_v3  ;;  %v7495_v63 = vld [vmem:[%s13431_s2 + $0x10] sm:$0xf0]  ;;  %v220_v3 = vadd.f32 %v13531_v29, %v9641_v53  ;;  %v7725_v25 = vld [vmem:[%s13432_s5 + $0xc8] sm:$0xf] }
 0x422   :  { %4459 = vmatpush.bf16.msrb.mxu3 %v7554_v34  ;;  %v7498_v46 = vor.u32 %v8507_v47, %v7495_v63  ;;  %v7735_v34 = vld [vmem:[%s13432_s5 + $0xf0] sm:$0xf0]  ;;  %v7746_v26 = vor.u32 %v8568_v41, %v7743_v52  ;;  %v8566_v40 = vld [vmem:[%s13432_s5 + $0xd4] sm:$0xf0]  ;;  %v7727_v0 = vld [vmem:[%s13432_s5 + $0xd8] sm:$0xf0] }
 0x423   :  { %v3586_v14 = vpack.c.bf16 %v3582_v56, %v3582_v56  ;;  %v7543_v56 = vld [vmem:[%s13431_s2 + $0x70] sm:$0xf0]  ;;  %v7726_v28 = vor.u32 %v8566_v40, %v7725_v25  ;;  %v8558_v41 = vld [vmem:[%s13432_s5 + $0x94] sm:$0xf0]  ;;  %v13535_v40 = vld [vmem:[#allocation14_spill] sm:$0xff] }
 0x424   :  { %v7546_v13 = vor.u32 %v8519_v9, %v7543_v56  ;;  %v7502_v9 = vor.u32 %v8510_v16, %v7501_v1  ;;  %v7503_v56 = vld [vmem:[%s13431_s2 + $0x18] sm:$0xf0]  ;;  %v13532_v31 = vld [vmem:[#allocation24_spill] sm:$0xff]  ;;  %v7709_v1 = vld [vmem:[%s13432_s5 + $0xa8] sm:$0xf] }
 0x425   :  { %3588 = vst [vmem:[#allocation5 + $0xc] sm:$0xf] %v3586_v14  ;;  %4043 = vmatmul.bf16.vlgmr.msrb.gmra.mxu0 %v3586_v14  ;;  %4056 = vmatmul.bf16.vlgmr.msrb.gmra.mxu1 %v3586_v14  ;;  %v191_v37 = vadd.f32 %v13532_v31, %v9638_v20  ;;  %v8562_v16 = vld [vmem:[%s13432_s5 + $0xb4] sm:$0xf0]  ;;  %v8541_v31 = vld [vmem:[%s13432_s5 + $0xc] sm:$0xf0] }
 0x426   :  { %4069 = vmatmul.bf16.vlgmr.msra.gmra.mxu2 %v3586_v14  ;;  %4082 = vmatmul.bf16.vlgmr.msra.gmra.mxu3 %v3586_v14  ;;  %v7549_v14 = vld [vmem:[%s13431_s2 + $0x68] sm:$0xf] }
 0x427   :  { %4419 = vmatpush.bf16.msra.mxu0 %v7558_v27  ;;  %v7550_v21 = vor.u32 %v8522_v6, %v7549_v14  ;;  %4433 = vmatpush.bf16.msra.mxu1 %v7546_v13  ;;  %v7522_v27 = vor.u32 %v8512_v36, %v7519_v51  ;;  %v7733_v14 = vld [vmem:[%s13432_s5 + $0xe0] sm:$0xf]  ;;  %v8561_v36 = vld [vmem:[%s13432_s5 + $0xac] sm:$0xf0]  ;;  %v8559_v51 = vld [vmem:[%s13432_s5 + $0xa4] sm:$0xf] }
 0x428   :  { %4460 = vmatpush.bf16.msrb.mxu3 %v7538_v4  ;;  %v8563_v4 = vld [vmem:[%s13432_s5 + $0xc4] sm:$0xf] }
 0x429   :  { %4446 = vmatpush.bf16.msrb.mxu2 %v7550_v21 }
 0x42b   :  { %4420 = vmatpush.bf16.msra.mxu0 %v7542_v42  ;;  %4434 = vmatpush.bf16.msra.mxu1 %v7530_v2  ;;  %v8508_v42 = vld [vmem:[%s13431_s2 + $0xc] sm:$0xf]  ;;  %v7738_v2 = vor.u32 %v8567_v43, %v7735_v34 }
 0x42c   :  { %4461 = vmatpush.bf16.msrb.mxu3 %v7522_v27  ;;  %v7506_v21 = vor.u32 %v8508_v42, %v7503_v56  ;;  %v7703_v27 = vld [vmem:[%s13432_s5 + $0xb0] sm:$0xf0] }
 0x42d   :  { %4447 = vmatpush.bf16.msrb.mxu2 %v7534_v49  ;;  %v7742_v49 = vor.u32 %v8570_v48, %v7741_v50  ;;  %v7706_v63 = vor.u32 %v8559_v51, %v7703_v27  ;;  %v7693_v48 = vld [vmem:[%s13432_s5 + $0x88] sm:$0xf] }
 0x42f   :  { %4421 = vmatpush.bf16.msra.mxu0 %v7526_v12  ;;  %4435 = vmatpush.bf16.msra.mxu1 %v7514_v19  ;;  %v7734_v12 = vor.u32 %v8569_v45, %v7733_v14  ;;  %v8555_v45 = vld [vmem:[%s13432_s5 + $0x84] sm:$0xf] }
 0x430   :  { %4462 = vmatpush.bf16.msrb.mxu3 %v7506_v21  ;;  %v8557_v21 = vld [vmem:[%s13432_s5 + $0x8c] sm:$0xf0] }
 0x431   :  { %4448 = vmatpush.bf16.msrb.mxu2 %v7518_v32  ;;  %v7701_v32 = vld [vmem:[%s13432_s5 + $0xa0] sm:$0xf] }
 0x433   :  { %4422 = vmatpush.bf16.msra.mxu0 %v7510_v60  ;;  %4436 = vmatpush.bf16.msra.mxu1 %v7498_v46  ;;  %v8560_v46 = vld [vmem:[%s13432_s5 + $0xac] sm:$0xf] }
 0x434   :  { %4704 = vmatpush.bf16.msra.mxu3 %v7746_v26 }
 0x435   :  { %4449 = vmatpush.bf16.msrb.mxu2 %v7502_v9  ;;  %v7711_v9 = vld [vmem:[%s13432_s5 + $0xb8] sm:$0xf0] }
 0x436   :  { %v7714_v14 = vor.u32 %v8560_v46, %v7711_v9  ;;  %v8549_v46 = vld [vmem:[%s13432_s5 + $0x4c] sm:$0xf0]  ;;  %v8547_v9 = vld [vmem:[%s13432_s5 + $0x44] sm:$0xf] }
 0x437   :  { %4423 = vmatpush.bf16.msra.mxu0 %v7494_v17  ;;  %4678 = vmatpush.bf16.msrb.mxu1 %v7738_v2  ;;  %v7702_v17 = vor.u32 %v8561_v36, %v7701_v32  ;;  %v8554_v32 = vld [vmem:[%s13432_s5 + $0x74] sm:$0xf0] }
 0x439   :  { %4691 = vmatpush.bf16.msra.mxu2 %v7742_v49 }
 0x43b   :  { %4665 = vmatpush.bf16.msrb.mxu0 %v7734_v12 }
 0x43d   :  { %4692 = vmatpush.bf16.msra.mxu2 %v7726_v28 }
 0x48b   :  { %v3795_v10 = vpop.f32.mrf.mxu0  ;;  %v3808_v30 = vpop.f32.mrf.mxu1 }
 0x48c   :  { %v3796_v58 = vadd.f32 %v3795_v10, %v133_v54  ;;  %v3809_v59 = vadd.f32 %v3808_v30, %v162_v7  ;;  %v7718_v7 = vor.u32 %v8565_v39, %v7717_v5  ;;  %v7719_v10 = vld [vmem:[%s13432_s5 + $0xd0] sm:$0xf0]  ;;  %v8556_v5 = vld [vmem:[%s13432_s5 + $0x8c] sm:$0xf]  ;;  %v7695_v39 = vld [vmem:[%s13432_s5 + $0x98] sm:$0xf0] }
 0x48d   :  { %v7722_v38 = vor.u32 %v8563_v4, %v7719_v10  ;;  %v8553_v10 = vld [vmem:[%s13432_s5 + $0x6c] sm:$0xf0] }
 0x48e   :  { %v7485_v33 = vmul.f32 -1.442695, %v3796_v58  ;;  %v7486_v35 = vmul.f32 -1.442695, %v3809_v59  ;;  %v8564_v58 = vld [vmem:[%s13432_s5 + $0xcc] sm:$0xf]  ;;  %4666 = vmatpush.bf16.msrb.mxu0 %v7718_v7 }
 0x48f   :  { %v7730_v19 = vor.u32 %v8564_v58, %v7727_v0  ;;  %4679 = vmatpush.bf16.msrb.mxu1 %v7722_v38  ;;  %v7671_v38 = vld [vmem:[%s13432_s5 + $0x70] sm:$0xf0]  ;;  %v7694_v0 = vor.u32 %v8558_v41, %v7693_v48  ;;  %v7663_v48 = vld [vmem:[%s13432_s5 + $0x58] sm:$0xf0]  ;;  %v7637_v41 = vld [vmem:[%s13432_s5 + $0x20] sm:$0xf] }
 0x490   :  { %8823 = vpow2.f32 %v7485_v33 }
 0x491   :  { %8825 = vpow2.f32 %v7486_v35  ;;  %4705 = vmatpush.bf16.msra.mxu3 %v7730_v19  ;;  %v7677_v19 = vld [vmem:[%s13432_s5 + $0x68] sm:$0xf] }
 0x492   :  { %v12473_v6 = vpop.f32.mrf.mxu2  ;;  %v3834_v13 = vpop.f32.mrf.mxu3  ;;  %4667 = vmatpush.bf16.msrb.mxu0 %v7702_v17 }
 0x493   :  { %v3835_v24 = vadd.f32 %v3834_v13, %v220_v3  ;;  %v3797_v61 = vpop.f32.mrf.mxu0  ;;  %v3810_v44 = vpop.f32.mrf.mxu1  ;;  %v7710_v3 = vor.u32 %v8562_v16, %v7709_v1  ;;  %v3822_v56 = vadd.f32 %v12473_v6, %v191_v37  ;;  %v7685_v13 = vld [vmem:[%s13432_s5 + $0x80] sm:$0xf]  ;;  %4680 = vmatpush.bf16.msrb.mxu1 %v7706_v63  ;;  %v7679_v63 = vld [vmem:[%s13432_s5 + $0x78] sm:$0xf0] }
 0x494   :  { %v7686_v6 = vor.u32 %v8557_v21, %v7685_v13  ;;  %v7655_v13 = vld [vmem:[%s13432_s5 + $0x50] sm:$0xf0]  ;;  %v7661_v21 = vld [vmem:[%s13432_s5 + $0x48] sm:$0xf] }
 0x495   :  { %v7487_v54 = vmul.f32 -1.442695, %v3835_v24  ;;  %4693 = vmatpush.bf16.msra.mxu2 %v7710_v3  ;;  %v7687_v24 = vld [vmem:[%s13432_s5 + $0x90] sm:$0xf0]  ;;  %4706 = vmatpush.bf16.msra.mxu3 %v7714_v14 }
 0x496   :  { %v8824_v30 = vpop.eup %8823  ;;  %v7690_v50 = vor.u32 %v8555_v45, %v7687_v24  ;;  %4668 = vmatpush.bf16.msrb.mxu0 %v7686_v6  ;;  %v8550_v45 = vld [vmem:[%s13432_s5 + $0x54] sm:$0xf0] }
 0x497   :  { %v8826_v59 = vpop.eup %8825  ;;  %v12517_v60 = vadd.f32 1.0, %v8824_v30  ;;  %8827 = vpow2.f32 %v7487_v54  ;;  %v7669_v54 = vld [vmem:[%s13432_s5 + $0x60] sm:$0xf]  ;;  %v8551_v30 = vld [vmem:[%s13432_s5 + $0x64] sm:$0xf] }
 0x498   :  { %v12522_v8 = vadd.f32 1.0, %v8826_v59  ;;  %v13536_v59 = vld [vmem:[#allocation15_spill] sm:$0xff]  ;;  %4681 = vmatpush.bf16.msrb.mxu1 %v7690_v50  ;;  %v7670_v17 = vor.u32 %v8553_v10, %v7669_v54  ;;  %v7674_v16 = vor.u32 %v8551_v30, %v7671_v38  ;;  %v8545_v10 = vld [vmem:[%s13432_s5 + $0x2c] sm:$0xf0] }
 0x499   :  { %8829 = vrcp.f32 %v12517_v60  ;;  %v4102_v47 = vand.u32 2147483648, %v12517_v60  ;;  %v4100_v29 = vand.u32 2147483647, %v12517_v60  ;;  %vm4096_vm10 = vweird.f32 %v12517_v60  ;;  %4694 = vmatpush.bf16.msra.mxu2 %v7694_v0  ;;  %v8548_v50 = vld [vmem:[%s13432_s5 + $0x4c] sm:$0xf] }
 0x49a   :  { %8831 = vrcp.f32 %v12522_v8  ;;  %v3823_v33 = vpop.f32.mrf.mxu2  ;;  %v3836_v35 = vpop.f32.mrf.mxu3  ;;  %v4119_v43 = vand.u32 2147483647, %v12522_v8  ;;  %v4121_v44 = vand.u32 2147483648, %v12522_v8  ;;  %4669 = vmatpush.bf16.msrb.mxu0 %v7670_v17  ;;  %vm4115_vm14 = vweird.f32 %v12522_v8 }
 0x49b   :  { %v12573_v12 = vor.u32 1.1754944e-38, %v4102_v47  ;;  %vm12585_vm9 = vcmp.eq.f32.partialorder %v4100_v29, 8.507059e+37  ;;  %v7698_v33 = vor.u32 %v8556_v5, %v7695_v39  ;;  %v8552_v35 = vld [vmem:[%s13432_s5 + $0x6c] sm:$0xf]  ;;  %v7678_v29 = vor.u32 %v8554_v32, %v7677_v19  ;;  %v8546_v19 = vld [vmem:[%s13432_s5 + $0x34] sm:$0xf0] }
 0x49c   :  { %v4122_v51 = vor.u32 1.1754944e-38, %v4121_v44  ;;  %v7682_v3 = vor.u32 %v8552_v35, %v7679_v63  ;;  %4682 = vmatpush.bf16.msrb.mxu1 %v7674_v16  ;;  %vm12682_vm0 = vcmp.eq.f32.partialorder %v4119_v43, 8.507059e+37  ;;  %v8544_v32 = vld [vmem:[%s13432_s5 + $0x2c] sm:$0xf]  ;;  %v7623_v63 = vld [vmem:[%s13432_s5 + $0x10] sm:$0xf0] }
 0x49d   :  { %v8828_v42 = vpop.eup %8827  ;;  %4707 = vmatpush.bf16.msra.mxu3 %v7698_v33  ;;  %4695 = vmatpush.bf16.msra.mxu2 %v7678_v29 }
 0x49e   :  { %v12565_v34 = vadd.f32 1.0, %v8828_v42 }
 0x49f   :  { %v12570_v61 = vpop.eup %8829 }
 0x4a0   :  { %v12581_v2 = vpop.eup %8831  ;;  %v4092_v49 = vmul.f32 %v12570_v61, %v12517_v60  ;;  %8833 = vrcp.f32 %v12565_v34  ;;  %vm4097_vm11 = vweird.f32 %v12570_v61  ;;  %v7653_v60 = vld [vmem:[%s13432_s5 + $0x40] sm:$0xf]  ;;  %vm4135_vm2 = vweird.f32 %v12565_v34 }
 0x4a1   :  { %v4111_v26 = vmul.f32 %v12581_v2, %v12522_v8  ;;  %8835 = vtanh.f32 %v3822_v56  ;;  %vm4116_vm12 = vweird.f32 %v12581_v2  ;;  %vm12629_vm13 = vmor %vm4096_vm10, %vm4097_vm11  ;;  %v7654_v14 = vor.u32 %v8549_v46, %v7653_v60  ;;  %4708 = vmatpush.bf16.msra.mxu3 %v7682_v3  ;;  %v7629_v60 = vld [vmem:[%s13432_s5 + $0x8] sm:$0xf]  ;;  %v8542_v46 = vld [vmem:[%s13432_s5 + $0x14] sm:$0xf0] }
 0x4a2   :  { %v4044_v7 = vpop.f32.mrf.mxu0  ;;  %v4057_v4 = vpop.f32.mrf.mxu1  ;;  %v4093_v25 = vsub.f32 1.0, %v4092_v49  ;;  %vm12673_vm15 = vmor %vm4115_vm14, %vm4116_vm12 }
 0x4a3   :  { %v4045_v58 = vadd.f32 %v4044_v7, %v13535_v40  ;;  %v4058_v28 = vadd.f32 %v4057_v4, %v13536_v59  ;;  %v4112_v36 = vsub.f32 1.0, %v4111_v26  ;;  %v7658_v7 = vor.u32 %v8547_v9, %v7655_v13  ;;  %v7645_v59 = vld [vmem:[%s13432_s5 + $0x28] sm:$0xf]  ;;  %4670 = vmatpush.bf16.msrb.mxu0 %v7654_v14 }
 0x4a4   :  { %v4094_v27 = vmul.f32 %v12570_v61, %v4093_v25  ;;  %v7662_v4 = vor.u32 %v8550_v45, %v7661_v21  ;;  %v7666_v40 = vor.u32 %v8548_v50, %v7663_v48  ;;  %v7646_v17 = vor.u32 %v8546_v19, %v7645_v59  ;;  %v8540_v45 = vld [vmem:[%s13432_s5 + $0xc] sm:$0xf] }
 0x4a5   :  { %v7488_v37 = vmul.f32 -1.442695, %v4045_v58  ;;  %v7489_v47 = vmul.f32 -1.442695, %v4058_v28  ;;  %v4113_v1 = vmul.f32 %v12581_v2, %v4112_v36  ;;  %v7639_v58 = vld [vmem:[%s13432_s5 + $0x30] sm:$0xf0]  ;;  %4683 = vmatpush.bf16.msrb.mxu1 %v7658_v7  ;;  %v7630_v48 = vor.u32 %v8542_v46, %v7629_v60 }
 0x4a6   :  { %v12646_v42 = vpop.eup %8833  ;;  %v4095_v56 = vadd.f32 %v12570_v61, %v4094_v27  ;;  %v13543_v28 = vld [vmem:[#allocation35_spill] sm:$0xff]  ;;  %v7647_v36 = vld [vmem:[%s13432_s5 + $0x38] sm:$0xf0]  ;;  %v7621_v27 = vld [vmem:[%s13432_s5] sm:$0xf]  ;;  %4696 = vmatpush.bf16.msra.mxu2 %v7662_v4  ;;  %4709 = vmatpush.bf16.msra.mxu3 %v7666_v40  ;;  %v4141_v13 = vand.u32 2147483648, %v12565_v34 }
 0x4a7   :  { %8837 = vpow2.f32 %v7488_v37  ;;  %v8836_v6 = vpop.eup %8835  ;;  %v4114_v24 = vadd.f32 %v12581_v2, %v4113_v1  ;;  %v4131_v44 = vmul.f32 %v12646_v42, %v12565_v34  ;;  %vm4136_vm1 = vweird.f32 %v12646_v42 }
 0x4a8   :  { %8839 = vpow2.f32 %v7489_v47  ;;  %v4099_v5 = vsel %vm12629_vm13, %v12570_v61, %v4095_v56  ;;  %v8543_v61 = vld [vmem:[%s13432_s5 + $0x24] sm:$0xf]  ;;  %v7650_v3 = vor.u32 %v8544_v32, %v7647_v36  ;;  %v7622_v14 = vor.u32 %v8541_v31, %v7621_v27  ;;  %vm4137_vm3 = vmor %vm4135_vm2, %vm4136_vm1 }
 0x4a9   :  { %v12686_v54 = vpop.f32.mrf.mxu2  ;;  %v4083_v26 = vpop.f32.mrf.mxu3  ;;  %v4104_v8 = vsel %vm12585_vm9, %v12573_v12, %v4099_v5  ;;  %v4118_v43 = vsel %vm12673_vm15, %v12581_v2, %v4114_v24  ;;  %v4132_v30 = vsub.f32 1.0, %v4131_v44  ;;  %v7638_v2 = vor.u32 %v8545_v10, %v7637_v41  ;;  %v13544_v10 = vld [vmem:[#allocation34_spill] sm:$0xff] }
 0x4aa   :  { %v4046_v38 = vpop.f32.mrf.mxu0  ;;  %v4059_v25 = vpop.f32.mrf.mxu1  ;;  %v4123_v12 = vsel %vm12682_vm0, %v4122_v51, %v4118_v43  ;;  %v4146_v52 = vmul.f32 %v8836_v6, %v4104_v8  ;;  %v4084_v0 = vadd.f32 %v4083_v26, %v13543_v28  ;;  %v7642_v35 = vor.u32 %v8543_v61, %v7639_v58  ;;  %v7631_v6 = vld [vmem:[%s13432_s5 + $0x18] sm:$0xf0]  ;;  %4697 = vmatpush.bf16.msra.mxu2 %v7646_v17  ;;  %v7869_v43 = vld [vmem:[%s13431_s2 + $0xf0] sm:$0xf0] }
 0x4ab   :  { %v4145_v33 = vmul.f32 %v4123_v12, %v12225_v18  ;;  %v4133_v51 = vmul.f32 %v12646_v42, %v4132_v30  ;;  %v8539_v18 = vld [vmem:[%s13432_s5 + $0x4] sm:$0xf]  ;;  %4671 = vmatpush.bf16.msrb.mxu0 %v7638_v2  ;;  %v4139_v24 = vand.u32 2147483647, %v12565_v34  ;;  %4710 = vmatpush.bf16.msra.mxu3 %v7650_v3  ;;  %v7634_v49 = vor.u32 %v8540_v45, %v7631_v6  ;;  %v7853_v28 = vld [vmem:[%s13431_s2 + $0xd0] sm:$0xf0] }
 0x4ac   :  { %v7490_v47 = vmul.f32 -1.442695, %v4084_v0  ;;  %4684 = vmatpush.bf16.msrb.mxu1 %v7642_v35  ;;  %v7626_v21 = vor.u32 %v8539_v18, %v7623_v63  ;;  %v4142_v5 = vor.u32 1.1754944e-38, %v4141_v13  ;;  %v4071_v61 = vadd.f32 %v12686_v54, %v13544_v10  ;;  %v7837_v17 = vld [vmem:[%s13431_s2 + $0xb0] sm:$0xf0] }
 0x4ad   :  { %v8838_v37 = vpop.eup %8837  ;;  %v12732_v16 = vadd.f32 %v4146_v52, %v4145_v33  ;;  %v4134_v56 = vadd.f32 %v12646_v42, %v4133_v51  ;;  %vm4140_vm4 = vcmp.eq.f32.partialorder %v4139_v24, 8.507059e+37  ;;  %v8595_v52 = vld [vmem:[%s13431_s2 + $0xc4] sm:$0xf] }
 0x4ae   :  { %v8840_v1 = vpop.eup %8839  ;;  %v12735_v29 = vadd.f32 1.0, %v8838_v37  ;;  %8841 = vpow2.f32 %v7490_v47  ;;  %4698 = vmatpush.bf16.msra.mxu2 %v7630_v48  ;;  %v7856_v35 = vor.u32 %v8595_v52, %v7853_v28  ;;  %v8591_v47 = vld [vmem:[%s13431_s2 + $0xa4] sm:$0xf]  ;;  %v8598_v52 = vld [vmem:[%s13431_s2 + $0xd4] sm:$0xf0] }
 0x4af   :  { %v12743_v9 = vadd.f32 1.0, %v8840_v1  ;;  %8843 = vtanh.f32 %v12732_v16  ;;  %v4138_v41 = vsel %vm4137_vm3, %v12646_v42, %v4134_v56  ;;  %4672 = vmatpush.bf16.msrb.mxu0 %v7622_v14  ;;  %4711 = vmatpush.bf16.msra.mxu3 %v7634_v49  ;;  %v8599_v42 = vld [vmem:[%s13431_s2 + $0xe4] sm:$0xf]  ;;  %v7840_v56 = vor.u32 %v8591_v47, %v7837_v17  ;;  %v8596_v28 = vld [vmem:[%s13431_s2 + $0xcc] sm:$0xf] }
 0x4b0   :  { %8845 = vrcp.f32 %v12735_v29  ;;  %4685 = vmatpush.bf16.msrb.mxu1 %v7626_v21  ;;  %v4143_v7 = vsel %vm4140_vm4, %v4142_v5, %v4138_v41  ;;  %v7872_v59 = vor.u32 %v8599_v42, %v7869_v43  ;;  %v4165_v12 = vand.u32 2147483648, %v12735_v29  ;;  %v8587_v5 = vld [vmem:[%s13431_s2 + $0x84] sm:$0xf]  ;;  %v7877_v42 = vld [vmem:[%s13431_s2 + $0xf8] sm:$0xf0] }
 0x4b1   :  { %v4072_v44 = vpop.f32.mrf.mxu2  ;;  %v4085_v50 = vpop.f32.mrf.mxu3  ;;  %8847 = vrcp.f32 %v12743_v9  ;;  %v4184_v0 = vand.u32 2147483648, %v12743_v9  ;;  %v4163_v19 = vand.u32 2147483647, %v12735_v29  ;;  %v4182_v36 = vand.u32 2147483647, %v12743_v9 }
 0x4b2   :  { %vm4159_vm7 = vweird.f32 %v12735_v29  ;;  %vm4178_vm8 = vweird.f32 %v12743_v9  ;;  %v4166_v27 = vor.u32 1.1754944e-38, %v4165_v12  ;;  %v8592_v47 = vld [vmem:[%s13431_s2 + $0xac] sm:$0xf]  ;;  %v7845_v17 = vld [vmem:[%s13431_s2 + $0xb8] sm:$0xf0] }
 0x4b3   :  { %v4185_v18 = vor.u32 1.1754944e-38, %v4184_v0  ;;  %vm4164_vm11 = vcmp.eq.f32.partialorder %v4163_v19, 8.507059e+37  ;;  %vm4183_vm12 = vcmp.eq.f32.partialorder %v4182_v36, 8.507059e+37  ;;  %v7861_v0 = vld [vmem:[%s13431_s2 + $0xd8] sm:$0xf0] }
 0x4b4   :  { %v8842_v39 = vpop.eup %8841  ;;  %v7864_v19 = vor.u32 %v8596_v28, %v7861_v0  ;;  %v7789_v36 = vld [vmem:[%s13431_s2 + $0x50] sm:$0xf0] }
 0x4b5   :  { %v8844_v34 = vpop.eup %8843  ;;  %v12761_v26 = vadd.f32 1.0, %v8842_v39  ;;  %v7821_v39 = vld [vmem:[%s13431_s2 + $0x90] sm:$0xf0] }
 0x4b6   :  { %v8846_v4 = vpop.eup %8845  ;;  %v4149_v8 = vmul.f32 %v8844_v34, %v4143_v7  ;;  %v7824_v34 = vor.u32 %v8587_v5, %v7821_v39  ;;  %v8601_v7 = vld [vmem:[%s13431_s2 + $0xec] sm:$0xf0]  ;;  %v8586_v39 = vld [vmem:[%s13431_s2 + $0x74] sm:$0xf0] }
 0x4b7   :  { %v8848_v30 = vpop.eup %8847  ;;  %v4155_v38 = vmul.f32 %v8846_v4, %v12735_v29  ;;  %8849 = vrcp.f32 %v12761_v26  ;;  %vm4160_vm5 = vweird.f32 %v8846_v4  ;;  %v4204_v6 = vand.u32 2147483648, %v12761_v26 }
 0x4b8   :  { %v4174_v25 = vmul.f32 %v8848_v30, %v12743_v9  ;;  %v4213_v58 = vpack.c.bf16 %v4149_v8, %v4149_v8  ;;  %8851 = vtanh.f32 %v4071_v61  ;;  %vm4179_vm6 = vweird.f32 %v8848_v30  ;;  %vm4161_vm9 = vmor %vm4159_vm7, %vm4160_vm5  ;;  %v8602_v61 = vld [vmem:[%s13431_s2 + $0xf4] sm:$0xf0]  ;;  %v8600_v8 = vld [vmem:[%s13431_s2 + $0xec] sm:$0xf] }
 0x4b9   :  { %v4156_v40 = vsub.f32 1.0, %v4155_v38  ;;  %vm4180_vm10 = vmor %vm4178_vm8, %vm4179_vm6  ;;  %vm4198_vm14 = vweird.f32 %v12761_v26  ;;  %v4202_v24 = vand.u32 2147483647, %v12761_v26  ;;  %v4205_v50 = vor.u32 1.1754944e-38, %v4204_v6  ;;  %v8583_v38 = vld [vmem:[%s13431_s2 + $0x64] sm:$0xf] }
 0x4ba   :  { %v4175_v54 = vsub.f32 1.0, %v4174_v25  ;;  %4215 = vst [vmem:[#allocation4 + $0x14] sm:$0xf] %v4213_v58  ;;  %4424 = vmatmul.bf16.vlgmr.msra.gmra.mxu0 %v4213_v58  ;;  %4437 = vmatmul.bf16.vlgmr.msra.gmra.mxu1 %v4213_v58  ;;  %v7805_v25 = vld [vmem:[%s13431_s2 + $0x70] sm:$0xf0] }
 0x4bb   :  { %v4157_v2 = vmul.f32 %v8846_v4, %v4156_v40  ;;  %4450 = vmatmul.bf16.vlgmr.msrb.gmra.mxu2 %v4213_v58  ;;  %4463 = vmatmul.bf16.vlgmr.msrb.gmra.mxu3 %v4213_v58  ;;  %vm4203_vm0 = vcmp.eq.f32.partialorder %v4202_v24, 8.507059e+37  ;;  %v7808_v40 = vor.u32 %v8583_v38, %v7805_v25  ;;  %v7851_v58 = vld [vmem:[%s13431_s2 + $0xc0] sm:$0xf]  ;;  %v8582_v25 = vld [vmem:[%s13431_s2 + $0x54] sm:$0xf0] }
 0x4bc   :  { %v4176_v32 = vmul.f32 %v8848_v30, %v4175_v54  ;;  %5059 = vmatpush.bf16.msra.mxu1 %v7872_v59  ;;  %v8597_v59 = vld [vmem:[%s13431_s2 + $0xcc] sm:$0xf0]  ;;  %v7859_v54 = vld [vmem:[%s13431_s2 + $0xc8] sm:$0xf] }
 0x4bd   :  { %v8850_v33 = vpop.eup %8849  ;;  %v4158_v51 = vadd.f32 %v8846_v4, %v4157_v2  ;;  %v7852_v12 = vor.u32 %v8597_v59, %v7851_v58  ;;  %v7860_v2 = vor.u32 %v8598_v52, %v7859_v54  ;;  %v7797_v58 = vld [vmem:[%s13431_s2 + $0x58] sm:$0xf0]  ;;  %v7981_v52 = vld [vmem:[%s13432_s5 + $0xd0] sm:$0xf0] }
 0x4be   :  { %v4177_v31 = vadd.f32 %v8848_v30, %v4176_v32  ;;  %v4194_v37 = vmul.f32 %v8850_v33, %v12761_v26  ;;  %v8852_v1 = vpop.eup %8851  ;;  %vm4199_vm13 = vweird.f32 %v8850_v33  ;;  %v7867_v26 = vld [vmem:[%s13431_s2 + $0xe0] sm:$0xf]  ;;  %v8579_v32 = vld [vmem:[%s13431_s2 + $0x44] sm:$0xf] }
 0x4bf   :  { %v4162_v63 = vsel %vm4161_vm9, %v8846_v4, %v4158_v51  ;;  %vm4200_vm15 = vmor %vm4198_vm14, %vm4199_vm13  ;;  %v7875_v4 = vld [vmem:[%s13431_s2 + $0xe8] sm:$0xf]  ;;  %v7868_v10 = vor.u32 %v8601_v7, %v7867_v26  ;;  %v7835_v51 = vld [vmem:[%s13431_s2 + $0xa0] sm:$0xf] }
 0x4c0   :  { %v4167_v29 = vsel %vm4164_vm11, %v4166_v27, %v4162_v63  ;;  %v4181_v3 = vsel %vm4180_vm10, %v8848_v30, %v4177_v31  ;;  %v4195_v60 = vsub.f32 1.0, %v4194_v37  ;;  %5060 = vmatpush.bf16.msra.mxu1 %v7856_v35  ;;  %v7876_v43 = vor.u32 %v8602_v61, %v7875_v4  ;;  %v8593_v35 = vld [vmem:[%s13431_s2 + $0xac] sm:$0xf0]  ;;  %v7843_v27 = vld [vmem:[%s13431_s2 + $0xa8] sm:$0xf] }
 0x4c1   :  { %v4186_v46 = vsel %vm4183_vm12, %v4185_v18, %v4181_v3  ;;  %v4209_v9 = vmul.f32 %v8852_v1, %v4167_v29  ;;  %v7880_v30 = vor.u32 %v8600_v8, %v7877_v42  ;;  %5046 = vmatpush.bf16.msra.mxu0 %v7868_v10  ;;  %v7836_v31 = vor.u32 %v8593_v35, %v7835_v51  ;;  %v8594_v37 = vld [vmem:[%s13431_s2 + $0xb4] sm:$0xf0]  ;;  %v8575_v1 = vld [vmem:[%s13431_s2 + $0x24] sm:$0xf]  ;;  %v7773_v29 = vld [vmem:[%s13431_s2 + $0x30] sm:$0xf0] }
 0x4c2   :  { %v4208_v14 = vmul.f32 %v4186_v46, %v12269_v55  ;;  %v4196_v13 = vmul.f32 %v8850_v33, %v4195_v60  ;;  %5072 = vmatpush.bf16.msrb.mxu2 %v7876_v43  ;;  %v7844_v18 = vor.u32 %v8594_v37, %v7843_v27  ;;  %v7848_v63 = vor.u32 %v8592_v47, %v7845_v17  ;;  %v7819_v60 = vld [vmem:[%s13431_s2 + $0x80] sm:$0xf]  ;;  %v8589_v46 = vld [vmem:[%s13431_s2 + $0x8c] sm:$0xf0]  ;;  %v7813_v26 = vld [vmem:[%s13431_s2 + $0x78] sm:$0xf0] }
 0x4c3   :  { %5085 = vmatpush.bf16.msrb.mxu3 %v7880_v30  ;;  %v7776_v3 = vor.u32 %v8575_v1, %v7773_v29  ;;  %v8631_v10 = vld [vmem:[%s13432_s5 + $0xe4] sm:$0xf]  ;;  %v7997_v61 = vld [vmem:[%s13432_s5 + $0xf0] sm:$0xf0]  ;;  %v7787_v42 = vld [vmem:[%s13431_s2 + $0x40] sm:$0xf] }
 0x4c4   :  { %v12796_v21 = vadd.f32 %v4209_v9, %v4208_v14  ;;  %v4197_v45 = vadd.f32 %v8850_v33, %v4196_v13  ;;  %5061 = vmatpush.bf16.msra.mxu1 %v7840_v56  ;;  %v7827_v9 = vld [vmem:[%s13431_s2 + $0x88] sm:$0xf]  ;;  %v7820_v56 = vor.u32 %v8589_v46, %v7819_v60  ;;  %v8590_v14 = vld [vmem:[%s13431_s2 + $0x94] sm:$0xf0]  ;;  %v8588_v13 = vld [vmem:[%s13431_s2 + $0x8c] sm:$0xf]  ;;  %v8000_v8 = vor.u32 %v8631_v10, %v7997_v61 }
 0x4c5   :  { %5047 = vmatpush.bf16.msra.mxu0 %v7852_v12  ;;  %v7828_v6 = vor.u32 %v8590_v14, %v7827_v9  ;;  %v8581_v43 = vld [vmem:[%s13431_s2 + $0x4c] sm:$0xf0]  ;;  %v7795_v30 = vld [vmem:[%s13431_s2 + $0x48] sm:$0xf]  ;;  %v8627_v12 = vld [vmem:[%s13432_s5 + $0xc4] sm:$0xf] }
 0x4c6   :  { %8853 = vtanh.f32 %v12796_v21  ;;  %v4201_v44 = vsel %vm4200_vm15, %v8850_v33, %v4197_v45  ;;  %5073 = vmatpush.bf16.msrb.mxu2 %v7860_v2  ;;  %v7792_v33 = vor.u32 %v8579_v32, %v7789_v36  ;;  %v7829_v45 = vld [vmem:[%s13431_s2 + $0x98] sm:$0xf0]  ;;  %v7788_v38 = vor.u32 %v8581_v43, %v7787_v42  ;;  %v8577_v32 = vld [vmem:[%s13431_s2 + $0x2c] sm:$0xf0]  ;;  %v7779_v36 = vld [vmem:[%s13431_s2 + $0x28] sm:$0xf] }
 0x4c7   :  { %v4206_v55 = vsel %vm4203_vm0, %v4205_v50, %v4201_v44  ;;  %5086 = vmatpush.bf16.msrb.mxu3 %v7864_v19  ;;  %v7832_v24 = vor.u32 %v8588_v13, %v7829_v45  ;;  %v8571_v44 = vld [vmem:[%s13431_s2 + $0x4] sm:$0xf]  ;;  %v7757_v50 = vld [vmem:[%s13431_s2 + $0x10] sm:$0xf0]  ;;  %v7796_v59 = vor.u32 %v8582_v25, %v7795_v30  ;;  %v7984_v28 = vor.u32 %v8627_v12, %v7981_v52  ;;  %v7771_v19 = vld [vmem:[%s13431_s2 + $0x20] sm:$0xf] }
 0x4c8   :  { %5062 = vmatpush.bf16.msra.mxu1 %v7824_v34  ;;  %v8584_v34 = vld [vmem:[%s13431_s2 + $0x6c] sm:$0xf]  ;;  %v13546_v35 = vld [vmem:[#allocation17_spill] sm:$0xff]  ;;  %v8623_v1 = vld [vmem:[%s13432_s5 + $0xa4] sm:$0xf] }
 0x4c9   :  { %5048 = vmatpush.bf16.msra.mxu0 %v7836_v31  ;;  %v7816_v4 = vor.u32 %v8584_v34, %v7813_v26  ;;  %v7772_v31 = vor.u32 %v8577_v32, %v7771_v19  ;;  %v8578_v37 = vld [vmem:[%s13431_s2 + $0x34] sm:$0xf0]  ;;  %v8576_v47 = vld [vmem:[%s13431_s2 + $0x2c] sm:$0xf]  ;;  %v7781_v17 = vld [vmem:[%s13431_s2 + $0x38] sm:$0xf0] }
 0x4ca   :  { %5074 = vmatpush.bf16.msrb.mxu2 %v7844_v18  ;;  %v7780_v18 = vor.u32 %v8578_v37, %v7779_v36  ;;  %v7965_v29 = vld [vmem:[%s13432_s5 + $0xb0] sm:$0xf0]  ;;  %v7755_v9 = vld [vmem:[%s13431_s2] sm:$0xf]  ;;  %v7763_v14 = vld [vmem:[%s13431_s2 + $0x8] sm:$0xf] }
 0x4cb   :  { %5087 = vmatpush.bf16.msrb.mxu3 %v7848_v63  ;;  %v7784_v63 = vor.u32 %v8576_v47, %v7781_v17  ;;  %v7968_v46 = vor.u32 %v8623_v1, %v7965_v29  ;;  %v8574_v45 = vld [vmem:[%s13431_s2 + $0x14] sm:$0xf0]  ;;  %v8633_v34 = vld [vmem:[%s13432_s5 + $0xec] sm:$0xf0]  ;;  %v8003_v26 = vld [vmem:[%s13432_s5 + $0xe8] sm:$0xf] }
 0x4cc   :  { %v8854_v48 = vpop.eup %8853  ;;  %5063 = vmatpush.bf16.msra.mxu1 %v7808_v40  ;;  %v8580_v40 = vld [vmem:[%s13431_s2 + $0x4c] sm:$0xf]  ;;  %v8005_v30 = vld [vmem:[%s13432_s5 + $0xf8] sm:$0xf0]  ;;  %v7917_v37 = vld [vmem:[%s13432_s5 + $0x50] sm:$0xf0] }
 0x4cd   :  { %v4212_v41 = vmul.f32 %v8854_v48, %v4206_v55  ;;  %5049 = vmatpush.bf16.msra.mxu0 %v7820_v56  ;;  %v7760_v48 = vor.u32 %v8571_v44, %v7757_v50  ;;  %v7803_v55 = vld [vmem:[%s13431_s2 + $0x60] sm:$0xf]  ;;  %v7800_v54 = vor.u32 %v8580_v40, %v7797_v58  ;;  %v8573_v56 = vld [vmem:[%s13431_s2 + $0xc] sm:$0xf0]  ;;  %v7764_v44 = vor.u32 %v8574_v45, %v7763_v14  ;;  %v8632_v43 = vld [vmem:[%s13432_s5 + $0xec] sm:$0xf] }
 0x4ce   :  { %5075 = vmatpush.bf16.msrb.mxu2 %v7828_v6  ;;  %v7756_v13 = vor.u32 %v8573_v56, %v7755_v9  ;;  %v8572_v6 = vld [vmem:[%s13431_s2 + $0xc] sm:$0xf]  ;;  %v8008_v40 = vor.u32 %v8632_v43, %v8005_v30  ;;  %v7933_v58 = vld [vmem:[%s13432_s5 + $0x70] sm:$0xf0]  ;;  %v7971_v1 = vld [vmem:[%s13432_s5 + $0xa8] sm:$0xf] }
 0x4cf   :  { %v4216_v49 = vpack.c.bf16 %v4212_v41, %v4212_v41  ;;  %5088 = vmatpush.bf16.msrb.mxu3 %v7832_v24  ;;  %v8585_v41 = vld [vmem:[%s13431_s2 + $0x6c] sm:$0xf0]  ;;  %v7765_v24 = vld [vmem:[%s13431_s2 + $0x18] sm:$0xf0]  ;;  %v8628_v36 = vld [vmem:[%s13432_s5 + $0xcc] sm:$0xf] }
 0x4d0   :  { %5064 = vmatpush.bf16.msra.mxu1 %v7792_v33  ;;  %v7804_v5 = vor.u32 %v8585_v41, %v7803_v55  ;;  %v13545_v33 = vld [vmem:[#allocation16_spill] sm:$0xff]  ;;  %v7768_v50 = vor.u32 %v8572_v6, %v7765_v24  ;;  %v7995_v41 = vld [vmem:[%s13432_s5 + $0xe0] sm:$0xf]  ;;  %v8624_v56 = vld [vmem:[%s13432_s5 + $0xac] sm:$0xf] }
 0x4d1   :  { %4218 = vst [vmem:[#allocation5 + $0x8] sm:$0xf] %v4216_v49  ;;  %4673 = vmatmul.bf16.vlgmr.msrb.gmra.mxu0 %v4216_v49  ;;  %4686 = vmatmul.bf16.vlgmr.msrb.gmra.mxu1 %v4216_v49  ;;  %v7949_v55 = vld [vmem:[%s13432_s5 + $0x90] sm:$0xf0]  ;;  %v7996_v42 = vor.u32 %v8633_v34, %v7995_v41  ;;  %v7973_v14 = vld [vmem:[%s13432_s5 + $0xb8] sm:$0xf0] }
 0x4d2   :  { %4699 = vmatmul.bf16.vlgmr.msra.gmra.mxu2 %v4216_v49  ;;  %4712 = vmatmul.bf16.vlgmr.msra.gmra.mxu3 %v4216_v49  ;;  %v7811_v49 = vld [vmem:[%s13431_s2 + $0x68] sm:$0xf]  ;;  %v8607_v45 = vld [vmem:[%s13432_s5 + $0x24] sm:$0xf]  ;;  %v7901_v6 = vld [vmem:[%s13432_s5 + $0x30] sm:$0xf0] }
 0x4d3   :  { %v7812_v7 = vor.u32 %v8586_v39, %v7811_v49  ;;  %5050 = vmatpush.bf16.msra.mxu0 %v7804_v5  ;;  %5089 = vmatpush.bf16.msrb.mxu3 %v7816_v4  ;;  %v13547_v4 = vld [vmem:[#allocation27_spill] sm:$0xff]  ;;  %v8621_v41 = vld [vmem:[%s13432_s5 + $0x8c] sm:$0xf0]  ;;  %v7957_v30 = vld [vmem:[%s13432_s5 + $0x98] sm:$0xf0] }
 0x4d4   :  { %5065 = vmatpush.bf16.msra.mxu1 %v7776_v3  ;;  %v8620_v43 = vld [vmem:[%s13432_s5 + $0x8c] sm:$0xf] }
 0x4d5   :  { %5076 = vmatpush.bf16.msrb.mxu2 %v7812_v7  ;;  %v8634_v7 = vld [vmem:[%s13432_s5 + $0xf4] sm:$0xf0] }
 0x4d6   :  { %v8004_v25 = vor.u32 %v8634_v7, %v8003_v26  ;;  %v8622_v26 = vld [vmem:[%s13432_s5 + $0x94] sm:$0xf0] }
 0x4d7   :  { %5051 = vmatpush.bf16.msra.mxu0 %v7788_v38  ;;  %5090 = vmatpush.bf16.msrb.mxu3 %v7800_v54  ;;  %v8615_v38 = vld [vmem:[%s13432_s5 + $0x64] sm:$0xf]  ;;  %v8629_v54 = vld [vmem:[%s13432_s5 + $0xcc] sm:$0xf0] }
 0x4d8   :  { %5066 = vmatpush.bf16.msra.mxu1 %v7760_v48  ;;  %v8619_v48 = vld [vmem:[%s13432_s5 + $0x84] sm:$0xf]  ;;  %v7936_v52 = vor.u32 %v8615_v38, %v7933_v58 }
 0x4d9   :  { %5077 = vmatpush.bf16.msrb.mxu2 %v7796_v59  ;;  %v7952_v39 = vor.u32 %v8619_v48, %v7949_v55  ;;  %v7979_v59 = vld [vmem:[%s13432_s5 + $0xc0] sm:$0xf]  ;;  %v7904_v48 = vor.u32 %v8607_v45, %v7901_v6  ;;  %v8614_v45 = vld [vmem:[%s13432_s5 + $0x54] sm:$0xf0] }
 0x4da   :  { %v7947_v55 = vld [vmem:[%s13432_s5 + $0x80] sm:$0xf] }
 0x4db   :  { %5052 = vmatpush.bf16.msra.mxu0 %v7772_v31  ;;  %5091 = vmatpush.bf16.msrb.mxu3 %v7784_v63  ;;  %v8611_v31 = vld [vmem:[%s13432_s5 + $0x44] sm:$0xf]  ;;  %v8625_v63 = vld [vmem:[%s13432_s5 + $0xac] sm:$0xf0] }
 0x4dc   :  { %5307 = vmatpush.bf16.msrb.mxu1 %v8000_v8  ;;  %v7920_v17 = vor.u32 %v8611_v31, %v7917_v37  ;;  %v7941_v31 = vld [vmem:[%s13432_s5 + $0x78] sm:$0xf0] }
 0x4dd   :  { %5078 = vmatpush.bf16.msrb.mxu2 %v7780_v18  ;;  %v7963_v18 = vld [vmem:[%s13432_s5 + $0xa0] sm:$0xf] }
 0x4df   :  { %5053 = vmatpush.bf16.msra.mxu0 %v7756_v13  ;;  %5092 = vmatpush.bf16.msrb.mxu3 %v7768_v50  ;;  %v7976_v13 = vor.u32 %v8624_v56, %v7973_v14  ;;  %v8613_v14 = vld [vmem:[%s13432_s5 + $0x4c] sm:$0xf0] }
 0x4e0   :  { %5308 = vmatpush.bf16.msrb.mxu1 %v7984_v28  ;;  %v7980_v28 = vor.u32 %v8629_v54, %v7979_v59  ;;  %v8603_v54 = vld [vmem:[%s13432_s5 + $0x4] sm:$0xf] }
 0x4e1   :  { %5079 = vmatpush.bf16.msrb.mxu2 %v7764_v44  ;;  %v13548_v44 = vld [vmem:[#allocation26_spill] sm:$0xff] }
 0x4e3   :  { %5294 = vmatpush.bf16.msrb.mxu0 %v7996_v42  ;;  %5333 = vmatpush.bf16.msra.mxu3 %v8008_v40 }
 0x4e4   :  { %5309 = vmatpush.bf16.msrb.mxu1 %v7968_v46  ;;  %v7964_v46 = vor.u32 %v8625_v63, %v7963_v18 }
 0x4e5   :  { %5320 = vmatpush.bf16.msra.mxu2 %v8004_v25  ;;  %v13550_v25 = vld [vmem:[#allocation11_spill] sm:$0xff] }
 0x4e6   :  { %v334_v40 = vadd.f32 %v13550_v25, %v9493_v23  ;;  %v7931_v23 = vld [vmem:[%s13432_s5 + $0x60] sm:$0xf] }
 0x4e7   :  { %5295 = vmatpush.bf16.msrb.mxu0 %v7980_v28 }
 0x4e8   :  { %5310 = vmatpush.bf16.msrb.mxu1 %v7952_v39 }
 0x4eb   :  { %5296 = vmatpush.bf16.msrb.mxu0 %v7964_v46 }
 0x4ec   :  { %5311 = vmatpush.bf16.msrb.mxu1 %v7936_v52 }
 0x4f0   :  { %5312 = vmatpush.bf16.msrb.mxu1 %v7920_v17 }
 0x4f4   :  { %5313 = vmatpush.bf16.msrb.mxu1 %v7904_v48  ;;  %v8612_v48 = vld [vmem:[%s13432_s5 + $0x4c] sm:$0xf] }
 0x537   :  { %v4425_v0 = vpop.f32.mrf.mxu0  ;;  %v4438_v2 = vpop.f32.mrf.mxu1 }
 0x538   :  { %v4426_v51 = vadd.f32 %v4425_v0, %v13545_v33  ;;  %v4439_v27 = vadd.f32 %v4438_v2, %v13546_v35  ;;  %v7987_v0 = vld [vmem:[%s13432_s5 + $0xc8] sm:$0xf]  ;;  %v8630_v2 = vld [vmem:[%s13432_s5 + $0xd4] sm:$0xf0]  ;;  %v7989_v33 = vld [vmem:[%s13432_s5 + $0xd8] sm:$0xf0] }
 0x539   :  { %v7988_v32 = vor.u32 %v8630_v2, %v7987_v0  ;;  %v8617_v0 = vld [vmem:[%s13432_s5 + $0x6c] sm:$0xf0]  ;;  %v7939_v2 = vld [vmem:[%s13432_s5 + $0x68] sm:$0xf] }
 0x53a   :  { %v7747_v3 = vmul.f32 -1.442695, %v4426_v51  ;;  %v7748_v60 = vmul.f32 -1.442695, %v4439_v27  ;;  %v7992_v27 = vor.u32 %v8628_v36, %v7989_v33 }
 0x53b   :  { %5321 = vmatpush.bf16.msra.mxu2 %v7988_v32 }
 0x53c   :  { %8855 = vpow2.f32 %v7747_v3  ;;  %5334 = vmatpush.bf16.msra.mxu3 %v7992_v27  ;;  %v8616_v27 = vld [vmem:[%s13432_s5 + $0x6c] sm:$0xf] }
 0x53d   :  { %8857 = vpow2.f32 %v7748_v60  ;;  %v8626_v60 = vld [vmem:[%s13432_s5 + $0xb4] sm:$0xf0]  ;;  %v7944_v56 = vor.u32 %v8616_v27, %v7941_v31 }
 0x53e   :  { %v13005_v49 = vpop.f32.mrf.mxu2  ;;  %v4464_v5 = vpop.f32.mrf.mxu3  ;;  %v7972_v9 = vor.u32 %v8626_v60, %v7971_v1  ;;  %v7915_v60 = vld [vmem:[%s13432_s5 + $0x40] sm:$0xf]  ;;  %v8606_v27 = vld [vmem:[%s13432_s5 + $0x14] sm:$0xf0] }
 0x53f   :  { %v4465_v10 = vadd.f32 %v4464_v5, %v13547_v4  ;;  %v4427_v61 = vpop.f32.mrf.mxu0  ;;  %v4440_v8 = vpop.f32.mrf.mxu1  ;;  %v4452_v50 = vadd.f32 %v13005_v49, %v13548_v44  ;;  %v7955_v5 = vld [vmem:[%s13432_s5 + $0x88] sm:$0xf]  ;;  %v7948_v49 = vor.u32 %v8621_v41, %v7947_v55  ;;  %v13549_v4 = vld [vmem:[#allocation10_spill] sm:$0xff]  ;;  %v7925_v55 = vld [vmem:[%s13432_s5 + $0x58] sm:$0xf0] }
 0x540   :  { %5322 = vmatpush.bf16.msra.mxu2 %v7972_v9  ;;  %5335 = vmatpush.bf16.msra.mxu3 %v7976_v13  ;;  %v7956_v42 = vor.u32 %v8622_v26, %v7955_v5  ;;  %v7923_v13 = vld [vmem:[%s13432_s5 + $0x48] sm:$0xf] }
 0x541   :  { %v7749_v12 = vmul.f32 -1.442695, %v4465_v10  ;;  %v305_v10 = vadd.f32 %v13549_v4, %v9490_v22  ;;  %v13551_v22 = vld [vmem:[#allocation33_spill] sm:$0xff]  ;;  %5297 = vmatpush.bf16.msrb.mxu0 %v7948_v49  ;;  %v7924_v4 = vor.u32 %v8614_v45, %v7923_v13 }
 0x542   :  { %v8856_v19 = vpop.eup %8855  ;;  %v13118_v58 = vadd.f32 %v13551_v22, %v9685_v15  ;;  %v7928_v22 = vor.u32 %v8612_v48, %v7925_v55 }
 0x543   :  { %v8858_v51 = vpop.eup %8857  ;;  %v13047_v35 = vadd.f32 1.0, %v8856_v19  ;;  %8859 = vpow2.f32 %v7749_v12  ;;  %v7885_v12 = vld [vmem:[%s13432_s5 + $0x10] sm:$0xf0]  ;;  %v8618_v19 = vld [vmem:[%s13432_s5 + $0x74] sm:$0xf0] }
 0x544   :  { %v13055_v47 = vadd.f32 1.0, %v8858_v51  ;;  %5323 = vmatpush.bf16.msra.mxu2 %v7956_v42  ;;  %v7960_v51 = vor.u32 %v8620_v43, %v7957_v30  ;;  %v7888_v18 = vor.u32 %v8603_v54, %v7885_v12  ;;  %v7940_v9 = vor.u32 %v8618_v19, %v7939_v2  ;;  %v8608_v12 = vld [vmem:[%s13432_s5 + $0x2c] sm:$0xf] }
 0x545   :  { %8861 = vrcp.f32 %v13047_v35  ;;  %v4730_v39 = vand.u32 2147483647, %v13047_v35  ;;  %v4732_v8 = vand.u32 2147483648, %v13047_v35  ;;  %vm4726_vm2 = vweird.f32 %v13047_v35 }
 0x546   :  { %8863 = vrcp.f32 %v13055_v47  ;;  %v4453_v29 = vpop.f32.mrf.mxu2  ;;  %v4466_v3 = vpop.f32.mrf.mxu3  ;;  %v4751_v61 = vand.u32 2147483648, %v13055_v47  ;;  %vm4745_vm1 = vweird.f32 %v13055_v47  ;;  %v4749_v17 = vand.u32 2147483647, %v13055_v47  ;;  %5336 = vmatpush.bf16.msra.mxu3 %v7960_v51  ;;  %5314 = vmatpush.bf16.msrb.mxu1 %v7888_v18  ;;  %v8604_v18 = vld [vmem:[%s13432_s5 + $0xc] sm:$0xf] }
 0x547   :  { %v7932_v3 = vor.u32 %v8617_v0, %v7931_v23  ;;  %v4733_v44 = vor.u32 1.1754944e-38, %v4732_v8  ;;  %v8609_v8 = vld [vmem:[%s13432_s5 + $0x2c] sm:$0xf0]  ;;  %vm4731_vm7 = vcmp.eq.f32.partialorder %v4730_v39, 8.507059e+37  ;;  %v7909_v23 = vld [vmem:[%s13432_s5 + $0x38] sm:$0xf0] }
 0x548   :  { %5324 = vmatpush.bf16.msra.mxu2 %v7940_v9  ;;  %v4752_v43 = vor.u32 1.1754944e-38, %v4751_v61  ;;  %vm4750_vm8 = vcmp.eq.f32.partialorder %v4749_v17, 8.507059e+37 }
 0x549   :  { %v8860_v24 = vpop.eup %8859  ;;  %5298 = vmatpush.bf16.msrb.mxu0 %v7932_v3 }
 0x54a   :  { %v13095_v34 = vadd.f32 1.0, %v8860_v24  ;;  %5337 = vmatpush.bf16.msra.mxu3 %v7944_v56 }
 0x54b   :  { %v13100_v7 = vpop.eup %8861 }
 0x54c   :  { %v13112_v38 = vpop.eup %8863  ;;  %v4722_v59 = vmul.f32 %v13100_v7, %v13047_v35  ;;  %8865 = vrcp.f32 %v13095_v34  ;;  %vm4727_vm3 = vweird.f32 %v13100_v7  ;;  %5325 = vmatpush.bf16.msra.mxu2 %v7924_v4  ;;  %vm4765_vm10 = vweird.f32 %v13095_v34 }
 0x54d   :  { %v4741_v15 = vmul.f32 %v13112_v38, %v13055_v47  ;;  %8867 = vtanh.f32 %v4452_v50  ;;  %vm4746_vm4 = vweird.f32 %v13112_v38  ;;  %v7916_v50 = vor.u32 %v8613_v14, %v7915_v60  ;;  %vm13181_vm5 = vmor %vm4726_vm2, %vm4727_vm3  ;;  %v8610_v47 = vld [vmem:[%s13432_s5 + $0x34] sm:$0xf0] }
 0x54e   :  { %v4674_v52 = vpop.f32.mrf.mxu0  ;;  %v4687_v28 = vpop.f32.mrf.mxu1  ;;  %v4723_v32 = vsub.f32 1.0, %v4722_v59  ;;  %vm13198_vm6 = vmor %vm4745_vm1, %vm4746_vm4  ;;  %v7907_v59 = vld [vmem:[%s13432_s5 + $0x28] sm:$0xf]  ;;  %5338 = vmatpush.bf16.msra.mxu3 %v7928_v22  ;;  %v4771_v60 = vand.u32 2147483648, %v13095_v34  ;;  %v4769_v9 = vand.u32 2147483647, %v13095_v34 }
 0x54f   :  { %v4675_v36 = vadd.f32 %v4674_v52, %v305_v10  ;;  %v4688_v33 = vadd.f32 %v4687_v28, %v334_v40  ;;  %v4742_v37 = vsub.f32 1.0, %v4741_v15  ;;  %v7899_v10 = vld [vmem:[%s13432_s5 + $0x20] sm:$0xf]  ;;  %5299 = vmatpush.bf16.msrb.mxu0 %v7916_v50  ;;  %v7908_v19 = vor.u32 %v8610_v47, %v7907_v59  ;;  %v13556_v50 = vld [vmem:[#allocation32_spill] sm:$0xff] }
 0x550   :  { %v4724_v63 = vmul.f32 %v13100_v7, %v4723_v32  ;;  %v7900_v0 = vor.u32 %v8609_v8, %v7899_v10  ;;  %v7883_v32 = vld [vmem:[%s13432_s5] sm:$0xf]  ;;  %vm4770_vm12 = vcmp.eq.f32.partialorder %v4769_v9, 8.507059e+37 }
 0x551   :  { %v7750_v1 = vmul.f32 -1.442695, %v4675_v36  ;;  %v7751_v29 = vmul.f32 -1.442695, %v4688_v33  ;;  %v4743_v46 = vmul.f32 %v13112_v38, %v4742_v37  ;;  %v8605_v36 = vld [vmem:[%s13432_s5 + $0xc] sm:$0xf0]  ;;  %5326 = vmatpush.bf16.msra.mxu2 %v7908_v19 }
 0x552   :  { %v13168_v6 = vpop.eup %8865  ;;  %v4725_v24 = vadd.f32 %v13100_v7, %v4724_v63  ;;  %v7893_v63 = vld [vmem:[%s13432_s5 + $0x18] sm:$0xf0]  ;;  %v7884_v3 = vor.u32 %v8605_v36, %v7883_v32  ;;  %v8648_v32 = vld [vmem:[%s13435_s7 + $0x28] sm:$0xff]  ;;  %v8643_v9 = vld [vmem:[%s13435_s7] sm:$0xff] }
 0x553   :  { %8869 = vpow2.f32 %v7750_v1  ;;  %v8868_v41 = vpop.eup %8867  ;;  %v4744_v49 = vadd.f32 %v13112_v38, %v4743_v46  ;;  %v4761_v26 = vmul.f32 %v13168_v6, %v13095_v34  ;;  %vm4766_vm9 = vweird.f32 %v13168_v6  ;;  %5300 = vmatpush.bf16.msrb.mxu0 %v7900_v0 }
 0x554   :  { %8871 = vpow2.f32 %v7751_v29  ;;  %v4729_v30 = vsel %vm13181_vm5, %v13100_v7, %v4725_v24  ;;  %v7896_v13 = vor.u32 %v8604_v18, %v7893_v63  ;;  %vm4767_vm11 = vmor %vm4765_vm10, %vm4766_vm9  ;;  %v4772_v24 = vor.u32 1.1754944e-38, %v4771_v60  ;;  %v8645_v60 = vld [vmem:[%s13435_s7 + $0x10] sm:$0xff] }
 0x555   :  { %v13209_v25 = vpop.f32.mrf.mxu2  ;;  %v4713_v40 = vpop.f32.mrf.mxu3  ;;  %v4734_v61 = vsel %vm4731_vm7, %v4733_v44, %v4729_v30  ;;  %v4748_v7 = vsel %vm13198_vm6, %v13112_v38, %v4744_v49  ;;  %v4762_v35 = vsub.f32 1.0, %v4761_v26  ;;  %v363_v34 = vadd.f32 %v13556_v50, %v9682_v11  ;;  %v8650_v11 = vld [vmem:[%s13435_s7 + $0x38] sm:$0xff] }
 0x556   :  { %v4676_v39 = vpop.f32.mrf.mxu0  ;;  %v4689_v54 = vpop.f32.mrf.mxu1  ;;  %v4753_v15 = vsel %vm4750_vm8, %v4752_v43, %v4748_v7  ;;  %v4776_v52 = vmul.f32 %v8868_v41, %v4734_v61  ;;  %v4714_v28 = vadd.f32 %v4713_v40, %v13118_v58  ;;  %v7912_v58 = vor.u32 %v8608_v12, %v7909_v23 }
 0x557   :  { %v4775_v38 = vmul.f32 %v4753_v15, %v12732_v16  ;;  %v4763_v2 = vmul.f32 %v13168_v6, %v4762_v35  ;;  %v7891_v16 = vld [vmem:[%s13432_s5 + $0x8] sm:$0xf]  ;;  %5301 = vmatpush.bf16.msrb.mxu0 %v7884_v3  ;;  %v4701_v49 = vadd.f32 %v13209_v25, %v363_v34  ;;  %v8649_v35 = vld [vmem:[%s13435_s7 + $0x30] sm:$0xff] }
 0x558   :  { %v7752_v51 = vmul.f32 -1.442695, %v4714_v28  ;;  %v7892_v46 = vor.u32 %v8606_v27, %v7891_v16  ;;  %5339 = vmatpush.bf16.msra.mxu3 %v7912_v58  ;;  %v8647_v58 = vld [vmem:[%s13435_s7 + $0x20] sm:$0xff] }
 0x559   :  { %v8870_v33 = vpop.eup %8869  ;;  %v13241_v37 = vadd.f32 %v4776_v52, %v4775_v38  ;;  %v4764_v29 = vadd.f32 %v13168_v6, %v4763_v2 }
 0x55a   :  { %v8872_v31 = vpop.eup %8871  ;;  %v13244_v17 = vadd.f32 1.0, %v8870_v33  ;;  %8873 = vpow2.f32 %v7752_v51  ;;  %5327 = vmatpush.bf16.msra.mxu2 %v7892_v46  ;;  %v8644_v46 = vld [vmem:[%s13435_s7 + $0x8] sm:$0xff] }
 0x55b   :  { %v13252_v1 = vadd.f32 1.0, %v8872_v31  ;;  %8875 = vtanh.f32 %v13241_v37  ;;  %v4768_v45 = vsel %vm4767_vm11, %v13168_v6, %v4764_v29 }
 0x55c   :  { %8877 = vrcp.f32 %v13244_v17  ;;  %5340 = vmatpush.bf16.msra.mxu3 %v7896_v13  ;;  %v4773_v41 = vsel %vm4770_vm12, %v4772_v24, %v4768_v45  ;;  %v4795_v30 = vand.u32 2147483648, %v13244_v17  ;;  %v4793_v22 = vand.u32 2147483647, %v13244_v17  ;;  %v8637_v13 = vld [vmem:[#allocation4 + $0x10] sm:$0xff] }
 0x55d   :  { %v4702_v56 = vpop.f32.mrf.mxu2  ;;  %v4715_v14 = vpop.f32.mrf.mxu3  ;;  %8879 = vrcp.f32 %v13252_v1  ;;  %v4814_v25 = vand.u32 2147483648, %v13252_v1  ;;  %v4812_v47 = vand.u32 2147483647, %v13252_v1  ;;  %vm4789_vm15 = vweird.f32 %v13244_v17  ;;  %v13557_v45 = vld [vmem:[#allocation20_spill] sm:$0xff] }
 0x55e   :  { %vm4808_vm0 = vweird.f32 %v13252_v1  ;;  %v4796_v39 = vor.u32 1.1754944e-38, %v4795_v30  ;;  %vm4794_vm3 = vcmp.eq.f32.partialorder %v4793_v22, 8.507059e+37  ;;  %v8635_v56 = vld [vmem:[#allocation4] sm:$0xff]  ;;  %v8636_v14 = vld [vmem:[#allocation4 + $0x8] sm:$0xff]  ;;  %v138_v24 = vadd.f32 %v13557_v45, %v9435_v57 }
 0x55f   :  { %v4815_v23 = vor.u32 1.1754944e-38, %v4814_v25  ;;  %vm4813_vm4 = vcmp.eq.f32.partialorder %v4812_v47, 8.507059e+37 }
 0x560   :  { %v8874_v44 = vpop.eup %8873 }
 0x561   :  { %v8876_v48 = vpop.eup %8875  ;;  %v13266_v55 = vadd.f32 1.0, %v8874_v44  ;;  %v13558_v44 = vld [vmem:[#allocation21_spill] sm:$0xff] }
 0x562   :  { %v8878_v5 = vpop.eup %8877  ;;  %v4779_v26 = vmul.f32 %v8876_v48, %v4773_v41  ;;  %v167_v50 = vadd.f32 %v13558_v44, %v9446_v62 }
 0x563   :  { %v8880_v4 = vpop.eup %8879  ;;  %v4785_v6 = vmul.f32 %v8878_v5, %v13244_v17  ;;  %8881 = vrcp.f32 %v13266_v55  ;;  %vm4790_vm13 = vweird.f32 %v8878_v5  ;;  %v4834_v27 = vand.u32 2147483648, %v13266_v55  ;;  %v8646_v17 = vld [vmem:[%s13435_s7 + $0x18] sm:$0xff] }
 0x564   :  { %v4804_v10 = vmul.f32 %v8880_v4, %v13252_v1  ;;  %v4843_v42 = vpack.c.bf16 %v4779_v26, %v4779_v26  ;;  %8883 = vtanh.f32 %v4701_v49  ;;  %vm4809_vm14 = vweird.f32 %v8880_v4  ;;  %vm4791_vm1 = vmor %vm4789_vm15, %vm4790_vm13  ;;  %v13559_v26 = vld [vmem:[#allocation29_spill] sm:$0xff] }
 0x565   :  { %v4786_v8 = vsub.f32 1.0, %v4785_v6  ;;  %vm4810_vm2 = vmor %vm4808_vm0, %vm4809_vm14  ;;  %vm4828_vm6 = vweird.f32 %v13266_v55  ;;  %v4832_v31 = vand.u32 2147483647, %v13266_v55  ;;  %v4835_v18 = vor.u32 1.1754944e-38, %v4834_v27 }
 0x566   :  { %v4805_v43 = vsub.f32 1.0, %v4804_v10  ;;  %4845 = vst [vmem:[#allocation4 + $0x18] sm:$0xf] %v4843_v42  ;;  %5054 = vmatmul.bf16.vlgmr.msra.gmra.mxu0 %v4843_v42  ;;  %5067 = vmatmul.bf16.vlgmr.msra.gmra.mxu1 %v4843_v42 }
 0x567   :  { %v4787_v40 = vmul.f32 %v8878_v5, %v4786_v8  ;;  %5080 = vmatmul.bf16.vlgmr.msrb.gmra.mxu2 %v4843_v42  ;;  %5093 = vmatmul.bf16.vlgmr.msrb.gmra.mxu3 %v4843_v42  ;;  %vm4833_vm8 = vcmp.eq.f32.partialorder %v4832_v31, 8.507059e+37 }
 0x568   :  { %v4806_v59 = vmul.f32 %v8880_v4, %v4805_v43  ;;  %5698 = vmatpush.bf16.msra.mxu1 %v8650_v11 }
 0x569   :  { %v8882_v61 = vpop.eup %8881  ;;  %v4788_v7 = vadd.f32 %v8878_v5, %v4787_v40 }
 0x56a   :  { %v4807_v54 = vadd.f32 %v8880_v4, %v4806_v59  ;;  %v4824_v12 = vmul.f32 %v8882_v61, %v13266_v55  ;;  %v8884_v52 = vpop.eup %8883  ;;  %vm4829_vm5 = vweird.f32 %v8882_v61  ;;  %v13560_v59 = vld [vmem:[#allocation28_spill] sm:$0xff] }
 0x56b   :  { %v4792_v15 = vsel %vm4791_vm1, %v8878_v5, %v4788_v7  ;;  %vm4830_vm7 = vmor %vm4828_vm6, %vm4829_vm5  ;;  %v196_v47 = vadd.f32 %v13560_v59, %v9638_v20  ;;  %v13561_v20 = vld [vmem:[#allocation6_spill] sm:$0xff] }
 0x56c   :  { %v4797_v28 = vsel %vm4794_vm3, %v4796_v39, %v4792_v15  ;;  %v4811_v0 = vsel %vm4810_vm2, %v8880_v4, %v4807_v54  ;;  %v4825_v38 = vsub.f32 1.0, %v4824_v12  ;;  %5699 = vmatpush.bf16.msra.mxu1 %v8649_v35  ;;  %v225_v4 = vadd.f32 %v13559_v26, %v9641_v53  ;;  %v8658_v53 = vld [vmem:[%s13436_s8 + $0x38] sm:$0xff]  ;;  %v8657_v54 = vld [vmem:[%s13436_s8 + $0x30] sm:$0xff] }
 0x56d   :  { %v4816_v2 = vsel %vm4813_vm4, %v4815_v23, %v4811_v0  ;;  %v4839_v19 = vmul.f32 %v8884_v52, %v4797_v28  ;;  %5597 = vmatpush.bf16.msra.mxu0 %v8658_v53  ;;  %v8652_v53 = vld [vmem:[%s13436_s8 + $0x8] sm:$0xff] }
 0x56e   :  { %v4838_v36 = vmul.f32 %v4816_v2, %v12796_v21  ;;  %v4826_v33 = vmul.f32 %v8882_v61, %v4825_v38  ;;  %v13562_v2 = vld [vmem:[#allocation7_spill] sm:$0xff] }
 0x570   :  { %v13290_v51 = vadd.f32 %v4839_v19, %v4838_v36  ;;  %5700 = vmatpush.bf16.msra.mxu1 %v8648_v32  ;;  %v4827_v16 = vadd.f32 %v8882_v61, %v4826_v33 }
 0x571   :  { %5598 = vmatpush.bf16.msra.mxu0 %v8657_v54 }
 0x572   :  { %8885 = vtanh.f32 %v13290_v51  ;;  %v4831_v21 = vsel %vm4830_vm7, %v8882_v61, %v4827_v16  ;;  %v8656_v16 = vld [vmem:[%s13436_s8 + $0x28] sm:$0xff] }
 0x573   :  { %v4836_v1 = vsel %vm4833_vm8, %v4835_v18, %v4831_v21 }
 0x574   :  { %5701 = vmatpush.bf16.msra.mxu1 %v8647_v58 }
 0x575   :  { %5599 = vmatpush.bf16.msra.mxu0 %v8656_v16 }
 0x578   :  { %v8886_v63 = vpop.eup %8885  ;;  %5702 = vmatpush.bf16.msra.mxu1 %v8646_v17 }
 0x579   :  { %v4842_v29 = vmul.f32 %v8886_v63, %v4836_v1 }
 0x57b   :  { %v4846_v3 = vpack.c.bf16 %v4842_v29, %v4842_v29 }
 0x57c   :  { %5703 = vmatpush.bf16.msra.mxu1 %v8645_v60 }
 0x57d   :  { %4848 = vst [vmem:[#allocation5 + $0x4] sm:$0xf] %v4846_v3  ;;  %5302 = vmatmul.bf16.vlgmr.msrb.gmra.mxu0 %v4846_v3  ;;  %5315 = vmatmul.bf16.vlgmr.msrb.gmra.mxu1 %v4846_v3 }
 0x57e   :  { %5328 = vmatmul.bf16.vlgmr.msra.gmra.mxu2 %v4846_v3  ;;  %5341 = vmatmul.bf16.vlgmr.msra.gmra.mxu3 %v4846_v3 }
 0x580   :  { %5704 = vmatpush.bf16.msra.mxu1 %v8644_v46  ;;  %v8655_v46 = vld [vmem:[%s13436_s8 + $0x20] sm:$0xff] }
 0x581   :  { %5600 = vmatpush.bf16.msra.mxu0 %v8655_v46 }
 0x584   :  { %5705 = vmatpush.bf16.msra.mxu1 %v8643_v9 }
 0x58d   :  { %5706 = vmatmul.bf16.vlgmr.msra.gmra.mxu1 %v8635_v56 }
 0x59d   :  { %5711 = vmatmul.bf16.gmra.mxu1 %v8636_v14 }
 0x5ad   :  { %5716 = vmatmul.bf16.gmra.mxu1 %v8637_v13 }
 0x5e3   :  { %v5055_v34 = vpop.f32.mrf.mxu0  ;;  %v5068_v48 = vpop.f32.mrf.mxu1 }
 0x5e4   :  { %v5056_v55 = vadd.f32 %v5055_v34, %v138_v24  ;;  %v5069_v41 = vadd.f32 %v5068_v48, %v167_v50 }
 0x5e6   :  { %v8009_v5 = vmul.f32 -1.442695, %v5056_v55  ;;  %v8010_v49 = vmul.f32 -1.442695, %v5069_v41 }
 0x5e8   :  { %8887 = vpow2.f32 %v8009_v5  ;;  %v13563_v5 = vld [vmem:[#allocation31_spill] sm:$0xff] }
 0x5e9   :  { %8889 = vpow2.f32 %v8010_v49 }
 0x5ea   :  { %v5081_v6 = vpop.f32.mrf.mxu2  ;;  %v5094_v10 = vpop.f32.mrf.mxu3 }
 0x5eb   :  { %v5095_v8 = vadd.f32 %v5094_v10, %v225_v4  ;;  %v5057_v42 = vpop.f32.mrf.mxu0  ;;  %v5070_v11 = vpop.f32.mrf.mxu1  ;;  %v5082_v7 = vadd.f32 %v5081_v6, %v196_v47  ;;  %v8654_v6 = vld [vmem:[%s13436_s8 + $0x18] sm:$0xff] }
 0x5ec   :  { %5601 = vmatpush.bf16.msra.mxu0 %v8654_v6 }
 0x5ed   :  { %v8011_v57 = vmul.f32 -1.442695, %v5095_v8 }
 0x5ee   :  { %v8888_v43 = vpop.eup %8887 }
 0x5ef   :  { %v8890_v30 = vpop.eup %8889  ;;  %v5349_v62 = vadd.f32 1.0, %v8888_v43  ;;  %8891 = vpow2.f32 %v8011_v57 }
 0x5f0   :  { %v5368_v25 = vadd.f32 1.0, %v8890_v30 }
 0x5f1   :  { %8893 = vrcp.f32 %v5349_v62  ;;  %v5359_v33 = vand.u32 2147483647, %v5349_v62  ;;  %v5361_v58 = vand.u32 2147483648, %v5349_v62  ;;  %vm5355_vm12 = vweird.f32 %v5349_v62 }
 0x5f2   :  { %8895 = vrcp.f32 %v5368_v25  ;;  %v5083_v40 = vpop.f32.mrf.mxu2  ;;  %v5096_v22 = vpop.f32.mrf.mxu3  ;;  %v5380_v36 = vand.u32 2147483648, %v5368_v25  ;;  %v5378_v18 = vand.u32 2147483647, %v5368_v25  ;;  %vm5374_vm11 = vweird.f32 %v5368_v25 }
 0x5f3   :  { %v5362_v29 = vor.u32 1.1754944e-38, %v5361_v58  ;;  %vm5360_vm15 = vcmp.eq.f32.partialorder %v5359_v33, 8.507059e+37 }
 0x5f4   :  { %v5381_v56 = vor.u32 1.1754944e-38, %v5380_v36  ;;  %vm5379_vm0 = vcmp.eq.f32.partialorder %v5378_v18, 8.507059e+37 }
 0x5f5   :  { %v8892_v61 = vpop.eup %8891 }
 0x5f6   :  { %v13322_v35 = vadd.f32 1.0, %v8892_v61 }
 0x5f7   :  { %v8894_v39 = vpop.eup %8893 }
 0x5f8   :  { %v8896_v12 = vpop.eup %8895  ;;  %v5351_v23 = vmul.f32 %v8894_v39, %v5349_v62  ;;  %8897 = vrcp.f32 %v13322_v35  ;;  %vm5356_vm9 = vweird.f32 %v8894_v39  ;;  %v5400_v62 = vand.u32 2147483648, %v13322_v35 }
 0x5f9   :  { %v5370_v15 = vmul.f32 %v8896_v12, %v5368_v25  ;;  %8899 = vtanh.f32 %v5082_v7  ;;  %vm5375_vm10 = vweird.f32 %v8896_v12  ;;  %vm5357_vm13 = vmor %vm5355_vm12, %vm5356_vm9  ;;  %vm5394_vm2 = vweird.f32 %v13322_v35 }
 0x5fa   :  { %v5303_v52 = vpop.f32.mrf.mxu0  ;;  %v5316_v28 = vpop.f32.mrf.mxu1  ;;  %v5352_v0 = vsub.f32 1.0, %v5351_v23  ;;  %vm5376_vm14 = vmor %vm5374_vm11, %vm5375_vm10  ;;  %v5398_v25 = vand.u32 2147483647, %v13322_v35  ;;  %v5401_v47 = vor.u32 1.1754944e-38, %v5400_v62 }
 0x5fb   :  { %v5304_v38 = vadd.f32 %v5303_v52, %v13561_v20  ;;  %v5317_v19 = vadd.f32 %v5316_v28, %v13562_v2  ;;  %v5371_v32 = vsub.f32 1.0, %v5370_v15  ;;  %v13564_v15 = vld [vmem:[#allocation30_spill] sm:$0xff] }
 0x5fc   :  { %v5353_v27 = vmul.f32 %v8894_v39, %v5352_v0  ;;  %vm5399_vm4 = vcmp.eq.f32.partialorder %v5398_v25, 8.507059e+37 }
 0x5fd   :  { %v8012_v31 = vmul.f32 -1.442695, %v5304_v38  ;;  %v8013_v21 = vmul.f32 -1.442695, %v5317_v19  ;;  %v5372_v17 = vmul.f32 %v8896_v12, %v5371_v32 }
 0x5fe   :  { %v8898_v63 = vpop.eup %8897  ;;  %v5354_v1 = vadd.f32 %v8894_v39, %v5353_v27 }
 0x5ff   :  { %8901 = vpow2.f32 %v8012_v31  ;;  %v5373_v3 = vadd.f32 %v8896_v12, %v5372_v17  ;;  %v5390_v60 = vmul.f32 %v8898_v63, %v13322_v35  ;;  %v8900_v9 = vpop.eup %8899  ;;  %vm5395_vm1 = vweird.f32 %v8898_v63  ;;  %v8651_v35 = vld [vmem:[%s13436_s8] sm:$0xff] }
 0x600   :  { %8903 = vpow2.f32 %v8013_v21  ;;  %v5358_v14 = vsel %vm5357_vm13, %v8894_v39, %v5354_v1  ;;  %vm5396_vm3 = vmor %vm5394_vm2, %vm5395_vm1 }
 0x601   :  { %v5329_v13 = vpop.f32.mrf.mxu2  ;;  %v5342_v45 = vpop.f32.mrf.mxu3  ;;  %v5363_v24 = vsel %vm5360_vm15, %v5362_v29, %v5358_v14  ;;  %v5377_v44 = vsel %vm5376_vm14, %v8896_v12, %v5373_v3  ;;  %v5391_v50 = vsub.f32 1.0, %v5390_v60 }
 0x602   :  { %v5305_v34 = vpop.f32.mrf.mxu0  ;;  %v5318_v48 = vpop.f32.mrf.mxu1  ;;  %v5382_v55 = vsel %vm5379_vm0, %v5381_v56, %v5377_v44  ;;  %v5405_v41 = vmul.f32 %v8900_v9, %v5363_v24  ;;  %v5343_v49 = vadd.f32 %v5342_v45, %v13563_v5  ;;  %v5330_v52 = vadd.f32 %v5329_v13, %v13564_v15 }
 0x603   :  { %v5404_v26 = vmul.f32 %v5382_v55, %v13241_v37  ;;  %v5392_v4 = vmul.f32 %v8898_v63, %v5391_v50  ;;  %v8653_v37 = vld [vmem:[%s13436_s8 + $0x10] sm:$0xff] }
 0x604   :  { %v8014_v8 = vmul.f32 -1.442695, %v5343_v49  ;;  %5602 = vmatpush.bf16.msra.mxu0 %v8653_v37 }
 0x605   :  { %v8902_v10 = vpop.eup %8901  ;;  %v5406_v11 = vadd.f32 %v5405_v41, %v5404_v26  ;;  %v5393_v43 = vadd.f32 %v8898_v63, %v5392_v4 }
 0x606   :  { %v8904_v42 = vpop.eup %8903  ;;  %v5412_v57 = vadd.f32 1.0, %v8902_v10  ;;  %8905 = vpow2.f32 %v8014_v8  ;;  %v8641_v10 = vld [vmem:[#allocation5 + $0x10] sm:$0xff]  ;;  %v8642_v8 = vld [vmem:[#allocation5 + $0x18] sm:$0xff] }
 0x607   :  { %v5431_v30 = vadd.f32 1.0, %v8904_v42  ;;  %8907 = vtanh.f32 %v5406_v11  ;;  %v5397_v59 = vsel %vm5396_vm3, %v8898_v63, %v5393_v43 }
 0x608   :  { %8909 = vrcp.f32 %v5412_v57  ;;  %v5402_v39 = vsel %vm5399_vm4, %v5401_v47, %v5397_v59  ;;  %5603 = vmatpush.bf16.msra.mxu0 %v8652_v53  ;;  %v5424_v32 = vand.u32 2147483648, %v5412_v57  ;;  %v5422_v58 = vand.u32 2147483647, %v5412_v57 }
 0x609   :  { %v5331_v40 = vpop.f32.mrf.mxu2  ;;  %v5344_v22 = vpop.f32.mrf.mxu3  ;;  %8911 = vrcp.f32 %v5431_v30  ;;  %v5443_v36 = vand.u32 2147483648, %v5431_v30  ;;  %v5441_v27 = vand.u32 2147483647, %v5431_v30  ;;  %vm5418_vm7 = vweird.f32 %v5412_v57 }
 0x60a   :  { %vm5437_vm8 = vweird.f32 %v5431_v30  ;;  %v5425_v17 = vor.u32 1.1754944e-38, %v5424_v32  ;;  %vm5423_vm11 = vcmp.eq.f32.partialorder %v5422_v58, 8.507059e+37  ;;  %v5707_v42 = vpop.f32.mrf.mxu1 }
 0x60b   :  { %v5444_v1 = vor.u32 1.1754944e-38, %v5443_v36  ;;  %vm5442_vm12 = vcmp.eq.f32.partialorder %v5441_v27, 8.507059e+37 }
 0x60c   :  { %v8906_v61 = vpop.eup %8905  ;;  %5604 = vmatpush.bf16.msra.mxu0 %v8651_v35 }
 0x60d   :  { %v8908_v7 = vpop.eup %8907  ;;  %v5451_v54 = vadd.f32 1.0, %v8906_v61 }
 0x60e   :  { %v8910_v12 = vpop.eup %8909  ;;  %v5408_v23 = vmul.f32 %v8908_v7, %v5402_v39 }
 0x60f   :  { %v8912_v28 = vpop.eup %8911  ;;  %v5414_v0 = vmul.f32 %v8910_v12, %v5412_v57  ;;  %8913 = vrcp.f32 %v5451_v54  ;;  %vm5419_vm5 = vweird.f32 %v8910_v12  ;;  %v5463_v34 = vand.u32 2147483648, %v5451_v54  ;;  %v8662_v57 = vld [vmem:[%s13437_s9] ss:$0 sm:$0xff] }
 0x610   :  { %v5472_v20 = vpack.c.bf16 %v5408_v23, %v5408_v23  ;;  %v5433_v38 = vmul.f32 %v8912_v28, %v5431_v30  ;;  %8915 = vtanh.f32 %v5330_v52  ;;  %vm5438_vm6 = vweird.f32 %v8912_v28  ;;  %vm5420_vm9 = vmor %vm5418_vm7, %vm5419_vm5 }
 0x611   :  { %v5415_v2 = vsub.f32 1.0, %v5414_v0  ;;  %vm5439_vm10 = vmor %vm5437_vm8, %vm5438_vm6  ;;  %vm5457_vm14 = vweird.f32 %v5451_v54  ;;  %v5461_v48 = vand.u32 2147483647, %v5451_v54  ;;  %v5464_v41 = vor.u32 1.1754944e-38, %v5463_v34 }
 0x612   :  { %5474 = vst [vmem:[#allocation4 + $0x1c] sm:$0xf] %v5472_v20  ;;  %v5434_v19 = vsub.f32 1.0, %v5433_v38  ;;  %v5709_v11 = vpop.f32.mrf.mxu1 }
 0x613   :  { %v5416_v33 = vmul.f32 %v8910_v12, %v5415_v2  ;;  %vm5462_vm0 = vcmp.eq.f32.partialorder %v5461_v48, 8.507059e+37 }
 0x614   :  { %v5435_v16 = vmul.f32 %v8912_v28, %v5434_v19 }
 0x615   :  { %v8914_v31 = vpop.eup %8913  ;;  %v5417_v21 = vadd.f32 %v8910_v12, %v5416_v33 }
 0x616   :  { %v5436_v18 = vadd.f32 %v8912_v28, %v5435_v16  ;;  %v5453_v63 = vmul.f32 %v8914_v31, %v5451_v54  ;;  %v8916_v3 = vpop.eup %8915  ;;  %vm5458_vm13 = vweird.f32 %v8914_v31 }
 0x617   :  { %v5421_v29 = vsel %vm5420_vm9, %v8910_v12, %v5417_v21  ;;  %vm5459_vm15 = vmor %vm5457_vm14, %vm5458_vm13 }
 0x618   :  { %v5426_v60 = vsel %vm5423_vm11, %v5425_v17, %v5421_v29  ;;  %v5440_v46 = vsel %vm5439_vm10, %v8912_v28, %v5436_v18  ;;  %v5454_v9 = vsub.f32 1.0, %v5453_v63 }
 0x619   :  { %v5445_v56 = vsel %vm5442_vm12, %v5444_v1, %v5440_v46  ;;  %v5468_v14 = vmul.f32 %v8916_v3, %v5426_v60  ;;  %v8638_v13 = vld [vmem:[#allocation4 + $0x18] sm:$0xff] }
 0x61a   :  { %v5467_v45 = vmul.f32 %v5445_v56, %v13290_v51  ;;  %v5455_v24 = vmul.f32 %v8914_v31, %v5454_v9  ;;  %5721 = vmatmul.bf16.gmra.mxu1 %v8638_v13  ;;  %v8640_v51 = vld [vmem:[#allocation5 + $0x8] sm:$0xff]  ;;  %v5712_v37 = vpop.f32.mrf.mxu1 }
 0x61c   :  { %v5469_v44 = vadd.f32 %v5468_v14, %v5467_v45  ;;  %v5456_v50 = vadd.f32 %v8914_v31, %v5455_v24 }
 0x61e   :  { %8917 = vtanh.f32 %v5469_v44  ;;  %v5460_v55 = vsel %vm5459_vm15, %v8914_v31, %v5456_v50 }
 0x61f   :  { %v5465_v49 = vsel %vm5462_vm0, %v5464_v41, %v5460_v55 }
 0x622   :  { %v5714_v47 = vpop.f32.mrf.mxu1 }
 0x624   :  { %v8918_v5 = vpop.eup %8917 }
 0x625   :  { %v5471_v26 = vmul.f32 %v8918_v5, %v5465_v49 }
 0x627   :  { %v5475_v4 = vpack.c.bf16 %v5471_v26, %v5471_v26 }
 0x629   :  { %5476 = vst [vmem:[#allocation5] sm:$0xf] %v5475_v4 }
 0x62a   :  { %v5717_v35 = vpop.f32.mrf.mxu1 }
 0x630   :  { %v8639_v6 = vld [vmem:[#allocation5] sm:$0xff] }
 0x631   :  { %5605 = vmatmul.bf16.vlgmr.msra.gmra.mxu0 %v8639_v6 }
 0x632   :  { %v5719_v52 = vpop.f32.mrf.mxu1 }
 0x641   :  { %5610 = vmatmul.bf16.gmra.mxu0 %v8640_v51 }
 0x651   :  { %5615 = vmatmul.bf16.gmra.mxu0 %v8641_v10 }
 0x661   :  { %5620 = vmatmul.bf16.gmra.mxu0 %v8642_v8 }
 0x697   :  { %v5722_v38 = vpop.f32.mrf.mxu1 }
 0x69f   :  { %v5724_v36 = vpop.f32.mrf.mxu1 }
 0x6ae   :  { %v5606_v43 = vpop.f32.mrf.mxu0 }
 0x6af   :  { %v5708_v30 = vadd.f32 %v5707_v42, %v5606_v43 }
 0x6b1   :  { %v13360_v62 = vadd.f32 %v8662_v57, %v5708_v30 }
 0x6b3   :  { %5739 = vmax.xlane.f32.xlu0 %v13360_v62 }
 0x6b6   :  { %v5608_v25 = vpop.f32.mrf.mxu0 }
 0x6b7   :  { %v5710_v40 = vadd.f32 %v5709_v11, %v5608_v25 }
 0x6b9   :  { %v13363_v22 = vadd.f32 %v8662_v57, %v5710_v40 }
 0x6bb   :  { %5741 = vmax.xlane.f32.xlu0 %v13363_v22 }
 0x6be   :  { %v5611_v53 = vpop.f32.mrf.mxu0 }
 0x6bf   :  { %v5713_v59 = vadd.f32 %v5712_v37, %v5611_v53 }
 0x6c1   :  { %v13366_v61 = vadd.f32 %v8662_v57, %v5713_v59 }
 0x6c3   :  { %5743 = vmax.xlane.f32.xlu1 %v13366_v61 }
 0x6c6   :  { %v5613_v7 = vpop.f32.mrf.mxu0 }
 0x6c7   :  { %v5715_v39 = vadd.f32 %v5714_v47, %v5613_v7 }
 0x6c9   :  { %v13369_v54 = vadd.f32 %v8662_v57, %v5715_v39 }
 0x6cb   :  { %5745 = vmax.xlane.f32.xlu1 %v13369_v54 }
 0x6ce   :  { %v5616_v12 = vpop.f32.mrf.mxu0 }
 0x6cf   :  { %v5718_v23 = vadd.f32 %v5717_v35, %v5616_v12 }
 0x6d1   :  { %v13372_v15 = vadd.f32 %v8662_v57, %v5718_v23 }
 0x6d3   :  { %5747 = vmax.xlane.f32.xlu2 %v13372_v15 }
 0x6d6   :  { %v5618_v28 = vpop.f32.mrf.mxu0 }
 0x6d7   :  { %v5720_v0 = vadd.f32 %v5719_v52, %v5618_v28 }
 0x6d9   :  { %v13375_v20 = vadd.f32 %v8662_v57, %v5720_v0 }
 0x6db   :  { %5749 = vmax.xlane.f32.xlu2 %v13375_v20 }
 0x6de   :  { %v5621_v2 = vpop.f32.mrf.mxu0 }
 0x6df   :  { %v5723_v19 = vadd.f32 %v5722_v38, %v5621_v2 }
 0x6e1   :  { %v13378_v32 = vadd.f32 %v8662_v57, %v5723_v19 }
 0x6e3   :  { %5751 = vmax.xlane.f32.xlu0 %v13378_v32 }
 0x6e6   :  { %v5623_v33 = vpop.f32.mrf.mxu0 }
 0x6e7   :  { %v5725_v58 = vadd.f32 %v5724_v36, %v5623_v33 }
 0x6e9   :  { %v13381_v16 = vadd.f32 %v8662_v57, %v5725_v58 }
 0x6eb   :  { %5753 = vmax.xlane.f32.xlu1 %v13381_v16 }
 0x726   :  { %v5740_v27 = vpop.xlane.xlu0 %5739 }
 0x727   :  { %v5755_v31 = vsub.f32 %v13360_v62, %v5740_v27 }
 0x729   :  { %v5763_v21 = vmul.f32 1.442695, %v5755_v31 }
 0x72b   :  { %8919 = vpow2.f32 %v5763_v21 }
 0x72e   :  { %v5742_v17 = vpop.xlane.xlu0 %5741 }
 0x72f   :  { %v5756_v18 = vsub.f32 %v13363_v22, %v5742_v17 }
 0x731   :  { %v8920_v63 = vpop.eup %8919  ;;  %v5765_v1 = vmul.f32 1.442695, %v5756_v18 }
 0x732   :  { %5779 = vadd.xlane.f32.xlu2 %v8920_v63 }
 0x733   :  { %8921 = vpow2.f32 %v5765_v1 }
 0x736   :  { %v5744_v29 = vpop.xlane.xlu1 %5743 }
 0x737   :  { %v5757_v3 = vsub.f32 %v13366_v61, %v5744_v29 }
 0x739   :  { %v8922_v60 = vpop.eup %8921  ;;  %v5767_v46 = vmul.f32 1.442695, %v5757_v3 }
 0x73a   :  { %5781 = vadd.xlane.f32.xlu0 %v8922_v60 }
 0x73b   :  { %8923 = vpow2.f32 %v5767_v46 }
 0x73e   :  { %v5746_v9 = vpop.xlane.xlu1 %5745 }
 0x73f   :  { %v5758_v56 = vsub.f32 %v13369_v54, %v5746_v9 }
 0x741   :  { %v8924_v14 = vpop.eup %8923  ;;  %v5769_v13 = vmul.f32 1.442695, %v5758_v56 }
 0x742   :  { %5783 = vadd.xlane.f32.xlu1 %v8924_v14 }
 0x743   :  { %8925 = vpow2.f32 %v5769_v13 }
 0x746   :  { %v5748_v45 = vpop.xlane.xlu2 %5747 }
 0x747   :  { %v5759_v24 = vsub.f32 %v13372_v15, %v5748_v45 }
 0x749   :  { %v8926_v44 = vpop.eup %8925  ;;  %v5771_v50 = vmul.f32 1.442695, %v5759_v24 }
 0x74a   :  { %5785 = vadd.xlane.f32.xlu2 %v8926_v44 }
 0x74b   :  { %8927 = vpow2.f32 %v5771_v50 }
 0x74e   :  { %v5750_v34 = vpop.xlane.xlu2 %5749 }
 0x74f   :  { %v5760_v48 = vsub.f32 %v13375_v20, %v5750_v34 }
 0x751   :  { %v8928_v55 = vpop.eup %8927  ;;  %v5773_v41 = vmul.f32 1.442695, %v5760_v48 }
 0x752   :  { %5787 = vadd.xlane.f32.xlu0 %v8928_v55 }
 0x753   :  { %8929 = vpow2.f32 %v5773_v41 }
 0x756   :  { %v13390_v5 = vpop.xlane.xlu0 %5751 }
 0x757   :  { %v5761_v49 = vsub.f32 %v13378_v32, %v13390_v5 }
 0x759   :  { %v8930_v26 = vpop.eup %8929  ;;  %v5775_v4 = vmul.f32 1.442695, %v5761_v49 }
 0x75a   :  { %5789 = vadd.xlane.f32.xlu1 %v8930_v26 }
 0x75b   :  { %8931 = vpow2.f32 %v5775_v4 }
 0x75e   :  { %v5754_v6 = vpop.xlane.xlu1 %5753 }
 0x75f   :  { %v5762_v51 = vsub.f32 %v13381_v16, %v5754_v6 }
 0x761   :  { %v8932_v10 = vpop.eup %8931  ;;  %v5777_v8 = vmul.f32 1.442695, %v5762_v51 }
 0x762   :  { %5791 = vadd.xlane.f32.xlu2 %v8932_v10 }
 0x763   :  { %8933 = vpow2.f32 %v5777_v8 }
 0x769   :  { %v8934_v42 = vpop.eup %8933 }
 0x76a   :  { %5793 = vadd.xlane.f32.xlu0 %v8934_v42 }
 0x7a5   :  { %v5780_v11 = vpop.xlane.xlu2 %5779 }
 0x7a6   :  { %8935 = vlog2.f32 %v5780_v11 }
 0x7ac   :  { %v8936_v57 = vpop.eup %8935 }
 0x7ad   :  { %v5796_v43 = vmul.f32 0.6931472, %v8936_v57  ;;  %v5782_v30 = vpop.xlane.xlu0 %5781 }
 0x7ae   :  { %8937 = vlog2.f32 %v5782_v30 }
 0x7af   :  { %v5811_v37 = vadd.f32 %v5796_v43, %v5740_v27 }
 0x7b1   :  { %v5819_v25 = vsub.f32 %v13360_v62, %v5811_v37 }
 0x7b3   :  { %5827 = vst [vmem:[%s13438_s10] sm:$0xff] %v5819_v25 }
 0x7b4   :  { %v8938_v40 = vpop.eup %8937 }
 0x7b5   :  { %v5798_v53 = vmul.f32 0.6931472, %v8938_v40  ;;  %v5784_v59 = vpop.xlane.xlu1 %5783 }
 0x7b6   :  { %8939 = vlog2.f32 %v5784_v59 }
 0x7b7   :  { %v5812_v47 = vadd.f32 %v5798_v53, %v5742_v17 }
 0x7b9   :  { %v5820_v7 = vsub.f32 %v13363_v22, %v5812_v47 }
 0x7bb   :  { %5828 = vst [vmem:[%s13438_s10 + $0x8] sm:$0xff] %v5820_v7 }
 0x7bc   :  { %v8940_v39 = vpop.eup %8939 }
 0x7bd   :  { %v5800_v35 = vmul.f32 0.6931472, %v8940_v39  ;;  %v5786_v12 = vpop.xlane.xlu2 %5785 }
 0x7be   :  { %8941 = vlog2.f32 %v5786_v12 }
 0x7bf   :  { %v5813_v62 = vadd.f32 %v5800_v35, %v5744_v29 }
 0x7c1   :  { %v5821_v23 = vsub.f32 %v13366_v61, %v5813_v62 }
 0x7c3   :  { %5829 = vst [vmem:[%s13438_s10 + $0x10] sm:$0xff] %v5821_v23 }
 0x7c4   :  { %v8942_v52 = vpop.eup %8941 }
 0x7c5   :  { %v5802_v28 = vmul.f32 0.6931472, %v8942_v52  ;;  %v5788_v0 = vpop.xlane.xlu0 %5787 }
 0x7c6   :  { %8943 = vlog2.f32 %v5788_v0 }
 0x7c7   :  { %v5814_v22 = vadd.f32 %v5802_v28, %v5746_v9 }
 0x7c9   :  { %v5822_v38 = vsub.f32 %v13369_v54, %v5814_v22 }
 0x7cb   :  { %5830 = vst [vmem:[%s13438_s10 + $0x18] sm:$0xff] %v5822_v38 }
 0x7cc   :  { %v8944_v2 = vpop.eup %8943 }
 0x7cd   :  { %v5804_v19 = vmul.f32 0.6931472, %v8944_v2  ;;  %v5790_v36 = vpop.xlane.xlu1 %5789 }
 0x7ce   :  { %8945 = vlog2.f32 %v5790_v36 }
 0x7cf   :  { %v5815_v61 = vadd.f32 %v5804_v19, %v5748_v45 }
 0x7d1   :  { %v5823_v33 = vsub.f32 %v13372_v15, %v5815_v61 }
 0x7d3   :  { %5831 = vst [vmem:[%s13438_s10 + $0x20] sm:$0xff] %v5823_v33 }
 0x7d4   :  { %v8946_v58 = vpop.eup %8945 }
 0x7d5   :  { %v5806_v27 = vmul.f32 0.6931472, %v8946_v58  ;;  %v5792_v31 = vpop.xlane.xlu2 %5791 }
 0x7d6   :  { %8947 = vlog2.f32 %v5792_v31 }
 0x7d7   :  { %v5816_v54 = vadd.f32 %v5806_v27, %v5750_v34 }
 0x7d9   :  { %v5824_v21 = vsub.f32 %v13375_v20, %v5816_v54 }
 0x7db   :  { %5832 = vst [vmem:[%s13438_s10 + $0x28] sm:$0xff] %v5824_v21 }
 0x7dc   :  { %v8948_v17 = vpop.eup %8947 }
 0x7dd   :  { %v5808_v18 = vmul.f32 0.6931472, %v8948_v17  ;;  %v5794_v63 = vpop.xlane.xlu0 %5793 }
 0x7de   :  { %8949 = vlog2.f32 %v5794_v63 }
 0x7df   :  { %v5817_v15 = vadd.f32 %v5808_v18, %v13390_v5 }
 0x7e1   :  { %v5825_v1 = vsub.f32 %v13378_v32, %v5817_v15 }
 0x7e3   :  { %5833 = vst [vmem:[%s13438_s10 + $0x30] sm:$0xff] %v5825_v1 }
 0x7e4   :  { %v8950_v29 = vpop.eup %8949 }
 0x7e5   :  { %v5810_v3 = vmul.f32 0.6931472, %v8950_v29 }
 0x7e7   :  { %v5818_v60 = vadd.f32 %v5810_v3, %v5754_v6 }
 0x7e9   :  { %v5826_v20 = vsub.f32 %v13381_v16, %v5818_v60 }
 0x7eb   :  { %5834 = vst [vmem:[%s13438_s10 + $0x38] sm:$0xff] %v5826_v20 }

</bundles_post_ra>
